<compile_context>
chip_gen: v6e
topology: v6e:2x2x1
jax: 0.10.0
libtpu: 0.0.40
codegen_flags: <defaults>
</compile_context>

<pallas_src>
import math
import functools

import jax
import jax.numpy as jnp
from jax import lax
from jax.experimental import pallas as pl
from jax.experimental.pallas import tpu as pltpu


NEG_INF = -1e30   # finite "-inf": fully masked rows give a uniform distribution
LN_EPS = 1e-5     # (PyTorch would give NaN there); documented divergence.


# ----------------------------------------------------------------------------
# In-kernel building blocks (traced inside the fused stack kernels)
# ----------------------------------------------------------------------------

def _sdpa_and_proj(q, k, v, wo, bo, bias3, B, Lq, Lk, H, Dh):
    """Scaled-dot-product attention for all (batch, head) pairs + output proj.

    q: (B*Lq, E) f32, k/v: (B*Lk, E) f32, batch-major rows.
    bias3: (B, Lq, Lk) additive mask (finite, clamped).
    Head merge is done implicitly by accumulating per-head partial projections,
    so the result (B*Lq, E) stays lane-dense and no lane concat is needed.
    """
    scale = 1.0 / math.sqrt(Dh)
    batch_outs = []
    for b in range(B):
        qb = q[b * Lq:(b + 1) * Lq, :]
        kb = k[b * Lk:(b + 1) * Lk, :]
        vb = v[b * Lk:(b + 1) * Lk, :]
        bias = bias3[b]                                   # (Lq, Lk)
        proj = None
        for h in range(H):
            qh = qb[:, h * Dh:(h + 1) * Dh]
            kh = kb[:, h * Dh:(h + 1) * Dh]
            vh = vb[:, h * Dh:(h + 1) * Dh]
            s = lax.dot_general(qh, kh, (((1,), (1,)), ((), ())),
                                preferred_element_type=jnp.float32) * scale
            s = s + bias
            m = jnp.max(s, axis=-1, keepdims=True)
            p = jnp.exp(s - m)
            denom = jnp.sum(p, axis=-1, keepdims=True)
            o = jnp.dot(p, vh, preferred_element_type=jnp.float32)
            o = o * pl.reciprocal(denom, approx=True)     # EUP; tiny rel. error
            # concat_h(o_h) @ Wo == sum_h o_h @ Wo[h*Dh:(h+1)*Dh, :]
            ph = jnp.dot(o.astype(jnp.bfloat16), wo[h * Dh:(h + 1) * Dh, :],
                         preferred_element_type=jnp.float32)
            proj = ph if proj is None else proj + ph
        batch_outs.append(proj)                           # (Lq, E)
    out = jnp.concatenate(batch_outs, axis=0)             # (B*Lq, E)
    return out + bo


def _self_attention(x, wqkv, bqkv, wo, bo, bias3, B, L, H, Dh):
    E = H * Dh
    qkv = jnp.dot(x.astype(jnp.bfloat16), wqkv,
                  preferred_element_type=jnp.float32) + bqkv      # (B*L, 3E)
    q = qkv[:, :E]
    k = qkv[:, E:2 * E]
    v = qkv[:, 2 * E:]
    return _sdpa_and_proj(q, k, v, wo, bo, bias3, B, L, L, H, Dh)


def _cross_attention(y, mem, wq, bq, wkv, bkv, wo, bo, bias3, B, Lq, Lk, H, Dh):
    E = H * Dh
    q = jnp.dot(y.astype(jnp.bfloat16), wq,
                preferred_element_type=jnp.float32) + bq          # (B*Lq, E)
    kv = jnp.dot(mem.astype(jnp.bfloat16), wkv,
                 preferred_element_type=jnp.float32) + bkv        # (B*Lk, 2E)
    k = kv[:, :E]
    v = kv[:, E:]
    return _sdpa_and_proj(q, k, v, wo, bo, bias3, B, Lq, Lk, H, Dh)


def _ffn(x, w1, b1, w2, b2):
    h = jnp.dot(x.astype(jnp.bfloat16), w1,
                preferred_element_type=jnp.float32) + b1
    h = jnp.maximum(h, 0.0)
    return jnp.dot(h.astype(jnp.bfloat16), w2,
                   preferred_element_type=jnp.float32) + b2


def _add_layer_norm(x, r, g, b):
    y = x + r
    mean = jnp.mean(y, axis=-1, keepdims=True)
    var = jnp.mean((y - mean) ** 2, axis=-1, keepdims=True)
    return (y - mean) * lax.rsqrt(var + LN_EPS) * g + b


def _layer_norm(x, g, b):
    mean = jnp.mean(x, axis=-1, keepdims=True)
    var = jnp.mean((x - mean) ** 2, axis=-1, keepdims=True)
    return (x - mean) * lax.rsqrt(var + LN_EPS) * g + b


# ----------------------------------------------------------------------------
# Fused stack kernels
# ----------------------------------------------------------------------------

def _encoder_stack_kernel(x0_ref, bias_ref,
                          wqkv_ref, bqkv_ref, wo_ref, bo_ref,
                          ln1g_ref, ln1b_ref,
                          w1_ref, b1_ref, w2_ref, b2_ref,
                          ln2g_ref, ln2b_ref,
                          fng_ref, fnb_ref,
                          mem_ref,
                          x_sc,
                          *, B, S, H, Dh):
    layer = pl.program_id(0)

    @pl.when(layer == 0)
    def _():
        x_sc[...] = x0_ref[...]

    x = x_sc[...]
    bias3 = bias_ref[...]                                  # (B, S, S)

    a = _self_attention(x, wqkv_ref[0], bqkv_ref[0], wo_ref[0], bo_ref[0],
                        bias3, B, S, H, Dh)
    x = _add_layer_norm(x, a, ln1g_ref[0], ln1b_ref[0])
    f = _ffn(x, w1_ref[0], b1_ref[0], w2_ref[0], b2_ref[0])
    x = _add_layer_norm(x, f, ln2g_ref[0], ln2b_ref[0])

    x_sc[...] = x
    mem_ref[...] = x

    @pl.when(layer == pl.num_programs(0) - 1)
    def _():
        mem_ref[...] = _layer_norm(x, fng_ref[...], fnb_ref[...])


def _decoder_stack_kernel(y0_ref, mem_ref, sbias_ref, cbias_ref,
                          sa_wqkv_ref, sa_bqkv_ref, sa_wo_ref, sa_bo_ref,
                          ln1g_ref, ln1b_ref,
                          ca_wq_ref, ca_bq_ref, ca_wkv_ref, ca_bkv_ref,
                          ca_wo_ref, ca_bo_ref,
                          ln2g_ref, ln2b_ref,
                          w1_ref, b1_ref, w2_ref, b2_ref,
                          ln3g_ref, ln3b_ref,
                          fng_ref, fnb_ref, outw_ref, outb_ref,
                          logits_ref,
                          y_sc,
                          *, B, S_tgt, S_src, H, Dh):
    layer = pl.program_id(0)

    @pl.when(layer == 0)
    def _():
        y_sc[...] = y0_ref[...]

    y = y_sc[...]
    mem = mem_ref[...]
    sbias = sbias_ref[...]                                 # (B, S_tgt, S_tgt)
    cbias = cbias_ref[...]                                 # (B, S_tgt, S_src)

    a = _self_attention(y, sa_wqkv_ref[0], sa_bqkv_ref[0],
                        sa_wo_ref[0], sa_bo_ref[0], sbias, B, S_tgt, H, Dh)
    y = _add_layer_norm(y, a, ln1g_ref[0], ln1b_ref[0])
    c = _cross_attention(y, mem, ca_wq_ref[0], ca_bq_ref[0],
                         ca_wkv_ref[0], ca_bkv_ref[0],
                         ca_wo_ref[0], ca_bo_ref[0],
                         cbias, B, S_tgt, S_src, H, Dh)
    y = _add_layer_norm(y, c, ln2g_ref[0], ln2b_ref[0])
    f = _ffn(y, w1_ref[0], b1_ref[0], w2_ref[0], b2_ref[0])
    y = _add_layer_norm(y, f, ln3g_ref[0], ln3b_ref[0])

    y_sc[...] = y

    @pl.when(layer == pl.num_programs(0) - 1)
    def _():
        yn = _layer_norm(y, fng_ref[...], fnb_ref[...])
        logits_ref[...] = (jnp.dot(yn.astype(jnp.bfloat16), outw_ref[...],
                                   preferred_element_type=jnp.float32)
                           + outb_ref[...])


# ----------------------------------------------------------------------------
# pallas_call wrappers
# ----------------------------------------------------------------------------

def _full_spec(shape):
    return pl.BlockSpec(shape, lambda l, _n=len(shape): (0,) * _n)


def _layer_spec(shape):
    return pl.BlockSpec((1,) + shape, lambda l, _n=len(shape): (l,) + (0,) * _n)


def encoder_stack(x0, bias3, p, fng, fnb, *, B, S, H):
    M, E = x0.shape
    F = p['w1'].shape[-1]
    n_layers = p['wqkv'].shape[0]
    Dh = E // H

    kernel = functools.partial(_encoder_stack_kernel, B=B, S=S, H=H, Dh=Dh)
    return pl.pallas_call(
        kernel,
        out_shape=jax.ShapeDtypeStruct((M, E), jnp.float32),
        grid_spec=pltpu.PrefetchScalarGridSpec(
            num_scalar_prefetch=0,
            grid=(n_layers,),
            in_specs=[
                _full_spec((M, E)),
                _full_spec((B, S, S)),
                _layer_spec((E, 3 * E)), _layer_spec((1, 3 * E)),
                _layer_spec((E, E)), _layer_spec((1, E)),
                _layer_spec((1, E)), _layer_spec((1, E)),
                _layer_spec((E, F)), _layer_spec((1, F)),
                _layer_spec((F, E)), _layer_spec((1, E)),
                _layer_spec((1, E)), _layer_spec((1, E)),
                _full_spec((1, E)), _full_spec((1, E)),
            ],
            out_specs=pl.BlockSpec((M, E), lambda l: (0, 0)),
            scratch_shapes=[pltpu.VMEM((M, E), jnp.float32)],
        ),
        compiler_params=pltpu.CompilerParams(
            dimension_semantics=("arbitrary",)),
    )(x0, bias3,
      p['wqkv'], p['bqkv'], p['wo'], p['bo'],
      p['ln1_g'], p['ln1_b'],
      p['w1'], p['b1'], p['w2'], p['b2'],
      p['ln2_g'], p['ln2_b'],
      fng, fnb)


def decoder_stack(y0, memory, sbias3, cbias3, p, fng, fnb, out_w, out_b,
                  *, B, S_tgt, S_src, H):
    Mt, E = y0.shape
    Ms = memory.shape[0]
    F = p['w1'].shape[-1]
    V = out_w.shape[-1]
    n_layers = p['sa_wqkv'].shape[0]
    Dh = E // H

    kernel = functools.partial(_decoder_stack_kernel, B=B, S_tgt=S_tgt,
                               S_src=S_src, H=H, Dh=Dh)
    return pl.pallas_call(
        kernel,
        out_shape=jax.ShapeDtypeStruct((Mt, V), jnp.float32),
        grid_spec=pltpu.PrefetchScalarGridSpec(
            num_scalar_prefetch=0,
            grid=(n_layers,),
            in_specs=[
                _full_spec((Mt, E)), _full_spec((Ms, E)),
                _full_spec((B, S_tgt, S_tgt)), _full_spec((B, S_tgt, S_src)),
                _layer_spec((E, 3 * E)), _layer_spec((1, 3 * E)),
                _layer_spec((E, E)), _layer_spec((1, E)),
                _layer_spec((1, E)), _layer_spec((1, E)),
                _layer_spec((E, E)), _layer_spec((1, E)),
                _layer_spec((E, 2 * E)), _layer_spec((1, 2 * E)),
                _layer_spec((E, E)), _layer_spec((1, E)),
                _layer_spec((1, E)), _layer_spec((1, E)),
                _layer_spec((E, F)), _layer_spec((1, F)),
                _layer_spec((F, E)), _layer_spec((1, E)),
                _layer_spec((1, E)), _layer_spec((1, E)),
                _full_spec((1, E)), _full_spec((1, E)),
                _full_spec((E, V)), _full_spec((1, V)),
            ],
            out_specs=pl.BlockSpec((Mt, V), lambda l: (0, 0)),
            scratch_shapes=[pltpu.VMEM((Mt, E), jnp.float32)],
        ),
        compiler_params=pltpu.CompilerParams(
            dimension_semantics=("arbitrary",)),
    )(y0, memory, sbias3, cbias3,
      p['sa_wqkv'], p['sa_bqkv'], p['sa_wo'], p['sa_bo'],
      p['ln1_g'], p['ln1_b'],
      p['ca_wq'], p['ca_bq'], p['ca_wkv'], p['ca_bkv'], p['ca_wo'], p['ca_bo'],
      p['ln2_g'], p['ln2_b'],
      p['w1'], p['b1'], p['w2'], p['b2'],
      p['ln3_g'], p['ln3_b'],
      fng, fnb, out_w, out_b)


# ----------------------------------------------------------------------------
# Host-side glue (mask prep, embeddings, layout)
# ----------------------------------------------------------------------------

def _additive_attn_mask(mask, L, S):
    if mask is None:
        return jnp.zeros((L, S), jnp.float32)
    if mask.dtype == jnp.bool_:      # PyTorch-style boolean attn mask
        return jnp.where(mask, NEG_INF, 0.0).astype(jnp.float32)
    return jnp.maximum(mask.astype(jnp.float32), NEG_INF)   # additive float mask


def _padding_bias(kpm, B, S):
    if kpm is None:
        return jnp.zeros((B, S), jnp.float32)
    if kpm.dtype == jnp.bool_:
        return jnp.where(kpm, NEG_INF, 0.0).astype(jnp.float32)
    return jnp.maximum(kpm.astype(jnp.float32), NEG_INF)


@functools.partial(jax.jit, static_argnames=('emb_size', 'num_heads'))
def seq2seq_forward(params, source, target, source_mask, target_mask,
                    source_padding_mask, target_padding_mask,
                    memory_key_padding_mask, *, emb_size, num_heads):
    E = emb_size
    H = num_heads
    S_src, B = source.shape
    S_tgt = target.shape[0]
    pos = params['positions']
    sqrt_e = math.sqrt(E)

    # Embedding gather + sqrt(E) scale + positional add, batch-major layout.
    # (XLA fuses this into the gather epilogue — no standalone elementwise kernel.)
    src_x = (jnp.take(params['src_emb'], source.T, axis=0) * sqrt_e
             + pos[None, :S_src, :]).reshape(B * S_src, E)
    tgt_x = (jnp.take(params['tgt_emb'], target.T, axis=0) * sqrt_e
             + pos[None, :S_tgt, :]).reshape(B * S_tgt, E)

    # Tiny (B, L, S) additive biases, clamped finite (no (B*H, L, S) tensor).
    enc_am = _additive_attn_mask(source_mask, S_src, S_src)
    dec_am = _additive_attn_mask(target_mask, S_tgt, S_tgt)
    enc_kpb = _padding_bias(source_padding_mask, B, S_src)
    dec_kpb = _padding_bias(target_padding_mask, B, S_tgt)
    crs_kpb = _padding_bias(memory_key_padding_mask, B, S_src)
    enc_bias = enc_am[None, :, :] + enc_kpb[:, None, :]
    dec_bias = dec_am[None, :, :] + dec_kpb[:, None, :]
    crs_bias = jnp.broadcast_to(crs_kpb[:, None, :], (B, S_tgt, S_src))

    # One fused kernel for the whole encoder, one for the whole decoder+generator.
    memory = encoder_stack(src_x, enc_bias, params['encoder'],
                           params['enc_norm_g'], params['enc_norm_b'],
                           B=B, S=S_src, H=H)
    logits2d = decoder_stack(tgt_x, memory, dec_bias, crs_bias,
                             params['decoder'],
                             params['dec_norm_g'], params['dec_norm_b'],
                             params['out_w'], params['out_b'],
                             B=B, S_tgt=S_tgt, S_src=S_src, H=H)

    V = params['out_w'].shape[-1]
    return logits2d.reshape(B, S_tgt, V).transpose(1, 0, 2)   # (S_tgt, B, V)


# ----------------------------------------------------------------------------
# Deterministic parameter initialization (synthetic weights, stacked per layer)
# ----------------------------------------------------------------------------

def init_params(key, cfg):
    E = cfg['emb_size']
    F = cfg['dim_feed_forward']
    Lenc = cfg['num_encoder_layers']
    Ldec = cfg['num_decoder_layers']
    max_len = cfg['max_len']
    keys = iter(jax.random.split(key, 1024))

    def w(shape, scale=0.05):
        # MXU-facing weights stored in bf16; accumulation stays f32 in-kernel.
        return (jax.random.normal(next(keys), shape, jnp.float32) * scale
                ).astype(jnp.bfloat16)

    def zeros(shape):
        return jnp.zeros(shape, jnp.float32)

    def ones(shape):
        return jnp.ones(shape, jnp.float32)

    enc = dict(
        wqkv=w((Lenc, E, 3 * E)), bqkv=zeros((Lenc, 1, 3 * E)),
        wo=w((Lenc, E, E)), bo=zeros((Lenc, 1, E)),
        ln1_g=ones((Lenc, 1, E)), ln1_b=zeros((Lenc, 1, E)),
        w1=w((Lenc, E, F)), b1=zeros((Lenc, 1, F)),
        w2=w((Lenc, F, E)), b2=zeros((Lenc, 1, E)),
        ln2_g=ones((Lenc, 1, E)), ln2_b=zeros((Lenc, 1, E)),
    )
    dec = dict(
        sa_wqkv=w((Ldec, E, 3 * E)), sa_bqkv=zeros((Ldec, 1, 3 * E)),
        sa_wo=w((Ldec, E, E)), sa_bo=zeros((Ldec, 1, E)),
        ln1_g=ones((Ldec, 1, E)), ln1_b=zeros((Ldec, 1, E)),
        ca_wq=w((Ldec, E, E)), ca_bq=zeros((Ldec, 1, E)),
        ca_wkv=w((Ldec, E, 2 * E)), ca_bkv=zeros((Ldec, 1, 2 * E)),
        ca_wo=w((Ldec, E, E)), ca_bo=zeros((Ldec, 1, E)),
        ln2_g=ones((Ldec, 1, E)), ln2_b=zeros((Ldec, 1, E)),
        w1=w((Ldec, E, F)), b1=zeros((Ldec, 1, F)),
        w2=w((Ldec, F, E)), b2=zeros((Ldec, 1, E)),
        ln3_g=ones((Ldec, 1, E)), ln3_b=zeros((Ldec, 1, E)),
    )

    # sinusoidal positions, same formula as PositionalEncoding.__init__
    denom = jnp.exp(-jnp.arange(0, E, 2, dtype=jnp.float32) * math.log(10000.0) / E)
    posn = jnp.arange(0, max_len, dtype=jnp.float32).reshape(max_len, 1)
    positions = jnp.zeros((max_len, E), jnp.float32)
    positions = positions.at[:, 0::2].set(jnp.sin(posn * denom))
    positions = positions.at[:, 1::2].set(jnp.cos(posn * denom))

    return dict(
        src_emb=jax.random.normal(next(keys), (cfg['source_vocab_size'], E),
                                  jnp.float32) * 0.1,
        tgt_emb=jax.random.normal(next(keys), (cfg['target_vocab_size'], E),
                                  jnp.float32) * 0.1,
        positions=positions,
        encoder=enc, decoder=dec,
        enc_norm_g=ones((1, E)), enc_norm_b=zeros((1, E)),
        dec_norm_g=ones((1, E)), dec_norm_b=zeros((1, E)),
        out_w=w((E, cfg['target_vocab_size'])),
        out_b=zeros((1, cfg['target_vocab_size'])),
    )


# ----------------------------------------------------------------------------
# Main
# ----------------------------------------------------------------------------

if __name__ == "__main__":
    # Lane-dense config: E, FFN and vocab sizes are multiples of 128.
    cfg = dict(num_encoder_layers=2, num_decoder_layers=2, emb_size=128,
               max_len=16, num_heads=4, source_vocab_size=128,
               target_vocab_size=128, dim_feed_forward=256, dropout=0.1)

    S_src, S_tgt, B = 8, 8, 2

    key = jax.random.PRNGKey(0)
    k_src, k_tgt = jax.random.split(key)
    source = jax.random.randint(k_src, (S_src, B), 0, cfg['source_vocab_size'], jnp.int32)
    target = jax.random.randint(k_tgt, (S_tgt, B), 0, cfg['target_vocab_size'], jnp.int32)

    # masks following the PyTorch conventions used with nn.Transformer
    source_mask = jnp.zeros((S_src, S_src), jnp.float32)
    target_mask = jnp.where(jnp.triu(jnp.ones((S_tgt, S_tgt), bool), k=1),
                            -jnp.inf, 0.0).astype(jnp.float32)       # causal
    source_padding_mask = jnp.zeros((B, S_src), bool).at[1, S_src - 1].set(True)
    target_padding_mask = jnp.zeros((B, S_tgt), bool)
    memory_key_padding_mask = source_padding_mask

    params = init_params(jax.random.PRNGKey(1), cfg)

    out = seq2seq_forward(params, source, target, source_mask, target_mask,
                          source_padding_mask, target_padding_mask,
                          memory_key_padding_mask,
                          emb_size=cfg['emb_size'], num_heads=cfg['num_heads'])
    out = jax.block_until_ready(out)

    assert out.shape == (S_tgt, B, cfg['target_vocab_size']), out.shape
    assert bool(jnp.all(jnp.isfinite(out)))
    print("KERNEL_OK")
</pallas_src>

<mosaic_0001>
module attributes {stable_mosaic.version = 11 : i64} {
  func.func @_encoder_stack_kernel(%arg0: i32, %arg1: memref<16x128xf32, #tpu.memory_space<vmem>>, %arg2: memref<2x8x8xf32, #tpu.memory_space<vmem>>, %arg3: memref<1x128x384xbf16, #tpu.memory_space<vmem>>, %arg4: memref<1x1x384xf32, #tpu.memory_space<vmem>>, %arg5: memref<1x128x128xbf16, #tpu.memory_space<vmem>>, %arg6: memref<1x1x128xf32, #tpu.memory_space<vmem>>, %arg7: memref<1x1x128xf32, #tpu.memory_space<vmem>>, %arg8: memref<1x1x128xf32, #tpu.memory_space<vmem>>, %arg9: memref<1x128x256xbf16, #tpu.memory_space<vmem>>, %arg10: memref<1x1x256xf32, #tpu.memory_space<vmem>>, %arg11: memref<1x256x128xbf16, #tpu.memory_space<vmem>>, %arg12: memref<1x1x128xf32, #tpu.memory_space<vmem>>, %arg13: memref<1x1x128xf32, #tpu.memory_space<vmem>>, %arg14: memref<1x1x128xf32, #tpu.memory_space<vmem>>, %arg15: memref<1x128xf32, #tpu.memory_space<vmem>>, %arg16: memref<1x128xf32, #tpu.memory_space<vmem>>, %arg17: memref<16x128xf32, #tpu.memory_space<vmem>>, %arg18: memref<16x128xf32, #tpu.memory_space<vmem>>) attributes {dimension_semantics = [#tpu.dimension_semantics<arbitrary>], iteration_bounds = array<i64: 2>, scalar_prefetch = 0 : i64, scratch_operands = 1 : i64, tpu.core_type = #tpu.core_type<tc>, window_params = [{pipeline_mode = #tpu.pipeline_mode<synchronous>, transform_indices = @transform_0, window_bounds = array<i64: 16, 128>}, {pipeline_mode = #tpu.pipeline_mode<synchronous>, transform_indices = @transform_1, window_bounds = array<i64: 2, 8, 8>}, {transform_indices = @transform_2, window_bounds = array<i64: 1, 128, 384>}, {transform_indices = @transform_3, window_bounds = array<i64: 1, 1, 384>}, {transform_indices = @transform_4, window_bounds = array<i64: 1, 128, 128>}, {transform_indices = @transform_5, window_bounds = array<i64: 1, 1, 128>}, {transform_indices = @transform_6, window_bounds = array<i64: 1, 1, 128>}, {transform_indices = @transform_7, window_bounds = array<i64: 1, 1, 128>}, {transform_indices = @transform_8, window_bounds = array<i64: 1, 128, 256>}, {transform_indices = @transform_9, window_bounds = array<i64: 1, 1, 256>}, {transform_indices = @transform_10, window_bounds = array<i64: 1, 256, 128>}, {transform_indices = @transform_11, window_bounds = array<i64: 1, 1, 128>}, {transform_indices = @transform_12, window_bounds = array<i64: 1, 1, 128>}, {transform_indices = @transform_13, window_bounds = array<i64: 1, 1, 128>}, {pipeline_mode = #tpu.pipeline_mode<synchronous>, transform_indices = @transform_14, window_bounds = array<i64: 1, 128>}, {pipeline_mode = #tpu.pipeline_mode<synchronous>, transform_indices = @transform_15, window_bounds = array<i64: 1, 128>}, {pipeline_mode = #tpu.pipeline_mode<synchronous>, transform_indices = @transform_16, window_bounds = array<i64: 16, 128>}]} {
    %c0_i32 = arith.constant 0 : i32
    %0 = arith.cmpi eq, %arg0, %c0_i32 : i32
    %1 = arith.extui %0 : i1 to i32
    %c0_i32_0 = arith.constant 0 : i32
    %2 = arith.cmpi ne, %1, %c0_i32_0 : i32
    scf.if %2 {
      %c0_107 = arith.constant 0 : index
      %c0_108 = arith.constant 0 : index
      %284 = vector.load %arg1[%c0_107, %c0_108] : memref<16x128xf32, #tpu.memory_space<vmem>>, vector<16x128xf32>
      %c0_109 = arith.constant 0 : index
      %c0_110 = arith.constant 0 : index
      %285 = vector.load %arg18[%c0_109, %c0_110] : memref<16x128xf32, #tpu.memory_space<vmem>>, vector<16x128xf32>
      tpu.vector_store %arg18[%c0_109, %c0_110], %284 {strides = array<i32>} : memref<16x128xf32, #tpu.memory_space<vmem>>, vector<16x128xf32>,
    } else {
    }
    %c0 = arith.constant 0 : index
    %c0_1 = arith.constant 0 : index
    %3 = vector.load %arg18[%c0, %c0_1] : memref<16x128xf32, #tpu.memory_space<vmem>>, vector<16x128xf32>
    %c0_2 = arith.constant 0 : index
    %c0_3 = arith.constant 0 : index
    %c0_4 = arith.constant 0 : index
    %4 = vector.load %arg2[%c0_2, %c0_3, %c0_4] : memref<2x8x8xf32, #tpu.memory_space<vmem>>, vector<2x8x8xf32>
    %c0_5 = arith.constant 0 : index
    %c0_6 = arith.constant 0 : index
    %c0_7 = arith.constant 0 : index
    %5 = vector.load %arg3[%c0_5, %c0_6, %c0_7] : memref<1x128x384xbf16, #tpu.memory_space<vmem>>, vector<1x128x384xbf16>
    %6 = vector.shape_cast %5 : vector<1x128x384xbf16> to vector<128x384xbf16>
    %c0_8 = arith.constant 0 : index
    %c0_9 = arith.constant 0 : index
    %c0_10 = arith.constant 0 : index
    %7 = vector.load %arg4[%c0_8, %c0_9, %c0_10] : memref<1x1x384xf32, #tpu.memory_space<vmem>>, vector<1x1x384xf32>
    %8 = vector.shape_cast %7 : vector<1x1x384xf32> to vector<1x384xf32>
    %c0_11 = arith.constant 0 : index
    %c0_12 = arith.constant 0 : index
    %c0_13 = arith.constant 0 : index
    %9 = vector.load %arg5[%c0_11, %c0_12, %c0_13] : memref<1x128x128xbf16, #tpu.memory_space<vmem>>, vector<1x128x128xbf16>
    %10 = vector.shape_cast %9 : vector<1x128x128xbf16> to vector<128x128xbf16>
    %c0_14 = arith.constant 0 : index
    %c0_15 = arith.constant 0 : index
    %c0_16 = arith.constant 0 : index
    %11 = vector.load %arg6[%c0_14, %c0_15, %c0_16] : memref<1x1x128xf32, #tpu.memory_space<vmem>>, vector<1x1x128xf32>
    %12 = vector.shape_cast %11 : vector<1x1x128xf32> to vector<1x128xf32>
    %13 = arith.truncf %3 : vector<16x128xf32> to vector<16x128xbf16>
    %cst = arith.constant dense<0.000000e+00> : vector<16x384xf32>
    %14 = tpu.matmul %13, %6, %cst {dimension_numbers = #tpu.dot_dimension_numbers<[1], [0], [0], [1], [0, 0, 1, 1], [], []>} : vector<16x128xbf16>, vector<128x384xbf16>, vector<16x384xf32> -> vector<16x384xf32>
    %15 = vector.broadcast %8 : vector<1x384xf32> to vector<16x384xf32>
    %16 = arith.addf %14, %15 : vector<16x384xf32>
    %17 = vector.extract_strided_slice %16 {offsets = [0, 0], sizes = [16, 128], strides = [1, 1]} : vector<16x384xf32> to vector<16x128xf32>
    %18 = vector.extract_strided_slice %16 {offsets = [0, 128], sizes = [16, 128], strides = [1, 1]} : vector<16x384xf32> to vector<16x128xf32>
    %19 = vector.extract_strided_slice %16 {offsets = [0, 256], sizes = [16, 128], strides = [1, 1]} : vector<16x384xf32> to vector<16x128xf32>
    %20 = vector.extract_strided_slice %17 {offsets = [0, 0], sizes = [8, 128], strides = [1, 1]} : vector<16x128xf32> to vector<8x128xf32>
    %21 = vector.extract_strided_slice %18 {offsets = [0, 0], sizes = [8, 128], strides = [1, 1]} : vector<16x128xf32> to vector<8x128xf32>
    %22 = vector.extract_strided_slice %19 {offsets = [0, 0], sizes = [8, 128], strides = [1, 1]} : vector<16x128xf32> to vector<8x128xf32>
    %23 = vector.extract_strided_slice %4 {offsets = [0, 0, 0], sizes = [1, 8, 8], strides = [1, 1, 1]} : vector<2x8x8xf32> to vector<1x8x8xf32>
    %24 = vector.shape_cast %23 : vector<1x8x8xf32> to vector<8x8xf32>
    %25 = vector.extract_strided_slice %20 {offsets = [0, 0], sizes = [8, 32], strides = [1, 1]} : vector<8x128xf32> to vector<8x32xf32>
    %26 = vector.extract_strided_slice %21 {offsets = [0, 0], sizes = [8, 32], strides = [1, 1]} : vector<8x128xf32> to vector<8x32xf32>
    %27 = vector.extract_strided_slice %22 {offsets = [0, 0], sizes = [8, 32], strides = [1, 1]} : vector<8x128xf32> to vector<8x32xf32>
    %cst_17 = arith.constant dense<0.000000e+00> : vector<8x8xf32>
    %28 = tpu.matmul %25, %26, %cst_17 {dimension_numbers = #tpu.dot_dimension_numbers<[1], [1], [0], [0], [0, 0, 1, 0], [], []>} : vector<8x32xf32>, vector<8x32xf32>, vector<8x8xf32> -> vector<8x8xf32>
    %cst_18 = arith.constant 0.176776692 : f32
    %29 = vector.broadcast %cst_18 : f32 to vector<8x8xf32>
    %30 = arith.mulf %28, %29 : vector<8x8xf32>
    %31 = arith.addf %30, %24 : vector<8x8xf32>
    %cst_19 = arith.constant dense<0xFF800000> : vector<8xf32>
    %32 = vector.multi_reduction <maximumf>, %31, %cst_19 [1] : vector<8x8xf32> to vector<8xf32>
    %33 = vector.shape_cast %32 : vector<8xf32> to vector<8x1xf32>
    %34 = vector.broadcast %33 : vector<8x1xf32> to vector<8x8xf32>
    %35 = arith.subf %31, %34 : vector<8x8xf32>
    %36 = math.exp %35 : vector<8x8xf32>
    %cst_20 = arith.constant dense<0.000000e+00> : vector<8xf32>
    %37 = vector.multi_reduction <add>, %36, %cst_20 [1] : vector<8x8xf32> to vector<8xf32>
    %38 = vector.shape_cast %37 : vector<8xf32> to vector<8x1xf32>
    %cst_21 = arith.constant dense<0.000000e+00> : vector<8x32xf32>
    %39 = tpu.matmul %36, %27, %cst_21 {dimension_numbers = #tpu.dot_dimension_numbers<[1], [0], [0], [1], [0, 0, 1, 1], [], []>} : vector<8x8xf32>, vector<8x32xf32>, vector<8x32xf32> -> vector<8x32xf32>
    %40 = tpu.reciprocal %38 {approx = true} : vector<8x1xf32> -> vector<8x1xf32>
    %41 = vector.broadcast %40 : vector<8x1xf32> to vector<8x32xf32>
    %42 = arith.mulf %39, %41 : vector<8x32xf32>
    %43 = arith.truncf %42 : vector<8x32xf32> to vector<8x32xbf16>
    %44 = vector.extract_strided_slice %10 {offsets = [0, 0], sizes = [32, 128], strides = [1, 1]} : vector<128x128xbf16> to vector<32x128xbf16>
    %cst_22 = arith.constant dense<0.000000e+00> : vector<8x128xf32>
    %45 = tpu.matmul %43, %44, %cst_22 {dimension_numbers = #tpu.dot_dimension_numbers<[1], [0], [0], [1], [0, 0, 1, 1], [], []>} : vector<8x32xbf16>, vector<32x128xbf16>, vector<8x128xf32> -> vector<8x128xf32>
    %46 = vector.extract_strided_slice %20 {offsets = [0, 32], sizes = [8, 32], strides = [1, 1]} : vector<8x128xf32> to vector<8x32xf32>
    %47 = vector.extract_strided_slice %21 {offsets = [0, 32], sizes = [8, 32], strides = [1, 1]} : vector<8x128xf32> to vector<8x32xf32>
    %48 = vector.extract_strided_slice %22 {offsets = [0, 32], sizes = [8, 32], strides = [1, 1]} : vector<8x128xf32> to vector<8x32xf32>
    %cst_23 = arith.constant dense<0.000000e+00> : vector<8x8xf32>
    %49 = tpu.matmul %46, %47, %cst_23 {dimension_numbers = #tpu.dot_dimension_numbers<[1], [1], [0], [0], [0, 0, 1, 0], [], []>} : vector<8x32xf32>, vector<8x32xf32>, vector<8x8xf32> -> vector<8x8xf32>
    %cst_24 = arith.constant 0.176776692 : f32
    %50 = vector.broadcast %cst_24 : f32 to vector<8x8xf32>
    %51 = arith.mulf %49, %50 : vector<8x8xf32>
    %52 = arith.addf %51, %24 : vector<8x8xf32>
    %cst_25 = arith.constant dense<0xFF800000> : vector<8xf32>
    %53 = vector.multi_reduction <maximumf>, %52, %cst_25 [1] : vector<8x8xf32> to vector<8xf32>
    %54 = vector.shape_cast %53 : vector<8xf32> to vector<8x1xf32>
    %55 = vector.broadcast %54 : vector<8x1xf32> to vector<8x8xf32>
    %56 = arith.subf %52, %55 : vector<8x8xf32>
    %57 = math.exp %56 : vector<8x8xf32>
    %cst_26 = arith.constant dense<0.000000e+00> : vector<8xf32>
    %58 = vector.multi_reduction <add>, %57, %cst_26 [1] : vector<8x8xf32> to vector<8xf32>
    %59 = vector.shape_cast %58 : vector<8xf32> to vector<8x1xf32>
    %cst_27 = arith.constant dense<0.000000e+00> : vector<8x32xf32>
    %60 = tpu.matmul %57, %48, %cst_27 {dimension_numbers = #tpu.dot_dimension_numbers<[1], [0], [0], [1], [0, 0, 1, 1], [], []>} : vector<8x8xf32>, vector<8x32xf32>, vector<8x32xf32> -> vector<8x32xf32>
    %61 = tpu.reciprocal %59 {approx = true} : vector<8x1xf32> -> vector<8x1xf32>
    %62 = vector.broadcast %61 : vector<8x1xf32> to vector<8x32xf32>
    %63 = arith.mulf %60, %62 : vector<8x32xf32>
    %64 = arith.truncf %63 : vector<8x32xf32> to vector<8x32xbf16>
    %65 = vector.extract_strided_slice %10 {offsets = [32, 0], sizes = [32, 128], strides = [1, 1]} : vector<128x128xbf16> to vector<32x128xbf16>
    %cst_28 = arith.constant dense<0.000000e+00> : vector<8x128xf32>
    %66 = tpu.matmul %64, %65, %cst_28 {dimension_numbers = #tpu.dot_dimension_numbers<[1], [0], [0], [1], [0, 0, 1, 1], [], []>} : vector<8x32xbf16>, vector<32x128xbf16>, vector<8x128xf32> -> vector<8x128xf32>
    %67 = arith.addf %45, %66 : vector<8x128xf32>
    %68 = vector.extract_strided_slice %20 {offsets = [0, 64], sizes = [8, 32], strides = [1, 1]} : vector<8x128xf32> to vector<8x32xf32>
    %69 = vector.extract_strided_slice %21 {offsets = [0, 64], sizes = [8, 32], strides = [1, 1]} : vector<8x128xf32> to vector<8x32xf32>
    %70 = vector.extract_strided_slice %22 {offsets = [0, 64], sizes = [8, 32], strides = [1, 1]} : vector<8x128xf32> to vector<8x32xf32>
    %cst_29 = arith.constant dense<0.000000e+00> : vector<8x8xf32>
    %71 = tpu.matmul %68, %69, %cst_29 {dimension_numbers = #tpu.dot_dimension_numbers<[1], [1], [0], [0], [0, 0, 1, 0], [], []>} : vector<8x32xf32>, vector<8x32xf32>, vector<8x8xf32> -> vector<8x8xf32>
    %cst_30 = arith.constant 0.176776692 : f32
    %72 = vector.broadcast %cst_30 : f32 to vector<8x8xf32>
    %73 = arith.mulf %71, %72 : vector<8x8xf32>
    %74 = arith.addf %73, %24 : vector<8x8xf32>
    %cst_31 = arith.constant dense<0xFF800000> : vector<8xf32>
    %75 = vector.multi_reduction <maximumf>, %74, %cst_31 [1] : vector<8x8xf32> to vector<8xf32>
    %76 = vector.shape_cast %75 : vector<8xf32> to vector<8x1xf32>
    %77 = vector.broadcast %76 : vector<8x1xf32> to vector<8x8xf32>
    %78 = arith.subf %74, %77 : vector<8x8xf32>
    %79 = math.exp %78 : vector<8x8xf32>
    %cst_32 = arith.constant dense<0.000000e+00> : vector<8xf32>
    %80 = vector.multi_reduction <add>, %79, %cst_32 [1] : vector<8x8xf32> to vector<8xf32>
    %81 = vector.shape_cast %80 : vector<8xf32> to vector<8x1xf32>
    %cst_33 = arith.constant dense<0.000000e+00> : vector<8x32xf32>
    %82 = tpu.matmul %79, %70, %cst_33 {dimension_numbers = #tpu.dot_dimension_numbers<[1], [0], [0], [1], [0, 0, 1, 1], [], []>} : vector<8x8xf32>, vector<8x32xf32>, vector<8x32xf32> -> vector<8x32xf32>
    %83 = tpu.reciprocal %81 {approx = true} : vector<8x1xf32> -> vector<8x1xf32>
    %84 = vector.broadcast %83 : vector<8x1xf32> to vector<8x32xf32>
    %85 = arith.mulf %82, %84 : vector<8x32xf32>
    %86 = arith.truncf %85 : vector<8x32xf32> to vector<8x32xbf16>
    %87 = vector.extract_strided_slice %10 {offsets = [64, 0], sizes = [32, 128], strides = [1, 1]} : vector<128x128xbf16> to vector<32x128xbf16>
    %cst_34 = arith.constant dense<0.000000e+00> : vector<8x128xf32>
    %88 = tpu.matmul %86, %87, %cst_34 {dimension_numbers = #tpu.dot_dimension_numbers<[1], [0], [0], [1], [0, 0, 1, 1], [], []>} : vector<8x32xbf16>, vector<32x128xbf16>, vector<8x128xf32> -> vector<8x128xf32>
    %89 = arith.addf %67, %88 : vector<8x128xf32>
    %90 = vector.extract_strided_slice %20 {offsets = [0, 96], sizes = [8, 32], strides = [1, 1]} : vector<8x128xf32> to vector<8x32xf32>
    %91 = vector.extract_strided_slice %21 {offsets = [0, 96], sizes = [8, 32], strides = [1, 1]} : vector<8x128xf32> to vector<8x32xf32>
    %92 = vector.extract_strided_slice %22 {offsets = [0, 96], sizes = [8, 32], strides = [1, 1]} : vector<8x128xf32> to vector<8x32xf32>
    %cst_35 = arith.constant dense<0.000000e+00> : vector<8x8xf32>
    %93 = tpu.matmul %90, %91, %cst_35 {dimension_numbers = #tpu.dot_dimension_numbers<[1], [1], [0], [0], [0, 0, 1, 0], [], []>} : vector<8x32xf32>, vector<8x32xf32>, vector<8x8xf32> -> vector<8x8xf32>
    %cst_36 = arith.constant 0.176776692 : f32
    %94 = vector.broadcast %cst_36 : f32 to vector<8x8xf32>
    %95 = arith.mulf %93, %94 : vector<8x8xf32>
    %96 = arith.addf %95, %24 : vector<8x8xf32>
    %cst_37 = arith.constant dense<0xFF800000> : vector<8xf32>
    %97 = vector.multi_reduction <maximumf>, %96, %cst_37 [1] : vector<8x8xf32> to vector<8xf32>
    %98 = vector.shape_cast %97 : vector<8xf32> to vector<8x1xf32>
    %99 = vector.broadcast %98 : vector<8x1xf32> to vector<8x8xf32>
    %100 = arith.subf %96, %99 : vector<8x8xf32>
    %101 = math.exp %100 : vector<8x8xf32>
    %cst_38 = arith.constant dense<0.000000e+00> : vector<8xf32>
    %102 = vector.multi_reduction <add>, %101, %cst_38 [1] : vector<8x8xf32> to vector<8xf32>
    %103 = vector.shape_cast %102 : vector<8xf32> to vector<8x1xf32>
    %cst_39 = arith.constant dense<0.000000e+00> : vector<8x32xf32>
    %104 = tpu.matmul %101, %92, %cst_39 {dimension_numbers = #tpu.dot_dimension_numbers<[1], [0], [0], [1], [0, 0, 1, 1], [], []>} : vector<8x8xf32>, vector<8x32xf32>, vector<8x32xf32> -> vector<8x32xf32>
    %105 = tpu.reciprocal %103 {approx = true} : vector<8x1xf32> -> vector<8x1xf32>
    %106 = vector.broadcast %105 : vector<8x1xf32> to vector<8x32xf32>
    %107 = arith.mulf %104, %106 : vector<8x32xf32>
    %108 = arith.truncf %107 : vector<8x32xf32> to vector<8x32xbf16>
    %109 = vector.extract_strided_slice %10 {offsets = [96, 0], sizes = [32, 128], strides = [1, 1]} : vector<128x128xbf16> to vector<32x128xbf16>
    %cst_40 = arith.constant dense<0.000000e+00> : vector<8x128xf32>
    %110 = tpu.matmul %108, %109, %cst_40 {dimension_numbers = #tpu.dot_dimension_numbers<[1], [0], [0], [1], [0, 0, 1, 1], [], []>} : vector<8x32xbf16>, vector<32x128xbf16>, vector<8x128xf32> -> vector<8x128xf32>
    %111 = arith.addf %89, %110 : vector<8x128xf32>
    %112 = vector.extract_strided_slice %17 {offsets = [8, 0], sizes = [8, 128], strides = [1, 1]} : vector<16x128xf32> to vector<8x128xf32>
    %113 = vector.extract_strided_slice %18 {offsets = [8, 0], sizes = [8, 128], strides = [1, 1]} : vector<16x128xf32> to vector<8x128xf32>
    %114 = vector.extract_strided_slice %19 {offsets = [8, 0], sizes = [8, 128], strides = [1, 1]} : vector<16x128xf32> to vector<8x128xf32>
    %115 = vector.extract_strided_slice %4 {offsets = [1, 0, 0], sizes = [1, 8, 8], strides = [1, 1, 1]} : vector<2x8x8xf32> to vector<1x8x8xf32>
    %116 = vector.shape_cast %115 : vector<1x8x8xf32> to vector<8x8xf32>
    %117 = vector.extract_strided_slice %112 {offsets = [0, 0], sizes = [8, 32], strides = [1, 1]} : vector<8x128xf32> to vector<8x32xf32>
    %118 = vector.extract_strided_slice %113 {offsets = [0, 0], sizes = [8, 32], strides = [1, 1]} : vector<8x128xf32> to vector<8x32xf32>
    %119 = vector.extract_strided_slice %114 {offsets = [0, 0], sizes = [8, 32], strides = [1, 1]} : vector<8x128xf32> to vector<8x32xf32>
    %cst_41 = arith.constant dense<0.000000e+00> : vector<8x8xf32>
    %120 = tpu.matmul %117, %118, %cst_41 {dimension_numbers = #tpu.dot_dimension_numbers<[1], [1], [0], [0], [0, 0, 1, 0], [], []>} : vector<8x32xf32>, vector<8x32xf32>, vector<8x8xf32> -> vector<8x8xf32>
    %cst_42 = arith.constant 0.176776692 : f32
    %121 = vector.broadcast %cst_42 : f32 to vector<8x8xf32>
    %122 = arith.mulf %120, %121 : vector<8x8xf32>
    %123 = arith.addf %122, %116 : vector<8x8xf32>
    %cst_43 = arith.constant dense<0xFF800000> : vector<8xf32>
    %124 = vector.multi_reduction <maximumf>, %123, %cst_43 [1] : vector<8x8xf32> to vector<8xf32>
    %125 = vector.shape_cast %124 : vector<8xf32> to vector<8x1xf32>
    %126 = vector.broadcast %125 : vector<8x1xf32> to vector<8x8xf32>
    %127 = arith.subf %123, %126 : vector<8x8xf32>
    %128 = math.exp %127 : vector<8x8xf32>
    %cst_44 = arith.constant dense<0.000000e+00> : vector<8xf32>
    %129 = vector.multi_reduction <add>, %128, %cst_44 [1] : vector<8x8xf32> to vector<8xf32>
    %130 = vector.shape_cast %129 : vector<8xf32> to vector<8x1xf32>
    %cst_45 = arith.constant dense<0.000000e+00> : vector<8x32xf32>
    %131 = tpu.matmul %128, %119, %cst_45 {dimension_numbers = #tpu.dot_dimension_numbers<[1], [0], [0], [1], [0, 0, 1, 1], [], []>} : vector<8x8xf32>, vector<8x32xf32>, vector<8x32xf32> -> vector<8x32xf32>
    %132 = tpu.reciprocal %130 {approx = true} : vector<8x1xf32> -> vector<8x1xf32>
    %133 = vector.broadcast %132 : vector<8x1xf32> to vector<8x32xf32>
    %134 = arith.mulf %131, %133 : vector<8x32xf32>
    %135 = arith.truncf %134 : vector<8x32xf32> to vector<8x32xbf16>
    %136 = vector.extract_strided_slice %10 {offsets = [0, 0], sizes = [32, 128], strides = [1, 1]} : vector<128x128xbf16> to vector<32x128xbf16>
    %cst_46 = arith.constant dense<0.000000e+00> : vector<8x128xf32>
    %137 = tpu.matmul %135, %136, %cst_46 {dimension_numbers = #tpu.dot_dimension_numbers<[1], [0], [0], [1], [0, 0, 1, 1], [], []>} : vector<8x32xbf16>, vector<32x128xbf16>, vector<8x128xf32> -> vector<8x128xf32>
    %138 = vector.extract_strided_slice %112 {offsets = [0, 32], sizes = [8, 32], strides = [1, 1]} : vector<8x128xf32> to vector<8x32xf32>
    %139 = vector.extract_strided_slice %113 {offsets = [0, 32], sizes = [8, 32], strides = [1, 1]} : vector<8x128xf32> to vector<8x32xf32>
    %140 = vector.extract_strided_slice %114 {offsets = [0, 32], sizes = [8, 32], strides = [1, 1]} : vector<8x128xf32> to vector<8x32xf32>
    %cst_47 = arith.constant dense<0.000000e+00> : vector<8x8xf32>
    %141 = tpu.matmul %138, %139, %cst_47 {dimension_numbers = #tpu.dot_dimension_numbers<[1], [1], [0], [0], [0, 0, 1, 0], [], []>} : vector<8x32xf32>, vector<8x32xf32>, vector<8x8xf32> -> vector<8x8xf32>
    %cst_48 = arith.constant 0.176776692 : f32
    %142 = vector.broadcast %cst_48 : f32 to vector<8x8xf32>
    %143 = arith.mulf %141, %142 : vector<8x8xf32>
    %144 = arith.addf %143, %116 : vector<8x8xf32>
    %cst_49 = arith.constant dense<0xFF800000> : vector<8xf32>
    %145 = vector.multi_reduction <maximumf>, %144, %cst_49 [1] : vector<8x8xf32> to vector<8xf32>
    %146 = vector.shape_cast %145 : vector<8xf32> to vector<8x1xf32>
    %147 = vector.broadcast %146 : vector<8x1xf32> to vector<8x8xf32>
    %148 = arith.subf %144, %147 : vector<8x8xf32>
    %149 = math.exp %148 : vector<8x8xf32>
    %cst_50 = arith.constant dense<0.000000e+00> : vector<8xf32>
    %150 = vector.multi_reduction <add>, %149, %cst_50 [1] : vector<8x8xf32> to vector<8xf32>
    %151 = vector.shape_cast %150 : vector<8xf32> to vector<8x1xf32>
    %cst_51 = arith.constant dense<0.000000e+00> : vector<8x32xf32>
    %152 = tpu.matmul %149, %140, %cst_51 {dimension_numbers = #tpu.dot_dimension_numbers<[1], [0], [0], [1], [0, 0, 1, 1], [], []>} : vector<8x8xf32>, vector<8x32xf32>, vector<8x32xf32> -> vector<8x32xf32>
    %153 = tpu.reciprocal %151 {approx = true} : vector<8x1xf32> -> vector<8x1xf32>
    %154 = vector.broadcast %153 : vector<8x1xf32> to vector<8x32xf32>
    %155 = arith.mulf %152, %154 : vector<8x32xf32>
    %156 = arith.truncf %155 : vector<8x32xf32> to vector<8x32xbf16>
    %157 = vector.extract_strided_slice %10 {offsets = [32, 0], sizes = [32, 128], strides = [1, 1]} : vector<128x128xbf16> to vector<32x128xbf16>
    %cst_52 = arith.constant dense<0.000000e+00> : vector<8x128xf32>
    %158 = tpu.matmul %156, %157, %cst_52 {dimension_numbers = #tpu.dot_dimension_numbers<[1], [0], [0], [1], [0, 0, 1, 1], [], []>} : vector<8x32xbf16>, vector<32x128xbf16>, vector<8x128xf32> -> vector<8x128xf32>
    %159 = arith.addf %137, %158 : vector<8x128xf32>
    %160 = vector.extract_strided_slice %112 {offsets = [0, 64], sizes = [8, 32], strides = [1, 1]} : vector<8x128xf32> to vector<8x32xf32>
    %161 = vector.extract_strided_slice %113 {offsets = [0, 64], sizes = [8, 32], strides = [1, 1]} : vector<8x128xf32> to vector<8x32xf32>
    %162 = vector.extract_strided_slice %114 {offsets = [0, 64], sizes = [8, 32], strides = [1, 1]} : vector<8x128xf32> to vector<8x32xf32>
    %cst_53 = arith.constant dense<0.000000e+00> : vector<8x8xf32>
    %163 = tpu.matmul %160, %161, %cst_53 {dimension_numbers = #tpu.dot_dimension_numbers<[1], [1], [0], [0], [0, 0, 1, 0], [], []>} : vector<8x32xf32>, vector<8x32xf32>, vector<8x8xf32> -> vector<8x8xf32>
    %cst_54 = arith.constant 0.176776692 : f32
    %164 = vector.broadcast %cst_54 : f32 to vector<8x8xf32>
    %165 = arith.mulf %163, %164 : vector<8x8xf32>
    %166 = arith.addf %165, %116 : vector<8x8xf32>
    %cst_55 = arith.constant dense<0xFF800000> : vector<8xf32>
    %167 = vector.multi_reduction <maximumf>, %166, %cst_55 [1] : vector<8x8xf32> to vector<8xf32>
    %168 = vector.shape_cast %167 : vector<8xf32> to vector<8x1xf32>
    %169 = vector.broadcast %168 : vector<8x1xf32> to vector<8x8xf32>
    %170 = arith.subf %166, %169 : vector<8x8xf32>
    %171 = math.exp %170 : vector<8x8xf32>
    %cst_56 = arith.constant dense<0.000000e+00> : vector<8xf32>
    %172 = vector.multi_reduction <add>, %171, %cst_56 [1] : vector<8x8xf32> to vector<8xf32>
    %173 = vector.shape_cast %172 : vector<8xf32> to vector<8x1xf32>
    %cst_57 = arith.constant dense<0.000000e+00> : vector<8x32xf32>
    %174 = tpu.matmul %171, %162, %cst_57 {dimension_numbers = #tpu.dot_dimension_numbers<[1], [0], [0], [1], [0, 0, 1, 1], [], []>} : vector<8x8xf32>, vector<8x32xf32>, vector<8x32xf32> -> vector<8x32xf32>
    %175 = tpu.reciprocal %173 {approx = true} : vector<8x1xf32> -> vector<8x1xf32>
    %176 = vector.broadcast %175 : vector<8x1xf32> to vector<8x32xf32>
    %177 = arith.mulf %174, %176 : vector<8x32xf32>
    %178 = arith.truncf %177 : vector<8x32xf32> to vector<8x32xbf16>
    %179 = vector.extract_strided_slice %10 {offsets = [64, 0], sizes = [32, 128], strides = [1, 1]} : vector<128x128xbf16> to vector<32x128xbf16>
    %cst_58 = arith.constant dense<0.000000e+00> : vector<8x128xf32>
    %180 = tpu.matmul %178, %179, %cst_58 {dimension_numbers = #tpu.dot_dimension_numbers<[1], [0], [0], [1], [0, 0, 1, 1], [], []>} : vector<8x32xbf16>, vector<32x128xbf16>, vector<8x128xf32> -> vector<8x128xf32>
    %181 = arith.addf %159, %180 : vector<8x128xf32>
    %182 = vector.extract_strided_slice %112 {offsets = [0, 96], sizes = [8, 32], strides = [1, 1]} : vector<8x128xf32> to vector<8x32xf32>
    %183 = vector.extract_strided_slice %113 {offsets = [0, 96], sizes = [8, 32], strides = [1, 1]} : vector<8x128xf32> to vector<8x32xf32>
    %184 = vector.extract_strided_slice %114 {offsets = [0, 96], sizes = [8, 32], strides = [1, 1]} : vector<8x128xf32> to vector<8x32xf32>
    %cst_59 = arith.constant dense<0.000000e+00> : vector<8x8xf32>
    %185 = tpu.matmul %182, %183, %cst_59 {dimension_numbers = #tpu.dot_dimension_numbers<[1], [1], [0], [0], [0, 0, 1, 0], [], []>} : vector<8x32xf32>, vector<8x32xf32>, vector<8x8xf32> -> vector<8x8xf32>
    %cst_60 = arith.constant 0.176776692 : f32
    %186 = vector.broadcast %cst_60 : f32 to vector<8x8xf32>
    %187 = arith.mulf %185, %186 : vector<8x8xf32>
    %188 = arith.addf %187, %116 : vector<8x8xf32>
    %cst_61 = arith.constant dense<0xFF800000> : vector<8xf32>
    %189 = vector.multi_reduction <maximumf>, %188, %cst_61 [1] : vector<8x8xf32> to vector<8xf32>
    %190 = vector.shape_cast %189 : vector<8xf32> to vector<8x1xf32>
    %191 = vector.broadcast %190 : vector<8x1xf32> to vector<8x8xf32>
    %192 = arith.subf %188, %191 : vector<8x8xf32>
    %193 = math.exp %192 : vector<8x8xf32>
    %cst_62 = arith.constant dense<0.000000e+00> : vector<8xf32>
    %194 = vector.multi_reduction <add>, %193, %cst_62 [1] : vector<8x8xf32> to vector<8xf32>
    %195 = vector.shape_cast %194 : vector<8xf32> to vector<8x1xf32>
    %cst_63 = arith.constant dense<0.000000e+00> : vector<8x32xf32>
    %196 = tpu.matmul %193, %184, %cst_63 {dimension_numbers = #tpu.dot_dimension_numbers<[1], [0], [0], [1], [0, 0, 1, 1], [], []>} : vector<8x8xf32>, vector<8x32xf32>, vector<8x32xf32> -> vector<8x32xf32>
    %197 = tpu.reciprocal %195 {approx = true} : vector<8x1xf32> -> vector<8x1xf32>
    %198 = vector.broadcast %197 : vector<8x1xf32> to vector<8x32xf32>
    %199 = arith.mulf %196, %198 : vector<8x32xf32>
    %200 = arith.truncf %199 : vector<8x32xf32> to vector<8x32xbf16>
    %201 = vector.extract_strided_slice %10 {offsets = [96, 0], sizes = [32, 128], strides = [1, 1]} : vector<128x128xbf16> to vector<32x128xbf16>
    %cst_64 = arith.constant dense<0.000000e+00> : vector<8x128xf32>
    %202 = tpu.matmul %200, %201, %cst_64 {dimension_numbers = #tpu.dot_dimension_numbers<[1], [0], [0], [1], [0, 0, 1, 1], [], []>} : vector<8x32xbf16>, vector<32x128xbf16>, vector<8x128xf32> -> vector<8x128xf32>
    %203 = arith.addf %181, %202 : vector<8x128xf32>
    %204 = tpu.concatenate %111, %203 in 0 : vector<8x128xf32>, vector<8x128xf32> -> vector<16x128xf32>
    %205 = vector.broadcast %12 : vector<1x128xf32> to vector<16x128xf32>
    %206 = arith.addf %204, %205 : vector<16x128xf32>
    %c0_65 = arith.constant 0 : index
    %c0_66 = arith.constant 0 : index
    %c0_67 = arith.constant 0 : index
    %207 = vector.load %arg7[%c0_65, %c0_66, %c0_67] : memref<1x1x128xf32, #tpu.memory_space<vmem>>, vector<1x1x128xf32>
    %208 = vector.shape_cast %207 : vector<1x1x128xf32> to vector<1x128xf32>
    %c0_68 = arith.constant 0 : index
    %c0_69 = arith.constant 0 : index
    %c0_70 = arith.constant 0 : index
    %209 = vector.load %arg8[%c0_68, %c0_69, %c0_70] : memref<1x1x128xf32, #tpu.memory_space<vmem>>, vector<1x1x128xf32>
    %210 = vector.shape_cast %209 : vector<1x1x128xf32> to vector<1x128xf32>
    %211 = arith.addf %3, %206 : vector<16x128xf32>
    %cst_71 = arith.constant dense<0.000000e+00> : vector<16xf32>
    %212 = vector.multi_reduction <add>, %211, %cst_71 [1] : vector<16x128xf32> to vector<16xf32>
    %213 = vector.shape_cast %212 : vector<16xf32> to vector<16x1xf32>
    %cst_72 = arith.constant 1.280000e+02 : f32
    %214 = vector.broadcast %cst_72 : f32 to vector<16x1xf32>
    %215 = arith.divf %213, %214 : vector<16x1xf32>
    %216 = vector.broadcast %215 : vector<16x1xf32> to vector<16x128xf32>
    %217 = arith.subf %211, %216 : vector<16x128xf32>
    %218 = arith.mulf %217, %217 : vector<16x128xf32>
    %cst_73 = arith.constant dense<0.000000e+00> : vector<16xf32>
    %219 = vector.multi_reduction <add>, %218, %cst_73 [1] : vector<16x128xf32> to vector<16xf32>
    %220 = vector.shape_cast %219 : vector<16xf32> to vector<16x1xf32>
    %cst_74 = arith.constant 1.280000e+02 : f32
    %221 = vector.broadcast %cst_74 : f32 to vector<16x1xf32>
    %222 = arith.divf %220, %221 : vector<16x1xf32>
    %223 = vector.broadcast %215 : vector<16x1xf32> to vector<16x128xf32>
    %224 = arith.subf %211, %223 : vector<16x128xf32>
    %cst_75 = arith.constant 9.99999974E-6 : f32
    %225 = vector.broadcast %cst_75 : f32 to vector<16x1xf32>
    %226 = arith.addf %222, %225 : vector<16x1xf32>
    %227 = math.rsqrt %226 : vector<16x1xf32>
    %228 = vector.broadcast %227 : vector<16x1xf32> to vector<16x128xf32>
    %229 = arith.mulf %224, %228 : vector<16x128xf32>
    %230 = vector.broadcast %208 : vector<1x128xf32> to vector<16x128xf32>
    %231 = arith.mulf %229, %230 : vector<16x128xf32>
    %232 = vector.broadcast %210 : vector<1x128xf32> to vector<16x128xf32>
    %233 = arith.addf %231, %232 : vector<16x128xf32>
    %c0_76 = arith.constant 0 : index
    %c0_77 = arith.constant 0 : index
    %c0_78 = arith.constant 0 : index
    %234 = vector.load %arg9[%c0_76, %c0_77, %c0_78] : memref<1x128x256xbf16, #tpu.memory_space<vmem>>, vector<1x128x256xbf16>
    %235 = vector.shape_cast %234 : vector<1x128x256xbf16> to vector<128x256xbf16>
    %c0_79 = arith.constant 0 : index
    %c0_80 = arith.constant 0 : index
    %c0_81 = arith.constant 0 : index
    %236 = vector.load %arg10[%c0_79, %c0_80, %c0_81] : memref<1x1x256xf32, #tpu.memory_space<vmem>>, vector<1x1x256xf32>
    %237 = vector.shape_cast %236 : vector<1x1x256xf32> to vector<1x256xf32>
    %c0_82 = arith.constant 0 : index
    %c0_83 = arith.constant 0 : index
    %c0_84 = arith.constant 0 : index
    %238 = vector.load %arg11[%c0_82, %c0_83, %c0_84] : memref<1x256x128xbf16, #tpu.memory_space<vmem>>, vector<1x256x128xbf16>
    %239 = vector.shape_cast %238 : vector<1x256x128xbf16> to vector<256x128xbf16>
    %c0_85 = arith.constant 0 : index
    %c0_86 = arith.constant 0 : index
    %c0_87 = arith.constant 0 : index
    %240 = vector.load %arg12[%c0_85, %c0_86, %c0_87] : memref<1x1x128xf32, #tpu.memory_space<vmem>>, vector<1x1x128xf32>
    %241 = vector.shape_cast %240 : vector<1x1x128xf32> to vector<1x128xf32>
    %242 = arith.truncf %233 : vector<16x128xf32> to vector<16x128xbf16>
    %cst_88 = arith.constant dense<0.000000e+00> : vector<16x256xf32>
    %243 = tpu.matmul %242, %235, %cst_88 {dimension_numbers = #tpu.dot_dimension_numbers<[1], [0], [0], [1], [0, 0, 1, 1], [], []>} : vector<16x128xbf16>, vector<128x256xbf16>, vector<16x256xf32> -> vector<16x256xf32>
    %244 = vector.broadcast %237 : vector<1x256xf32> to vector<16x256xf32>
    %245 = arith.addf %243, %244 : vector<16x256xf32>
    %cst_89 = arith.constant 0.000000e+00 : f32
    %246 = vector.broadcast %cst_89 : f32 to vector<16x256xf32>
    %247 = arith.maximumf %245, %246 : vector<16x256xf32>
    %248 = arith.truncf %247 : vector<16x256xf32> to vector<16x256xbf16>
    %cst_90 = arith.constant dense<0.000000e+00> : vector<16x128xf32>
    %249 = tpu.matmul %248, %239, %cst_90 {dimension_numbers = #tpu.dot_dimension_numbers<[1], [0], [0], [1], [0, 0, 1, 1], [], []>} : vector<16x256xbf16>, vector<256x128xbf16>, vector<16x128xf32> -> vector<16x128xf32>
    %250 = vector.broadcast %241 : vector<1x128xf32> to vector<16x128xf32>
    %251 = arith.addf %249, %250 : vector<16x128xf32>
    %c0_91 = arith.constant 0 : index
    %c0_92 = arith.constant 0 : index
    %c0_93 = arith.constant 0 : index
    %252 = vector.load %arg13[%c0_91, %c0_92, %c0_93] : memref<1x1x128xf32, #tpu.memory_space<vmem>>, vector<1x1x128xf32>
    %253 = vector.shape_cast %252 : vector<1x1x128xf32> to vector<1x128xf32>
    %c0_94 = arith.constant 0 : index
    %c0_95 = arith.constant 0 : index
    %c0_96 = arith.constant 0 : index
    %254 = vector.load %arg14[%c0_94, %c0_95, %c0_96] : memref<1x1x128xf32, #tpu.memory_space<vmem>>, vector<1x1x128xf32>
    %255 = vector.shape_cast %254 : vector<1x1x128xf32> to vector<1x128xf32>
    %256 = arith.addf %233, %251 : vector<16x128xf32>
    %cst_97 = arith.constant dense<0.000000e+00> : vector<16xf32>
    %257 = vector.multi_reduction <add>, %256, %cst_97 [1] : vector<16x128xf32> to vector<16xf32>
    %258 = vector.shape_cast %257 : vector<16xf32> to vector<16x1xf32>
    %cst_98 = arith.constant 1.280000e+02 : f32
    %259 = vector.broadcast %cst_98 : f32 to vector<16x1xf32>
    %260 = arith.divf %258, %259 : vector<16x1xf32>
    %261 = vector.broadcast %260 : vector<16x1xf32> to vector<16x128xf32>
    %262 = arith.subf %256, %261 : vector<16x128xf32>
    %263 = arith.mulf %262, %262 : vector<16x128xf32>
    %cst_99 = arith.constant dense<0.000000e+00> : vector<16xf32>
    %264 = vector.multi_reduction <add>, %263, %cst_99 [1] : vector<16x128xf32> to vector<16xf32>
    %265 = vector.shape_cast %264 : vector<16xf32> to vector<16x1xf32>
    %cst_100 = arith.constant 1.280000e+02 : f32
    %266 = vector.broadcast %cst_100 : f32 to vector<16x1xf32>
    %267 = arith.divf %265, %266 : vector<16x1xf32>
    %268 = vector.broadcast %260 : vector<16x1xf32> to vector<16x128xf32>
    %269 = arith.subf %256, %268 : vector<16x128xf32>
    %cst_101 = arith.constant 9.99999974E-6 : f32
    %270 = vector.broadcast %cst_101 : f32 to vector<16x1xf32>
    %271 = arith.addf %267, %270 : vector<16x1xf32>
    %272 = math.rsqrt %271 : vector<16x1xf32>
    %273 = vector.broadcast %272 : vector<16x1xf32> to vector<16x128xf32>
    %274 = arith.mulf %269, %273 : vector<16x128xf32>
    %275 = vector.broadcast %253 : vector<1x128xf32> to vector<16x128xf32>
    %276 = arith.mulf %274, %275 : vector<16x128xf32>
    %277 = vector.broadcast %255 : vector<1x128xf32> to vector<16x128xf32>
    %278 = arith.addf %276, %277 : vector<16x128xf32>
    %c0_102 = arith.constant 0 : index
    %c0_103 = arith.constant 0 : index
    %279 = vector.load %arg18[%c0_102, %c0_103] : memref<16x128xf32, #tpu.memory_space<vmem>>, vector<16x128xf32>
    tpu.vector_store %arg18[%c0_102, %c0_103], %278 {strides = array<i32>} : memref<16x128xf32, #tpu.memory_space<vmem>>, vector<16x128xf32>,
    %c0_104 = arith.constant 0 : index
    %c0_105 = arith.constant 0 : index
    %280 = vector.load %arg17[%c0_104, %c0_105] : memref<16x128xf32, #tpu.memory_space<vmem>>, vector<16x128xf32>
    tpu.vector_store %arg17[%c0_104, %c0_105], %278 {strides = array<i32>} : memref<16x128xf32, #tpu.memory_space<vmem>>, vector<16x128xf32>,
    %c1_i32 = arith.constant 1 : i32
    %281 = arith.cmpi eq, %arg0, %c1_i32 : i32
    %282 = arith.extui %281 : i1 to i32
    %c0_i32_106 = arith.constant 0 : i32
    %283 = arith.cmpi ne, %282, %c0_i32_106 : i32
    scf.if %283 {
      %c0_107 = arith.constant 0 : index
      %c0_108 = arith.constant 0 : index
      %284 = vector.load %arg15[%c0_107, %c0_108] : memref<1x128xf32, #tpu.memory_space<vmem>>, vector<1x128xf32>
      %c0_109 = arith.constant 0 : index
      %c0_110 = arith.constant 0 : index
      %285 = vector.load %arg16[%c0_109, %c0_110] : memref<1x128xf32, #tpu.memory_space<vmem>>, vector<1x128xf32>
      %cst_111 = arith.constant dense<0.000000e+00> : vector<16xf32>
      %286 = vector.multi_reduction <add>, %278, %cst_111 [1] : vector<16x128xf32> to vector<16xf32>
      %287 = vector.shape_cast %286 : vector<16xf32> to vector<16x1xf32>
      %cst_112 = arith.constant 1.280000e+02 : f32
      %288 = vector.broadcast %cst_112 : f32 to vector<16x1xf32>
      %289 = arith.divf %287, %288 : vector<16x1xf32>
      %290 = vector.broadcast %289 : vector<16x1xf32> to vector<16x128xf32>
      %291 = arith.subf %278, %290 : vector<16x128xf32>
      %292 = arith.mulf %291, %291 : vector<16x128xf32>
      %cst_113 = arith.constant dense<0.000000e+00> : vector<16xf32>
      %293 = vector.multi_reduction <add>, %292, %cst_113 [1] : vector<16x128xf32> to vector<16xf32>
      %294 = vector.shape_cast %293 : vector<16xf32> to vector<16x1xf32>
      %cst_114 = arith.constant 1.280000e+02 : f32
      %295 = vector.broadcast %cst_114 : f32 to vector<16x1xf32>
      %296 = arith.divf %294, %295 : vector<16x1xf32>
      %297 = vector.broadcast %289 : vector<16x1xf32> to vector<16x128xf32>
      %298 = arith.subf %278, %297 : vector<16x128xf32>
      %cst_115 = arith.constant 9.99999974E-6 : f32
      %299 = vector.broadcast %cst_115 : f32 to vector<16x1xf32>
      %300 = arith.addf %296, %299 : vector<16x1xf32>
      %301 = math.rsqrt %300 : vector<16x1xf32>
      %302 = vector.broadcast %301 : vector<16x1xf32> to vector<16x128xf32>
      %303 = arith.mulf %298, %302 : vector<16x128xf32>
      %304 = vector.broadcast %284 : vector<1x128xf32> to vector<16x128xf32>
      %305 = arith.mulf %303, %304 : vector<16x128xf32>
      %306 = vector.broadcast %285 : vector<1x128xf32> to vector<16x128xf32>
      %307 = arith.addf %305, %306 : vector<16x128xf32>
      %c0_116 = arith.constant 0 : index
      %c0_117 = arith.constant 0 : index
      %308 = vector.load %arg17[%c0_116, %c0_117] : memref<16x128xf32, #tpu.memory_space<vmem>>, vector<16x128xf32>
      tpu.vector_store %arg17[%c0_116, %c0_117], %307 {strides = array<i32>} : memref<16x128xf32, #tpu.memory_space<vmem>>, vector<16x128xf32>,
    } else {
    }
    return
  }
  func.func @transform_0(%arg0: i32) -> (i32, i32) {
    %c0_i32 = arith.constant 0 : i32
    %c0_i32_0 = arith.constant 0 : i32
    %c0_i32_1 = arith.constant 0 : i32
    return %c0_i32, %c0_i32_0 : i32, i32
  }
  func.func @transform_1(%arg0: i32) -> (i32, i32, i32) {
    %c0_i32 = arith.constant 0 : i32
    %c0_i32_0 = arith.constant 0 : i32
    %c0_i32_1 = arith.constant 0 : i32
    %c0_i32_2 = arith.constant 0 : i32
    return %c0_i32, %c0_i32_0, %c0_i32_1 : i32, i32, i32
  }
  func.func @transform_2(%arg0: i32) -> (i32, i32, i32) {
    %c0_i32 = arith.constant 0 : i32
    %c0_i32_0 = arith.constant 0 : i32
    %c0_i32_1 = arith.constant 0 : i32
    return %arg0, %c0_i32, %c0_i32_0 : i32, i32, i32
  }
  func.func @transform_3(%arg0: i32) -> (i32, i32, i32) {
    %c0_i32 = arith.constant 0 : i32
    %c0_i32_0 = arith.constant 0 : i32
    %c0_i32_1 = arith.constant 0 : i32
    return %arg0, %c0_i32, %c0_i32_0 : i32, i32, i32
  }
  func.func @transform_4(%arg0: i32) -> (i32, i32, i32) {
    %c0_i32 = arith.constant 0 : i32
    %c0_i32_0 = arith.constant 0 : i32
    %c0_i32_1 = arith.constant 0 : i32
    return %arg0, %c0_i32, %c0_i32_0 : i32, i32, i32
  }
  func.func @transform_5(%arg0: i32) -> (i32, i32, i32) {
    %c0_i32 = arith.constant 0 : i32
    %c0_i32_0 = arith.constant 0 : i32
    %c0_i32_1 = arith.constant 0 : i32
    return %arg0, %c0_i32, %c0_i32_0 : i32, i32, i32
  }
  func.func @transform_6(%arg0: i32) -> (i32, i32, i32) {
    %c0_i32 = arith.constant 0 : i32
    %c0_i32_0 = arith.constant 0 : i32
    %c0_i32_1 = arith.constant 0 : i32
    return %arg0, %c0_i32, %c0_i32_0 : i32, i32, i32
  }
  func.func @transform_7(%arg0: i32) -> (i32, i32, i32) {
    %c0_i32 = arith.constant 0 : i32
    %c0_i32_0 = arith.constant 0 : i32
    %c0_i32_1 = arith.constant 0 : i32
    return %arg0, %c0_i32, %c0_i32_0 : i32, i32, i32
  }
  func.func @transform_8(%arg0: i32) -> (i32, i32, i32) {
    %c0_i32 = arith.constant 0 : i32
    %c0_i32_0 = arith.constant 0 : i32
    %c0_i32_1 = arith.constant 0 : i32
    return %arg0, %c0_i32, %c0_i32_0 : i32, i32, i32
  }
  func.func @transform_9(%arg0: i32) -> (i32, i32, i32) {
    %c0_i32 = arith.constant 0 : i32
    %c0_i32_0 = arith.constant 0 : i32
    %c0_i32_1 = arith.constant 0 : i32
    return %arg0, %c0_i32, %c0_i32_0 : i32, i32, i32
  }
  func.func @transform_10(%arg0: i32) -> (i32, i32, i32) {
    %c0_i32 = arith.constant 0 : i32
    %c0_i32_0 = arith.constant 0 : i32
    %c0_i32_1 = arith.constant 0 : i32
    return %arg0, %c0_i32, %c0_i32_0 : i32, i32, i32
  }
  func.func @transform_11(%arg0: i32) -> (i32, i32, i32) {
    %c0_i32 = arith.constant 0 : i32
    %c0_i32_0 = arith.constant 0 : i32
    %c0_i32_1 = arith.constant 0 : i32
    return %arg0, %c0_i32, %c0_i32_0 : i32, i32, i32
  }
  func.func @transform_12(%arg0: i32) -> (i32, i32, i32) {
    %c0_i32 = arith.constant 0 : i32
    %c0_i32_0 = arith.constant 0 : i32
    %c0_i32_1 = arith.constant 0 : i32
    return %arg0, %c0_i32, %c0_i32_0 : i32, i32, i32
  }
  func.func @transform_13(%arg0: i32) -> (i32, i32, i32) {
    %c0_i32 = arith.constant 0 : i32
    %c0_i32_0 = arith.constant 0 : i32
    %c0_i32_1 = arith.constant 0 : i32
    return %arg0, %c0_i32, %c0_i32_0 : i32, i32, i32
  }
  func.func @transform_14(%arg0: i32) -> (i32, i32) {
    %c0_i32 = arith.constant 0 : i32
    %c0_i32_0 = arith.constant 0 : i32
    %c0_i32_1 = arith.constant 0 : i32
    return %c0_i32, %c0_i32_0 : i32, i32
  }
  func.func @transform_15(%arg0: i32) -> (i32, i32) {
    %c0_i32 = arith.constant 0 : i32
    %c0_i32_0 = arith.constant 0 : i32
    %c0_i32_1 = arith.constant 0 : i32
    return %c0_i32, %c0_i32_0 : i32, i32
  }
  func.func @transform_16(%arg0: i32) -> (i32, i32) {
    %c0_i32 = arith.constant 0 : i32
    %c0_i32_0 = arith.constant 0 : i32
    %c0_i32_1 = arith.constant 0 : i32
    return %c0_i32, %c0_i32_0 : i32, i32
  }
}

module attributes {stable_mosaic.version = 11 : i64} {
  func.func @_decoder_stack_kernel(%arg0: i32, %arg1: memref<16x128xf32, #tpu.memory_space<vmem>>, %arg2: memref<16x128xf32, #tpu.memory_space<vmem>>, %arg3: memref<2x8x8xf32, #tpu.memory_space<vmem>>, %arg4: memref<2x8x8xf32, #tpu.memory_space<vmem>>, %arg5: memref<1x128x384xbf16, #tpu.memory_space<vmem>>, %arg6: memref<1x1x384xf32, #tpu.memory_space<vmem>>, %arg7: memref<1x128x128xbf16, #tpu.memory_space<vmem>>, %arg8: memref<1x1x128xf32, #tpu.memory_space<vmem>>, %arg9: memref<1x1x128xf32, #tpu.memory_space<vmem>>, %arg10: memref<1x1x128xf32, #tpu.memory_space<vmem>>, %arg11: memref<1x128x128xbf16, #tpu.memory_space<vmem>>, %arg12: memref<1x1x128xf32, #tpu.memory_space<vmem>>, %arg13: memref<1x128x256xbf16, #tpu.memory_space<vmem>>, %arg14: memref<1x1x256xf32, #tpu.memory_space<vmem>>, %arg15: memref<1x128x128xbf16, #tpu.memory_space<vmem>>, %arg16: memref<1x1x128xf32, #tpu.memory_space<vmem>>, %arg17: memref<1x1x128xf32, #tpu.memory_space<vmem>>, %arg18: memref<1x1x128xf32, #tpu.memory_space<vmem>>, %arg19: memref<1x128x256xbf16, #tpu.memory_space<vmem>>, %arg20: memref<1x1x256xf32, #tpu.memory_space<vmem>>, %arg21: memref<1x256x128xbf16, #tpu.memory_space<vmem>>, %arg22: memref<1x1x128xf32, #tpu.memory_space<vmem>>, %arg23: memref<1x1x128xf32, #tpu.memory_space<vmem>>, %arg24: memref<1x1x128xf32, #tpu.memory_space<vmem>>, %arg25: memref<1x128xf32, #tpu.memory_space<vmem>>, %arg26: memref<1x128xf32, #tpu.memory_space<vmem>>, %arg27: memref<128x128xbf16, #tpu.memory_space<vmem>>, %arg28: memref<1x128xf32, #tpu.memory_space<vmem>>, %arg29: memref<16x128xf32, #tpu.memory_space<vmem>>, %arg30: memref<16x128xf32, #tpu.memory_space<vmem>>) attributes {dimension_semantics = [#tpu.dimension_semantics<arbitrary>], iteration_bounds = array<i64: 2>, scalar_prefetch = 0 : i64, scratch_operands = 1 : i64, tpu.core_type = #tpu.core_type<tc>, window_params = [{pipeline_mode = #tpu.pipeline_mode<synchronous>, transform_indices = @transform_0, window_bounds = array<i64: 16, 128>}, {pipeline_mode = #tpu.pipeline_mode<synchronous>, transform_indices = @transform_1, window_bounds = array<i64: 16, 128>}, {pipeline_mode = #tpu.pipeline_mode<synchronous>, transform_indices = @transform_2, window_bounds = array<i64: 2, 8, 8>}, {pipeline_mode = #tpu.pipeline_mode<synchronous>, transform_indices = @transform_3, window_bounds = array<i64: 2, 8, 8>}, {transform_indices = @transform_4, window_bounds = array<i64: 1, 128, 384>}, {transform_indices = @transform_5, window_bounds = array<i64: 1, 1, 384>}, {transform_indices = @transform_6, window_bounds = array<i64: 1, 128, 128>}, {transform_indices = @transform_7, window_bounds = array<i64: 1, 1, 128>}, {transform_indices = @transform_8, window_bounds = array<i64: 1, 1, 128>}, {transform_indices = @transform_9, window_bounds = array<i64: 1, 1, 128>}, {transform_indices = @transform_10, window_bounds = array<i64: 1, 128, 128>}, {transform_indices = @transform_11, window_bounds = array<i64: 1, 1, 128>}, {transform_indices = @transform_12, window_bounds = array<i64: 1, 128, 256>}, {transform_indices = @transform_13, window_bounds = array<i64: 1, 1, 256>}, {transform_indices = @transform_14, window_bounds = array<i64: 1, 128, 128>}, {transform_indices = @transform_15, window_bounds = array<i64: 1, 1, 128>}, {transform_indices = @transform_16, window_bounds = array<i64: 1, 1, 128>}, {transform_indices = @transform_17, window_bounds = array<i64: 1, 1, 128>}, {transform_indices = @transform_18, window_bounds = array<i64: 1, 128, 256>}, {transform_indices = @transform_19, window_bounds = array<i64: 1, 1, 256>}, {transform_indices = @transform_20, window_bounds = array<i64: 1, 256, 128>}, {transform_indices = @transform_21, window_bounds = array<i64: 1, 1, 128>}, {transform_indices = @transform_22, window_bounds = array<i64: 1, 1, 128>}, {transform_indices = @transform_23, window_bounds = array<i64: 1, 1, 128>}, {pipeline_mode = #tpu.pipeline_mode<synchronous>, transform_indices = @transform_24, window_bounds = array<i64: 1, 128>}, {pipeline_mode = #tpu.pipeline_mode<synchronous>, transform_indices = @transform_25, window_bounds = array<i64: 1, 128>}, {pipeline_mode = #tpu.pipeline_mode<synchronous>, transform_indices = @transform_26, window_bounds = array<i64: 128, 128>}, {pipeline_mode = #tpu.pipeline_mode<synchronous>, transform_indices = @transform_27, window_bounds = array<i64: 1, 128>}, {pipeline_mode = #tpu.pipeline_mode<synchronous>, transform_indices = @transform_28, window_bounds = array<i64: 16, 128>}]} {
    %c0_i32 = arith.constant 0 : i32
    %0 = arith.cmpi eq, %arg0, %c0_i32 : i32
    %1 = arith.extui %0 : i1 to i32
    %c0_i32_0 = arith.constant 0 : i32
    %2 = arith.cmpi ne, %1, %c0_i32_0 : i32
    scf.if %2 {
      %c0_189 = arith.constant 0 : index
      %c0_190 = arith.constant 0 : index
      %521 = vector.load %arg1[%c0_189, %c0_190] : memref<16x128xf32, #tpu.memory_space<vmem>>, vector<16x128xf32>
      %c0_191 = arith.constant 0 : index
      %c0_192 = arith.constant 0 : index
      %522 = vector.load %arg30[%c0_191, %c0_192] : memref<16x128xf32, #tpu.memory_space<vmem>>, vector<16x128xf32>
      tpu.vector_store %arg30[%c0_191, %c0_192], %521 {strides = array<i32>} : memref<16x128xf32, #tpu.memory_space<vmem>>, vector<16x128xf32>,
    } else {
    }
    %c0 = arith.constant 0 : index
    %c0_1 = arith.constant 0 : index
    %3 = vector.load %arg30[%c0, %c0_1] : memref<16x128xf32, #tpu.memory_space<vmem>>, vector<16x128xf32>
    %c0_2 = arith.constant 0 : index
    %c0_3 = arith.constant 0 : index
    %4 = vector.load %arg2[%c0_2, %c0_3] : memref<16x128xf32, #tpu.memory_space<vmem>>, vector<16x128xf32>
    %c0_4 = arith.constant 0 : index
    %c0_5 = arith.constant 0 : index
    %c0_6 = arith.constant 0 : index
    %5 = vector.load %arg3[%c0_4, %c0_5, %c0_6] : memref<2x8x8xf32, #tpu.memory_space<vmem>>, vector<2x8x8xf32>
    %c0_7 = arith.constant 0 : index
    %c0_8 = arith.constant 0 : index
    %c0_9 = arith.constant 0 : index
    %6 = vector.load %arg4[%c0_7, %c0_8, %c0_9] : memref<2x8x8xf32, #tpu.memory_space<vmem>>, vector<2x8x8xf32>
    %c0_10 = arith.constant 0 : index
    %c0_11 = arith.constant 0 : index
    %c0_12 = arith.constant 0 : index
    %7 = vector.load %arg5[%c0_10, %c0_11, %c0_12] : memref<1x128x384xbf16, #tpu.memory_space<vmem>>, vector<1x128x384xbf16>
    %8 = vector.shape_cast %7 : vector<1x128x384xbf16> to vector<128x384xbf16>
    %c0_13 = arith.constant 0 : index
    %c0_14 = arith.constant 0 : index
    %c0_15 = arith.constant 0 : index
    %9 = vector.load %arg6[%c0_13, %c0_14, %c0_15] : memref<1x1x384xf32, #tpu.memory_space<vmem>>, vector<1x1x384xf32>
    %10 = vector.shape_cast %9 : vector<1x1x384xf32> to vector<1x384xf32>
    %c0_16 = arith.constant 0 : index
    %c0_17 = arith.constant 0 : index
    %c0_18 = arith.constant 0 : index
    %11 = vector.load %arg7[%c0_16, %c0_17, %c0_18] : memref<1x128x128xbf16, #tpu.memory_space<vmem>>, vector<1x128x128xbf16>
    %12 = vector.shape_cast %11 : vector<1x128x128xbf16> to vector<128x128xbf16>
    %c0_19 = arith.constant 0 : index
    %c0_20 = arith.constant 0 : index
    %c0_21 = arith.constant 0 : index
    %13 = vector.load %arg8[%c0_19, %c0_20, %c0_21] : memref<1x1x128xf32, #tpu.memory_space<vmem>>, vector<1x1x128xf32>
    %14 = vector.shape_cast %13 : vector<1x1x128xf32> to vector<1x128xf32>
    %15 = arith.truncf %3 : vector<16x128xf32> to vector<16x128xbf16>
    %cst = arith.constant dense<0.000000e+00> : vector<16x384xf32>
    %16 = tpu.matmul %15, %8, %cst {dimension_numbers = #tpu.dot_dimension_numbers<[1], [0], [0], [1], [0, 0, 1, 1], [], []>} : vector<16x128xbf16>, vector<128x384xbf16>, vector<16x384xf32> -> vector<16x384xf32>
    %17 = vector.broadcast %10 : vector<1x384xf32> to vector<16x384xf32>
    %18 = arith.addf %16, %17 : vector<16x384xf32>
    %19 = vector.extract_strided_slice %18 {offsets = [0, 0], sizes = [16, 128], strides = [1, 1]} : vector<16x384xf32> to vector<16x128xf32>
    %20 = vector.extract_strided_slice %18 {offsets = [0, 128], sizes = [16, 128], strides = [1, 1]} : vector<16x384xf32> to vector<16x128xf32>
    %21 = vector.extract_strided_slice %18 {offsets = [0, 256], sizes = [16, 128], strides = [1, 1]} : vector<16x384xf32> to vector<16x128xf32>
    %22 = vector.extract_strided_slice %19 {offsets = [0, 0], sizes = [8, 128], strides = [1, 1]} : vector<16x128xf32> to vector<8x128xf32>
    %23 = vector.extract_strided_slice %20 {offsets = [0, 0], sizes = [8, 128], strides = [1, 1]} : vector<16x128xf32> to vector<8x128xf32>
    %24 = vector.extract_strided_slice %21 {offsets = [0, 0], sizes = [8, 128], strides = [1, 1]} : vector<16x128xf32> to vector<8x128xf32>
    %25 = vector.extract_strided_slice %5 {offsets = [0, 0, 0], sizes = [1, 8, 8], strides = [1, 1, 1]} : vector<2x8x8xf32> to vector<1x8x8xf32>
    %26 = vector.shape_cast %25 : vector<1x8x8xf32> to vector<8x8xf32>
    %27 = vector.extract_strided_slice %22 {offsets = [0, 0], sizes = [8, 32], strides = [1, 1]} : vector<8x128xf32> to vector<8x32xf32>
    %28 = vector.extract_strided_slice %23 {offsets = [0, 0], sizes = [8, 32], strides = [1, 1]} : vector<8x128xf32> to vector<8x32xf32>
    %29 = vector.extract_strided_slice %24 {offsets = [0, 0], sizes = [8, 32], strides = [1, 1]} : vector<8x128xf32> to vector<8x32xf32>
    %cst_22 = arith.constant dense<0.000000e+00> : vector<8x8xf32>
    %30 = tpu.matmul %27, %28, %cst_22 {dimension_numbers = #tpu.dot_dimension_numbers<[1], [1], [0], [0], [0, 0, 1, 0], [], []>} : vector<8x32xf32>, vector<8x32xf32>, vector<8x8xf32> -> vector<8x8xf32>
    %cst_23 = arith.constant 0.176776692 : f32
    %31 = vector.broadcast %cst_23 : f32 to vector<8x8xf32>
    %32 = arith.mulf %30, %31 : vector<8x8xf32>
    %33 = arith.addf %32, %26 : vector<8x8xf32>
    %cst_24 = arith.constant dense<0xFF800000> : vector<8xf32>
    %34 = vector.multi_reduction <maximumf>, %33, %cst_24 [1] : vector<8x8xf32> to vector<8xf32>
    %35 = vector.shape_cast %34 : vector<8xf32> to vector<8x1xf32>
    %36 = vector.broadcast %35 : vector<8x1xf32> to vector<8x8xf32>
    %37 = arith.subf %33, %36 : vector<8x8xf32>
    %38 = math.exp %37 : vector<8x8xf32>
    %cst_25 = arith.constant dense<0.000000e+00> : vector<8xf32>
    %39 = vector.multi_reduction <add>, %38, %cst_25 [1] : vector<8x8xf32> to vector<8xf32>
    %40 = vector.shape_cast %39 : vector<8xf32> to vector<8x1xf32>
    %cst_26 = arith.constant dense<0.000000e+00> : vector<8x32xf32>
    %41 = tpu.matmul %38, %29, %cst_26 {dimension_numbers = #tpu.dot_dimension_numbers<[1], [0], [0], [1], [0, 0, 1, 1], [], []>} : vector<8x8xf32>, vector<8x32xf32>, vector<8x32xf32> -> vector<8x32xf32>
    %42 = tpu.reciprocal %40 {approx = true} : vector<8x1xf32> -> vector<8x1xf32>
    %43 = vector.broadcast %42 : vector<8x1xf32> to vector<8x32xf32>
    %44 = arith.mulf %41, %43 : vector<8x32xf32>
    %45 = arith.truncf %44 : vector<8x32xf32> to vector<8x32xbf16>
    %46 = vector.extract_strided_slice %12 {offsets = [0, 0], sizes = [32, 128], strides = [1, 1]} : vector<128x128xbf16> to vector<32x128xbf16>
    %cst_27 = arith.constant dense<0.000000e+00> : vector<8x128xf32>
    %47 = tpu.matmul %45, %46, %cst_27 {dimension_numbers = #tpu.dot_dimension_numbers<[1], [0], [0], [1], [0, 0, 1, 1], [], []>} : vector<8x32xbf16>, vector<32x128xbf16>, vector<8x128xf32> -> vector<8x128xf32>
    %48 = vector.extract_strided_slice %22 {offsets = [0, 32], sizes = [8, 32], strides = [1, 1]} : vector<8x128xf32> to vector<8x32xf32>
    %49 = vector.extract_strided_slice %23 {offsets = [0, 32], sizes = [8, 32], strides = [1, 1]} : vector<8x128xf32> to vector<8x32xf32>
    %50 = vector.extract_strided_slice %24 {offsets = [0, 32], sizes = [8, 32], strides = [1, 1]} : vector<8x128xf32> to vector<8x32xf32>
    %cst_28 = arith.constant dense<0.000000e+00> : vector<8x8xf32>
    %51 = tpu.matmul %48, %49, %cst_28 {dimension_numbers = #tpu.dot_dimension_numbers<[1], [1], [0], [0], [0, 0, 1, 0], [], []>} : vector<8x32xf32>, vector<8x32xf32>, vector<8x8xf32> -> vector<8x8xf32>
    %cst_29 = arith.constant 0.176776692 : f32
    %52 = vector.broadcast %cst_29 : f32 to vector<8x8xf32>
    %53 = arith.mulf %51, %52 : vector<8x8xf32>
    %54 = arith.addf %53, %26 : vector<8x8xf32>
    %cst_30 = arith.constant dense<0xFF800000> : vector<8xf32>
    %55 = vector.multi_reduction <maximumf>, %54, %cst_30 [1] : vector<8x8xf32> to vector<8xf32>
    %56 = vector.shape_cast %55 : vector<8xf32> to vector<8x1xf32>
    %57 = vector.broadcast %56 : vector<8x1xf32> to vector<8x8xf32>
    %58 = arith.subf %54, %57 : vector<8x8xf32>
    %59 = math.exp %58 : vector<8x8xf32>
    %cst_31 = arith.constant dense<0.000000e+00> : vector<8xf32>
    %60 = vector.multi_reduction <add>, %59, %cst_31 [1] : vector<8x8xf32> to vector<8xf32>
    %61 = vector.shape_cast %60 : vector<8xf32> to vector<8x1xf32>
    %cst_32 = arith.constant dense<0.000000e+00> : vector<8x32xf32>
    %62 = tpu.matmul %59, %50, %cst_32 {dimension_numbers = #tpu.dot_dimension_numbers<[1], [0], [0], [1], [0, 0, 1, 1], [], []>} : vector<8x8xf32>, vector<8x32xf32>, vector<8x32xf32> -> vector<8x32xf32>
    %63 = tpu.reciprocal %61 {approx = true} : vector<8x1xf32> -> vector<8x1xf32>
    %64 = vector.broadcast %63 : vector<8x1xf32> to vector<8x32xf32>
    %65 = arith.mulf %62, %64 : vector<8x32xf32>
    %66 = arith.truncf %65 : vector<8x32xf32> to vector<8x32xbf16>
    %67 = vector.extract_strided_slice %12 {offsets = [32, 0], sizes = [32, 128], strides = [1, 1]} : vector<128x128xbf16> to vector<32x128xbf16>
    %cst_33 = arith.constant dense<0.000000e+00> : vector<8x128xf32>
    %68 = tpu.matmul %66, %67, %cst_33 {dimension_numbers = #tpu.dot_dimension_numbers<[1], [0], [0], [1], [0, 0, 1, 1], [], []>} : vector<8x32xbf16>, vector<32x128xbf16>, vector<8x128xf32> -> vector<8x128xf32>
    %69 = arith.addf %47, %68 : vector<8x128xf32>
    %70 = vector.extract_strided_slice %22 {offsets = [0, 64], sizes = [8, 32], strides = [1, 1]} : vector<8x128xf32> to vector<8x32xf32>
    %71 = vector.extract_strided_slice %23 {offsets = [0, 64], sizes = [8, 32], strides = [1, 1]} : vector<8x128xf32> to vector<8x32xf32>
    %72 = vector.extract_strided_slice %24 {offsets = [0, 64], sizes = [8, 32], strides = [1, 1]} : vector<8x128xf32> to vector<8x32xf32>
    %cst_34 = arith.constant dense<0.000000e+00> : vector<8x8xf32>
    %73 = tpu.matmul %70, %71, %cst_34 {dimension_numbers = #tpu.dot_dimension_numbers<[1], [1], [0], [0], [0, 0, 1, 0], [], []>} : vector<8x32xf32>, vector<8x32xf32>, vector<8x8xf32> -> vector<8x8xf32>
    %cst_35 = arith.constant 0.176776692 : f32
    %74 = vector.broadcast %cst_35 : f32 to vector<8x8xf32>
    %75 = arith.mulf %73, %74 : vector<8x8xf32>
    %76 = arith.addf %75, %26 : vector<8x8xf32>
    %cst_36 = arith.constant dense<0xFF800000> : vector<8xf32>
    %77 = vector.multi_reduction <maximumf>, %76, %cst_36 [1] : vector<8x8xf32> to vector<8xf32>
    %78 = vector.shape_cast %77 : vector<8xf32> to vector<8x1xf32>
    %79 = vector.broadcast %78 : vector<8x1xf32> to vector<8x8xf32>
    %80 = arith.subf %76, %79 : vector<8x8xf32>
    %81 = math.exp %80 : vector<8x8xf32>
    %cst_37 = arith.constant dense<0.000000e+00> : vector<8xf32>
    %82 = vector.multi_reduction <add>, %81, %cst_37 [1] : vector<8x8xf32> to vector<8xf32>
    %83 = vector.shape_cast %82 : vector<8xf32> to vector<8x1xf32>
    %cst_38 = arith.constant dense<0.000000e+00> : vector<8x32xf32>
    %84 = tpu.matmul %81, %72, %cst_38 {dimension_numbers = #tpu.dot_dimension_numbers<[1], [0], [0], [1], [0, 0, 1, 1], [], []>} : vector<8x8xf32>, vector<8x32xf32>, vector<8x32xf32> -> vector<8x32xf32>
    %85 = tpu.reciprocal %83 {approx = true} : vector<8x1xf32> -> vector<8x1xf32>
    %86 = vector.broadcast %85 : vector<8x1xf32> to vector<8x32xf32>
    %87 = arith.mulf %84, %86 : vector<8x32xf32>
    %88 = arith.truncf %87 : vector<8x32xf32> to vector<8x32xbf16>
    %89 = vector.extract_strided_slice %12 {offsets = [64, 0], sizes = [32, 128], strides = [1, 1]} : vector<128x128xbf16> to vector<32x128xbf16>
    %cst_39 = arith.constant dense<0.000000e+00> : vector<8x128xf32>
    %90 = tpu.matmul %88, %89, %cst_39 {dimension_numbers = #tpu.dot_dimension_numbers<[1], [0], [0], [1], [0, 0, 1, 1], [], []>} : vector<8x32xbf16>, vector<32x128xbf16>, vector<8x128xf32> -> vector<8x128xf32>
    %91 = arith.addf %69, %90 : vector<8x128xf32>
    %92 = vector.extract_strided_slice %22 {offsets = [0, 96], sizes = [8, 32], strides = [1, 1]} : vector<8x128xf32> to vector<8x32xf32>
    %93 = vector.extract_strided_slice %23 {offsets = [0, 96], sizes = [8, 32], strides = [1, 1]} : vector<8x128xf32> to vector<8x32xf32>
    %94 = vector.extract_strided_slice %24 {offsets = [0, 96], sizes = [8, 32], strides = [1, 1]} : vector<8x128xf32> to vector<8x32xf32>
    %cst_40 = arith.constant dense<0.000000e+00> : vector<8x8xf32>
    %95 = tpu.matmul %92, %93, %cst_40 {dimension_numbers = #tpu.dot_dimension_numbers<[1], [1], [0], [0], [0, 0, 1, 0], [], []>} : vector<8x32xf32>, vector<8x32xf32>, vector<8x8xf32> -> vector<8x8xf32>
    %cst_41 = arith.constant 0.176776692 : f32
    %96 = vector.broadcast %cst_41 : f32 to vector<8x8xf32>
    %97 = arith.mulf %95, %96 : vector<8x8xf32>
    %98 = arith.addf %97, %26 : vector<8x8xf32>
    %cst_42 = arith.constant dense<0xFF800000> : vector<8xf32>
    %99 = vector.multi_reduction <maximumf>, %98, %cst_42 [1] : vector<8x8xf32> to vector<8xf32>
    %100 = vector.shape_cast %99 : vector<8xf32> to vector<8x1xf32>
    %101 = vector.broadcast %100 : vector<8x1xf32> to vector<8x8xf32>
    %102 = arith.subf %98, %101 : vector<8x8xf32>
    %103 = math.exp %102 : vector<8x8xf32>
    %cst_43 = arith.constant dense<0.000000e+00> : vector<8xf32>
    %104 = vector.multi_reduction <add>, %103, %cst_43 [1] : vector<8x8xf32> to vector<8xf32>
    %105 = vector.shape_cast %104 : vector<8xf32> to vector<8x1xf32>
    %cst_44 = arith.constant dense<0.000000e+00> : vector<8x32xf32>
    %106 = tpu.matmul %103, %94, %cst_44 {dimension_numbers = #tpu.dot_dimension_numbers<[1], [0], [0], [1], [0, 0, 1, 1], [], []>} : vector<8x8xf32>, vector<8x32xf32>, vector<8x32xf32> -> vector<8x32xf32>
    %107 = tpu.reciprocal %105 {approx = true} : vector<8x1xf32> -> vector<8x1xf32>
    %108 = vector.broadcast %107 : vector<8x1xf32> to vector<8x32xf32>
    %109 = arith.mulf %106, %108 : vector<8x32xf32>
    %110 = arith.truncf %109 : vector<8x32xf32> to vector<8x32xbf16>
    %111 = vector.extract_strided_slice %12 {offsets = [96, 0], sizes = [32, 128], strides = [1, 1]} : vector<128x128xbf16> to vector<32x128xbf16>
    %cst_45 = arith.constant dense<0.000000e+00> : vector<8x128xf32>
    %112 = tpu.matmul %110, %111, %cst_45 {dimension_numbers = #tpu.dot_dimension_numbers<[1], [0], [0], [1], [0, 0, 1, 1], [], []>} : vector<8x32xbf16>, vector<32x128xbf16>, vector<8x128xf32> -> vector<8x128xf32>
    %113 = arith.addf %91, %112 : vector<8x128xf32>
    %114 = vector.extract_strided_slice %19 {offsets = [8, 0], sizes = [8, 128], strides = [1, 1]} : vector<16x128xf32> to vector<8x128xf32>
    %115 = vector.extract_strided_slice %20 {offsets = [8, 0], sizes = [8, 128], strides = [1, 1]} : vector<16x128xf32> to vector<8x128xf32>
    %116 = vector.extract_strided_slice %21 {offsets = [8, 0], sizes = [8, 128], strides = [1, 1]} : vector<16x128xf32> to vector<8x128xf32>
    %117 = vector.extract_strided_slice %5 {offsets = [1, 0, 0], sizes = [1, 8, 8], strides = [1, 1, 1]} : vector<2x8x8xf32> to vector<1x8x8xf32>
    %118 = vector.shape_cast %117 : vector<1x8x8xf32> to vector<8x8xf32>
    %119 = vector.extract_strided_slice %114 {offsets = [0, 0], sizes = [8, 32], strides = [1, 1]} : vector<8x128xf32> to vector<8x32xf32>
    %120 = vector.extract_strided_slice %115 {offsets = [0, 0], sizes = [8, 32], strides = [1, 1]} : vector<8x128xf32> to vector<8x32xf32>
    %121 = vector.extract_strided_slice %116 {offsets = [0, 0], sizes = [8, 32], strides = [1, 1]} : vector<8x128xf32> to vector<8x32xf32>
    %cst_46 = arith.constant dense<0.000000e+00> : vector<8x8xf32>
    %122 = tpu.matmul %119, %120, %cst_46 {dimension_numbers = #tpu.dot_dimension_numbers<[1], [1], [0], [0], [0, 0, 1, 0], [], []>} : vector<8x32xf32>, vector<8x32xf32>, vector<8x8xf32> -> vector<8x8xf32>
    %cst_47 = arith.constant 0.176776692 : f32
    %123 = vector.broadcast %cst_47 : f32 to vector<8x8xf32>
    %124 = arith.mulf %122, %123 : vector<8x8xf32>
    %125 = arith.addf %124, %118 : vector<8x8xf32>
    %cst_48 = arith.constant dense<0xFF800000> : vector<8xf32>
    %126 = vector.multi_reduction <maximumf>, %125, %cst_48 [1] : vector<8x8xf32> to vector<8xf32>
    %127 = vector.shape_cast %126 : vector<8xf32> to vector<8x1xf32>
    %128 = vector.broadcast %127 : vector<8x1xf32> to vector<8x8xf32>
    %129 = arith.subf %125, %128 : vector<8x8xf32>
    %130 = math.exp %129 : vector<8x8xf32>
    %cst_49 = arith.constant dense<0.000000e+00> : vector<8xf32>
    %131 = vector.multi_reduction <add>, %130, %cst_49 [1] : vector<8x8xf32> to vector<8xf32>
    %132 = vector.shape_cast %131 : vector<8xf32> to vector<8x1xf32>
    %cst_50 = arith.constant dense<0.000000e+00> : vector<8x32xf32>
    %133 = tpu.matmul %130, %121, %cst_50 {dimension_numbers = #tpu.dot_dimension_numbers<[1], [0], [0], [1], [0, 0, 1, 1], [], []>} : vector<8x8xf32>, vector<8x32xf32>, vector<8x32xf32> -> vector<8x32xf32>
    %134 = tpu.reciprocal %132 {approx = true} : vector<8x1xf32> -> vector<8x1xf32>
    %135 = vector.broadcast %134 : vector<8x1xf32> to vector<8x32xf32>
    %136 = arith.mulf %133, %135 : vector<8x32xf32>
    %137 = arith.truncf %136 : vector<8x32xf32> to vector<8x32xbf16>
    %138 = vector.extract_strided_slice %12 {offsets = [0, 0], sizes = [32, 128], strides = [1, 1]} : vector<128x128xbf16> to vector<32x128xbf16>
    %cst_51 = arith.constant dense<0.000000e+00> : vector<8x128xf32>
    %139 = tpu.matmul %137, %138, %cst_51 {dimension_numbers = #tpu.dot_dimension_numbers<[1], [0], [0], [1], [0, 0, 1, 1], [], []>} : vector<8x32xbf16>, vector<32x128xbf16>, vector<8x128xf32> -> vector<8x128xf32>
    %140 = vector.extract_strided_slice %114 {offsets = [0, 32], sizes = [8, 32], strides = [1, 1]} : vector<8x128xf32> to vector<8x32xf32>
    %141 = vector.extract_strided_slice %115 {offsets = [0, 32], sizes = [8, 32], strides = [1, 1]} : vector<8x128xf32> to vector<8x32xf32>
    %142 = vector.extract_strided_slice %116 {offsets = [0, 32], sizes = [8, 32], strides = [1, 1]} : vector<8x128xf32> to vector<8x32xf32>
    %cst_52 = arith.constant dense<0.000000e+00> : vector<8x8xf32>
    %143 = tpu.matmul %140, %141, %cst_52 {dimension_numbers = #tpu.dot_dimension_numbers<[1], [1], [0], [0], [0, 0, 1, 0], [], []>} : vector<8x32xf32>, vector<8x32xf32>, vector<8x8xf32> -> vector<8x8xf32>
    %cst_53 = arith.constant 0.176776692 : f32
    %144 = vector.broadcast %cst_53 : f32 to vector<8x8xf32>
    %145 = arith.mulf %143, %144 : vector<8x8xf32>
    %146 = arith.addf %145, %118 : vector<8x8xf32>
    %cst_54 = arith.constant dense<0xFF800000> : vector<8xf32>
    %147 = vector.multi_reduction <maximumf>, %146, %cst_54 [1] : vector<8x8xf32> to vector<8xf32>
    %148 = vector.shape_cast %147 : vector<8xf32> to vector<8x1xf32>
    %149 = vector.broadcast %148 : vector<8x1xf32> to vector<8x8xf32>
    %150 = arith.subf %146, %149 : vector<8x8xf32>
    %151 = math.exp %150 : vector<8x8xf32>
    %cst_55 = arith.constant dense<0.000000e+00> : vector<8xf32>
    %152 = vector.multi_reduction <add>, %151, %cst_55 [1] : vector<8x8xf32> to vector<8xf32>
    %153 = vector.shape_cast %152 : vector<8xf32> to vector<8x1xf32>
    %cst_56 = arith.constant dense<0.000000e+00> : vector<8x32xf32>
    %154 = tpu.matmul %151, %142, %cst_56 {dimension_numbers = #tpu.dot_dimension_numbers<[1], [0], [0], [1], [0, 0, 1, 1], [], []>} : vector<8x8xf32>, vector<8x32xf32>, vector<8x32xf32> -> vector<8x32xf32>
    %155 = tpu.reciprocal %153 {approx = true} : vector<8x1xf32> -> vector<8x1xf32>
    %156 = vector.broadcast %155 : vector<8x1xf32> to vector<8x32xf32>
    %157 = arith.mulf %154, %156 : vector<8x32xf32>
    %158 = arith.truncf %157 : vector<8x32xf32> to vector<8x32xbf16>
    %159 = vector.extract_strided_slice %12 {offsets = [32, 0], sizes = [32, 128], strides = [1, 1]} : vector<128x128xbf16> to vector<32x128xbf16>
    %cst_57 = arith.constant dense<0.000000e+00> : vector<8x128xf32>
    %160 = tpu.matmul %158, %159, %cst_57 {dimension_numbers = #tpu.dot_dimension_numbers<[1], [0], [0], [1], [0, 0, 1, 1], [], []>} : vector<8x32xbf16>, vector<32x128xbf16>, vector<8x128xf32> -> vector<8x128xf32>
    %161 = arith.addf %139, %160 : vector<8x128xf32>
    %162 = vector.extract_strided_slice %114 {offsets = [0, 64], sizes = [8, 32], strides = [1, 1]} : vector<8x128xf32> to vector<8x32xf32>
    %163 = vector.extract_strided_slice %115 {offsets = [0, 64], sizes = [8, 32], strides = [1, 1]} : vector<8x128xf32> to vector<8x32xf32>
    %164 = vector.extract_strided_slice %116 {offsets = [0, 64], sizes = [8, 32], strides = [1, 1]} : vector<8x128xf32> to vector<8x32xf32>
    %cst_58 = arith.constant dense<0.000000e+00> : vector<8x8xf32>
    %165 = tpu.matmul %162, %163, %cst_58 {dimension_numbers = #tpu.dot_dimension_numbers<[1], [1], [0], [0], [0, 0, 1, 0], [], []>} : vector<8x32xf32>, vector<8x32xf32>, vector<8x8xf32> -> vector<8x8xf32>
    %cst_59 = arith.constant 0.176776692 : f32
    %166 = vector.broadcast %cst_59 : f32 to vector<8x8xf32>
    %167 = arith.mulf %165, %166 : vector<8x8xf32>
    %168 = arith.addf %167, %118 : vector<8x8xf32>
    %cst_60 = arith.constant dense<0xFF800000> : vector<8xf32>
    %169 = vector.multi_reduction <maximumf>, %168, %cst_60 [1] : vector<8x8xf32> to vector<8xf32>
    %170 = vector.shape_cast %169 : vector<8xf32> to vector<8x1xf32>
    %171 = vector.broadcast %170 : vector<8x1xf32> to vector<8x8xf32>
    %172 = arith.subf %168, %171 : vector<8x8xf32>
    %173 = math.exp %172 : vector<8x8xf32>
    %cst_61 = arith.constant dense<0.000000e+00> : vector<8xf32>
    %174 = vector.multi_reduction <add>, %173, %cst_61 [1] : vector<8x8xf32> to vector<8xf32>
    %175 = vector.shape_cast %174 : vector<8xf32> to vector<8x1xf32>
    %cst_62 = arith.constant dense<0.000000e+00> : vector<8x32xf32>
    %176 = tpu.matmul %173, %164, %cst_62 {dimension_numbers = #tpu.dot_dimension_numbers<[1], [0], [0], [1], [0, 0, 1, 1], [], []>} : vector<8x8xf32>, vector<8x32xf32>, vector<8x32xf32> -> vector<8x32xf32>
    %177 = tpu.reciprocal %175 {approx = true} : vector<8x1xf32> -> vector<8x1xf32>
    %178 = vector.broadcast %177 : vector<8x1xf32> to vector<8x32xf32>
    %179 = arith.mulf %176, %178 : vector<8x32xf32>
    %180 = arith.truncf %179 : vector<8x32xf32> to vector<8x32xbf16>
    %181 = vector.extract_strided_slice %12 {offsets = [64, 0], sizes = [32, 128], strides = [1, 1]} : vector<128x128xbf16> to vector<32x128xbf16>
    %cst_63 = arith.constant dense<0.000000e+00> : vector<8x128xf32>
    %182 = tpu.matmul %180, %181, %cst_63 {dimension_numbers = #tpu.dot_dimension_numbers<[1], [0], [0], [1], [0, 0, 1, 1], [], []>} : vector<8x32xbf16>, vector<32x128xbf16>, vector<8x128xf32> -> vector<8x128xf32>
    %183 = arith.addf %161, %182 : vector<8x128xf32>
    %184 = vector.extract_strided_slice %114 {offsets = [0, 96], sizes = [8, 32], strides = [1, 1]} : vector<8x128xf32> to vector<8x32xf32>
    %185 = vector.extract_strided_slice %115 {offsets = [0, 96], sizes = [8, 32], strides = [1, 1]} : vector<8x128xf32> to vector<8x32xf32>
    %186 = vector.extract_strided_slice %116 {offsets = [0, 96], sizes = [8, 32], strides = [1, 1]} : vector<8x128xf32> to vector<8x32xf32>
    %cst_64 = arith.constant dense<0.000000e+00> : vector<8x8xf32>
    %187 = tpu.matmul %184, %185, %cst_64 {dimension_numbers = #tpu.dot_dimension_numbers<[1], [1], [0], [0], [0, 0, 1, 0], [], []>} : vector<8x32xf32>, vector<8x32xf32>, vector<8x8xf32> -> vector<8x8xf32>
    %cst_65 = arith.constant 0.176776692 : f32
    %188 = vector.broadcast %cst_65 : f32 to vector<8x8xf32>
    %189 = arith.mulf %187, %188 : vector<8x8xf32>
    %190 = arith.addf %189, %118 : vector<8x8xf32>
    %cst_66 = arith.constant dense<0xFF800000> : vector<8xf32>
    %191 = vector.multi_reduction <maximumf>, %190, %cst_66 [1] : vector<8x8xf32> to vector<8xf32>
    %192 = vector.shape_cast %191 : vector<8xf32> to vector<8x1xf32>
    %193 = vector.broadcast %192 : vector<8x1xf32> to vector<8x8xf32>
    %194 = arith.subf %190, %193 : vector<8x8xf32>
    %195 = math.exp %194 : vector<8x8xf32>
    %cst_67 = arith.constant dense<0.000000e+00> : vector<8xf32>
    %196 = vector.multi_reduction <add>, %195, %cst_67 [1] : vector<8x8xf32> to vector<8xf32>
    %197 = vector.shape_cast %196 : vector<8xf32> to vector<8x1xf32>
    %cst_68 = arith.constant dense<0.000000e+00> : vector<8x32xf32>
    %198 = tpu.matmul %195, %186, %cst_68 {dimension_numbers = #tpu.dot_dimension_numbers<[1], [0], [0], [1], [0, 0, 1, 1], [], []>} : vector<8x8xf32>, vector<8x32xf32>, vector<8x32xf32> -> vector<8x32xf32>
    %199 = tpu.reciprocal %197 {approx = true} : vector<8x1xf32> -> vector<8x1xf32>
    %200 = vector.broadcast %199 : vector<8x1xf32> to vector<8x32xf32>
    %201 = arith.mulf %198, %200 : vector<8x32xf32>
    %202 = arith.truncf %201 : vector<8x32xf32> to vector<8x32xbf16>
    %203 = vector.extract_strided_slice %12 {offsets = [96, 0], sizes = [32, 128], strides = [1, 1]} : vector<128x128xbf16> to vector<32x128xbf16>
    %cst_69 = arith.constant dense<0.000000e+00> : vector<8x128xf32>
    %204 = tpu.matmul %202, %203, %cst_69 {dimension_numbers = #tpu.dot_dimension_numbers<[1], [0], [0], [1], [0, 0, 1, 1], [], []>} : vector<8x32xbf16>, vector<32x128xbf16>, vector<8x128xf32> -> vector<8x128xf32>
    %205 = arith.addf %183, %204 : vector<8x128xf32>
    %206 = tpu.concatenate %113, %205 in 0 : vector<8x128xf32>, vector<8x128xf32> -> vector<16x128xf32>
    %207 = vector.broadcast %14 : vector<1x128xf32> to vector<16x128xf32>
    %208 = arith.addf %206, %207 : vector<16x128xf32>
    %c0_70 = arith.constant 0 : index
    %c0_71 = arith.constant 0 : index
    %c0_72 = arith.constant 0 : index
    %209 = vector.load %arg9[%c0_70, %c0_71, %c0_72] : memref<1x1x128xf32, #tpu.memory_space<vmem>>, vector<1x1x128xf32>
    %210 = vector.shape_cast %209 : vector<1x1x128xf32> to vector<1x128xf32>
    %c0_73 = arith.constant 0 : index
    %c0_74 = arith.constant 0 : index
    %c0_75 = arith.constant 0 : index
    %211 = vector.load %arg10[%c0_73, %c0_74, %c0_75] : memref<1x1x128xf32, #tpu.memory_space<vmem>>, vector<1x1x128xf32>
    %212 = vector.shape_cast %211 : vector<1x1x128xf32> to vector<1x128xf32>
    %213 = arith.addf %3, %208 : vector<16x128xf32>
    %cst_76 = arith.constant dense<0.000000e+00> : vector<16xf32>
    %214 = vector.multi_reduction <add>, %213, %cst_76 [1] : vector<16x128xf32> to vector<16xf32>
    %215 = vector.shape_cast %214 : vector<16xf32> to vector<16x1xf32>
    %cst_77 = arith.constant 1.280000e+02 : f32
    %216 = vector.broadcast %cst_77 : f32 to vector<16x1xf32>
    %217 = arith.divf %215, %216 : vector<16x1xf32>
    %218 = vector.broadcast %217 : vector<16x1xf32> to vector<16x128xf32>
    %219 = arith.subf %213, %218 : vector<16x128xf32>
    %220 = arith.mulf %219, %219 : vector<16x128xf32>
    %cst_78 = arith.constant dense<0.000000e+00> : vector<16xf32>
    %221 = vector.multi_reduction <add>, %220, %cst_78 [1] : vector<16x128xf32> to vector<16xf32>
    %222 = vector.shape_cast %221 : vector<16xf32> to vector<16x1xf32>
    %cst_79 = arith.constant 1.280000e+02 : f32
    %223 = vector.broadcast %cst_79 : f32 to vector<16x1xf32>
    %224 = arith.divf %222, %223 : vector<16x1xf32>
    %225 = vector.broadcast %217 : vector<16x1xf32> to vector<16x128xf32>
    %226 = arith.subf %213, %225 : vector<16x128xf32>
    %cst_80 = arith.constant 9.99999974E-6 : f32
    %227 = vector.broadcast %cst_80 : f32 to vector<16x1xf32>
    %228 = arith.addf %224, %227 : vector<16x1xf32>
    %229 = math.rsqrt %228 : vector<16x1xf32>
    %230 = vector.broadcast %229 : vector<16x1xf32> to vector<16x128xf32>
    %231 = arith.mulf %226, %230 : vector<16x128xf32>
    %232 = vector.broadcast %210 : vector<1x128xf32> to vector<16x128xf32>
    %233 = arith.mulf %231, %232 : vector<16x128xf32>
    %234 = vector.broadcast %212 : vector<1x128xf32> to vector<16x128xf32>
    %235 = arith.addf %233, %234 : vector<16x128xf32>
    %c0_81 = arith.constant 0 : index
    %c0_82 = arith.constant 0 : index
    %c0_83 = arith.constant 0 : index
    %236 = vector.load %arg11[%c0_81, %c0_82, %c0_83] : memref<1x128x128xbf16, #tpu.memory_space<vmem>>, vector<1x128x128xbf16>
    %237 = vector.shape_cast %236 : vector<1x128x128xbf16> to vector<128x128xbf16>
    %c0_84 = arith.constant 0 : index
    %c0_85 = arith.constant 0 : index
    %c0_86 = arith.constant 0 : index
    %238 = vector.load %arg12[%c0_84, %c0_85, %c0_86] : memref<1x1x128xf32, #tpu.memory_space<vmem>>, vector<1x1x128xf32>
    %239 = vector.shape_cast %238 : vector<1x1x128xf32> to vector<1x128xf32>
    %c0_87 = arith.constant 0 : index
    %c0_88 = arith.constant 0 : index
    %c0_89 = arith.constant 0 : index
    %240 = vector.load %arg13[%c0_87, %c0_88, %c0_89] : memref<1x128x256xbf16, #tpu.memory_space<vmem>>, vector<1x128x256xbf16>
    %241 = vector.shape_cast %240 : vector<1x128x256xbf16> to vector<128x256xbf16>
    %c0_90 = arith.constant 0 : index
    %c0_91 = arith.constant 0 : index
    %c0_92 = arith.constant 0 : index
    %242 = vector.load %arg14[%c0_90, %c0_91, %c0_92] : memref<1x1x256xf32, #tpu.memory_space<vmem>>, vector<1x1x256xf32>
    %243 = vector.shape_cast %242 : vector<1x1x256xf32> to vector<1x256xf32>
    %c0_93 = arith.constant 0 : index
    %c0_94 = arith.constant 0 : index
    %c0_95 = arith.constant 0 : index
    %244 = vector.load %arg15[%c0_93, %c0_94, %c0_95] : memref<1x128x128xbf16, #tpu.memory_space<vmem>>, vector<1x128x128xbf16>
    %245 = vector.shape_cast %244 : vector<1x128x128xbf16> to vector<128x128xbf16>
    %c0_96 = arith.constant 0 : index
    %c0_97 = arith.constant 0 : index
    %c0_98 = arith.constant 0 : index
    %246 = vector.load %arg16[%c0_96, %c0_97, %c0_98] : memref<1x1x128xf32, #tpu.memory_space<vmem>>, vector<1x1x128xf32>
    %247 = vector.shape_cast %246 : vector<1x1x128xf32> to vector<1x128xf32>
    %248 = arith.truncf %235 : vector<16x128xf32> to vector<16x128xbf16>
    %cst_99 = arith.constant dense<0.000000e+00> : vector<16x128xf32>
    %249 = tpu.matmul %248, %237, %cst_99 {dimension_numbers = #tpu.dot_dimension_numbers<[1], [0], [0], [1], [0, 0, 1, 1], [], []>} : vector<16x128xbf16>, vector<128x128xbf16>, vector<16x128xf32> -> vector<16x128xf32>
    %250 = vector.broadcast %239 : vector<1x128xf32> to vector<16x128xf32>
    %251 = arith.addf %249, %250 : vector<16x128xf32>
    %252 = arith.truncf %4 : vector<16x128xf32> to vector<16x128xbf16>
    %cst_100 = arith.constant dense<0.000000e+00> : vector<16x256xf32>
    %253 = tpu.matmul %252, %241, %cst_100 {dimension_numbers = #tpu.dot_dimension_numbers<[1], [0], [0], [1], [0, 0, 1, 1], [], []>} : vector<16x128xbf16>, vector<128x256xbf16>, vector<16x256xf32> -> vector<16x256xf32>
    %254 = vector.broadcast %243 : vector<1x256xf32> to vector<16x256xf32>
    %255 = arith.addf %253, %254 : vector<16x256xf32>
    %256 = vector.extract_strided_slice %255 {offsets = [0, 0], sizes = [16, 128], strides = [1, 1]} : vector<16x256xf32> to vector<16x128xf32>
    %257 = vector.extract_strided_slice %255 {offsets = [0, 128], sizes = [16, 128], strides = [1, 1]} : vector<16x256xf32> to vector<16x128xf32>
    %258 = vector.extract_strided_slice %251 {offsets = [0, 0], sizes = [8, 128], strides = [1, 1]} : vector<16x128xf32> to vector<8x128xf32>
    %259 = vector.extract_strided_slice %256 {offsets = [0, 0], sizes = [8, 128], strides = [1, 1]} : vector<16x128xf32> to vector<8x128xf32>
    %260 = vector.extract_strided_slice %257 {offsets = [0, 0], sizes = [8, 128], strides = [1, 1]} : vector<16x128xf32> to vector<8x128xf32>
    %261 = vector.extract_strided_slice %6 {offsets = [0, 0, 0], sizes = [1, 8, 8], strides = [1, 1, 1]} : vector<2x8x8xf32> to vector<1x8x8xf32>
    %262 = vector.shape_cast %261 : vector<1x8x8xf32> to vector<8x8xf32>
    %263 = vector.extract_strided_slice %258 {offsets = [0, 0], sizes = [8, 32], strides = [1, 1]} : vector<8x128xf32> to vector<8x32xf32>
    %264 = vector.extract_strided_slice %259 {offsets = [0, 0], sizes = [8, 32], strides = [1, 1]} : vector<8x128xf32> to vector<8x32xf32>
    %265 = vector.extract_strided_slice %260 {offsets = [0, 0], sizes = [8, 32], strides = [1, 1]} : vector<8x128xf32> to vector<8x32xf32>
    %cst_101 = arith.constant dense<0.000000e+00> : vector<8x8xf32>
    %266 = tpu.matmul %263, %264, %cst_101 {dimension_numbers = #tpu.dot_dimension_numbers<[1], [1], [0], [0], [0, 0, 1, 0], [], []>} : vector<8x32xf32>, vector<8x32xf32>, vector<8x8xf32> -> vector<8x8xf32>
    %cst_102 = arith.constant 0.176776692 : f32
    %267 = vector.broadcast %cst_102 : f32 to vector<8x8xf32>
    %268 = arith.mulf %266, %267 : vector<8x8xf32>
    %269 = arith.addf %268, %262 : vector<8x8xf32>
    %cst_103 = arith.constant dense<0xFF800000> : vector<8xf32>
    %270 = vector.multi_reduction <maximumf>, %269, %cst_103 [1] : vector<8x8xf32> to vector<8xf32>
    %271 = vector.shape_cast %270 : vector<8xf32> to vector<8x1xf32>
    %272 = vector.broadcast %271 : vector<8x1xf32> to vector<8x8xf32>
    %273 = arith.subf %269, %272 : vector<8x8xf32>
    %274 = math.exp %273 : vector<8x8xf32>
    %cst_104 = arith.constant dense<0.000000e+00> : vector<8xf32>
    %275 = vector.multi_reduction <add>, %274, %cst_104 [1] : vector<8x8xf32> to vector<8xf32>
    %276 = vector.shape_cast %275 : vector<8xf32> to vector<8x1xf32>
    %cst_105 = arith.constant dense<0.000000e+00> : vector<8x32xf32>
    %277 = tpu.matmul %274, %265, %cst_105 {dimension_numbers = #tpu.dot_dimension_numbers<[1], [0], [0], [1], [0, 0, 1, 1], [], []>} : vector<8x8xf32>, vector<8x32xf32>, vector<8x32xf32> -> vector<8x32xf32>
    %278 = tpu.reciprocal %276 {approx = true} : vector<8x1xf32> -> vector<8x1xf32>
    %279 = vector.broadcast %278 : vector<8x1xf32> to vector<8x32xf32>
    %280 = arith.mulf %277, %279 : vector<8x32xf32>
    %281 = arith.truncf %280 : vector<8x32xf32> to vector<8x32xbf16>
    %282 = vector.extract_strided_slice %245 {offsets = [0, 0], sizes = [32, 128], strides = [1, 1]} : vector<128x128xbf16> to vector<32x128xbf16>
    %cst_106 = arith.constant dense<0.000000e+00> : vector<8x128xf32>
    %283 = tpu.matmul %281, %282, %cst_106 {dimension_numbers = #tpu.dot_dimension_numbers<[1], [0], [0], [1], [0, 0, 1, 1], [], []>} : vector<8x32xbf16>, vector<32x128xbf16>, vector<8x128xf32> -> vector<8x128xf32>
    %284 = vector.extract_strided_slice %258 {offsets = [0, 32], sizes = [8, 32], strides = [1, 1]} : vector<8x128xf32> to vector<8x32xf32>
    %285 = vector.extract_strided_slice %259 {offsets = [0, 32], sizes = [8, 32], strides = [1, 1]} : vector<8x128xf32> to vector<8x32xf32>
    %286 = vector.extract_strided_slice %260 {offsets = [0, 32], sizes = [8, 32], strides = [1, 1]} : vector<8x128xf32> to vector<8x32xf32>
    %cst_107 = arith.constant dense<0.000000e+00> : vector<8x8xf32>
    %287 = tpu.matmul %284, %285, %cst_107 {dimension_numbers = #tpu.dot_dimension_numbers<[1], [1], [0], [0], [0, 0, 1, 0], [], []>} : vector<8x32xf32>, vector<8x32xf32>, vector<8x8xf32> -> vector<8x8xf32>
    %cst_108 = arith.constant 0.176776692 : f32
    %288 = vector.broadcast %cst_108 : f32 to vector<8x8xf32>
    %289 = arith.mulf %287, %288 : vector<8x8xf32>
    %290 = arith.addf %289, %262 : vector<8x8xf32>
    %cst_109 = arith.constant dense<0xFF800000> : vector<8xf32>
    %291 = vector.multi_reduction <maximumf>, %290, %cst_109 [1] : vector<8x8xf32> to vector<8xf32>
    %292 = vector.shape_cast %291 : vector<8xf32> to vector<8x1xf32>
    %293 = vector.broadcast %292 : vector<8x1xf32> to vector<8x8xf32>
    %294 = arith.subf %290, %293 : vector<8x8xf32>
    %295 = math.exp %294 : vector<8x8xf32>
    %cst_110 = arith.constant dense<0.000000e+00> : vector<8xf32>
    %296 = vector.multi_reduction <add>, %295, %cst_110 [1] : vector<8x8xf32> to vector<8xf32>
    %297 = vector.shape_cast %296 : vector<8xf32> to vector<8x1xf32>
    %cst_111 = arith.constant dense<0.000000e+00> : vector<8x32xf32>
    %298 = tpu.matmul %295, %286, %cst_111 {dimension_numbers = #tpu.dot_dimension_numbers<[1], [0], [0], [1], [0, 0, 1, 1], [], []>} : vector<8x8xf32>, vector<8x32xf32>, vector<8x32xf32> -> vector<8x32xf32>
    %299 = tpu.reciprocal %297 {approx = true} : vector<8x1xf32> -> vector<8x1xf32>
    %300 = vector.broadcast %299 : vector<8x1xf32> to vector<8x32xf32>
    %301 = arith.mulf %298, %300 : vector<8x32xf32>
    %302 = arith.truncf %301 : vector<8x32xf32> to vector<8x32xbf16>
    %303 = vector.extract_strided_slice %245 {offsets = [32, 0], sizes = [32, 128], strides = [1, 1]} : vector<128x128xbf16> to vector<32x128xbf16>
    %cst_112 = arith.constant dense<0.000000e+00> : vector<8x128xf32>
    %304 = tpu.matmul %302, %303, %cst_112 {dimension_numbers = #tpu.dot_dimension_numbers<[1], [0], [0], [1], [0, 0, 1, 1], [], []>} : vector<8x32xbf16>, vector<32x128xbf16>, vector<8x128xf32> -> vector<8x128xf32>
    %305 = arith.addf %283, %304 : vector<8x128xf32>
    %306 = vector.extract_strided_slice %258 {offsets = [0, 64], sizes = [8, 32], strides = [1, 1]} : vector<8x128xf32> to vector<8x32xf32>
    %307 = vector.extract_strided_slice %259 {offsets = [0, 64], sizes = [8, 32], strides = [1, 1]} : vector<8x128xf32> to vector<8x32xf32>
    %308 = vector.extract_strided_slice %260 {offsets = [0, 64], sizes = [8, 32], strides = [1, 1]} : vector<8x128xf32> to vector<8x32xf32>
    %cst_113 = arith.constant dense<0.000000e+00> : vector<8x8xf32>
    %309 = tpu.matmul %306, %307, %cst_113 {dimension_numbers = #tpu.dot_dimension_numbers<[1], [1], [0], [0], [0, 0, 1, 0], [], []>} : vector<8x32xf32>, vector<8x32xf32>, vector<8x8xf32> -> vector<8x8xf32>
    %cst_114 = arith.constant 0.176776692 : f32
    %310 = vector.broadcast %cst_114 : f32 to vector<8x8xf32>
    %311 = arith.mulf %309, %310 : vector<8x8xf32>
    %312 = arith.addf %311, %262 : vector<8x8xf32>
    %cst_115 = arith.constant dense<0xFF800000> : vector<8xf32>
    %313 = vector.multi_reduction <maximumf>, %312, %cst_115 [1] : vector<8x8xf32> to vector<8xf32>
    %314 = vector.shape_cast %313 : vector<8xf32> to vector<8x1xf32>
    %315 = vector.broadcast %314 : vector<8x1xf32> to vector<8x8xf32>
    %316 = arith.subf %312, %315 : vector<8x8xf32>
    %317 = math.exp %316 : vector<8x8xf32>
    %cst_116 = arith.constant dense<0.000000e+00> : vector<8xf32>
    %318 = vector.multi_reduction <add>, %317, %cst_116 [1] : vector<8x8xf32> to vector<8xf32>
    %319 = vector.shape_cast %318 : vector<8xf32> to vector<8x1xf32>
    %cst_117 = arith.constant dense<0.000000e+00> : vector<8x32xf32>
    %320 = tpu.matmul %317, %308, %cst_117 {dimension_numbers = #tpu.dot_dimension_numbers<[1], [0], [0], [1], [0, 0, 1, 1], [], []>} : vector<8x8xf32>, vector<8x32xf32>, vector<8x32xf32> -> vector<8x32xf32>
    %321 = tpu.reciprocal %319 {approx = true} : vector<8x1xf32> -> vector<8x1xf32>
    %322 = vector.broadcast %321 : vector<8x1xf32> to vector<8x32xf32>
    %323 = arith.mulf %320, %322 : vector<8x32xf32>
    %324 = arith.truncf %323 : vector<8x32xf32> to vector<8x32xbf16>
    %325 = vector.extract_strided_slice %245 {offsets = [64, 0], sizes = [32, 128], strides = [1, 1]} : vector<128x128xbf16> to vector<32x128xbf16>
    %cst_118 = arith.constant dense<0.000000e+00> : vector<8x128xf32>
    %326 = tpu.matmul %324, %325, %cst_118 {dimension_numbers = #tpu.dot_dimension_numbers<[1], [0], [0], [1], [0, 0, 1, 1], [], []>} : vector<8x32xbf16>, vector<32x128xbf16>, vector<8x128xf32> -> vector<8x128xf32>
    %327 = arith.addf %305, %326 : vector<8x128xf32>
    %328 = vector.extract_strided_slice %258 {offsets = [0, 96], sizes = [8, 32], strides = [1, 1]} : vector<8x128xf32> to vector<8x32xf32>
    %329 = vector.extract_strided_slice %259 {offsets = [0, 96], sizes = [8, 32], strides = [1, 1]} : vector<8x128xf32> to vector<8x32xf32>
    %330 = vector.extract_strided_slice %260 {offsets = [0, 96], sizes = [8, 32], strides = [1, 1]} : vector<8x128xf32> to vector<8x32xf32>
    %cst_119 = arith.constant dense<0.000000e+00> : vector<8x8xf32>
    %331 = tpu.matmul %328, %329, %cst_119 {dimension_numbers = #tpu.dot_dimension_numbers<[1], [1], [0], [0], [0, 0, 1, 0], [], []>} : vector<8x32xf32>, vector<8x32xf32>, vector<8x8xf32> -> vector<8x8xf32>
    %cst_120 = arith.constant 0.176776692 : f32
    %332 = vector.broadcast %cst_120 : f32 to vector<8x8xf32>
    %333 = arith.mulf %331, %332 : vector<8x8xf32>
    %334 = arith.addf %333, %262 : vector<8x8xf32>
    %cst_121 = arith.constant dense<0xFF800000> : vector<8xf32>
    %335 = vector.multi_reduction <maximumf>, %334, %cst_121 [1] : vector<8x8xf32> to vector<8xf32>
    %336 = vector.shape_cast %335 : vector<8xf32> to vector<8x1xf32>
    %337 = vector.broadcast %336 : vector<8x1xf32> to vector<8x8xf32>
    %338 = arith.subf %334, %337 : vector<8x8xf32>
    %339 = math.exp %338 : vector<8x8xf32>
    %cst_122 = arith.constant dense<0.000000e+00> : vector<8xf32>
    %340 = vector.multi_reduction <add>, %339, %cst_122 [1] : vector<8x8xf32> to vector<8xf32>
    %341 = vector.shape_cast %340 : vector<8xf32> to vector<8x1xf32>
    %cst_123 = arith.constant dense<0.000000e+00> : vector<8x32xf32>
    %342 = tpu.matmul %339, %330, %cst_123 {dimension_numbers = #tpu.dot_dimension_numbers<[1], [0], [0], [1], [0, 0, 1, 1], [], []>} : vector<8x8xf32>, vector<8x32xf32>, vector<8x32xf32> -> vector<8x32xf32>
    %343 = tpu.reciprocal %341 {approx = true} : vector<8x1xf32> -> vector<8x1xf32>
    %344 = vector.broadcast %343 : vector<8x1xf32> to vector<8x32xf32>
    %345 = arith.mulf %342, %344 : vector<8x32xf32>
    %346 = arith.truncf %345 : vector<8x32xf32> to vector<8x32xbf16>
    %347 = vector.extract_strided_slice %245 {offsets = [96, 0], sizes = [32, 128], strides = [1, 1]} : vector<128x128xbf16> to vector<32x128xbf16>
    %cst_124 = arith.constant dense<0.000000e+00> : vector<8x128xf32>
    %348 = tpu.matmul %346, %347, %cst_124 {dimension_numbers = #tpu.dot_dimension_numbers<[1], [0], [0], [1], [0, 0, 1, 1], [], []>} : vector<8x32xbf16>, vector<32x128xbf16>, vector<8x128xf32> -> vector<8x128xf32>
    %349 = arith.addf %327, %348 : vector<8x128xf32>
    %350 = vector.extract_strided_slice %251 {offsets = [8, 0], sizes = [8, 128], strides = [1, 1]} : vector<16x128xf32> to vector<8x128xf32>
    %351 = vector.extract_strided_slice %256 {offsets = [8, 0], sizes = [8, 128], strides = [1, 1]} : vector<16x128xf32> to vector<8x128xf32>
    %352 = vector.extract_strided_slice %257 {offsets = [8, 0], sizes = [8, 128], strides = [1, 1]} : vector<16x128xf32> to vector<8x128xf32>
    %353 = vector.extract_strided_slice %6 {offsets = [1, 0, 0], sizes = [1, 8, 8], strides = [1, 1, 1]} : vector<2x8x8xf32> to vector<1x8x8xf32>
    %354 = vector.shape_cast %353 : vector<1x8x8xf32> to vector<8x8xf32>
    %355 = vector.extract_strided_slice %350 {offsets = [0, 0], sizes = [8, 32], strides = [1, 1]} : vector<8x128xf32> to vector<8x32xf32>
    %356 = vector.extract_strided_slice %351 {offsets = [0, 0], sizes = [8, 32], strides = [1, 1]} : vector<8x128xf32> to vector<8x32xf32>
    %357 = vector.extract_strided_slice %352 {offsets = [0, 0], sizes = [8, 32], strides = [1, 1]} : vector<8x128xf32> to vector<8x32xf32>
    %cst_125 = arith.constant dense<0.000000e+00> : vector<8x8xf32>
    %358 = tpu.matmul %355, %356, %cst_125 {dimension_numbers = #tpu.dot_dimension_numbers<[1], [1], [0], [0], [0, 0, 1, 0], [], []>} : vector<8x32xf32>, vector<8x32xf32>, vector<8x8xf32> -> vector<8x8xf32>
    %cst_126 = arith.constant 0.176776692 : f32
    %359 = vector.broadcast %cst_126 : f32 to vector<8x8xf32>
    %360 = arith.mulf %358, %359 : vector<8x8xf32>
    %361 = arith.addf %360, %354 : vector<8x8xf32>
    %cst_127 = arith.constant dense<0xFF800000> : vector<8xf32>
    %362 = vector.multi_reduction <maximumf>, %361, %cst_127 [1] : vector<8x8xf32> to vector<8xf32>
    %363 = vector.shape_cast %362 : vector<8xf32> to vector<8x1xf32>
    %364 = vector.broadcast %363 : vector<8x1xf32> to vector<8x8xf32>
    %365 = arith.subf %361, %364 : vector<8x8xf32>
    %366 = math.exp %365 : vector<8x8xf32>
    %cst_128 = arith.constant dense<0.000000e+00> : vector<8xf32>
    %367 = vector.multi_reduction <add>, %366, %cst_128 [1] : vector<8x8xf32> to vector<8xf32>
    %368 = vector.shape_cast %367 : vector<8xf32> to vector<8x1xf32>
    %cst_129 = arith.constant dense<0.000000e+00> : vector<8x32xf32>
    %369 = tpu.matmul %366, %357, %cst_129 {dimension_numbers = #tpu.dot_dimension_numbers<[1], [0], [0], [1], [0, 0, 1, 1], [], []>} : vector<8x8xf32>, vector<8x32xf32>, vector<8x32xf32> -> vector<8x32xf32>
    %370 = tpu.reciprocal %368 {approx = true} : vector<8x1xf32> -> vector<8x1xf32>
    %371 = vector.broadcast %370 : vector<8x1xf32> to vector<8x32xf32>
    %372 = arith.mulf %369, %371 : vector<8x32xf32>
    %373 = arith.truncf %372 : vector<8x32xf32> to vector<8x32xbf16>
    %374 = vector.extract_strided_slice %245 {offsets = [0, 0], sizes = [32, 128], strides = [1, 1]} : vector<128x128xbf16> to vector<32x128xbf16>
    %cst_130 = arith.constant dense<0.000000e+00> : vector<8x128xf32>
    %375 = tpu.matmul %373, %374, %cst_130 {dimension_numbers = #tpu.dot_dimension_numbers<[1], [0], [0], [1], [0, 0, 1, 1], [], []>} : vector<8x32xbf16>, vector<32x128xbf16>, vector<8x128xf32> -> vector<8x128xf32>
    %376 = vector.extract_strided_slice %350 {offsets = [0, 32], sizes = [8, 32], strides = [1, 1]} : vector<8x128xf32> to vector<8x32xf32>
    %377 = vector.extract_strided_slice %351 {offsets = [0, 32], sizes = [8, 32], strides = [1, 1]} : vector<8x128xf32> to vector<8x32xf32>
    %378 = vector.extract_strided_slice %352 {offsets = [0, 32], sizes = [8, 32], strides = [1, 1]} : vector<8x128xf32> to vector<8x32xf32>
    %cst_131 = arith.constant dense<0.000000e+00> : vector<8x8xf32>
    %379 = tpu.matmul %376, %377, %cst_131 {dimension_numbers = #tpu.dot_dimension_numbers<[1], [1], [0], [0], [0, 0, 1, 0], [], []>} : vector<8x32xf32>, vector<8x32xf32>, vector<8x8xf32> -> vector<8x8xf32>
    %cst_132 = arith.constant 0.176776692 : f32
    %380 = vector.broadcast %cst_132 : f32 to vector<8x8xf32>
    %381 = arith.mulf %379, %380 : vector<8x8xf32>
    %382 = arith.addf %381, %354 : vector<8x8xf32>
    %cst_133 = arith.constant dense<0xFF800000> : vector<8xf32>
    %383 = vector.multi_reduction <maximumf>, %382, %cst_133 [1] : vector<8x8xf32> to vector<8xf32>
    %384 = vector.shape_cast %383 : vector<8xf32> to vector<8x1xf32>
    %385 = vector.broadcast %384 : vector<8x1xf32> to vector<8x8xf32>
    %386 = arith.subf %382, %385 : vector<8x8xf32>
    %387 = math.exp %386 : vector<8x8xf32>
    %cst_134 = arith.constant dense<0.000000e+00> : vector<8xf32>
    %388 = vector.multi_reduction <add>, %387, %cst_134 [1] : vector<8x8xf32> to vector<8xf32>
    %389 = vector.shape_cast %388 : vector<8xf32> to vector<8x1xf32>
    %cst_135 = arith.constant dense<0.000000e+00> : vector<8x32xf32>
    %390 = tpu.matmul %387, %378, %cst_135 {dimension_numbers = #tpu.dot_dimension_numbers<[1], [0], [0], [1], [0, 0, 1, 1], [], []>} : vector<8x8xf32>, vector<8x32xf32>, vector<8x32xf32> -> vector<8x32xf32>
    %391 = tpu.reciprocal %389 {approx = true} : vector<8x1xf32> -> vector<8x1xf32>
    %392 = vector.broadcast %391 : vector<8x1xf32> to vector<8x32xf32>
    %393 = arith.mulf %390, %392 : vector<8x32xf32>
    %394 = arith.truncf %393 : vector<8x32xf32> to vector<8x32xbf16>
    %395 = vector.extract_strided_slice %245 {offsets = [32, 0], sizes = [32, 128], strides = [1, 1]} : vector<128x128xbf16> to vector<32x128xbf16>
    %cst_136 = arith.constant dense<0.000000e+00> : vector<8x128xf32>
    %396 = tpu.matmul %394, %395, %cst_136 {dimension_numbers = #tpu.dot_dimension_numbers<[1], [0], [0], [1], [0, 0, 1, 1], [], []>} : vector<8x32xbf16>, vector<32x128xbf16>, vector<8x128xf32> -> vector<8x128xf32>
    %397 = arith.addf %375, %396 : vector<8x128xf32>
    %398 = vector.extract_strided_slice %350 {offsets = [0, 64], sizes = [8, 32], strides = [1, 1]} : vector<8x128xf32> to vector<8x32xf32>
    %399 = vector.extract_strided_slice %351 {offsets = [0, 64], sizes = [8, 32], strides = [1, 1]} : vector<8x128xf32> to vector<8x32xf32>
    %400 = vector.extract_strided_slice %352 {offsets = [0, 64], sizes = [8, 32], strides = [1, 1]} : vector<8x128xf32> to vector<8x32xf32>
    %cst_137 = arith.constant dense<0.000000e+00> : vector<8x8xf32>
    %401 = tpu.matmul %398, %399, %cst_137 {dimension_numbers = #tpu.dot_dimension_numbers<[1], [1], [0], [0], [0, 0, 1, 0], [], []>} : vector<8x32xf32>, vector<8x32xf32>, vector<8x8xf32> -> vector<8x8xf32>
    %cst_138 = arith.constant 0.176776692 : f32
    %402 = vector.broadcast %cst_138 : f32 to vector<8x8xf32>
    %403 = arith.mulf %401, %402 : vector<8x8xf32>
    %404 = arith.addf %403, %354 : vector<8x8xf32>
    %cst_139 = arith.constant dense<0xFF800000> : vector<8xf32>
    %405 = vector.multi_reduction <maximumf>, %404, %cst_139 [1] : vector<8x8xf32> to vector<8xf32>
    %406 = vector.shape_cast %405 : vector<8xf32> to vector<8x1xf32>
    %407 = vector.broadcast %406 : vector<8x1xf32> to vector<8x8xf32>
    %408 = arith.subf %404, %407 : vector<8x8xf32>
    %409 = math.exp %408 : vector<8x8xf32>
    %cst_140 = arith.constant dense<0.000000e+00> : vector<8xf32>
    %410 = vector.multi_reduction <add>, %409, %cst_140 [1] : vector<8x8xf32> to vector<8xf32>
    %411 = vector.shape_cast %410 : vector<8xf32> to vector<8x1xf32>
    %cst_141 = arith.constant dense<0.000000e+00> : vector<8x32xf32>
    %412 = tpu.matmul %409, %400, %cst_141 {dimension_numbers = #tpu.dot_dimension_numbers<[1], [0], [0], [1], [0, 0, 1, 1], [], []>} : vector<8x8xf32>, vector<8x32xf32>, vector<8x32xf32> -> vector<8x32xf32>
    %413 = tpu.reciprocal %411 {approx = true} : vector<8x1xf32> -> vector<8x1xf32>
    %414 = vector.broadcast %413 : vector<8x1xf32> to vector<8x32xf32>
    %415 = arith.mulf %412, %414 : vector<8x32xf32>
    %416 = arith.truncf %415 : vector<8x32xf32> to vector<8x32xbf16>
    %417 = vector.extract_strided_slice %245 {offsets = [64, 0], sizes = [32, 128], strides = [1, 1]} : vector<128x128xbf16> to vector<32x128xbf16>
    %cst_142 = arith.constant dense<0.000000e+00> : vector<8x128xf32>
    %418 = tpu.matmul %416, %417, %cst_142 {dimension_numbers = #tpu.dot_dimension_numbers<[1], [0], [0], [1], [0, 0, 1, 1], [], []>} : vector<8x32xbf16>, vector<32x128xbf16>, vector<8x128xf32> -> vector<8x128xf32>
    %419 = arith.addf %397, %418 : vector<8x128xf32>
    %420 = vector.extract_strided_slice %350 {offsets = [0, 96], sizes = [8, 32], strides = [1, 1]} : vector<8x128xf32> to vector<8x32xf32>
    %421 = vector.extract_strided_slice %351 {offsets = [0, 96], sizes = [8, 32], strides = [1, 1]} : vector<8x128xf32> to vector<8x32xf32>
    %422 = vector.extract_strided_slice %352 {offsets = [0, 96], sizes = [8, 32], strides = [1, 1]} : vector<8x128xf32> to vector<8x32xf32>
    %cst_143 = arith.constant dense<0.000000e+00> : vector<8x8xf32>
    %423 = tpu.matmul %420, %421, %cst_143 {dimension_numbers = #tpu.dot_dimension_numbers<[1], [1], [0], [0], [0, 0, 1, 0], [], []>} : vector<8x32xf32>, vector<8x32xf32>, vector<8x8xf32> -> vector<8x8xf32>
    %cst_144 = arith.constant 0.176776692 : f32
    %424 = vector.broadcast %cst_144 : f32 to vector<8x8xf32>
    %425 = arith.mulf %423, %424 : vector<8x8xf32>
    %426 = arith.addf %425, %354 : vector<8x8xf32>
    %cst_145 = arith.constant dense<0xFF800000> : vector<8xf32>
    %427 = vector.multi_reduction <maximumf>, %426, %cst_145 [1] : vector<8x8xf32> to vector<8xf32>
    %428 = vector.shape_cast %427 : vector<8xf32> to vector<8x1xf32>
    %429 = vector.broadcast %428 : vector<8x1xf32> to vector<8x8xf32>
    %430 = arith.subf %426, %429 : vector<8x8xf32>
    %431 = math.exp %430 : vector<8x8xf32>
    %cst_146 = arith.constant dense<0.000000e+00> : vector<8xf32>
    %432 = vector.multi_reduction <add>, %431, %cst_146 [1] : vector<8x8xf32> to vector<8xf32>
    %433 = vector.shape_cast %432 : vector<8xf32> to vector<8x1xf32>
    %cst_147 = arith.constant dense<0.000000e+00> : vector<8x32xf32>
    %434 = tpu.matmul %431, %422, %cst_147 {dimension_numbers = #tpu.dot_dimension_numbers<[1], [0], [0], [1], [0, 0, 1, 1], [], []>} : vector<8x8xf32>, vector<8x32xf32>, vector<8x32xf32> -> vector<8x32xf32>
    %435 = tpu.reciprocal %433 {approx = true} : vector<8x1xf32> -> vector<8x1xf32>
    %436 = vector.broadcast %435 : vector<8x1xf32> to vector<8x32xf32>
    %437 = arith.mulf %434, %436 : vector<8x32xf32>
    %438 = arith.truncf %437 : vector<8x32xf32> to vector<8x32xbf16>
    %439 = vector.extract_strided_slice %245 {offsets = [96, 0], sizes = [32, 128], strides = [1, 1]} : vector<128x128xbf16> to vector<32x128xbf16>
    %cst_148 = arith.constant dense<0.000000e+00> : vector<8x128xf32>
    %440 = tpu.matmul %438, %439, %cst_148 {dimension_numbers = #tpu.dot_dimension_numbers<[1], [0], [0], [1], [0, 0, 1, 1], [], []>} : vector<8x32xbf16>, vector<32x128xbf16>, vector<8x128xf32> -> vector<8x128xf32>
    %441 = arith.addf %419, %440 : vector<8x128xf32>
    %442 = tpu.concatenate %349, %441 in 0 : vector<8x128xf32>, vector<8x128xf32> -> vector<16x128xf32>
    %443 = vector.broadcast %247 : vector<1x128xf32> to vector<16x128xf32>
    %444 = arith.addf %442, %443 : vector<16x128xf32>
    %c0_149 = arith.constant 0 : index
    %c0_150 = arith.constant 0 : index
    %c0_151 = arith.constant 0 : index
    %445 = vector.load %arg17[%c0_149, %c0_150, %c0_151] : memref<1x1x128xf32, #tpu.memory_space<vmem>>, vector<1x1x128xf32>
    %446 = vector.shape_cast %445 : vector<1x1x128xf32> to vector<1x128xf32>
    %c0_152 = arith.constant 0 : index
    %c0_153 = arith.constant 0 : index
    %c0_154 = arith.constant 0 : index
    %447 = vector.load %arg18[%c0_152, %c0_153, %c0_154] : memref<1x1x128xf32, #tpu.memory_space<vmem>>, vector<1x1x128xf32>
    %448 = vector.shape_cast %447 : vector<1x1x128xf32> to vector<1x128xf32>
    %449 = arith.addf %235, %444 : vector<16x128xf32>
    %cst_155 = arith.constant dense<0.000000e+00> : vector<16xf32>
    %450 = vector.multi_reduction <add>, %449, %cst_155 [1] : vector<16x128xf32> to vector<16xf32>
    %451 = vector.shape_cast %450 : vector<16xf32> to vector<16x1xf32>
    %cst_156 = arith.constant 1.280000e+02 : f32
    %452 = vector.broadcast %cst_156 : f32 to vector<16x1xf32>
    %453 = arith.divf %451, %452 : vector<16x1xf32>
    %454 = vector.broadcast %453 : vector<16x1xf32> to vector<16x128xf32>
    %455 = arith.subf %449, %454 : vector<16x128xf32>
    %456 = arith.mulf %455, %455 : vector<16x128xf32>
    %cst_157 = arith.constant dense<0.000000e+00> : vector<16xf32>
    %457 = vector.multi_reduction <add>, %456, %cst_157 [1] : vector<16x128xf32> to vector<16xf32>
    %458 = vector.shape_cast %457 : vector<16xf32> to vector<16x1xf32>
    %cst_158 = arith.constant 1.280000e+02 : f32
    %459 = vector.broadcast %cst_158 : f32 to vector<16x1xf32>
    %460 = arith.divf %458, %459 : vector<16x1xf32>
    %461 = vector.broadcast %453 : vector<16x1xf32> to vector<16x128xf32>
    %462 = arith.subf %449, %461 : vector<16x128xf32>
    %cst_159 = arith.constant 9.99999974E-6 : f32
    %463 = vector.broadcast %cst_159 : f32 to vector<16x1xf32>
    %464 = arith.addf %460, %463 : vector<16x1xf32>
    %465 = math.rsqrt %464 : vector<16x1xf32>
    %466 = vector.broadcast %465 : vector<16x1xf32> to vector<16x128xf32>
    %467 = arith.mulf %462, %466 : vector<16x128xf32>
    %468 = vector.broadcast %446 : vector<1x128xf32> to vector<16x128xf32>
    %469 = arith.mulf %467, %468 : vector<16x128xf32>
    %470 = vector.broadcast %448 : vector<1x128xf32> to vector<16x128xf32>
    %471 = arith.addf %469, %470 : vector<16x128xf32>
    %c0_160 = arith.constant 0 : index
    %c0_161 = arith.constant 0 : index
    %c0_162 = arith.constant 0 : index
    %472 = vector.load %arg19[%c0_160, %c0_161, %c0_162] : memref<1x128x256xbf16, #tpu.memory_space<vmem>>, vector<1x128x256xbf16>
    %473 = vector.shape_cast %472 : vector<1x128x256xbf16> to vector<128x256xbf16>
    %c0_163 = arith.constant 0 : index
    %c0_164 = arith.constant 0 : index
    %c0_165 = arith.constant 0 : index
    %474 = vector.load %arg20[%c0_163, %c0_164, %c0_165] : memref<1x1x256xf32, #tpu.memory_space<vmem>>, vector<1x1x256xf32>
    %475 = vector.shape_cast %474 : vector<1x1x256xf32> to vector<1x256xf32>
    %c0_166 = arith.constant 0 : index
    %c0_167 = arith.constant 0 : index
    %c0_168 = arith.constant 0 : index
    %476 = vector.load %arg21[%c0_166, %c0_167, %c0_168] : memref<1x256x128xbf16, #tpu.memory_space<vmem>>, vector<1x256x128xbf16>
    %477 = vector.shape_cast %476 : vector<1x256x128xbf16> to vector<256x128xbf16>
    %c0_169 = arith.constant 0 : index
    %c0_170 = arith.constant 0 : index
    %c0_171 = arith.constant 0 : index
    %478 = vector.load %arg22[%c0_169, %c0_170, %c0_171] : memref<1x1x128xf32, #tpu.memory_space<vmem>>, vector<1x1x128xf32>
    %479 = vector.shape_cast %478 : vector<1x1x128xf32> to vector<1x128xf32>
    %480 = arith.truncf %471 : vector<16x128xf32> to vector<16x128xbf16>
    %cst_172 = arith.constant dense<0.000000e+00> : vector<16x256xf32>
    %481 = tpu.matmul %480, %473, %cst_172 {dimension_numbers = #tpu.dot_dimension_numbers<[1], [0], [0], [1], [0, 0, 1, 1], [], []>} : vector<16x128xbf16>, vector<128x256xbf16>, vector<16x256xf32> -> vector<16x256xf32>
    %482 = vector.broadcast %475 : vector<1x256xf32> to vector<16x256xf32>
    %483 = arith.addf %481, %482 : vector<16x256xf32>
    %cst_173 = arith.constant 0.000000e+00 : f32
    %484 = vector.broadcast %cst_173 : f32 to vector<16x256xf32>
    %485 = arith.maximumf %483, %484 : vector<16x256xf32>
    %486 = arith.truncf %485 : vector<16x256xf32> to vector<16x256xbf16>
    %cst_174 = arith.constant dense<0.000000e+00> : vector<16x128xf32>
    %487 = tpu.matmul %486, %477, %cst_174 {dimension_numbers = #tpu.dot_dimension_numbers<[1], [0], [0], [1], [0, 0, 1, 1], [], []>} : vector<16x256xbf16>, vector<256x128xbf16>, vector<16x128xf32> -> vector<16x128xf32>
    %488 = vector.broadcast %479 : vector<1x128xf32> to vector<16x128xf32>
    %489 = arith.addf %487, %488 : vector<16x128xf32>
    %c0_175 = arith.constant 0 : index
    %c0_176 = arith.constant 0 : index
    %c0_177 = arith.constant 0 : index
    %490 = vector.load %arg23[%c0_175, %c0_176, %c0_177] : memref<1x1x128xf32, #tpu.memory_space<vmem>>, vector<1x1x128xf32>
    %491 = vector.shape_cast %490 : vector<1x1x128xf32> to vector<1x128xf32>
    %c0_178 = arith.constant 0 : index
    %c0_179 = arith.constant 0 : index
    %c0_180 = arith.constant 0 : index
    %492 = vector.load %arg24[%c0_178, %c0_179, %c0_180] : memref<1x1x128xf32, #tpu.memory_space<vmem>>, vector<1x1x128xf32>
    %493 = vector.shape_cast %492 : vector<1x1x128xf32> to vector<1x128xf32>
    %494 = arith.addf %471, %489 : vector<16x128xf32>
    %cst_181 = arith.constant dense<0.000000e+00> : vector<16xf32>
    %495 = vector.multi_reduction <add>, %494, %cst_181 [1] : vector<16x128xf32> to vector<16xf32>
    %496 = vector.shape_cast %495 : vector<16xf32> to vector<16x1xf32>
    %cst_182 = arith.constant 1.280000e+02 : f32
    %497 = vector.broadcast %cst_182 : f32 to vector<16x1xf32>
    %498 = arith.divf %496, %497 : vector<16x1xf32>
    %499 = vector.broadcast %498 : vector<16x1xf32> to vector<16x128xf32>
    %500 = arith.subf %494, %499 : vector<16x128xf32>
    %501 = arith.mulf %500, %500 : vector<16x128xf32>
    %cst_183 = arith.constant dense<0.000000e+00> : vector<16xf32>
    %502 = vector.multi_reduction <add>, %501, %cst_183 [1] : vector<16x128xf32> to vector<16xf32>
    %503 = vector.shape_cast %502 : vector<16xf32> to vector<16x1xf32>
    %cst_184 = arith.constant 1.280000e+02 : f32
    %504 = vector.broadcast %cst_184 : f32 to vector<16x1xf32>
    %505 = arith.divf %503, %504 : vector<16x1xf32>
    %506 = vector.broadcast %498 : vector<16x1xf32> to vector<16x128xf32>
    %507 = arith.subf %494, %506 : vector<16x128xf32>
    %cst_185 = arith.constant 9.99999974E-6 : f32
    %508 = vector.broadcast %cst_185 : f32 to vector<16x1xf32>
    %509 = arith.addf %505, %508 : vector<16x1xf32>
    %510 = math.rsqrt %509 : vector<16x1xf32>
    %511 = vector.broadcast %510 : vector<16x1xf32> to vector<16x128xf32>
    %512 = arith.mulf %507, %511 : vector<16x128xf32>
    %513 = vector.broadcast %491 : vector<1x128xf32> to vector<16x128xf32>
    %514 = arith.mulf %512, %513 : vector<16x128xf32>
    %515 = vector.broadcast %493 : vector<1x128xf32> to vector<16x128xf32>
    %516 = arith.addf %514, %515 : vector<16x128xf32>
    %c0_186 = arith.constant 0 : index
    %c0_187 = arith.constant 0 : index
    %517 = vector.load %arg30[%c0_186, %c0_187] : memref<16x128xf32, #tpu.memory_space<vmem>>, vector<16x128xf32>
    tpu.vector_store %arg30[%c0_186, %c0_187], %516 {strides = array<i32>} : memref<16x128xf32, #tpu.memory_space<vmem>>, vector<16x128xf32>,
    %c1_i32 = arith.constant 1 : i32
    %518 = arith.cmpi eq, %arg0, %c1_i32 : i32
    %519 = arith.extui %518 : i1 to i32
    %c0_i32_188 = arith.constant 0 : i32
    %520 = arith.cmpi ne, %519, %c0_i32_188 : i32
    scf.if %520 {
      %c0_189 = arith.constant 0 : index
      %c0_190 = arith.constant 0 : index
      %521 = vector.load %arg25[%c0_189, %c0_190] : memref<1x128xf32, #tpu.memory_space<vmem>>, vector<1x128xf32>
      %c0_191 = arith.constant 0 : index
      %c0_192 = arith.constant 0 : index
      %522 = vector.load %arg26[%c0_191, %c0_192] : memref<1x128xf32, #tpu.memory_space<vmem>>, vector<1x128xf32>
      %cst_193 = arith.constant dense<0.000000e+00> : vector<16xf32>
      %523 = vector.multi_reduction <add>, %516, %cst_193 [1] : vector<16x128xf32> to vector<16xf32>
      %524 = vector.shape_cast %523 : vector<16xf32> to vector<16x1xf32>
      %cst_194 = arith.constant 1.280000e+02 : f32
      %525 = vector.broadcast %cst_194 : f32 to vector<16x1xf32>
      %526 = arith.divf %524, %525 : vector<16x1xf32>
      %527 = vector.broadcast %526 : vector<16x1xf32> to vector<16x128xf32>
      %528 = arith.subf %516, %527 : vector<16x128xf32>
      %529 = arith.mulf %528, %528 : vector<16x128xf32>
      %cst_195 = arith.constant dense<0.000000e+00> : vector<16xf32>
      %530 = vector.multi_reduction <add>, %529, %cst_195 [1] : vector<16x128xf32> to vector<16xf32>
      %531 = vector.shape_cast %530 : vector<16xf32> to vector<16x1xf32>
      %cst_196 = arith.constant 1.280000e+02 : f32
      %532 = vector.broadcast %cst_196 : f32 to vector<16x1xf32>
      %533 = arith.divf %531, %532 : vector<16x1xf32>
      %534 = vector.broadcast %526 : vector<16x1xf32> to vector<16x128xf32>
      %535 = arith.subf %516, %534 : vector<16x128xf32>
      %cst_197 = arith.constant 9.99999974E-6 : f32
      %536 = vector.broadcast %cst_197 : f32 to vector<16x1xf32>
      %537 = arith.addf %533, %536 : vector<16x1xf32>
      %538 = math.rsqrt %537 : vector<16x1xf32>
      %539 = vector.broadcast %538 : vector<16x1xf32> to vector<16x128xf32>
      %540 = arith.mulf %535, %539 : vector<16x128xf32>
      %541 = vector.broadcast %521 : vector<1x128xf32> to vector<16x128xf32>
      %542 = arith.mulf %540, %541 : vector<16x128xf32>
      %543 = vector.broadcast %522 : vector<1x128xf32> to vector<16x128xf32>
      %544 = arith.addf %542, %543 : vector<16x128xf32>
      %545 = arith.truncf %544 : vector<16x128xf32> to vector<16x128xbf16>
      %c0_198 = arith.constant 0 : index
      %c0_199 = arith.constant 0 : index
      %546 = vector.load %arg27[%c0_198, %c0_199] : memref<128x128xbf16, #tpu.memory_space<vmem>>, vector<128x128xbf16>
      %cst_200 = arith.constant dense<0.000000e+00> : vector<16x128xf32>
      %547 = tpu.matmul %545, %546, %cst_200 {dimension_numbers = #tpu.dot_dimension_numbers<[1], [0], [0], [1], [0, 0, 1, 1], [], []>} : vector<16x128xbf16>, vector<128x128xbf16>, vector<16x128xf32> -> vector<16x128xf32>
      %c0_201 = arith.constant 0 : index
      %c0_202 = arith.constant 0 : index
      %548 = vector.load %arg28[%c0_201, %c0_202] : memref<1x128xf32, #tpu.memory_space<vmem>>, vector<1x128xf32>
      %549 = vector.broadcast %548 : vector<1x128xf32> to vector<16x128xf32>
      %550 = arith.addf %547, %549 : vector<16x128xf32>
      %c0_203 = arith.constant 0 : index
      %c0_204 = arith.constant 0 : index
      %551 = vector.load %arg29[%c0_203, %c0_204] : memref<16x128xf32, #tpu.memory_space<vmem>>, vector<16x128xf32>
      tpu.vector_store %arg29[%c0_203, %c0_204], %550 {strides = array<i32>} : memref<16x128xf32, #tpu.memory_space<vmem>>, vector<16x128xf32>,
    } else {
    }
    return
  }
  func.func @transform_0(%arg0: i32) -> (i32, i32) {
    %c0_i32 = arith.constant 0 : i32
    %c0_i32_0 = arith.constant 0 : i32
    %c0_i32_1 = arith.constant 0 : i32
    return %c0_i32, %c0_i32_0 : i32, i32
  }
  func.func @transform_1(%arg0: i32) -> (i32, i32) {
    %c0_i32 = arith.constant 0 : i32
    %c0_i32_0 = arith.constant 0 : i32
    %c0_i32_1 = arith.constant 0 : i32
    return %c0_i32, %c0_i32_0 : i32, i32
  }
  func.func @transform_2(%arg0: i32) -> (i32, i32, i32) {
    %c0_i32 = arith.constant 0 : i32
    %c0_i32_0 = arith.constant 0 : i32
    %c0_i32_1 = arith.constant 0 : i32
    %c0_i32_2 = arith.constant 0 : i32
    return %c0_i32, %c0_i32_0, %c0_i32_1 : i32, i32, i32
  }
  func.func @transform_3(%arg0: i32) -> (i32, i32, i32) {
    %c0_i32 = arith.constant 0 : i32
    %c0_i32_0 = arith.constant 0 : i32
    %c0_i32_1 = arith.constant 0 : i32
    %c0_i32_2 = arith.constant 0 : i32
    return %c0_i32, %c0_i32_0, %c0_i32_1 : i32, i32, i32
  }
  func.func @transform_4(%arg0: i32) -> (i32, i32, i32) {
    %c0_i32 = arith.constant 0 : i32
    %c0_i32_0 = arith.constant 0 : i32
    %c0_i32_1 = arith.constant 0 : i32
    return %arg0, %c0_i32, %c0_i32_0 : i32, i32, i32
  }
  func.func @transform_5(%arg0: i32) -> (i32, i32, i32) {
    %c0_i32 = arith.constant 0 : i32
    %c0_i32_0 = arith.constant 0 : i32
    %c0_i32_1 = arith.constant 0 : i32
    return %arg0, %c0_i32, %c0_i32_0 : i32, i32, i32
  }
  func.func @transform_6(%arg0: i32) -> (i32, i32, i32) {
    %c0_i32 = arith.constant 0 : i32
    %c0_i32_0 = arith.constant 0 : i32
    %c0_i32_1 = arith.constant 0 : i32
    return %arg0, %c0_i32, %c0_i32_0 : i32, i32, i32
  }
  func.func @transform_7(%arg0: i32) -> (i32, i32, i32) {
    %c0_i32 = arith.constant 0 : i32
    %c0_i32_0 = arith.constant 0 : i32
    %c0_i32_1 = arith.constant 0 : i32
    return %arg0, %c0_i32, %c0_i32_0 : i32, i32, i32
  }
  func.func @transform_8(%arg0: i32) -> (i32, i32, i32) {
    %c0_i32 = arith.constant 0 : i32
    %c0_i32_0 = arith.constant 0 : i32
    %c0_i32_1 = arith.constant 0 : i32
    return %arg0, %c0_i32, %c0_i32_0 : i32, i32, i32
  }
  func.func @transform_9(%arg0: i32) -> (i32, i32, i32) {
    %c0_i32 = arith.constant 0 : i32
    %c0_i32_0 = arith.constant 0 : i32
    %c0_i32_1 = arith.constant 0 : i32
    return %arg0, %c0_i32, %c0_i32_0 : i32, i32, i32
  }
  func.func @transform_10(%arg0: i32) -> (i32, i32, i32) {
    %c0_i32 = arith.constant 0 : i32
    %c0_i32_0 = arith.constant 0 : i32
    %c0_i32_1 = arith.constant 0 : i32
    return %arg0, %c0_i32, %c0_i32_0 : i32, i32, i32
  }
  func.func @transform_11(%arg0: i32) -> (i32, i32, i32) {
    %c0_i32 = arith.constant 0 : i32
    %c0_i32_0 = arith.constant 0 : i32
    %c0_i32_1 = arith.constant 0 : i32
    return %arg0, %c0_i32, %c0_i32_0 : i32, i32, i32
  }
  func.func @transform_12(%arg0: i32) -> (i32, i32, i32) {
    %c0_i32 = arith.constant 0 : i32
    %c0_i32_0 = arith.constant 0 : i32
    %c0_i32_1 = arith.constant 0 : i32
    return %arg0, %c0_i32, %c0_i32_0 : i32, i32, i32
  }
  func.func @transform_13(%arg0: i32) -> (i32, i32, i32) {
    %c0_i32 = arith.constant 0 : i32
    %c0_i32_0 = arith.constant 0 : i32
    %c0_i32_1 = arith.constant 0 : i32
    return %arg0, %c0_i32, %c0_i32_0 : i32, i32, i32
  }
  func.func @transform_14(%arg0: i32) -> (i32, i32, i32) {
    %c0_i32 = arith.constant 0 : i32
    %c0_i32_0 = arith.constant 0 : i32
    %c0_i32_1 = arith.constant 0 : i32
    return %arg0, %c0_i32, %c0_i32_0 : i32, i32, i32
  }
  func.func @transform_15(%arg0: i32) -> (i32, i32, i32) {
    %c0_i32 = arith.constant 0 : i32
    %c0_i32_0 = arith.constant 0 : i32
    %c0_i32_1 = arith.constant 0 : i32
    return %arg0, %c0_i32, %c0_i32_0 : i32, i32, i32
  }
  func.func @transform_16(%arg0: i32) -> (i32, i32, i32) {
    %c0_i32 = arith.constant 0 : i32
    %c0_i32_0 = arith.constant 0 : i32
    %c0_i32_1 = arith.constant 0 : i32
    return %arg0, %c0_i32, %c0_i32_0 : i32, i32, i32
  }
  func.func @transform_17(%arg0: i32) -> (i32, i32, i32) {
    %c0_i32 = arith.constant 0 : i32
    %c0_i32_0 = arith.constant 0 : i32
    %c0_i32_1 = arith.constant 0 : i32
    return %arg0, %c0_i32, %c0_i32_0 : i32, i32, i32
  }
  func.func @transform_18(%arg0: i32) -> (i32, i32, i32) {
    %c0_i32 = arith.constant 0 : i32
    %c0_i32_0 = arith.constant 0 : i32
    %c0_i32_1 = arith.constant 0 : i32
    return %arg0, %c0_i32, %c0_i32_0 : i32, i32, i32
  }
  func.func @transform_19(%arg0: i32) -> (i32, i32, i32) {
    %c0_i32 = arith.constant 0 : i32
    %c0_i32_0 = arith.constant 0 : i32
    %c0_i32_1 = arith.constant 0 : i32
    return %arg0, %c0_i32, %c0_i32_0 : i32, i32, i32
  }
  func.func @transform_20(%arg0: i32) -> (i32, i32, i32) {
    %c0_i32 = arith.constant 0 : i32
    %c0_i32_0 = arith.constant 0 : i32
    %c0_i32_1 = arith.constant 0 : i32
    return %arg0, %c0_i32, %c0_i32_0 : i32, i32, i32
  }
  func.func @transform_21(%arg0: i32) -> (i32, i32, i32) {
    %c0_i32 = arith.constant 0 : i32
    %c0_i32_0 = arith.constant 0 : i32
    %c0_i32_1 = arith.constant 0 : i32
    return %arg0, %c0_i32, %c0_i32_0 : i32, i32, i32
  }
  func.func @transform_22(%arg0: i32) -> (i32, i32, i32) {
    %c0_i32 = arith.constant 0 : i32
    %c0_i32_0 = arith.constant 0 : i32
    %c0_i32_1 = arith.constant 0 : i32
    return %arg0, %c0_i32, %c0_i32_0 : i32, i32, i32
  }
  func.func @transform_23(%arg0: i32) -> (i32, i32, i32) {
    %c0_i32 = arith.constant 0 : i32
    %c0_i32_0 = arith.constant 0 : i32
    %c0_i32_1 = arith.constant 0 : i32
    return %arg0, %c0_i32, %c0_i32_0 : i32, i32, i32
  }
  func.func @transform_24(%arg0: i32) -> (i32, i32) {
    %c0_i32 = arith.constant 0 : i32
    %c0_i32_0 = arith.constant 0 : i32
    %c0_i32_1 = arith.constant 0 : i32
    return %c0_i32, %c0_i32_0 : i32, i32
  }
  func.func @transform_25(%arg0: i32) -> (i32, i32) {
    %c0_i32 = arith.constant 0 : i32
    %c0_i32_0 = arith.constant 0 : i32
    %c0_i32_1 = arith.constant 0 : i32
    return %c0_i32, %c0_i32_0 : i32, i32
  }
  func.func @transform_26(%arg0: i32) -> (i32, i32) {
    %c0_i32 = arith.constant 0 : i32
    %c0_i32_0 = arith.constant 0 : i32
    %c0_i32_1 = arith.constant 0 : i32
    return %c0_i32, %c0_i32_0 : i32, i32
  }
  func.func @transform_27(%arg0: i32) -> (i32, i32) {
    %c0_i32 = arith.constant 0 : i32
    %c0_i32_0 = arith.constant 0 : i32
    %c0_i32_1 = arith.constant 0 : i32
    return %c0_i32, %c0_i32_0 : i32, i32
  }
  func.func @transform_28(%arg0: i32) -> (i32, i32) {
    %c0_i32 = arith.constant 0 : i32
    %c0_i32_0 = arith.constant 0 : i32
    %c0_i32_1 = arith.constant 0 : i32
    return %c0_i32, %c0_i32_0 : i32, i32
  }
}

</mosaic_0001>

<bundles_post_ra>
// kernel: seq2seq_forward.2
= control target key start
LH: loop header
LB: loop body
LE: loop exit
PB: predicated region body
PF: predicated region fallthrough
CT: control target
= control target key end

     0   :  { %s5569_s0 = inlined_call_operand.vmem [shape: f32[16,128], index: 0, kind: input, shape index: {}]   ;;  %s5570_s1 = inlined_call_operand.vmem [shape: f32[2,8,8], index: 1, kind: input, shape index: {}]   ;;  %s5571_s2 = inlined_call_operand.vmem [shape: bf16[2,128,384], index: 2, kind: input, shape index: {}]   ;;  %s5572_s3 = inlined_call_operand.vmem [shape: f32[2,1,384], index: 3, kind: input, shape index: {}]   ;;  %s5573_s4 = inlined_call_operand.hbm [shape: bf16[2,128,128], index: 4, kind: input, shape index: {}]   ;;  %s5574_s5 = inlined_call_operand.hbm [shape: f32[2,1,128], index: 5, kind: input, shape index: {}]   ;;  %s5575_s6 = inlined_call_operand.hbm [shape: f32[2,1,128], index: 6, kind: input, shape index: {}]   ;;  %s5576_s7 = inlined_call_operand.hbm [shape: f32[2,1,128], index: 7, kind: input, shape index: {}]   ;;  %s5577_s8 = inlined_call_operand.hbm [shape: bf16[2,128,256], index: 8, kind: input, shape index: {}]   ;;  %s5578_s9 = inlined_call_operand.hbm [shape: f32[2,1,256], index: 9, kind: input, shape index: {}]   ;;  %s5579_s10 = inlined_call_operand.hbm [shape: bf16[2,256,128], index: 10, kind: input, shape index: {}]   ;;  %s5580_s11 = inlined_call_operand.hbm [shape: f32[2,1,128], index: 11, kind: input, shape index: {}]   ;;  %s5581_s12 = inlined_call_operand.hbm [shape: f32[2,1,128], index: 12, kind: input, shape index: {}]   ;;  %s5582_s13 = inlined_call_operand.hbm [shape: f32[2,1,128], index: 13, kind: input, shape index: {}]   ;;  %s5583_s14 = inlined_call_operand.vmem [shape: f32[1,128], index: 14, kind: input, shape index: {}]   ;;  %s5584_s15 = inlined_call_operand.hbm [shape: f32[1,128], index: 15, kind: input, shape index: {}]   ;;  %s5585_s16 = inlined_call_operand.vmem [shape: f32[16,128], index: 16, kind: output, shape index: {}]  }
   0x1   :  { %5601 = sst [smem:[#allocation31_spill]] %s5569_s0 }
   0x2   :  { %5602 = sst [smem:[#allocation32_spill]] %s5570_s1 }
   0x3   :  { %5603 = sst [smem:[#allocation33_spill]] %s5571_s2 }
   0x4   :  { %5604 = sst [smem:[#allocation34_spill]] %s5572_s3 }
   0x5   :  { %5605 = sst [smem:[#allocation35_spill]] %s5573_s4 }
   0x6   :  { %5606 = sst [smem:[#allocation36_spill]] %s5574_s5 }
   0x7   :  { %5607 = sst [smem:[#allocation37_spill]] %s5575_s6 }
   0x8   :  { %5608 = sst [smem:[#allocation38_spill]] %s5583_s14 }
   0x9   :  { %5609 = sst [smem:[#allocation39_spill]] %s5584_s15 }
   0xa   :  { %5610 = sst [smem:[#allocation40_spill]] %s5585_s16 }
   0xb   :  { %21 = vsyncpa [#allocation4], 0 }
   0xc   :  { %23 = vsyncpa [#allocation4 + $0x1], 0 }
   0xd   :  { %24 = vsyncpa [#allocation6], 0 }
   0xe   :  { %26 = vsyncpa [#allocation6 + $0x1], 0 }
   0xf   :  { %27 = vsyncpa [#allocation9], 0 }
  0x10   :  { %29 = vsyncpa [#allocation9 + $0x1], 0 }
  0x11   :  { %30 = vsyncpa [#allocation12], 0 }
  0x12   :  { %32 = vsyncpa [#allocation12 + $0x1], 0 }
  0x13   :  { %33 = vsyncpa [#allocation15], 0 }
  0x14   :  { %35 = vsyncpa [#allocation15 + $0x1], 0 }
  0x15   :  { %36 = vsyncpa [#allocation18], 0 }
  0x16   :  { %38 = vsyncpa [#allocation18 + $0x1], 0  ;;  %s4733_s21 = smov 0   ;;  %s4735_s22 = smov 0  }
  0x17   :  { %s4737_s23 = smov 0   ;;  %s4739_s24 = smov 0  }
  0x18 LB: > { %5611 = sst [smem:[#allocation27_spill]] %s4621_s23  ;;  %s4752_s25 = sadd.s32 4294967295, %s4625_s24   ;;  %s4625_s24 = sphi %s4739_s24, %s5653_s24   ;;  %s4621_s23 = sphi %s4737_s23, %s5655_s23   ;;  %s4617_s22 = sphi %s4735_s22, %s5657_s22   ;;  %s4613_s21 = sphi %s4733_s21, %s5656_s21  }
  0x19   : > { %5612 = sst [smem:[#allocation28_spill]] %s4752_s25  ;;  %s4755_s26 = sadd.s32 1, %s4625_s24  }
  0x1a   : > { %5613 = sst [smem:[#allocation29_spill]] %s4755_s26  ;;  %s142_s27 = ssub.s32 %s4625_s24, %s4755_s26 }
  0x1b   : > { %s145_s28 = sadd.s32 1, %s4621_s23  ;;  %p143_p0 = scmp.eq.s32.totalorder %s142_s27, 0 }
  0x1c   : > { %p152_p1 = scmp.ne.s32.totalorder %s4621_s23, %s4617_s22  ;;  %p153_p2 = scmp.eq.s32.totalorder %s4625_s24, 0 }
  0x1d   : > { %p158_p3 = scmp.ne.s32.totalorder %s4617_s22, %s4613_s21  ;;  %p5587_p5 = scmp.eq.s32.totalorder %s4752_s25, 0 }
  0x1e   : > { %s4765_s29 = scalar_select %p143_p0, %s4621_s23, %s145_s28  }
  0x1f   : > { %p4767_p4 = por %p153_p2, %p152_p1  ;;  %p3639_p6 = scmp.ge.s32.totalorder %s4625_s24, 1 }
  0x20   : > { %5614 = sst [smem:[#allocation30_spill]] %s4765_s29  ;;  %p466_p7 = scmp.lt.s32.totalorder %s4625_s24, 3 }
  0x21   : > { %p4776_p8 = por %p5587_p5, %p158_p3  ;;  %s4627_s18 = smov [#allocation19]  }
  0x22   : > { %p4781_p10 = pnand %p3639_p6, %p466_p7  ;;  %s488_s19 = sshll.u32 %s4627_s18, 4  ;;  %s489_s19 = int_to_ptr.vmem [resolvable:$true] %s488_s19 }
  0x23   : > { %s5616_s0 = scalar_select %p4776_p8, 1, 0 }
  0x24   : > { %s5617_s17 = scalar_select %p4781_p10, 1, 0 }
  0x25   : > { %p4056_p11 = pneg %p4781_p10  ;;  %p4092_p12 = scmp.lt.s32.totalorder %s4625_s24, 2 }
  0x26   : > { %s4789_s20 = sand.u32 1, %s4621_s23   ;;  %s4798_s27 = sand.u32 1, %s4625_s24  }
  0x27   : > { %p4793_p13 = pnand %p4056_p11, %p5587_p5  ;;  %p4802_p0 = pnand %p4092_p12, %p4767_p4 }
  0x28   : > { %s4272_s18 = scalar_lea.vmem %s489_s19, 16  ;;  %s4279_s29 = scalar_lea.vmem %s489_s19, 32 }
  0x29   : > { %p4263_p1 = pneg %p4793_p13  ;;  %p4273_p2 = scmp.ne.s32.totalorder %s489_s19, %s4272_s18 }
  0x2a   : > { %p4280_p7 = scmp.lt.s32.totalorder %s489_s19, %s489_s19  ;;  %p4281_p11 = scmp.lt.s32.totalorder %s4279_s29, %s4272_s18 }
  0x2b   : > { %p4275_p3 = pnand %p4273_p2, %p4263_p1 }
  0x2c   : > { %p4282_p9 = por %p4281_p11, %p4280_p7 }
  0x2d   : > { %p4276_p6 = pneg %p4275_p3 }
  0x2f   : > { %p4283_p5 = pnand %p4282_p9, %p4276_p6 }
  0x31   : > { %4286 = shalt.err (!%p4283_p5)
}
  0x32   : > { %s5620_s15 = sld [smem:[#allocation39_spill]]  ;;  %s4814_s26 = sshll.u32 %s4625_s24, 4 }
  0x33   : > { %s5621_s5 = sld [smem:[#allocation36_spill]]  ;;  %s538_s21 = scalar_lea.vmem [#allocation5], %s4789_s20 }
  0x34   : > { %s545_s18 = sshll.u32 %s538_s21, 4  ;;  %p4828_p5 = pneg %p4802_p0  ;;  %s546_s18 = int_to_ptr.vmem [resolvable:$true] %s545_s18 }
  0x38   : > { %4059 = dma.hbm_to_vmem [thread:$0]  (!%p4793_p13), %s5620_s15, 16, %s489_s19, [#allocation18]  }
  0x39   : > { %s4820_s29 = scalar_lea.hbm %s5621_s5, %s4814_s26  ;;  %s4292_s15 = scalar_lea.hbm %s5621_s5, 32 }
  0x3a   : > { %s4287_s30 = scalar_lea.hbm %s4820_s29, 16  ;;  %p4293_p13 = scmp.lt.s32.totalorder %s4820_s29, %s5621_s5 }
  0x3b   : > { %p4288_p4 = scmp.ne.s32.totalorder %s4820_s29, %s4287_s30  ;;  %p4294_p1 = scmp.lt.s32.totalorder %s4292_s15, %s4287_s30 }
  0x3d   : > { %p4290_p9 = pnand %p4828_p5, %p4288_p4  ;;  %p4295_p2 = por %p4294_p1, %p4293_p13 }
  0x3f   : > { %p4291_p12 = pneg %p4290_p9 }
  0x41   : > { %p4296_p3 = pnand %p4295_p2, %p4291_p12 }
  0x43   : > { %4299 = shalt.err (!%p4296_p3)
}
  0x44   : > { %s4300_s21 = scalar_lea.vmem %s546_s18, 16  ;;  %s4628_s23 = smov [#allocation5]  }
  0x45   : > { %p4301_p6 = scmp.ne.s32.totalorder %s546_s18, %s4300_s21  ;;  %s4305_s2 = sshll.u32 %s4628_s23, 4  ;;  %s4306_s2 = int_to_ptr.vmem [resolvable:$false] %s4305_s2 }
  0x46   : > { %s4307_s25 = scalar_lea.vmem %s4306_s2, 32  ;;  %p4308_p4 = scmp.lt.s32.totalorder %s546_s18, %s4306_s2 }
  0x47   : > { %p4303_p7 = pnand %p4301_p6, %p4828_p5  ;;  %p4309_p9 = scmp.lt.s32.totalorder %s4307_s25, %s4300_s21 }
  0x49   : > { %p4304_p11 = pneg %p4303_p7  ;;  %p4310_p8 = por %p4309_p9, %p4308_p4 }
  0x4b   : > { %p4311_p10 = pnand %p4310_p8, %p4304_p11 }
  0x4d   : > { %4314 = shalt.err (!%p4311_p10)
}
  0x4e   : > { %s5623_s1 = scalar_lea.sflag [#allocation6], %s4798_s27  ;;  %s4852_s23 = scalar_lea.hbm %s5576_s7, %s4814_s26 }
  0x4f   : > { %4066 = dma.hbm_to_vmem [thread:$0]  (!%p4802_p0), %s4820_s29, 16, %s546_s18, %s5623_s1  }
  0x50   : > { %s572_s2 = scalar_lea.vmem [#allocation8], %s4789_s20  ;;  %s3651_s30 = sshll.u32 %s4789_s20, 1 }
  0x51   : > { %s579_s25 = sshll.u32 %s572_s2, 4  ;;  %s4315_s16 = scalar_lea.hbm %s4852_s23, 16  ;;  %s580_s25 = int_to_ptr.vmem [resolvable:$true] %s579_s25 }
  0x52   : > { %p4316_p8 = scmp.ne.s32.totalorder %s4852_s23, %s4315_s16  ;;  %s4320_s18 = scalar_lea.hbm %s5576_s7, 32 }
  0x53   : > { %p4321_p13 = scmp.lt.s32.totalorder %s4852_s23, %s5576_s7  ;;  %p4322_p1 = scmp.lt.s32.totalorder %s4320_s18, %s4315_s16 }
  0x54   : > { %p4318_p10 = pnand %p4316_p8, %p4828_p5 }
  0x55   : > { %p4323_p2 = por %p4322_p1, %p4321_p13 }
  0x56   : > { %p4319_p12 = pneg %p4318_p10 }
  0x58   : > { %p4324_p3 = pnand %p4323_p2, %p4319_p12 }
  0x5a   : > { %4327 = shalt.err (!%p4324_p3)
}
  0x5b   : > { %s4328_s15 = scalar_lea.vmem %s580_s25, 16  ;;  %s4629_s2 = smov [#allocation8]  }
  0x5c   : > { %p4329_p6 = scmp.ne.s32.totalorder %s580_s25, %s4328_s15  ;;  %s4333_s14 = sshll.u32 %s4629_s2, 4  ;;  %s4334_s14 = int_to_ptr.vmem [resolvable:$false] %s4333_s14 }
  0x5d   : > { %s4335_s5 = scalar_lea.vmem %s4334_s14, 32  ;;  %p4336_p4 = scmp.lt.s32.totalorder %s580_s25, %s4334_s14 }
  0x5e   : > { %p4331_p7 = pnand %p4329_p6, %p4828_p5  ;;  %p4337_p9 = scmp.lt.s32.totalorder %s4335_s5, %s4328_s15 }
  0x60   : > { %p4332_p11 = pneg %p4331_p7  ;;  %p4338_p8 = por %p4337_p9, %p4336_p4 }
  0x62   : > { %p4339_p10 = pnand %p4338_p8, %p4332_p11 }
  0x64   : > { %4342 = shalt.err (!%p4339_p10)
}
  0x65   : > { %s5624_s16 = scalar_lea.sflag [#allocation9], %s4798_s27  ;;  %s3777_s21 = sshll.u32 %s4625_s24, 5 }
  0x66   : > { %4072 = dma.hbm_to_vmem [thread:$0]  (!%p4802_p0), %s4852_s23, 16, %s580_s25, %s5624_s16  }
  0x67   : > { %s4879_s1 = scalar_lea.hbm %s5578_s9, %s3777_s21  ;;  %s611_s5 = scalar_lea.vmem [#allocation11], %s3651_s30 }
  0x68   : > { %s619_s14 = sshll.u32 %s611_s5, 4  ;;  %s5598_s3 = scalar_lea.sflag [#allocation12], %s4798_s27  ;;  %s620_s14 = int_to_ptr.vmem [resolvable:$true] %s619_s14 }
  0x69   : > { %s4343_s15 = scalar_lea.hbm %s4879_s1, 32  ;;  %s4348_s25 = scalar_lea.hbm %s5578_s9, 64 }
  0x6a   : > { %p4344_p12 = scmp.ne.s32.totalorder %s4879_s1, %s4343_s15  ;;  %p4349_p2 = scmp.lt.s32.totalorder %s4879_s1, %s5578_s9 }
  0x6b   : > { %p4350_p3 = scmp.lt.s32.totalorder %s4348_s25, %s4343_s15 }
  0x6c   : > { %p4346_p13 = pnand %p4344_p12, %p4828_p5 }
  0x6d   : > { %p4351_p6 = por %p4350_p3, %p4349_p2 }
  0x6e   : > { %p4347_p1 = pneg %p4346_p13 }
  0x70   : > { %p4352_p7 = pnand %p4351_p6, %p4347_p1 }
  0x72   : > { %4355 = shalt.err (!%p4352_p7)
}
  0x73   : > { %s4356_s30 = scalar_lea.vmem %s620_s14, 32  ;;  %s4630_s21 = smov [#allocation11]  }
  0x74   : > { %p4357_p11 = scmp.ne.s32.totalorder %s620_s14, %s4356_s30  ;;  %s4361_s18 = sshll.u32 %s4630_s21, 4  ;;  %s4362_s18 = int_to_ptr.vmem [resolvable:$false] %s4361_s18 }
  0x75   : > { %s4363_s5 = scalar_lea.vmem %s4362_s18, 64  ;;  %p4364_p8 = scmp.lt.s32.totalorder %s620_s14, %s4362_s18 }
  0x76   : > { %p4359_p4 = pnand %p4357_p11, %p4828_p5  ;;  %p4365_p10 = scmp.lt.s32.totalorder %s4363_s5, %s4356_s30 }
  0x78   : > { %p4360_p9 = pneg %p4359_p4  ;;  %p4366_p12 = por %p4365_p10, %p4364_p8 }
  0x7a   : > { %p4367_p13 = pnand %p4366_p12, %p4360_p9 }
  0x7c   : > { %4370 = shalt.err (!%p4367_p13)
}
  0x7d   : > { %4078 = dma.hbm_to_vmem [thread:$0]  (!%p4802_p0), %s4879_s1, 32, %s620_s14, %s5598_s3  }
  0x7e   : > { %s4904_s23 = scalar_lea.hbm %s5580_s11, %s4814_s26  ;;  %s650_s25 = scalar_lea.vmem [#allocation14], %s4789_s20 }
  0x7f   : > { %s657_s16 = sshll.u32 %s650_s25, 4  ;;  %s3642_s29 = sshll.u32 %s4789_s20, 6  ;;  %s658_s16 = int_to_ptr.vmem [resolvable:$true] %s657_s16 }
  0x80   : > { %s4371_s21 = scalar_lea.hbm %s4904_s23, 16  ;;  %s4376_s14 = scalar_lea.hbm %s5580_s11, 32 }
  0x81   : > { %p4372_p1 = scmp.ne.s32.totalorder %s4904_s23, %s4371_s21  ;;  %p4377_p6 = scmp.lt.s32.totalorder %s4904_s23, %s5580_s11 }
  0x82   : > { %p4378_p7 = scmp.lt.s32.totalorder %s4376_s14, %s4371_s21 }
  0x83   : > { %p4374_p2 = pnand %p4372_p1, %p4828_p5 }
  0x84   : > { %p4379_p11 = por %p4378_p7, %p4377_p6 }
  0x85   : > { %p4375_p3 = pneg %p4374_p2 }
  0x87   : > { %p4380_p4 = pnand %p4379_p11, %p4375_p3 }
  0x89   : > { %4383 = shalt.err (!%p4380_p4)
}
  0x8a   : > { %s4384_s2 = scalar_lea.vmem %s658_s16, 16  ;;  %s4631_s25 = smov [#allocation14]  }
  0x8b   : > { %p4385_p9 = scmp.ne.s32.totalorder %s658_s16, %s4384_s2  ;;  %s4389_s3 = sshll.u32 %s4631_s25, 4  ;;  %s4390_s3 = int_to_ptr.vmem [resolvable:$false] %s4389_s3 }
  0x8c   : > { %s4391_s30 = scalar_lea.vmem %s4390_s3, 32  ;;  %p4392_p12 = scmp.lt.s32.totalorder %s658_s16, %s4390_s3 }
  0x8d   : > { %p4387_p8 = pnand %p4385_p9, %p4828_p5  ;;  %p4393_p13 = scmp.lt.s32.totalorder %s4391_s30, %s4384_s2 }
  0x8f   : > { %p4388_p10 = pneg %p4387_p8  ;;  %p4394_p1 = por %p4393_p13, %p4392_p12 }
  0x91   : > { %p4395_p2 = pnand %p4394_p1, %p4388_p10 }
  0x93   : > { %4398 = shalt.err (!%p4395_p2)
}
  0x94   : > { %s5625_s21 = scalar_lea.sflag [#allocation15], %s4798_s27  ;;  %s3775_s18 = sshll.u32 %s4625_s24, 10 }
  0x95   : > { %4084 = dma.hbm_to_vmem [thread:$0]  (!%p4802_p0), %s4904_s23, 16, %s658_s16, %s5625_s21  }
  0x96   : > { %s5626_s4 = sld [smem:[#allocation35_spill]]  ;;  %s518_s3 = scalar_lea.vmem [#allocation3], %s3642_s29 }
  0x97   : > { %s525_s30 = sshll.u32 %s518_s3, 4  ;;  %s515_s15 = scalar_lea.sflag [#allocation4], %s4789_s20  ;;  %s4933_s30 = int_to_ptr.vmem [resolvable:$true] %s525_s30 }
  0x9c   : > { %s4931_s5 = scalar_lea.hbm %s5626_s4, %s3775_s18  ;;  %s4404_s25 = scalar_lea.hbm %s5626_s4, 2048 }
  0x9d   : > { %s4399_s2 = scalar_lea.hbm %s4931_s5, 1024  ;;  %p4405_p11 = scmp.lt.s32.totalorder %s4931_s5, %s5626_s4 }
  0x9e   : > { %p4400_p3 = scmp.ne.s32.totalorder %s4931_s5, %s4399_s2  ;;  %p4406_p4 = scmp.lt.s32.totalorder %s4404_s25, %s4399_s2 }
  0xa0   : > { %p4402_p6 = pnand %p4400_p3, %p4828_p5  ;;  %p4407_p9 = por %p4406_p4, %p4405_p11 }
  0xa2   : > { %p4403_p7 = pneg %p4402_p6 }
  0xa4   : > { %p4408_p8 = pnand %p4407_p9, %p4403_p7 }
  0xa6   : > { %4411 = shalt.err (!%p4408_p8)
}
  0xa7   : > { %s4412_s29 = scalar_lea.vmem %s4933_s30, 1024  ;;  %s4632_s1 = smov [#allocation3]  }
  0xa8   : > { %p4413_p10 = scmp.ne.s32.totalorder %s4933_s30, %s4412_s29  ;;  %s4417_s14 = sshll.u32 %s4632_s1, 4  ;;  %s4418_s14 = int_to_ptr.vmem [resolvable:$false] %s4417_s14 }
  0xa9   : > { %s4419_s3 = scalar_lea.vmem %s4418_s14, 2048  ;;  %p4420_p1 = scmp.lt.s32.totalorder %s4933_s30, %s4418_s14 }
  0xaa   : > { %p4415_p12 = pnand %p4413_p10, %p4828_p5  ;;  %p4421_p2 = scmp.lt.s32.totalorder %s4419_s3, %s4412_s29 }
  0xac   : > { %p4416_p13 = pneg %p4415_p12  ;;  %p4422_p3 = por %p4421_p2, %p4420_p1 }
  0xae   : > { %p4423_p6 = pnand %p4422_p3, %p4416_p13 }
  0xb0   : > { %4426 = shalt.err (!%p4423_p6)
}
  0xb1   : > { %s5599_s2 = smov 64   ;;  %s5600_s23 = smov 4  }
  0xb2   : > { %4063 = dma.hbm_to_vmem [thread:$0]  (!%p4802_p0), %s4931_s5, 1024, %s4933_s30, %s515_s15, %s5599_s2, %s5599_s2, %s5600_s23  }
  0xb3   : > { %s5627_s6 = sld [smem:[#allocation37_spill]]  ;;  %s555_s18 = scalar_lea.vmem [#allocation7], %s4789_s20 }
  0xb4   : > { %s562_s29 = sshll.u32 %s555_s18, 4  ;;  %s3648_s1 = sshll.u32 %s4789_s20, 7  ;;  %s563_s29 = int_to_ptr.vmem [resolvable:$true] %s562_s29 }
  0xb9   : > { %s4965_s21 = scalar_lea.hbm %s5627_s6, %s4814_s26  ;;  %s4432_s5 = scalar_lea.hbm %s5627_s6, 32 }
  0xba   : > { %s4427_s14 = scalar_lea.hbm %s4965_s21, 16  ;;  %p4433_p9 = scmp.lt.s32.totalorder %s4965_s21, %s5627_s6 }
  0xbb   : > { %p4428_p7 = scmp.ne.s32.totalorder %s4965_s21, %s4427_s14  ;;  %p4434_p8 = scmp.lt.s32.totalorder %s4432_s5, %s4427_s14 }
  0xbd   : > { %p4430_p11 = pnand %p4428_p7, %p4828_p5  ;;  %p4435_p10 = por %p4434_p8, %p4433_p9 }
  0xbf   : > { %p4431_p4 = pneg %p4430_p11 }
  0xc1   : > { %p4436_p12 = pnand %p4435_p10, %p4431_p4 }
  0xc3   : > { %4439 = shalt.err (!%p4436_p12)
}
  0xc4   : > { %s4440_s16 = scalar_lea.vmem %s563_s29, 16  ;;  %s4635_s25 = smov [#allocation7]  }
  0xc5   : > { %p4441_p13 = scmp.ne.s32.totalorder %s563_s29, %s4440_s16  ;;  %s4445_s18 = sshll.u32 %s4635_s25, 4  ;;  %s4446_s18 = int_to_ptr.vmem [resolvable:$false] %s4445_s18 }
  0xc6   : > { %s4447_s2 = scalar_lea.vmem %s4446_s18, 32  ;;  %p4448_p3 = scmp.lt.s32.totalorder %s563_s29, %s4446_s18 }
  0xc7   : > { %p4443_p1 = pnand %p4441_p13, %p4828_p5  ;;  %p4449_p6 = scmp.lt.s32.totalorder %s4447_s2, %s4440_s16 }
  0xc9   : > { %p4444_p2 = pneg %p4443_p1  ;;  %p4450_p7 = por %p4449_p6, %p4448_p3 }
  0xcb   : > { %p4451_p11 = pnand %p4450_p7, %p4444_p2 }
  0xcd   : > { %4454 = shalt.err (!%p4451_p11)
}
  0xce   : > { %s5628_s4 = scalar_lea.sflag [#allocation6], %s4798_s27  ;;  %s3776_s14 = sshll.u32 %s4625_s24, 11 }
  0xcf   : > { %4069 = dma.hbm_to_vmem [thread:$0]  (!%p4802_p0), %s4965_s21, 16, %s563_s29, %s5628_s4  }
  0xd0   : > { %s4993_s30 = scalar_lea.hbm %s5577_s8, %s3776_s14  ;;  %s590_s2 = scalar_lea.vmem [#allocation10], %s3648_s1 }
  0xd1   : > { %s597_s15 = sshll.u32 %s590_s2, 4  ;;  %s4455_s16 = scalar_lea.hbm %s4993_s30, 2048  ;;  %s4997_s15 = int_to_ptr.vmem [resolvable:$true] %s597_s15 }
  0xd2   : > { %p4456_p4 = scmp.ne.s32.totalorder %s4993_s30, %s4455_s16  ;;  %s4460_s25 = scalar_lea.hbm %s5577_s8, 4096 }
  0xd3   : > { %p4461_p10 = scmp.lt.s32.totalorder %s4993_s30, %s5577_s8  ;;  %p4462_p12 = scmp.lt.s32.totalorder %s4460_s25, %s4455_s16 }
  0xd4   : > { %p4458_p9 = pnand %p4456_p4, %p4828_p5 }
  0xd5   : > { %p4463_p13 = por %p4462_p12, %p4461_p10 }
  0xd6   : > { %p4459_p8 = pneg %p4458_p9 }
  0xd8   : > { %p4464_p1 = pnand %p4463_p13, %p4459_p8 }
  0xda   : > { %4467 = shalt.err (!%p4464_p1)
}
  0xdb   : > { %s4468_s3 = scalar_lea.vmem %s4997_s15, 2048  ;;  %s4636_s5 = smov [#allocation10]  }
  0xdc   : > { %p4469_p2 = scmp.ne.s32.totalorder %s4997_s15, %s4468_s3  ;;  %s4473_s2 = sshll.u32 %s4636_s5, 4  ;;  %s4474_s2 = int_to_ptr.vmem [resolvable:$false] %s4473_s2 }
  0xdd   : > { %s4475_s21 = scalar_lea.vmem %s4474_s2, 4096  ;;  %p4476_p7 = scmp.lt.s32.totalorder %s4997_s15, %s4474_s2 }
  0xde   : > { %p4471_p3 = pnand %p4469_p2, %p4828_p5  ;;  %p4477_p11 = scmp.lt.s32.totalorder %s4475_s21, %s4468_s3 }
  0xe0   : > { %p4472_p6 = pneg %p4471_p3  ;;  %p4478_p4 = por %p4477_p11, %p4476_p7 }
  0xe2   : > { %p4479_p9 = pnand %p4478_p4, %p4472_p6 }
  0xe4   : > { %4482 = shalt.err (!%p4479_p9)
}
  0xe5   : > { %s4637_s16 = smov 128   ;;  %s4638_s29 = smov 8  }
  0xe6   : > { %s5629_s25 = scalar_lea.sflag [#allocation9], %s4798_s27  ;;  %s5026_s3 = scalar_lea.hbm %s5579_s10, %s3776_s14 }
  0xe7   : > { %4075 = dma.hbm_to_vmem [thread:$0]  (!%p4802_p0), %s4993_s30, 2048, %s4997_s15, %s5629_s25, %s4637_s16, %s4637_s16, %s4638_s29  }
  0xe8   : > { %s630_s5 = scalar_lea.vmem [#allocation13], %s3648_s1  ;;  %s4483_s21 = scalar_lea.hbm %s5026_s3, 2048 }
  0xe9   : > { %s637_s2 = sshll.u32 %s630_s5, 4  ;;  %p4484_p8 = scmp.ne.s32.totalorder %s5026_s3, %s4483_s21  ;;  %s638_s2 = int_to_ptr.vmem [resolvable:$true] %s637_s2 }
  0xea   : > { %s4488_s24 = scalar_lea.hbm %s5579_s10, 4096  ;;  %p4489_p13 = scmp.lt.s32.totalorder %s5026_s3, %s5579_s10 }
  0xeb   : > { %p4486_p10 = pnand %p4484_p8, %p4828_p5  ;;  %p4490_p1 = scmp.lt.s32.totalorder %s4488_s24, %s4483_s21 }
  0xed   : > { %p4487_p12 = pneg %p4486_p10  ;;  %p4491_p2 = por %p4490_p1, %p4489_p13 }
  0xef   : > { %p4492_p3 = pnand %p4491_p2, %p4487_p12 }
  0xf1   : > { %4495 = shalt.err (!%p4492_p3)
}
  0xf2   : > { %s4496_s1 = scalar_lea.vmem %s638_s2, 2048  ;;  %s4639_s14 = smov [#allocation13]  }
  0xf3   : > { %p4497_p6 = scmp.ne.s32.totalorder %s638_s2, %s4496_s1  ;;  %s4501_s29 = sshll.u32 %s4639_s14, 4  ;;  %s4502_s29 = int_to_ptr.vmem [resolvable:$false] %s4501_s29 }
  0xf4   : > { %s4503_s25 = scalar_lea.vmem %s4502_s29, 4096  ;;  %p4504_p4 = scmp.lt.s32.totalorder %s638_s2, %s4502_s29 }
  0xf5   : > { %p4499_p7 = pnand %p4497_p6, %p4828_p5  ;;  %p4505_p9 = scmp.lt.s32.totalorder %s4503_s25, %s4496_s1 }
  0xf7   : > { %p4500_p11 = pneg %p4499_p7  ;;  %p4506_p8 = por %p4505_p9, %p4504_p4 }
  0xf9   : > { %p4507_p10 = pnand %p4506_p8, %p4500_p11 }
  0xfb   : > { %4510 = shalt.err (!%p4507_p10)
}
  0xfc   : > { %s5630_s23 = smov 4   ;;  %s5631_s18 = smov 64  }
  0xfd   : > { %s5632_s4 = scalar_lea.sflag [#allocation12], %s4798_s27  ;;  %s672_s30 = scalar_lea.hbm %s5581_s12, %s4814_s26 }
  0xfe   : > { %4081 = dma.hbm_to_vmem [thread:$0]  (!%p4802_p0), %s5026_s3, 2048, %s638_s2, %s5632_s4, %s5631_s18, %s5631_s18, %s5630_s23  }
  0xff   : > { %s667_s24 = scalar_lea.vmem [#allocation16], %s4789_s20  ;;  %s4511_s16 = scalar_lea.hbm %s672_s30, 16 }
 0x100   : > { %s674_s15 = sshll.u32 %s667_s24, 4  ;;  %p4512_p12 = scmp.ne.s32.totalorder %s672_s30, %s4511_s16  ;;  %s675_s15 = int_to_ptr.vmem [resolvable:$true] %s674_s15 }
 0x101   : > { %s4516_s29 = scalar_lea.hbm %s5581_s12, 32  ;;  %p4517_p2 = scmp.lt.s32.totalorder %s672_s30, %s5581_s12 }
 0x102   : > { %p4514_p13 = pnand %p4512_p12, %p4828_p5  ;;  %p4518_p3 = scmp.lt.s32.totalorder %s4516_s29, %s4511_s16 }
 0x104   : > { %p4515_p1 = pneg %p4514_p13  ;;  %p4519_p6 = por %p4518_p3, %p4517_p2 }
 0x106   : > { %p4520_p7 = pnand %p4519_p6, %p4515_p1 }
 0x108   : > { %4523 = shalt.err (!%p4520_p7)
}
 0x109   : > { %s4524_s3 = scalar_lea.vmem %s675_s15, 16  ;;  %s4640_s2 = smov [#allocation16]  }
 0x10a   : > { %p4525_p11 = scmp.ne.s32.totalorder %s675_s15, %s4524_s3  ;;  %s4529_s23 = sshll.u32 %s4640_s2, 4  ;;  %s4530_s23 = int_to_ptr.vmem [resolvable:$false] %s4529_s23 }
 0x10b   : > { %s4531_s18 = scalar_lea.vmem %s4530_s23, 32  ;;  %p4532_p8 = scmp.lt.s32.totalorder %s675_s15, %s4530_s23 }
 0x10c   : > { %p4527_p4 = pnand %p4525_p11, %p4828_p5  ;;  %p4533_p10 = scmp.lt.s32.totalorder %s4531_s18, %s4524_s3 }
 0x10e   : > { %p4528_p9 = pneg %p4527_p4  ;;  %p4534_p12 = por %p4533_p10, %p4532_p8 }
 0x110   : > { %p4535_p13 = pnand %p4534_p12, %p4528_p9 }
 0x112   : > { %4538 = shalt.err (!%p4535_p13)
}
 0x113   : > { %s5633_s6 = scalar_lea.sflag [#allocation15], %s4798_s27  ;;  %s5074_s21 = scalar_lea.hbm %s5582_s13, %s4814_s26 }
 0x114   : > { %4087 = dma.hbm_to_vmem [thread:$0]  (!%p4802_p0), %s672_s30, 16, %s675_s15, %s5633_s6  }
 0x115   : > { %s684_s24 = scalar_lea.vmem [#allocation17], %s4789_s20  ;;  %s682_s1 = scalar_lea.sflag [#allocation18], %s4798_s27 }
 0x116   : > { %s691_s16 = sshll.u32 %s684_s24, 4  ;;  %s4539_s14 = scalar_lea.hbm %s5074_s21, 16  ;;  %s692_s16 = int_to_ptr.vmem [resolvable:$true] %s691_s16 }
 0x117   : > { %p4540_p1 = scmp.ne.s32.totalorder %s5074_s21, %s4539_s14  ;;  %s4544_s30 = scalar_lea.hbm %s5582_s13, 32 }
 0x118   : > { %p4545_p6 = scmp.lt.s32.totalorder %s5074_s21, %s5582_s13  ;;  %p4546_p7 = scmp.lt.s32.totalorder %s4544_s30, %s4539_s14 }
 0x119   : > { %p4542_p2 = pnand %p4540_p1, %p4828_p5 }
 0x11a   : > { %p4547_p11 = por %p4546_p7, %p4545_p6 }
 0x11b   : > { %p4543_p3 = pneg %p4542_p2 }
 0x11d   : > { %p4548_p4 = pnand %p4547_p11, %p4543_p3 }
 0x11f   : > { %4551 = shalt.err (!%p4548_p4)
}
 0x120   : > { %s4552_s26 = scalar_lea.vmem %s692_s16, 16  ;;  %s4641_s20 = smov [#allocation17]  }
 0x121   : > { %p4553_p9 = scmp.ne.s32.totalorder %s692_s16, %s4552_s26  ;;  %s4557_s27 = sshll.u32 %s4641_s20, 4  ;;  %s4558_s27 = int_to_ptr.vmem [resolvable:$false] %s4557_s27 }
 0x122   : > { %s4559_s2 = scalar_lea.vmem %s4558_s27, 32  ;;  %p4560_p12 = scmp.lt.s32.totalorder %s692_s16, %s4558_s27 }
 0x123   : > { %p4555_p8 = pnand %p4553_p9, %p4828_p5  ;;  %p4561_p13 = scmp.lt.s32.totalorder %s4559_s2, %s4552_s26 }
 0x125   : > { %p4556_p10 = pneg %p4555_p8  ;;  %p4562_p1 = por %p4561_p13, %p4560_p12 }
 0x127   : > { %p4563_p2 = pnand %p4562_p1, %p4556_p10 }
 0x129   : > { %4566 = shalt.err (!%p4563_p2)
}
 0x12a   : > { %4090 = dma.hbm_to_vmem [thread:$0]  (!%p4802_p0), %s5074_s21, 16, %s692_s16, %s682_s1  }
 0x12b   : > { %p5634_p3 = scmp.ne.s32.totalorder %s5617_s17, 0 }
 0x12c   : > { %s5097_s19 = sand.u32 (!%p5634_p3), 1, %s4617_s22   ;;  %p5635_p5 = scmp.ne.s32.totalorder (!%p5634_p3), %s5616_s0, 0 }
 0x12d   : > { %700 = sbr.rel (%p5634_p3) target bundleno = 5327 (0x14cf), region = 84  ;;  %s3661_s23 = sshll.u32 (!%p5634_p3), %s5097_s19, 6 }
 0x12e   : > { %s703_s18 = scalar_lea.sflag (!%p5634_p3), [#allocation4], %s5097_s19  ;;  %s5101_s6 = scalar_lea.vmem (!%p5634_p3), [#allocation3], %s3661_s23 }
 0x132   : > { %4584 = dma.done.wait (%p5635_p5), %s703_s18, 1024  }
 0x133   : > { %4586 = vsyncadd (%p5635_p5), %s703_s18, 4294966272  ;;  %s5636_s28 = sld [smem:[#allocation28_spill]]  ;;  %s714_s5 = scalar_lea.vmem [#allocation5], %s5097_s19 }
 0x139   : > { %s711_s17 = sand.u32 1, %s5636_s28  }
 0x13a   : > { %s712_s4 = scalar_lea.sflag [#allocation6], %s711_s17 }
 0x13b   : > { %4588 = dma.done.wait (%p5635_p5), %s712_s4, 32  }
 0x13c   : > { %4590 = vsyncadd (%p5635_p5), %s712_s4, 4294967264  ;;  %s728_s24 = scalar_lea.sflag [#allocation9], %s711_s17 }
 0x13d   : > { %4592 = dma.done.wait (%p5635_p5), %s728_s24, 2064  }
 0x13e   : > { %4594 = vsyncadd (%p5635_p5), %s728_s24, 4294965232  ;;  %s3662_s1 = sshll.u32 %s5097_s19, 7  ;;  %s3663_s14 = sshll.u32 %s5097_s19, 1 }
 0x13f   : > { %s5121_s29 = scalar_lea.vmem [#allocation10], %s3662_s1  ;;  %s745_s25 = scalar_lea.sflag [#allocation12], %s711_s17 }
 0x140   : > { %s5123_s30 = scalar_lea.vmem [#allocation11], %s3663_s14 }
 0x141   : > { %4596 = dma.done.wait (%p5635_p5), %s745_s25, 2080  }
 0x142   : > { %4598 = vsyncadd (%p5635_p5), %s745_s25, 4294965216  ;;  %s5129_s15 = scalar_lea.vmem [#allocation13], %s3662_s1  ;;  %s763_s3 = scalar_lea.sflag [#allocation15], %s711_s17 }
 0x143   : > { %4600 = dma.done.wait (%p5635_p5), %s763_s3, 32  }
 0x144   : > { %4602 = vsyncadd (%p5635_p5), %s763_s3, 4294967264  ;;  %s779_s27 = scalar_lea.sflag [#allocation18], %s711_s17 }
 0x145   : > { %4604 = dma.done.wait (%p5635_p5), %s779_s27, 16  }
 0x146   : > { %4606 = vsyncadd (%p5635_p5), %s779_s27, 4294967280  ;;  %p5637_p0 = scmp.eq.s32.totalorder %s5636_s28, 0 }
 0x148   : > { %4608 = dma.done.wait (%p5637_p0), [#allocation18], 16   ;;  %p5638_p6 = pmov %p5637_p0 }
 0x149   : > { %p877_p7 = scmp.lt.s32.totalorder %s5636_s28, 1  ;;  %s5639_s1 = sld [smem:[#allocation33_spill]] }
 0x14a   : > { %4610 = vsyncadd (%p5638_p6), [#allocation18], 4294967280  ;;  %s5640_s3 = sld [smem:[#allocation34_spill]]  ;;  %p5641_p11 = scmp.ne.s32.totalorder %s5636_s28, 0 }
 0x14b   : > { %s878_s23 = scalar_select %p877_p7, %s5636_s28, 1 }
 0x14c   : > { %890 = sbr.rel (%p5641_p11) target bundleno = 340 (0x154), region = 132  ;;  %s5642_s26 = sld [smem:[#allocation31_spill]] (!%p5641_p11) }
 0x14d   : > { %s4030_s18 = smul.u32 192, %s878_s23 }
 0x14e   : > { %s4031_s4 = smul.u32 3, %s878_s23 }
 0x14f   : > { %s5151_s14 = scalar_lea.vmem %s5639_s1, %s4030_s18 }
 0x150   : > { %s5156_s27 = scalar_lea.vmem %s5640_s3, %s4031_s4 }
 0x152   : > { %v891_v0 = vld [vmem:[%s5642_s26] sm:$0xff]  ;;  %v892_v1 = vld [vmem:[%s5642_s26 + $0x8] sm:$0xff] }
 0x153   : > { %893 = vst [vmem:[#allocation2] sm:$0xff] %v891_v0  ;;  %894 = vst [vmem:[#allocation2 + $0x8] sm:$0xff] %v892_v1 }
 0x154 PF: > { %v4137_v2 = vld [vmem:[%s5151_s14 + $0xac] ss:$12 sps:$4 sm:$0xff]   ;;  %v4139_v3 = vld [vmem:[%s5151_s14 + $0xa8] ss:$12 sps:$4 sm:$0xff]   ;;  %v4642_v4 = vmov 0.0   ;;  %v4643_v5 = vmov 0   ;;  %v951_v31 = vlaneseq }
 0x155   : > { %3866 = vmatprep.subr.bf16.mxu1 %v4642_v4  ;;  %1126 = vmatprep.mubr.bf16.mxu0 %v4643_v5  ;;  %v4140_v6 = vld [vmem:[%s5151_s14 + $0x94] ss:$12 sps:$4 sm:$0xff]   ;;  %vm4644_vm0 = vmmov 0   ;;  %v4142_v7 = vld [vmem:[%s5151_s14 + $0x90] ss:$12 sps:$4 sm:$0xff]   ;;  %vm1178_vm1 = vcmask 261120  }
 0x156   : > { %1094 = vmatprep.subr.bf16.mxu0 %v4137_v2  ;;  %3882 = vmatprep.mubr.msk.bf16.mxu1 %vm4644_vm0, %v4642_v4  ;;  %v4143_v8 = vld [vmem:[%s5151_s14 + $0x7c] ss:$12 sps:$4 sm:$0xff]   ;;  %v4145_v10 = vld [vmem:[%s5151_s14 + $0x78] ss:$12 sps:$4 sm:$0xff]   ;;  %v4154_v13 = vld [vmem:[%s5151_s14 + $0x80] ss:$12 sps:$4 sm:$0xff]  }
 0x157   : > { %1095 = vmatpush1.bf16.msra.mxu0 %v4139_v3  ;;  %v4146_v9 = vld [vmem:[%s5151_s14 + $0xb0] ss:$12 sps:$4 sm:$0xff]   ;;  %v4150_v11 = vld [vmem:[%s5151_s14 + $0x98] ss:$12 sps:$4 sm:$0xff]   ;;  %v4149_v14 = vld [vmem:[%s5151_s14 + $0x60] ss:$12 sps:$4 sm:$0xff]  }
 0x158   : > { %1096 = vmatprep.subr.bf16.mxu0 %v4140_v6  ;;  %3867 = vmatpush3.bf16.msra.mxu1 %v4146_v9  ;;  %v4147_v12 = vld [vmem:[%s5151_s14 + $0x64] ss:$12 sps:$4 sm:$0xff]   ;;  %v4151_v15 = vld [vmem:[%s5151_s14 + $0x4c] ss:$12 sps:$4 sm:$0xff]   ;;  %v4158_v16 = vld [vmem:[%s5151_s14 + $0x68] ss:$12 sps:$4 sm:$0xff]  }
 0x159   : > { %3868 = vmatprep.subr.bf16.mxu1 %v4642_v4  ;;  %v4153_v17 = vld [vmem:[%s5151_s14 + $0x48] ss:$12 sps:$4 sm:$0xff]   ;;  %v4162_v19 = vld [vmem:[%s5151_s14 + $0x50] ss:$12 sps:$4 sm:$0xff]   ;;  %v4166_v22 = vld [vmem:[%s5151_s14 + $0x38] ss:$12 sps:$4 sm:$0xff]  }
 0x15a   : > { %v4155_v18 = vld [vmem:[%s5151_s14 + $0x34] ss:$12 sps:$4 sm:$0xff]   ;;  %v4157_v20 = vld [vmem:[%s5151_s14 + $0x30] ss:$12 sps:$4 sm:$0xff]   ;;  %v4161_v23 = vld [vmem:[%s5151_s14 + $0x18] ss:$12 sps:$4 sm:$0xff]  }
 0x15b   : > { %1097 = vmatpush1.bf16.msra.mxu0 %v4142_v7  ;;  %v4159_v21 = vld [vmem:[%s5151_s14 + $0x1c] ss:$12 sps:$4 sm:$0xff]   ;;  %v4163_v24 = vld [vmem:[%s5151_s14 + $0x4] ss:$12 sps:$4 sm:$0xff]   ;;  %v4167_v25 = vld [vmem:[%s5151_s14 + $0x20] ss:$12 sps:$4 sm:$0xff]  }
 0x15c   : > { %1098 = vmatprep.subr.bf16.mxu0 %v4143_v8  ;;  %3869 = vmatpush3.bf16.msra.mxu1 %v4150_v11  ;;  %v4165_v26 = vld [vmem:[%s5151_s14] ss:$12 sps:$4 sm:$0xff]   ;;  %v4168_v29 = vld [vmem:[%s5151_s14 + $0x8] ss:$12 sps:$4 sm:$0xff]   ;;  %v5213_v32 = vshrl.u32 %v951_v31, 7  ;;  %s4645_s28 = smov 96  }
 0x15d   : > { %3870 = vmatprep.subr.bf16.mxu1 %v4642_v4  ;;  %v5198_v27 = vld [vmem:[#allocation2] sm:$0xff]  ;;  %v5200_v28 = vld [vmem:[#allocation2 + $0x8] sm:$0xff]  ;;  %s4646_s21 = smov 64   ;;  %s5643_s2 = sld [smem:[#allocation32_spill]]  ;;  %vm1257_vm2 = vcmask 64512  }
 0x15e   : > { %v949_v30 = vpack.c.bf16 %v5200_v28, %v5198_v27  ;;  %v957_v33 = vsub.s32 1, %v5213_v32  ;;  %v961_v34 = vsub.s32 2, %v5213_v32  ;;  %v931_v35 = vld [vmem:[%s5156_s27] sm:$0x7]  ;;  %v953_v36 = vsub.s32 0, %v5213_v32  ;;  %s4647_s23 = smov 32  }
 0x15f   : > { %1099 = vmatpush1.bf16.msra.mxu0 %v4145_v10  ;;  %s5649_s1 = sld [smem:[#allocation40_spill]] }
 0x160   : > { %1100 = vmatprep.subr.bf16.mxu0 %v4147_v12  ;;  %3871 = vmatpush3.bf16.msra.mxu1 %v4154_v13  ;;  %v5221_v37 = vrot.slane %v931_v35, %v957_v33  ;;  %v5223_v39 = vrot.slane %v931_v35, %v961_v34  ;;  %v954_v40 = vrot.slane %v931_v35, %v953_v36  ;;  %v5282_v12 = vld [vmem:[%s5101_s6 + $0x8] sm:$0xff]   ;;  %s5650_s0 = sld [smem:[#allocation28_spill]] }
 0x161   : > { %3872 = vmatprep.subr.bf16.mxu1 %v4642_v4 }
 0x163   : > { %1101 = vmatpush1.bf16.msra.mxu0 %v4149_v14  ;;  %v5264_v53 = vld [vmem:[%s5643_s2] sm:$0xff] }
 0x164   : > { %1102 = vmatprep.subr.bf16.mxu0 %v4151_v15  ;;  %3873 = vmatpush3.bf16.msra.mxu1 %v4158_v16  ;;  %v5288_v15 = vld [vmem:[%s5101_s6] sm:$0xff]   ;;  %v5296_v16 = vld [vmem:[%s5101_s6 + $0x18] sm:$0xff]  }
 0x165   : > { %3874 = vmatprep.subr.bf16.mxu1 %v4642_v4 }
 0x166   : > { %p3770_p4 = scmp.ne.s32.totalorder %s5650_s0, 1 }
 0x167   : > { %1103 = vmatpush1.bf16.msra.mxu0 %v4153_v17  ;;  %s5651_s27 = sld [smem:[#allocation38_spill]] (!%p3770_p4) }
 0x168   : > { %1104 = vmatprep.subr.bf16.mxu0 %v4155_v18  ;;  %3875 = vmatpush3.bf16.msra.mxu1 %v4162_v19  ;;  %v5303_v19 = vld [vmem:[%s5101_s6 + $0x10] sm:$0xff]   ;;  %s5652_s16 = sld [smem:[#allocation40_spill]] (!%p3770_p4) }
 0x169   : > { %3876 = vmatprep.subr.bf16.mxu1 %v4642_v4 }
 0x16b   : > { %1105 = vmatpush1.bf16.msra.mxu0 %v4157_v20 }
 0x16c   : > { %1106 = vmatprep.subr.bf16.mxu0 %v4159_v21  ;;  %3877 = vmatpush3.bf16.msra.mxu1 %v4166_v22 }
 0x16d   : > { %3878 = vmatprep.subr.bf16.mxu1 %v4642_v4 }
 0x16f   : > { %1107 = vmatpush1.bf16.msra.mxu0 %v4161_v23 }
 0x170   : > { %1108 = vmatprep.subr.bf16.mxu0 %v4163_v24  ;;  %3879 = vmatpush3.bf16.msra.mxu1 %v4167_v25 }
 0x171   : > { %3880 = vmatprep.subr.bf16.mxu1 %v4642_v4 }
 0x173   : > { %1109 = vmatpush1.bf16.msra.mxu0 %v4165_v26 }
 0x174   : > { %3886 = vmatprep.subr.mxu0 %v4642_v4  ;;  %3881 = vmatpush3.bf16.msra.mxu1 %v4168_v29 }
 0x175   : > { %3891 = vmatprep.subr.mxu1 %v4642_v4 }
 0x176   : > { %1127 = vmatmul.mubr.bf16.vlgmr.msra.gmra.mxu0 %v949_v30 }
 0x177   : > { %3888 = vmatprep.mubr.msk.f32.mxu0 %vm4644_vm0, %v4642_v4  ;;  %3883 = vmatmul.mubr.bf16.vlgmr.msra.gmra.mxu1 %v949_v30 }
 0x178   : > { %3893 = vmatprep.mubr.msk.f32.mxu1 %vm4644_vm0, %v4642_v4 }
 0x236   : > { %v1128_v38 = vpop.f32.mrf.mxu0 }
 0x237   : > { %v1171_v43 = vpop.f32.mrf.mxu1  ;;  %v5239_v48 = vadd.f32 %v1128_v38, %v954_v40 }
 0x238   : > { %v1130_v41 = vpop.f32.mrf.mxu0  ;;  %v5231_v45 = vadd.f32 %v1171_v43, %v5223_v39 }
 0x239   : > { %v5228_v42 = vadd.f32 %v1130_v41, %v5221_v37  ;;  %v3884_v47 = vpop.f32.mrf.mxu1 }
 0x23a   : > { %v1132_v44 = vpop.f32.mrf.mxu0  ;;  %3892 = vmatpush3.msra.mxu1 %v5231_v45 }
 0x23b   : > { %v5233_v46 = vadd.f32 %v1132_v44, %v954_v40  ;;  %1345 = vrot.lane.b32.xlu0 %v5228_v42, %s4645_s28  ;;  %3887 = vmatpush3.xpose.msk.msra.mxu0 %vm1178_vm1, %v5228_v42  ;;  %v5268_v58 = vpop.f32.mrf.mxu1 }
 0x23c   : > { %3896 = vmatprep.subr.mxu0 %v4642_v4  ;;  %3901 = vmatprep.subr.mxu1 %v4642_v4  ;;  %v5259_v51 = vpop.f32.mrf.mxu0 }
 0x23d   : > { %v3885_v59 = vpop.f32.mrf.mxu1 }
 0x23e   : > { %3889 = vmatmul.mubr.msk.f32.vlgmr.msra.gmra.mxu0 %vm1178_vm1, %v5239_v48 }
 0x23f   : > { %1343 = vrot.lane.b32.xlu0 %v5239_v48, %s4645_s28  ;;  %3898 = vmatprep.mubr.msk.f32.mxu0 %vm4644_vm0, %v4642_v4 }
 0x243   : > { %1433 = vrot.lane.b32.xlu0 %v5231_v45, %s4645_s28 }
 0x247   : > { %1624 = vrot.lane.b32.xlu0 %v5228_v42, %s4646_s21 }
 0x2ad   : > { %v1346_v49 = vpop.permute.xlu0 %1345 }
 0x2ae   : > { %3897 = vmatpush3.xpose.msk.msra.mxu0 %vm1178_vm1, %v1346_v49 }
 0x2af   : > { %3906 = vmatprep.subr.bf16.mxu0 %v4642_v4 }
 0x2b1   : > { %v1344_v50 = vpop.permute.xlu0 %1343 }
 0x2b2   : > { %3899 = vmatmul.mubr.msk.f32.vlgmr.msra.gmra.mxu0 %vm1178_vm1, %v1344_v50 }
 0x2b3   : > { %3910 = vmatprep.mubr.msk.bf16.mxu0 %vm4644_vm0, %v4642_v4  ;;  %3907 = vmatpush3.bf16.msra.mxu0 %v5296_v16 }
 0x2b4   : > { %3908 = vmatprep.subr.bf16.mxu0 %v4642_v4 }
 0x2b5   : > { %v1434_v7 = vpop.permute.xlu0 %1433 }
 0x2b7   : > { %3909 = vmatpush3.bf16.msra.mxu0 %v5303_v19 }
 0x2b8   : > { %3922 = vmatprep.subr.mxu0 %v4642_v4 }
 0x2b9   : > { %v1625_v17 = vpop.permute.xlu0 %1624 }
 0x2fe   : > { %v1251_v52 = vpop.f32.mrf.mxu0 }
 0x2ff   : > { %v1255_v54 = vmul.f32 0.17677669, %v1251_v52 }
 0x300   : > { %v3890_v55 = vpop.f32.mrf.mxu0 }
 0x301   : > { %v1256_v56 = vadd.f32 %v1255_v54, %v5264_v53 }
 0x303   : > { %v1258_v57 = vsel %vm1257_vm2, %v1256_v56, -inf }
 0x304   : > { %1259 = vmax.xlane.f32.xlu1 %v1258_v57 }
 0x372   : > { %v1417_v60 = vpop.f32.mrf.mxu0 }
 0x373   : > { %v1421_v61 = vmul.f32 0.17677669, %v1417_v60 }
 0x374   : > { %v3900_v62 = vpop.f32.mrf.mxu0 }
 0x375   : > { %v1422_v63 = vadd.f32 %v1421_v61, %v5264_v53 }
 0x377   : > { %v1423_v0 = vsel %vm1257_vm2, %v1422_v63, -inf }
 0x378   : > { %1424 = vmax.xlane.f32.xlu1 %v1423_v0 }
 0x38d   : > { %v1260_v1 = vpop.xlane.xlu1 %1259 }
 0x38e   : > { %v1261_v2 = vsub.f32 %v1256_v56, %v1260_v1 }
 0x390   : > { %v1262_v3 = vmul.f32 1.442695, %v1261_v2 }
 0x392   : > { %4217 = vpow2.f32 %v1262_v3 }
 0x39f   : > { %v4218_v6 = vpop.eup %4217 }
 0x3a0   : > { %3894 = vmatmul.mubr.msk.f32.vlgmr.msra.gmra.mxu1 %vm1257_vm2, %v4218_v6  ;;  %v1264_v8 = vsel %vm1257_vm2, %v4218_v6, 0.0 }
 0x3a1   : > { %1265 = vadd.xlane.f32.xlu0 %v1264_v8  ;;  %3902 = vmatpush3.msra.mxu1 %v1434_v7 }
 0x3a2   : > { %3903 = vmatprep.mubr.msk.f32.mxu1 %vm4644_vm0, %v4642_v4  ;;  %3914 = vmatprep.subr.bf16.mxu1 %v4642_v4 }
 0x3b7   : > { %1711 = vrot.lane.b32.xlu0 %v5231_v45, %s4646_s21 }
 0x3bb   : > { %1846 = vrot.lane.b32.xlu0 %v5239_v48, %s4647_s23 }
 0x401   : > { %v1425_v9 = vpop.xlane.xlu1 %1424 }
 0x402   : > { %v1426_v10 = vsub.f32 %v1422_v63, %v1425_v9  ;;  %v5342_v9 = vadd.f32 %v5259_v51, %v5221_v37 }
 0x404   : > { %v1427_v11 = vmul.f32 1.442695, %v1426_v10 }
 0x406   : > { %4219 = vpow2.f32 %v1427_v11  ;;  %v5348_v11 = vld [vmem:[%s5101_s6 + $0x28] sm:$0xff]  }
 0x413   : > { %v4220_v13 = vpop.eup %4219 }
 0x414   : > { %3904 = vmatmul.mubr.msk.f32.vlgmr.msra.gmra.mxu1 %vm1257_vm2, %v4220_v13  ;;  %v1429_v14 = vsel %vm1257_vm2, %v4220_v13, 0.0  ;;  %v5352_v13 = vld [vmem:[%s5101_s6 + $0x20] sm:$0xff]  }
 0x415   : > { %1430 = vadd.xlane.f32.xlu1 %v1429_v14  ;;  %3915 = vmatpush3.bf16.msra.mxu1 %v5282_v12 }
 0x416   : > { %3916 = vmatprep.subr.bf16.mxu1 %v4642_v4  ;;  %3918 = vmatprep.mubr.msk.bf16.mxu1 %vm4644_vm0, %v4642_v4 }
 0x419   : > { %3917 = vmatpush3.bf16.msra.mxu1 %v5288_v15 }
 0x41a   : > { %3927 = vmatprep.subr.mxu1 %v4642_v4 }
 0x426   : > { %1622 = vrot.lane.b32.xlu1 %v5239_v48, %s4646_s21 }
 0x42a   : > { %v1266_v18 = vpop.xlane.xlu0 %1265 }
 0x42b   : > { %4221 = vrcp.f32 %v1266_v18 }
 0x42e   : > { %v1712_v25 = vpop.permute.xlu0 %1711 }
 0x432   : > { %v1847_v0 = vpop.permute.xlu0 %1846 }
 0x438   : > { %v4222_v20 = vpop.eup %4221 }
 0x460   : > { %v1336_v21 = vpop.f32.mrf.mxu1 }
 0x461   : > { %v1341_v22 = vmul.f32 %v4222_v20, %v1336_v21 }
 0x462   : > { %v3895_v23 = vpop.f32.mrf.mxu1 }
 0x463   : > { %v1342_v24 = vpack.c.bf16 %v1341_v22, %v1341_v22 }
 0x465   : > { %3919 = vmatmul.mubr.msk.bf16.vlgmr.msra.gmra.mxu1 %vm1178_vm1, %v1342_v24 }
 0x466   : > { %3928 = vmatpush3.msra.mxu1 %v1712_v25  ;;  %3929 = vmatprep.mubr.msk.f32.mxu1 %vm4644_vm0, %v4642_v4  ;;  %v5379_v25 = vld [vmem:[%s5643_s2 + $0x8] sm:$0xff] }
 0x467   : > { %3940 = vmatprep.subr.mxu1 %v4642_v4 }
 0x49e   : > { %v1431_v26 = vpop.xlane.xlu1 %1430 }
 0x49f   : > { %4223 = vrcp.f32 %v1431_v26 }
 0x4a2   : > { %v1623_v38 = vpop.permute.xlu1 %1622 }
 0x4ac   : > { %v4224_v29 = vpop.eup %4223 }
 0x4d4   : > { %v1505_v30 = vpop.f32.mrf.mxu1 }
 0x4d5   : > { %v1510_v31 = vmul.f32 %v4224_v29, %v1505_v30 }
 0x4d6   : > { %v3905_v34 = vpop.f32.mrf.mxu1 }
 0x4d7   : > { %v1511_v35 = vpack.c.bf16 %v1510_v31, %v1510_v31 }
 0x4d9   : > { %3911 = vmatmul.mubr.msk.bf16.vlgmr.msra.gmra.mxu0 %vm1178_vm1, %v1511_v35 }
 0x4da   : > { %3923 = vmatpush3.xpose.msk.msra.mxu0 %vm1178_vm1, %v1625_v17  ;;  %3924 = vmatprep.mubr.msk.f32.mxu0 %vm4644_vm0, %v4642_v4  ;;  %v5365_v17 = vadd.f32 %v5268_v58, %v5223_v39 }
 0x4db   : > { %3932 = vmatprep.subr.bf16.mxu0 %v4642_v4 }
 0x4e1   : > { %3925 = vmatmul.mubr.msk.f32.vlgmr.msra.gmra.mxu0 %vm1178_vm1, %v1623_v38 }
 0x4e2   : > { %3936 = vmatprep.mubr.msk.bf16.mxu0 %vm4644_vm0, %v4642_v4  ;;  %3933 = vmatpush3.bf16.msra.mxu0 %v5348_v11 }
 0x4e3   : > { %3934 = vmatprep.subr.bf16.mxu0 %v4642_v4 }
 0x4e6   : > { %3935 = vmatpush3.bf16.msra.mxu0 %v5352_v13 }
 0x4e7   : > { %3950 = vmatprep.subr.bf16.mxu0 %v4642_v4 }
 0x525   : > { %v5319_v40 = vpop.f32.mrf.mxu1 }
 0x527   : > { %v3920_v41 = vpop.f32.mrf.mxu1 }
 0x529   : > { %v1619_v43 = vpop.f32.mrf.mxu1 }
 0x52b   : > { %v3921_v44 = vpop.f32.mrf.mxu1 }
 0x599   : > { %v5321_v47 = vpop.f32.mrf.mxu0 }
 0x59a   : > { %v1617_v34 = vadd.f32 %v5319_v40, %v5321_v47 }
 0x59b   : > { %v3912_v48 = vpop.f32.mrf.mxu0 }
 0x59d   : > { %v1564_v49 = vpop.f32.mrf.mxu0 }
 0x59e   : > { %v5389_v49 = vld [vmem:[%s5101_s6 + $0x38] sm:$0xff]  }
 0x59f   : > { %v3913_v50 = vpop.f32.mrf.mxu0 }
 0x5a0   : > { %v5393_v50 = vld [vmem:[%s5101_s6 + $0x30] sm:$0xff]   ;;  %s5644_s6 = scalar_lea.vmem [#allocation7], %s5097_s19 }
 0x5a1   : > { %v1696_v52 = vpop.f32.mrf.mxu0 }
 0x5a2   : > { %v1700_v54 = vmul.f32 0.17677669, %v1696_v52 }
 0x5a3   : > { %v3926_v55 = vpop.f32.mrf.mxu0 }
 0x5a4   : > { %v1701_v56 = vadd.f32 %v1700_v54, %v5264_v53 }
 0x5a6   : > { %v1702_v57 = vsel %vm1257_vm2, %v1701_v56, -inf }
 0x5a7   : > { %1703 = vmax.xlane.f32.xlu1 %v1702_v57 }
 0x5b8   : > { %1848 = vrot.lane.b32.xlu1 %v5228_v42, %s4647_s23 }
 0x5bc   : > { %1935 = vrot.lane.b32.xlu1 %v5231_v45, %s4647_s23 }
 0x630   : > { %v1704_v59 = vpop.xlane.xlu1 %1703 }
 0x631   : > { %v1705_v60 = vsub.f32 %v1701_v56, %v1704_v59 }
 0x633   : > { %v1706_v61 = vmul.f32 1.442695, %v1705_v60 }
 0x634   : > { %v1849_v62 = vpop.permute.xlu1 %1848 }
 0x635   : > { %4225 = vpow2.f32 %v1706_v61 }
 0x638   : > { %v1936_v42 = vpop.permute.xlu1 %1935 }
 0x642   : > { %v4226_v63 = vpop.eup %4225 }
 0x643   : > { %3930 = vmatmul.mubr.msk.f32.vlgmr.msra.gmra.mxu1 %vm1257_vm2, %v4226_v63  ;;  %v1708_v10 = vsel %vm1257_vm2, %v4226_v63, 0.0 }
 0x644   : > { %3941 = vmatpush3.xpose.msk.msra.mxu1 %vm1178_vm1, %v1849_v62  ;;  %3942 = vmatprep.mubr.msk.f32.mxu1 %vm4644_vm0, %v4642_v4 }
 0x645   : > { %3945 = vmatprep.subr.mxu1 %v4642_v4 }
 0x647   : > { %3943 = vmatmul.mubr.msk.f32.vlgmr.msra.gmra.mxu1 %vm1178_vm1, %v1847_v0 }
 0x648   : > { %3946 = vmatpush3.msra.mxu1 %v1936_v42  ;;  %3947 = vmatprep.mubr.msk.f32.mxu1 %vm4644_vm0, %v4642_v4 }
 0x649   : > { %3958 = vmatprep.subr.mxu1 %v4642_v4 }
 0x703   : > { %v1783_v45 = vpop.f32.mrf.mxu1 }
 0x705   : > { %v3931_v1 = vpop.f32.mrf.mxu1 }
 0x707   : > { %v1920_v2 = vpop.f32.mrf.mxu1 }
 0x708   : > { %v1924_v3 = vmul.f32 0.17677669, %v1920_v2 }
 0x709   : > { %v3944_v6 = vpop.f32.mrf.mxu1 }
 0x70a   : > { %v1925_v7 = vadd.f32 %v1924_v3, %v5264_v53 }
 0x70c   : > { %v1926_v8 = vsel %vm1257_vm2, %v1925_v7, -inf }
 0x70d   : > { %1927 = vmax.xlane.f32.xlu0 %v1926_v8 }
 0x723   : > { %2235 = vrot.lane.b32.xlu0 %v5342_v9, %s4645_s28 }
 0x742   : > { %1709 = vadd.xlane.f32.xlu0 %v1708_v10 }
 0x796   : > { %v1928_v37 = vpop.xlane.xlu0 %1927 }
 0x797   : > { %v1929_v51 = vsub.f32 %v1925_v7, %v1928_v37 }
 0x799   : > { %v1930_v53 = vmul.f32 1.442695, %v1929_v51 }
 0x79a   : > { %v2236_v18 = vpop.permute.xlu0 %2235 }
 0x79b   : > { %4227 = vpow2.f32 %v1930_v53 }
 0x7a8   : > { %v4228_v14 = vpop.eup %4227 }
 0x7a9   : > { %3948 = vmatmul.mubr.msk.f32.vlgmr.msra.gmra.mxu1 %vm1257_vm2, %v4228_v14  ;;  %v1932_v48 = vsel %vm1257_vm2, %v4228_v14, 0.0 }
 0x7aa   : > { %3959 = vmatpush3.xpose.msk.msra.mxu1 %vm1178_vm1, %v5342_v9  ;;  %3960 = vmatprep.mubr.msk.f32.mxu1 %vm4644_vm0, %v4642_v4 }
 0x7ab   : > { %3963 = vmatprep.subr.mxu1 %v4642_v4 }
 0x7ad   : > { %3961 = vmatmul.mubr.msk.f32.vlgmr.msra.gmra.mxu1 %vm1178_vm1, %v5233_v46 }
 0x7ae   : > { %3964 = vmatpush3.msra.mxu1 %v5365_v17  ;;  %3965 = vmatprep.mubr.msk.f32.mxu1 %vm4644_vm0, %v4642_v4 }
 0x7af   : > { %3968 = vmatprep.subr.mxu1 %v4642_v4 }
 0x7cb   : > { %v1710_v20 = vpop.xlane.xlu0 %1709 }
 0x7cc   : > { %4229 = vrcp.f32 %v1710_v20 }
 0x7d9   : > { %v4230_v21 = vpop.eup %4229 }
 0x7da   : > { %v1788_v22 = vmul.f32 %v4230_v21, %v1783_v45 }
 0x7dc   : > { %v1789_v23 = vpack.c.bf16 %v1788_v22, %v1788_v22 }
 0x7de   : > { %3937 = vmatmul.mubr.msk.bf16.vlgmr.msra.gmra.mxu0 %vm1178_vm1, %v1789_v23 }
 0x7df   : > { %3954 = vmatprep.mubr.msk.bf16.mxu0 %vm4644_vm0, %v4642_v4  ;;  %3951 = vmatpush3.bf16.msra.mxu0 %v5389_v49 }
 0x7e0   : > { %3952 = vmatprep.subr.bf16.mxu0 %v4642_v4 }
 0x7e3   : > { %3953 = vmatpush3.bf16.msra.mxu0 %v5393_v50 }
 0x7e4   : > { %3973 = vmatprep.subr.mxu0 %v4642_v4 }
 0x869   : > { %v2007_v39 = vpop.f32.mrf.mxu1 }
 0x86b   : > { %v3949_v58 = vpop.f32.mrf.mxu1 }
 0x86d   : > { %v2142_v24 = vpop.f32.mrf.mxu1 }
 0x86e   : > { %v2146_v26 = vmul.f32 0.17677669, %v2142_v24 }
 0x86f   : > { %v3962_v29 = vpop.f32.mrf.mxu1 }
 0x870   : > { %v2147_v30 = vadd.f32 %v2146_v26, %v5379_v25 }
 0x872   : > { %v2148_v31 = vsel %vm1257_vm2, %v2147_v30, -inf }
 0x873   : > { %2149 = vmax.xlane.f32.xlu1 %v2148_v31 }
 0x884   : > { %2233 = vrot.lane.b32.xlu1 %v5233_v46, %s4645_s28 }
 0x89e   : > { %v1839_v35 = vpop.f32.mrf.mxu0 }
 0x89f   : > { %v1845_v38 = vadd.f32 %v1839_v35, %v1617_v34 }
 0x8a0   : > { %v3938_v41 = vpop.f32.mrf.mxu0 }
 0x8a2   : > { %v1842_v43 = vpop.f32.mrf.mxu0 }
 0x8a4   : > { %v3939_v44 = vpop.f32.mrf.mxu0 }
 0x8a8   : > { %1933 = vadd.xlane.f32.xlu1 %v1932_v48 }
 0x8fc   : > { %v2150_v40 = vpop.xlane.xlu1 %2149 }
 0x8fd   : > { %v2151_v47 = vsub.f32 %v2147_v30, %v2150_v40 }
 0x8ff   : > { %v2152_v52 = vmul.f32 1.442695, %v2151_v47 }
 0x900   : > { %v2234_v55 = vpop.permute.xlu1 %2233 }
 0x901   : > { %4231 = vpow2.f32 %v2152_v52 }
 0x90e   : > { %v4232_v54 = vpop.eup %4231 }
 0x90f   : > { %3966 = vmatmul.mubr.msk.f32.vlgmr.msra.gmra.mxu1 %vm1257_vm2, %v4232_v54  ;;  %v2154_v7 = vsel %vm1257_vm2, %v4232_v54, 0.0 }
 0x910   : > { %3969 = vmatpush3.xpose.msk.msra.mxu1 %vm1178_vm1, %v2236_v18  ;;  %3970 = vmatprep.mubr.msk.f32.mxu1 %vm4644_vm0, %v4642_v4 }
 0x911   : > { %3978 = vmatprep.subr.bf16.mxu1 %v4642_v4 }
 0x913   : > { %3971 = vmatmul.mubr.msk.f32.vlgmr.msra.gmra.mxu1 %vm1178_vm1, %v2234_v55 }
 0x914   : > { %3979 = vmatpush3.bf16.msra.mxu1 %v5296_v16  ;;  %3982 = vmatprep.mubr.msk.bf16.mxu1 %vm4644_vm0, %v4642_v4 }
 0x915   : > { %3980 = vmatprep.subr.bf16.mxu1 %v4642_v4 }
 0x918   : > { %3981 = vmatpush3.bf16.msra.mxu1 %v5303_v19 }
 0x919   : > { %3994 = vmatprep.subr.mxu1 %v4642_v4 }
 0x931   : > { %v1934_v56 = vpop.xlane.xlu1 %1933 }
 0x932   : > { %4233 = vrcp.f32 %v1934_v56 }
 0x93f   : > { %v4234_v57 = vpop.eup %4233 }
 0x940   : > { %v2012_v59 = vmul.f32 %v4234_v57, %v2007_v39 }
 0x942   : > { %v2013_v60 = vpack.c.bf16 %v2012_v59, %v2012_v59 }
 0x944   : > { %3955 = vmatmul.mubr.msk.bf16.vlgmr.msra.gmra.mxu0 %vm1178_vm1, %v2013_v60 }
 0x945   : > { %3975 = vmatprep.mubr.msk.f32.mxu0 %vm4644_vm0, %v4642_v4 }
 0x9cf   : > { %v2226_v16 = vpop.f32.mrf.mxu1 }
 0x9d1   : > { %v3967_v61 = vpop.f32.mrf.mxu1 }
 0x9d3   : > { %v2307_v62 = vpop.f32.mrf.mxu1 }
 0x9d4   : > { %v2311_v63 = vmul.f32 0.17677669, %v2307_v62 }
 0x9d5   : > { %v3972_v0 = vpop.f32.mrf.mxu1 }
 0x9d6   : > { %v2312_v42 = vadd.f32 %v2311_v63, %v5379_v25 }
 0x9d8   : > { %v2313_v19 = vsel %vm1257_vm2, %v2312_v42, -inf }
 0x9d9   : > { %2314 = vmax.xlane.f32.xlu0 %v2313_v19 }
 0x9ef   : > { %2323 = vrot.lane.b32.xlu0 %v5365_v17, %s4645_s28 }
 0x9f3   : > { %2488 = vrot.lane.b32.xlu0 %v5233_v46, %s4646_s21 }
 0xa04   : > { %v2063_v45 = vpop.f32.mrf.mxu0 }
 0xa05   : > { %v5419_v1 = vadd.f32 %v2063_v45, %v1845_v38 }
 0xa06   : > { %v3956_v2 = vpop.f32.mrf.mxu0 }
 0xa08   : > { %v2066_v3 = vpop.f32.mrf.mxu0 }
 0xa0a   : > { %v3957_v6 = vpop.f32.mrf.mxu0 }
 0xa12   : > { %2155 = vadd.xlane.f32.xlu0 %v2154_v7 }
 0xa28   : > { %2577 = vrot.lane.b32.xlu0 %v5365_v17, %s4646_s21 }
 0xa2c   : > { %2700 = vrot.lane.b32.xlu0 %v5233_v46, %s4647_s23 }
 0xa62   : > { %v2315_v8 = vpop.xlane.xlu0 %2314 }
 0xa63   : > { %v2316_v10 = vsub.f32 %v2312_v42, %v2315_v8 }
 0xa65   : > { %v2317_v37 = vmul.f32 1.442695, %v2316_v10  ;;  %v3732_v10 = vld [vmem:[%s714_s5] ss:$0 sm:$0xff]  ;;  %s5645_s5 = scalar_lea.vmem [#allocation8], %s5097_s19 }
 0xa66   : > { %v2324_v51 = vpop.permute.xlu0 %2323 }
 0xa67   : > { %4235 = vpow2.f32 %v2317_v37  ;;  %3974 = vmatpush3.msra.mxu0 %v2324_v51 }
 0xa68   : > { %3986 = vmatprep.subr.bf16.mxu0 %v4642_v4 }
 0xa6a   : > { %v2489_v46 = vpop.permute.xlu0 %2488 }
 0xa74   : > { %v4236_v53 = vpop.eup %4235 }
 0xa75   : > { %3976 = vmatmul.mubr.msk.f32.vlgmr.msra.gmra.mxu0 %vm1257_vm2, %v4236_v53  ;;  %v2319_v14 = vsel %vm1257_vm2, %v4236_v53, 0.0 }
 0xa76   : > { %2320 = vadd.xlane.f32.xlu1 %v2319_v14  ;;  %3987 = vmatpush3.bf16.msra.mxu0 %v5282_v12 }
 0xa77   : > { %3988 = vmatprep.subr.bf16.mxu0 %v4642_v4  ;;  %3990 = vmatprep.mubr.msk.bf16.mxu0 %vm4644_vm0, %v4642_v4 }
 0xa7a   : > { %3989 = vmatpush3.bf16.msra.mxu0 %v5288_v15 }
 0xa7b   : > { %3999 = vmatprep.subr.mxu0 %v4642_v4 }
 0xa87   : > { %2490 = vrot.lane.b32.xlu1 %v5342_v9, %s4646_s21 }
 0xa9b   : > { %v2156_v18 = vpop.xlane.xlu0 %2155 }
 0xa9c   : > { %4237 = vrcp.f32 %v2156_v18 }
 0xa9f   : > { %v2578_v23 = vpop.permute.xlu0 %2577 }
 0xaa9   : > { %v4238_v20 = vpop.eup %4237 }
 0xaaa   : > { %v2231_v21 = vmul.f32 %v4238_v20, %v2226_v16 }
 0xaac   : > { %v2232_v22 = vpack.c.bf16 %v2231_v21, %v2231_v21 }
 0xaae   : > { %3991 = vmatmul.mubr.msk.bf16.vlgmr.msra.gmra.mxu0 %vm1178_vm1, %v2232_v22 }
 0xaaf   : > { %4000 = vmatpush3.msra.mxu0 %v2578_v23  ;;  %4001 = vmatprep.mubr.msk.f32.mxu0 %vm4644_vm0, %v4642_v4 }
 0xab0   : > { %4012 = vmatprep.subr.mxu0 %v4642_v4 }
 0xaff   : > { %v2321_v12 = vpop.xlane.xlu1 %2320 }
 0xb00   : > { %4239 = vrcp.f32 %v2321_v12 }
 0xb03   : > { %v2491_v29 = vpop.permute.xlu1 %2490 }
 0xb0d   : > { %v4240_v15 = vpop.eup %4239 }
 0xb35   : > { %v2395_v39 = vpop.f32.mrf.mxu0 }
 0xb36   : > { %v2400_v58 = vmul.f32 %v4240_v15, %v2395_v39 }
 0xb37   : > { %v3977_v24 = vpop.f32.mrf.mxu0 }
 0xb38   : > { %v2401_v26 = vpack.c.bf16 %v2400_v58, %v2400_v58 }
 0xb3a   : > { %3983 = vmatmul.mubr.msk.bf16.vlgmr.msra.gmra.mxu1 %vm1178_vm1, %v2401_v26 }
 0xb3b   : > { %3995 = vmatpush3.xpose.msk.msra.mxu1 %vm1178_vm1, %v2491_v29  ;;  %3996 = vmatprep.mubr.msk.f32.mxu1 %vm4644_vm0, %v4642_v4 }
 0xb3c   : > { %4004 = vmatprep.subr.bf16.mxu1 %v4642_v4 }
 0xb42   : > { %3997 = vmatmul.mubr.msk.f32.vlgmr.msra.gmra.mxu1 %vm1178_vm1, %v2489_v46 }
 0xb43   : > { %4005 = vmatpush3.bf16.msra.mxu1 %v5348_v11  ;;  %4008 = vmatprep.mubr.msk.bf16.mxu1 %vm4644_vm0, %v4642_v4 }
 0xb44   : > { %4006 = vmatprep.subr.bf16.mxu1 %v4642_v4 }
 0xb47   : > { %4007 = vmatpush3.bf16.msra.mxu1 %v5352_v13 }
 0xb48   : > { %4022 = vmatprep.subr.bf16.mxu1 %v4642_v4 }
 0xb6e   : > { %v5453_v30 = vpop.f32.mrf.mxu0 }
 0xb70   : > { %v3992_v31 = vpop.f32.mrf.mxu0 }
 0xb72   : > { %v2485_v34 = vpop.f32.mrf.mxu0 }
 0xb74   : > { %v3993_v35 = vpop.f32.mrf.mxu0 }
 0xb75   : > { %v4177_v35 = vld [vmem:[%s5121_s29 + $0x70] ss:$8 sps:$4 sm:$0xff]  }
 0xbfa   : > { %v2439_v38 = vpop.f32.mrf.mxu1 }
 0xbfc   : > { %v3984_v41 = vpop.f32.mrf.mxu1 }
 0xbfd   : > { %v4182_v41 = vld [vmem:[%s5121_s29 + $0x64] ss:$8 sps:$4 sm:$0xff]  }
 0xbfe   : > { %v2442_v43 = vpop.f32.mrf.mxu1 }
 0xbff   : > { %v4180_v43 = vld [vmem:[%s5121_s29 + $0x60] ss:$8 sps:$4 sm:$0xff]  }
 0xc00   : > { %v3985_v44 = vpop.f32.mrf.mxu1 }
 0xc02   : > { %v2562_v48 = vpop.f32.mrf.mxu1 }
 0xc03   : > { %v2566_v11 = vmul.f32 0.17677669, %v2562_v48 }
 0xc04   : > { %v3998_v40 = vpop.f32.mrf.mxu1 }
 0xc05   : > { %v2567_v47 = vadd.f32 %v2566_v11, %v5379_v25  ;;  %v4185_v40 = vld [vmem:[%s5121_s29 + $0x54] ss:$8 sps:$4 sm:$0xff]  }
 0xc07   : > { %v2568_v52 = vsel %vm1257_vm2, %v2567_v47, -inf }
 0xc08   : > { %2569 = vmax.xlane.f32.xlu1 %v2568_v52  ;;  %v4186_v52 = vld [vmem:[%s5121_s29 + $0x40] ss:$8 sps:$4 sm:$0xff]  }
 0xc19   : > { %2702 = vrot.lane.b32.xlu1 %v5342_v9, %s4647_s23  ;;  %v2701_v9 = vpop.permute.xlu0 %2700 }
 0xc1d   : > { %2789 = vrot.lane.b32.xlu1 %v5365_v17, %s4647_s23 }
 0xc91   : > { %v2570_v13 = vpop.xlane.xlu1 %2569 }
 0xc92   : > { %v2571_v54 = vsub.f32 %v2567_v47, %v2570_v13  ;;  %v4183_v47 = vld [vmem:[%s5121_s29 + $0x50] ss:$8 sps:$4 sm:$0xff]   ;;  %v4188_v13 = vld [vmem:[%s5121_s29 + $0x44] ss:$8 sps:$4 sm:$0xff]  }
 0xc94   : > { %v2572_v55 = vmul.f32 1.442695, %v2571_v54  ;;  %v4191_v54 = vld [vmem:[%s5121_s29 + $0x34] ss:$8 sps:$4 sm:$0xff]  }
 0xc95   : > { %v2703_v56 = vpop.permute.xlu1 %2702 }
 0xc96   : > { %4241 = vpow2.f32 %v2572_v55  ;;  %v4189_v55 = vld [vmem:[%s5121_s29 + $0x30] ss:$8 sps:$4 sm:$0xff]  }
 0xc99   : > { %v2790_v17 = vpop.permute.xlu1 %2789 }
 0xca3   : > { %v4242_v57 = vpop.eup %4241 }
 0xca4   : > { %4002 = vmatmul.mubr.msk.f32.vlgmr.msra.gmra.mxu0 %vm1257_vm2, %v4242_v57  ;;  %v2574_v59 = vsel %vm1257_vm2, %v4242_v57, 0.0  ;;  %v4192_v57 = vld [vmem:[%s5121_s29 + $0x20] ss:$8 sps:$4 sm:$0xff]  }
 0xca5   : > { %4013 = vmatpush3.xpose.msk.msra.mxu0 %vm1178_vm1, %v2703_v56  ;;  %2575 = vadd.xlane.f32.xlu1 %v2574_v59  ;;  %v4194_v56 = vld [vmem:[%s5121_s29 + $0x24] ss:$8 sps:$4 sm:$0xff]   ;;  %v4197_v59 = vld [vmem:[%s5121_s29 + $0x14] ss:$8 sps:$4 sm:$0xff]  }
 0xca6   : > { %4014 = vmatprep.mubr.msk.f32.mxu0 %vm4644_vm0, %v4642_v4  ;;  %4017 = vmatprep.subr.mxu0 %v4642_v4 }
 0xca8   : > { %4015 = vmatmul.mubr.msk.f32.vlgmr.msra.gmra.mxu0 %vm1178_vm1, %v2701_v9  ;;  %v4195_v9 = vld [vmem:[%s5121_s29 + $0x10] ss:$8 sps:$4 sm:$0xff]  }
 0xca9   : > { %4018 = vmatpush3.msra.mxu0 %v2790_v17  ;;  %4019 = vmatprep.mubr.msk.f32.mxu0 %vm4644_vm0, %v4642_v4  ;;  %v4200_v17 = vld [vmem:[%s5121_s29 + $0x4] ss:$8 sps:$4 sm:$0xff]  }
 0xd2e   : > { %v2576_v60 = vpop.xlane.xlu1 %2575 }
 0xd2f   : > { %4243 = vrcp.f32 %v2576_v60  ;;  %v4198_v60 = vld [vmem:[%s5121_s29] ss:$8 sps:$4 sm:$0xff]  }
 0xd3c   : > { %v4244_v16 = vpop.eup %4243 }
 0xd64   : > { %v2649_v61 = vpop.f32.mrf.mxu0 }
 0xd65   : > { %v2654_v62 = vmul.f32 %v4244_v16, %v2649_v61  ;;  %v4201_v16 = vld [vmem:[%s5129_s15 + $0x78] sm:$0xff]  }
 0xd66   : > { %v4003_v63 = vpop.f32.mrf.mxu0  ;;  %v4202_v61 = vld [vmem:[%s5129_s15 + $0x38] sm:$0xff]  }
 0xd67   : > { %v2655_v0 = vpack.c.bf16 %v2654_v62, %v2654_v62  ;;  %v4203_v62 = vld [vmem:[%s5129_s15 + $0x70] sm:$0xff]  }
 0xd68   : > { %v2774_v42 = vpop.f32.mrf.mxu0  ;;  %v4204_v63 = vld [vmem:[%s5129_s15 + $0x30] sm:$0xff]  }
 0xd69   : > { %v2778_v19 = vmul.f32 0.17677669, %v2774_v42  ;;  %4009 = vmatmul.mubr.msk.bf16.vlgmr.msra.gmra.mxu1 %vm1178_vm1, %v2655_v0  ;;  %v4205_v0 = vld [vmem:[%s5129_s15 + $0x68] sm:$0xff]  }
 0xd6a   : > { %v4016_v45 = vpop.f32.mrf.mxu0  ;;  %4023 = vmatpush3.bf16.msra.mxu1 %v5389_v49  ;;  %4026 = vmatprep.mubr.msk.bf16.mxu1 %vm4644_vm0, %v4642_v4  ;;  %v2918_v49 = vadd.f32 %v3732_v10, %v5419_v1  ;;  %v4206_v42 = vld [vmem:[%s5129_s15 + $0x28] sm:$0xff]  }
 0xd6b   : > { %v2779_v2 = vadd.f32 %v2778_v19, %v5379_v25  ;;  %4024 = vmatprep.subr.bf16.mxu1 %v4642_v4  ;;  %v4207_v19 = vld [vmem:[%s5129_s15 + $0x60] sm:$0xff]  }
 0xd6c   : > { %v2922_v4 = vadd.f32 %v2918_v49, %v5198_v27  ;;  %v4208_v45 = vld [vmem:[%s5129_s15 + $0x20] sm:$0xff]  }
 0xd6d   : > { %v2780_v3 = vsel %vm1257_vm2, %v2779_v2, -inf }
 0xd6e   : > { %2781 = vmax.xlane.f32.xlu0 %v2780_v3  ;;  %4025 = vmatpush3.bf16.msra.mxu1 %v5393_v50  ;;  %v2483_v50 = vadd.f32 %v5453_v30, %v2439_v38  ;;  %v4179_v38 = vld [vmem:[%s5121_s29 + $0x74] ss:$8 sps:$4 sm:$0xff]   ;;  %s5646_s29 = scalar_lea.vmem [#allocation14], %s5097_s19 }
 0xd6f   : > { %3105 = vmatprep.subr.bf16.mxu0 %v4179_v38  ;;  %3844 = vmatprep.subr.bf16.mxu1 %v4201_v16  ;;  %v4210_v3 = vld [vmem:[%s5129_s15 + $0x18] sm:$0xff]   ;;  %v3751_v32 = vld [vmem:[%s5646_s29] ss:$0 sm:$0xff] }
 0xdf7   : > { %v2782_v6 = vpop.xlane.xlu0 %2781 }
 0xdf8   : > { %v2783_v7 = vsub.f32 %v2779_v2, %v2782_v6  ;;  %v4209_v2 = vld [vmem:[%s5129_s15 + $0x58] sm:$0xff]  }
 0xdfa   : > { %v2784_v8 = vmul.f32 1.442695, %v2783_v7 }
 0xdfc   : > { %4245 = vpow2.f32 %v2784_v8 }
 0xe09   : > { %v4246_v37 = vpop.eup %4245 }
 0xe0a   : > { %4020 = vmatmul.mubr.msk.f32.vlgmr.msra.gmra.mxu0 %vm1257_vm2, %v4246_v37  ;;  %v2786_v25 = vsel %vm1257_vm2, %v4246_v37, 0.0 }
 0xe0b   : > { %2787 = vadd.xlane.f32.xlu0 %v2786_v25  ;;  %3137 = vmatprep.mubr.bf16.mxu0 %v4643_v5 }
 0xe0c   : > { %3106 = vmatpush1.bf16.msra.mxu0 %v4177_v35 }
 0xe0d   : > { %3107 = vmatprep.subr.bf16.mxu0 %v4182_v41 }
 0xe0f   : > { %2924 = vadd.xlane.f32.xlu0 %v2922_v4 }
 0xe10   : > { %3108 = vmatpush1.bf16.msra.mxu0 %v4180_v43 }
 0xe11   : > { %3109 = vmatprep.subr.bf16.mxu0 %v4185_v40 }
 0xe14   : > { %3110 = vmatpush1.bf16.msra.mxu0 %v4183_v47 }
 0xe15   : > { %3111 = vmatprep.subr.bf16.mxu0 %v4188_v13 }
 0xe18   : > { %3112 = vmatpush1.bf16.msra.mxu0 %v4186_v52 }
 0xe19   : > { %3113 = vmatprep.subr.bf16.mxu0 %v4191_v54 }
 0xe1c   : > { %3114 = vmatpush1.bf16.msra.mxu0 %v4189_v55 }
 0xe1d   : > { %3115 = vmatprep.subr.bf16.mxu0 %v4194_v56 }
 0xe20   : > { %3116 = vmatpush1.bf16.msra.mxu0 %v4192_v57 }
 0xe21   : > { %3117 = vmatprep.subr.bf16.mxu0 %v4197_v59 }
 0xe24   : > { %3118 = vmatpush1.bf16.msra.mxu0 %v4195_v9 }
 0xe25   : > { %3119 = vmatprep.subr.bf16.mxu0 %v4200_v17 }
 0xe28   : > { %3120 = vmatpush1.bf16.msra.mxu0 %v4198_v60 }
 0xe29   : > { %v2693_v51 = vpop.f32.mrf.mxu1 }
 0xe2a   : > { %v2699_v53 = vadd.f32 %v2693_v51, %v2483_v50  ;;  %v3733_v50 = vld [vmem:[%s5644_s6] ss:$0 sm:$0xff] }
 0xe2b   : > { %v4010_v14 = vpop.f32.mrf.mxu1 }
 0xe2d   : > { %v2696_v46 = vpop.f32.mrf.mxu1 }
 0xe2e   : > { %v3734_v46 = vld [vmem:[%s5645_s5] ss:$0 sm:$0xff] }
 0xe2f   : > { %v4011_v18 = vpop.f32.mrf.mxu1 }
 0xe94   : > { %v2788_v20 = vpop.xlane.xlu0 %2787 }
 0xe95   : > { %4247 = vrcp.f32 %v2788_v20 }
 0xe98   : > { %v2925_v5 = vpop.xlane.xlu0 %2924 }
 0xe99   : > { %v2929_v15 = vmul.f32 0.0078125, %v2925_v5  ;;  %v4214_v5 = vld [vmem:[%s5129_s15 + $0x8] sm:$0xff]  }
 0xe9b   : > { %v5487_v29 = vsub.f32 %v2922_v4, %v2929_v15  ;;  %v4216_v15 = vld [vmem:[%s5129_s15] sm:$0xff]  }
 0xe9d   : > { %v2933_v34 = vmul.f32 %v5487_v29, %v5487_v29 }
 0xea2   : > { %v4248_v1 = vpop.eup %4247 }
 0xeca   : > { %v2861_v21 = vpop.f32.mrf.mxu0 }
 0xecb   : > { %v2866_v22 = vmul.f32 %v4248_v1, %v2861_v21 }
 0xecc   : > { %v4021_v23 = vpop.f32.mrf.mxu0 }
 0xecd   : > { %v2867_v12 = vpack.c.bf16 %v2866_v22, %v2866_v22  ;;  %v4211_v22 = vld [vmem:[%s5129_s15 + $0x50] sm:$0xff]  }
 0xece   : > { %v4212_v23 = vld [vmem:[%s5129_s15 + $0x10] sm:$0xff]  }
 0xecf   : > { %4027 = vmatmul.mubr.msk.bf16.vlgmr.msra.gmra.mxu1 %vm1178_vm1, %v2867_v12  ;;  %v4213_v12 = vld [vmem:[%s5129_s15 + $0x48] sm:$0xff]  }
 0xed0   : > { %3845 = vmatpush3.bf16.msra.mxu1 %v4202_v61 }
 0xed1   : > { %3846 = vmatprep.subr.bf16.mxu1 %v4203_v62 }
 0xed4   : > { %3847 = vmatpush3.bf16.msra.mxu1 %v4204_v63 }
 0xed5   : > { %3848 = vmatprep.subr.bf16.mxu1 %v4205_v0 }
 0xed8   : > { %3849 = vmatpush3.bf16.msra.mxu1 %v4206_v42 }
 0xed9   : > { %3850 = vmatprep.subr.bf16.mxu1 %v4207_v19 }
 0xedc   : > { %3851 = vmatpush3.bf16.msra.mxu1 %v4208_v45 }
 0xedd   : > { %3852 = vmatprep.subr.bf16.mxu1 %v4209_v2 }
 0xee0   : > { %3853 = vmatpush3.bf16.msra.mxu1 %v4210_v3 }
 0xee1   : > { %3854 = vmatprep.subr.bf16.mxu1 %v4211_v22 }
 0xee4   : > { %3855 = vmatpush3.bf16.msra.mxu1 %v4212_v23 }
 0xee5   : > { %3856 = vmatprep.subr.bf16.mxu1 %v4213_v12 }
 0xee8   : > { %3857 = vmatpush3.bf16.msra.mxu1 %v4214_v5 }
 0xf8f   : > { %v2905_v27 = vpop.f32.mrf.mxu1 }
 0xf90   : > { %v2911_v39 = vadd.f32 %v2905_v27, %v2699_v53  ;;  %v4215_v27 = vld [vmem:[%s5129_s15 + $0x40] sm:$0xff]   ;;  %s5648_s15 = scalar_lea.vmem [#allocation17], %s5097_s19 }
 0xf91   : > { %v4028_v58 = vpop.f32.mrf.mxu1  ;;  %3858 = vmatprep.subr.bf16.mxu1 %v4215_v27 }
 0xf92   : > { %v2919_v24 = vadd.f32 %v3732_v10, %v2911_v39  ;;  %3859 = vmatpush3.bf16.msra.mxu1 %v4216_v15  ;;  %v2979_v39 = vld [vmem:[%s5123_s30] sm:$0x3]  ;;  %s5647_s30 = scalar_lea.vmem [#allocation16], %s5097_s19 }
 0xf93   : > { %v2908_v26 = vpop.f32.mrf.mxu1 }
 0xf94   : > { %v2923_v30 = vadd.f32 %v2919_v24, %v5200_v28  ;;  %v3022_v24 = vrot.slane %v2979_v39, %v957_v33  ;;  %v3018_v26 = vrot.slane %v2979_v39, %v953_v36 }
 0xf95   : > { %v4029_v31 = vpop.f32.mrf.mxu1 }
 0xf96   : > { %2926 = vadd.xlane.f32.xlu0 %v2923_v30 }
 0xf9a   : > { %2935 = vadd.xlane.f32.xlu0 %v2933_v34 }
0x101f   : > { %v2927_v28 = vpop.xlane.xlu0 %2926 }
0x1020   : > { %v2930_v44 = vmul.f32 0.0078125, %v2927_v28 }
0x1022   : > { %v2932_v48 = vsub.f32 %v2923_v30, %v2930_v44 }
0x1023   : > { %v2936_v6 = vpop.xlane.xlu0 %2935 }
0x1024   : > { %v2934_v11 = vmul.f32 %v2932_v48, %v2932_v48  ;;  %v2939_v7 = vmul.f32 0.0078125, %v2936_v6 }
0x1026   : > { %2937 = vadd.xlane.f32.xlu1 %v2934_v11  ;;  %v2941_v8 = vadd.f32 1e-05, %v2939_v7 }
0x1028   : > { %4249 = vrsqrt.f32 %v2941_v8  ;;  %v3768_v8 = vld [vmem:[%s5647_s30] ss:$0 sm:$0xff] }
0x1035   : > { %v4250_v25 = vpop.eup %4249 }
0x1036   : > { %v2945_v4 = vmul.f32 %v4250_v25, %v5487_v29 }
0x1038   : > { %v2953_v14 = vmul.f32 %v3733_v50, %v2945_v4 }
0x103a   : > { %v2961_v20 = vadd.f32 %v3734_v46, %v2953_v14 }
0x10af   : > { %v2938_v10 = vpop.xlane.xlu1 %2937 }
0x10b0   : > { %v2940_v37 = vmul.f32 0.0078125, %v2938_v10 }
0x10b2   : > { %v2942_v49 = vadd.f32 1e-05, %v2940_v37  ;;  %v3769_v37 = vld [vmem:[%s5648_s15] ss:$0 sm:$0xff] }
0x10b4   : > { %4251 = vrsqrt.f32 %v2942_v49 }
0x10c1   : > { %v4252_v51 = vpop.eup %4251 }
0x10c2   : > { %v2946_v53 = vmul.f32 %v4252_v51, %v2932_v48 }
0x10c4   : > { %v2954_v18 = vmul.f32 %v3733_v50, %v2946_v53 }
0x10c6   : > { %v2962_v1 = vadd.f32 %v3734_v46, %v2954_v18 }
0x10c8   : > { %v3013_v21 = vpack.c.bf16 %v2962_v1, %v2961_v20 }
0x10ca   : > { %3138 = vmatmul.mubr.bf16.vlgmr.msra.gmra.mxu0 %v3013_v21 }
0x118a   : > { %v3139_v58 = vpop.f32.mrf.mxu0 }
0x118b   : > { %v3140_v35 = vadd.f32 %v3139_v58, %v3018_v26 }
0x118c   : > { %v3141_v29 = vpop.f32.mrf.mxu0 }
0x118d   : > { %v3142_v31 = vadd.f32 %v3141_v29, %v3022_v24  ;;  %v3148_v48 = vmax.f32 %v3140_v35, 0.0 }
0x118e   : > { %v3143_v30 = vpop.f32.mrf.mxu0 }
0x118f   : > { %v3144_v34 = vadd.f32 %v3143_v30, %v3018_v26  ;;  %v3149_v28 = vmax.f32 %v3142_v31, 0.0 }
0x1190   : > { %v3145_v38 = vpop.f32.mrf.mxu0 }
0x1191   : > { %v3146_v41 = vadd.f32 %v3145_v38, %v3022_v24  ;;  %v3150_v43 = vmax.f32 %v3144_v34, 0.0 }
0x1193   : > { %v3151_v44 = vmax.f32 %v3146_v41, 0.0  ;;  %v3152_v40 = vpack.c.bf16 %v3150_v43, %v3148_v48 }
0x1195   : > { %v3153_v11 = vpack.c.bf16 %v3151_v44, %v3149_v28 }
0x1197   : > { %3288 = vmatprep.mubr.bf16.mxu1 %v3153_v11 }
0x1198   : > { %3289 = vmatmul.mubr.bf16.vlgmr.msra.gmra.mxu1 %v3152_v40 }
0x1258   : > { %v3860_v33 = vpop.f32.mrf.mxu1 }
0x125a   : > { %v3861_v36 = vpop.f32.mrf.mxu1 }
0x125b   : > { %v3862_v47 = vadd.f32 %v3861_v36, %v3860_v33 }
0x125c   : > { %v3863_v52 = vpop.f32.mrf.mxu1 }
0x125d   : > { %v3291_v13 = vadd.f32 %v3862_v47, %v3751_v32 }
0x125e   : > { %v3864_v54 = vpop.f32.mrf.mxu1 }
0x125f   : > { %v3865_v55 = vadd.f32 %v3864_v54, %v3863_v52  ;;  %v3299_v56 = vadd.f32 %v3291_v13, %v2961_v20 }
0x1261   : > { %v3294_v57 = vadd.f32 %v3865_v55, %v3751_v32  ;;  %3301 = vadd.xlane.f32.xlu0 %v3299_v56 }
0x1263   : > { %v3300_v59 = vadd.f32 %v3294_v57, %v2962_v1 }
0x1265   : > { %3303 = vadd.xlane.f32.xlu1 %v3300_v59 }
0x12ea   : > { %v3302_v9 = vpop.xlane.xlu0 %3301 }
0x12eb   : > { %v3305_v17 = vmul.f32 0.0078125, %v3302_v9 }
0x12ed   : > { %v3307_v60 = vsub.f32 %v3299_v56, %v3305_v17 }
0x12ee   : > { %v3304_v16 = vpop.xlane.xlu1 %3303 }
0x12ef   : > { %v3306_v61 = vmul.f32 0.0078125, %v3304_v16  ;;  %v3309_v62 = vmul.f32 %v3307_v60, %v3307_v60 }
0x12f1   : > { %v3308_v63 = vsub.f32 %v3300_v59, %v3306_v61  ;;  %3311 = vadd.xlane.f32.xlu0 %v3309_v62 }
0x12f3   : > { %v3310_v0 = vmul.f32 %v3308_v63, %v3308_v63 }
0x12f5   : > { %3313 = vadd.xlane.f32.xlu1 %v3310_v0 }
0x137a   : > { %v3312_v42 = vpop.xlane.xlu0 %3311 }
0x137b   : > { %v3315_v19 = vmul.f32 0.0078125, %v3312_v42 }
0x137d   : > { %v3317_v45 = vadd.f32 1e-05, %v3315_v19 }
0x137e   : > { %v3314_v2 = vpop.xlane.xlu1 %3313 }
0x137f   : > { %4253 = vrsqrt.f32 %v3317_v45  ;;  %v3316_v3 = vmul.f32 0.0078125, %v3314_v2 }
0x1381   : > { %v3318_v6 = vadd.f32 1e-05, %v3316_v3 }
0x1383   : > { %4255 = vrsqrt.f32 %v3318_v6 }
0x138c   : > { %v4254_v7 = vpop.eup %4253 }
0x138d   : > { %v3321_v10 = vmul.f32 %v4254_v7, %v3307_v60 }
0x138f   : > { %v3329_v49 = vmul.f32 %v3768_v8, %v3321_v10 }
0x1390   : > { %v4256_v25 = vpop.eup %4255 }
0x1391   : > { %v3337_v4 = vadd.f32 %v3769_v37, %v3329_v49  ;;  %v3322_v50 = vmul.f32 %v4256_v25, %v3308_v63 }
0x1393   : > { %3339 = vst [vmem:[#allocation2] sm:$0xff] %v3337_v4  ;;  %3341 = vst [vmem:[%s5649_s1] sm:$0xff] %v3337_v4  ;;  %v3330_v51 = vmul.f32 %v3768_v8, %v3322_v50  ;;  %3346 = sbr.rel (%p3770_p4) target bundleno = 5327 (0x14cf), region = 136 }
0x1395   : > { %v3338_v53 = vadd.f32 %v3769_v37, %v3330_v51 }
0x1397   : > { %3340 = vst [vmem:[#allocation2 + $0x8] sm:$0xff] %v3338_v53  ;;  %3342 = vst [vmem:[%s5649_s1 + $0x8] sm:$0xff] %v3338_v53 }
0x1398   : > { %3349 = vadd.xlane.f32.xlu0 %v3337_v4  ;;  %v3771_v26 = vld [vmem:[%s5651_s27] ss:$0 sm:$0xff] }
0x1399   : > { %v3772_v30 = vld [vmem:[#allocation19] ss:$0 sm:$0xff] }
0x139c   : > { %3351 = vadd.xlane.f32.xlu0 %v3338_v53 }
0x1421   : > { %v3350_v14 = vpop.xlane.xlu0 %3349 }
0x1422   : > { %v3353_v46 = vmul.f32 0.0078125, %v3350_v14 }
0x1424   : > { %v3355_v18 = vsub.f32 %v3337_v4, %v3353_v46 }
0x1425   : > { %v3352_v20 = vpop.xlane.xlu0 %3351 }
0x1426   : > { %v3354_v1 = vmul.f32 0.0078125, %v3352_v20  ;;  %v3357_v21 = vmul.f32 %v3355_v18, %v3355_v18 }
0x1428   : > { %v3356_v22 = vsub.f32 %v3338_v53, %v3354_v1  ;;  %3359 = vadd.xlane.f32.xlu1 %v3357_v21 }
0x142a   : > { %v3358_v23 = vmul.f32 %v3356_v22, %v3356_v22 }
0x142c   : > { %3361 = vadd.xlane.f32.xlu1 %v3358_v23 }
0x14b1   : > { %v3360_v12 = vpop.xlane.xlu1 %3359 }
0x14b2   : > { %v3363_v5 = vmul.f32 0.0078125, %v3360_v12 }
0x14b4   : > { %v3365_v27 = vadd.f32 1e-05, %v3363_v5 }
0x14b5   : > { %v3362_v15 = vpop.xlane.xlu1 %3361 }
0x14b6   : > { %4257 = vrsqrt.f32 %v3365_v27  ;;  %v3364_v39 = vmul.f32 0.0078125, %v3362_v15 }
0x14b8   : > { %v3366_v58 = vadd.f32 1e-05, %v3364_v39 }
0x14ba   : > { %4259 = vrsqrt.f32 %v3366_v58 }
0x14c3   : > { %v4258_v24 = vpop.eup %4257 }
0x14c4   : > { %v3369_v29 = vmul.f32 %v4258_v24, %v3355_v18 }
0x14c6   : > { %v3377_v31 = vmul.f32 %v3771_v26, %v3369_v29 }
0x14c7   : > { %v4260_v34 = vpop.eup %4259 }
0x14c8   : > { %v3385_v35 = vadd.f32 %v3772_v30, %v3377_v31  ;;  %v3370_v38 = vmul.f32 %v4260_v34, %v3356_v22 }
0x14ca   : > { %3387 = vst [vmem:[%s5652_s16] sm:$0xff] %v3385_v35  ;;  %v3378_v41 = vmul.f32 %v3771_v26, %v3370_v38 }
0x14cc   : > { %v3386_v43 = vadd.f32 %v3772_v30, %v3378_v41 }
0x14ce   : > { %3388 = vst [vmem:[%s5652_s16 + $0x8] sm:$0xff] %v3386_v43 }
0x14cf PF: > { %s5653_s24 = sld [smem:[#allocation29_spill]]  ;;  %s5656_s21 = smov %s4617_s22 }
0x14d0   : > { %s5654_s18 = sld [smem:[#allocation27_spill]] }
0x14d1   : > { %s5655_s23 = sld [smem:[#allocation30_spill]] }
0x14d5   : > { %p41_p9 = scmp.ge.s32.totalorder %s5653_s24, 4  }
0x14d6   : > { %s5657_s22 = smov %s5654_s18 }
0x14d7   :  { %43 = sbr.rel (!%p41_p9) target bundleno = 24 (0x18), region = 247 }
0x14dc   :  { %3400 = vsyncpa [#allocation4], 1 }
0x14dd   :  { %3402 = vsyncpa [#allocation4 + $0x1], 1 }
0x14de   :  { %3403 = vsyncpa [#allocation6], 1 }
0x14df   :  { %3405 = vsyncpa [#allocation6 + $0x1], 1 }
0x14e0   :  { %3406 = vsyncpa [#allocation9], 1 }
0x14e1   :  { %3408 = vsyncpa [#allocation9 + $0x1], 1 }
0x14e2   :  { %3409 = vsyncpa [#allocation12], 1 }
0x14e3   :  { %3411 = vsyncpa [#allocation12 + $0x1], 1 }
0x14e4   :  { %3412 = vsyncpa [#allocation15], 1 }
0x14e5   :  { %3414 = vsyncpa [#allocation15 + $0x1], 1 }
0x14e6   :  { %3415 = vsyncpa [#allocation18], 1 }
0x14e7   :  { %3417 = vsyncpa [#allocation18 + $0x1], 1 }

// kernel: seq2seq_forward.3
= control target key start
LH: loop header
LB: loop body
LE: loop exit
PB: predicated region body
PF: predicated region fallthrough
CT: control target
= control target key end

     0   :  { %s9677_s0 = inlined_call_operand.vmem [shape: f32[16,128], index: 0, kind: input, shape index: {}]   ;;  %s9678_s1 = inlined_call_operand.vmem [shape: f32[16,128], index: 1, kind: input, shape index: {}]   ;;  %s9679_s2 = inlined_call_operand.vmem [shape: f32[2,8,8], index: 2, kind: input, shape index: {}]   ;;  %s9680_s3 = inlined_call_operand.vmem [shape: f32[2,8,8], index: 3, kind: input, shape index: {}]   ;;  %s9681_s4 = inlined_call_operand.vmem [shape: bf16[2,128,384], index: 4, kind: input, shape index: {}]   ;;  %s9682_s5 = inlined_call_operand.hbm [shape: f32[2,1,384], index: 5, kind: input, shape index: {}]   ;;  %s9683_s6 = inlined_call_operand.hbm [shape: bf16[2,128,128], index: 6, kind: input, shape index: {}]   ;;  %s9684_s7 = inlined_call_operand.hbm [shape: f32[2,1,128], index: 7, kind: input, shape index: {}]   ;;  %s9685_s8 = inlined_call_operand.hbm [shape: f32[2,1,128], index: 8, kind: input, shape index: {}]   ;;  %s9686_s9 = inlined_call_operand.hbm [shape: f32[2,1,128], index: 9, kind: input, shape index: {}]   ;;  %s9687_s10 = inlined_call_operand.hbm [shape: bf16[2,128,128], index: 10, kind: input, shape index: {}]   ;;  %s9688_s11 = inlined_call_operand.hbm [shape: f32[2,1,128], index: 11, kind: input, shape index: {}]   ;;  %s9689_s12 = inlined_call_operand.vmem [shape: bf16[2,128,256], index: 12, kind: input, shape index: {}]   ;;  %s9690_s13 = inlined_call_operand.vmem [shape: f32[2,1,256], index: 13, kind: input, shape index: {}]   ;;  %s9691_s14 = inlined_call_operand.hbm [shape: bf16[2,128,128], index: 14, kind: input, shape index: {}]   ;;  %s9692_s15 = inlined_call_operand.hbm [shape: f32[2,1,128], index: 15, kind: input, shape index: {}]   ;;  %s9693_s16 = inlined_call_operand.hbm [shape: f32[2,1,128], index: 16, kind: input, shape index: {}]   ;;  %s9694_s17 = inlined_call_operand.hbm [shape: f32[2,1,128], index: 17, kind: input, shape index: {}]   ;;  %s9695_s18 = inlined_call_operand.vmem [shape: bf16[2,128,256], index: 18, kind: input, shape index: {}]   ;;  %s9696_s19 = inlined_call_operand.hbm [shape: f32[2,1,256], index: 19, kind: input, shape index: {}]   ;;  %s9697_s20 = inlined_call_operand.vmem [shape: bf16[2,256,128], index: 20, kind: input, shape index: {}]   ;;  %s9698_s21 = inlined_call_operand.hbm [shape: f32[2,1,128], index: 21, kind: input, shape index: {}]   ;;  %s9699_s22 = inlined_call_operand.hbm [shape: f32[2,1,128], index: 22, kind: input, shape index: {}]   ;;  %s9700_s23 = inlined_call_operand.hbm [shape: f32[2,1,128], index: 23, kind: input, shape index: {}]   ;;  %s9701_s24 = inlined_call_operand.hbm [shape: f32[1,128], index: 24, kind: input, shape index: {}]   ;;  %s9702_s25 = inlined_call_operand.hbm [shape: f32[1,128], index: 25, kind: input, shape index: {}]   ;;  %s9703_s26 = inlined_call_operand.hbm [shape: bf16[128,128], index: 26, kind: input, shape index: {}]   ;;  %s9704_s27 = inlined_call_operand.hbm [shape: f32[1,128], index: 27, kind: input, shape index: {}]   ;;  %s9705_s28 = inlined_call_operand.vmem [shape: f32[16,128], index: 28, kind: output, shape index: {}]  }
   0x1   :  { %9741 = sst [smem:[#allocation48_spill]] %s9677_s0 }
   0x2   :  { %9742 = sst [smem:[#allocation49_spill]] %s9678_s1 }
   0x3   :  { %9743 = sst [smem:[#allocation50_spill]] %s9679_s2 }
   0x4   :  { %9744 = sst [smem:[#allocation51_spill]] %s9680_s3 }
   0x5   :  { %9745 = sst [smem:[#allocation52_spill]] %s9681_s4 }
   0x6   :  { %9746 = sst [smem:[#allocation53_spill]] %s9682_s5 }
   0x7   :  { %9747 = sst [smem:[#allocation54_spill]] %s9683_s6 }
   0x8   :  { %9748 = sst [smem:[#allocation55_spill]] %s9684_s7 }
   0x9   :  { %9749 = sst [smem:[#allocation56_spill]] %s9685_s8 }
   0xa   :  { %9750 = sst [smem:[#allocation57_spill]] %s9686_s9 }
   0xb   :  { %9751 = sst [smem:[#allocation58_spill]] %s9687_s10 }
   0xc   :  { %9752 = sst [smem:[#allocation59_spill]] %s9688_s11 }
   0xd   :  { %9753 = sst [smem:[#allocation60_spill]] %s9689_s12 }
   0xe   :  { %9754 = sst [smem:[#allocation61_spill]] %s9690_s13 }
   0xf   :  { %9755 = sst [smem:[#allocation62_spill]] %s9691_s14 }
  0x10   :  { %9756 = sst [smem:[#allocation63_spill]] %s9692_s15 }
  0x11   :  { %9757 = sst [smem:[#allocation64_spill]] %s9693_s16 }
  0x12   :  { %9758 = sst [smem:[#allocation65_spill]] %s9694_s17 }
  0x13   :  { %9759 = sst [smem:[#allocation66_spill]] %s9695_s18 }
  0x14   :  { %9760 = sst [smem:[#allocation67_spill]] %s9696_s19 }
  0x15   :  { %9761 = sst [smem:[#allocation68_spill]] %s9697_s20 }
  0x16   :  { %9762 = sst [smem:[#allocation69_spill]] %s9698_s21 }
  0x17   :  { %9763 = sst [smem:[#allocation70_spill]] %s9699_s22 }
  0x18   :  { %9764 = sst [smem:[#allocation71_spill]] %s9701_s24 }
  0x19   :  { %9765 = sst [smem:[#allocation72_spill]] %s9702_s25 }
  0x1a   :  { %9766 = sst [smem:[#allocation73_spill]] %s9703_s26 }
  0x1b   :  { %9767 = sst [smem:[#allocation74_spill]] %s9704_s27 }
  0x1c   :  { %9768 = sst [smem:[#allocation75_spill]] %s9705_s28 }
  0x1d   :  { %33 = vsyncpa [#allocation4], 0 }
  0x1e   :  { %35 = vsyncpa [#allocation4 + $0x1], 0 }
  0x1f   :  { %36 = vsyncpa [#allocation6], 0 }
  0x20   :  { %38 = vsyncpa [#allocation6 + $0x1], 0 }
  0x21   :  { %39 = vsyncpa [#allocation9], 0 }
  0x22   :  { %41 = vsyncpa [#allocation9 + $0x1], 0 }
  0x23   :  { %42 = vsyncpa [#allocation12], 0 }
  0x24   :  { %44 = vsyncpa [#allocation12 + $0x1], 0 }
  0x25   :  { %45 = vsyncpa [#allocation15], 0 }
  0x26   :  { %47 = vsyncpa [#allocation15 + $0x1], 0 }
  0x27   :  { %48 = vsyncpa [#allocation18], 0 }
  0x28   :  { %50 = vsyncpa [#allocation18 + $0x1], 0 }
  0x29   :  { %51 = vsyncpa [#allocation21], 0 }
  0x2a   :  { %53 = vsyncpa [#allocation21 + $0x1], 0 }
  0x2b   :  { %54 = vsyncpa [#allocation24], 0 }
  0x2c   :  { %56 = vsyncpa [#allocation24 + $0x1], 0 }
  0x2d   :  { %57 = vsyncpa [#allocation27], 0 }
  0x2e   :  { %58 = vsyncpa [#allocation30], 0  ;;  %s8382_s8 = smov 0   ;;  %s8384_s5 = smov 0  }
  0x2f   :  { %s8386_s9 = smov 0   ;;  %s8388_s30 = smov 0  }
  0x30 LB: > { %9769 = sst [smem:[#allocation42_spill]] %s8196_s5  ;;  %s8401_s3 = sadd.s32 4294967295, %s8204_s30   ;;  %s8204_s30 = sphi %s8388_s30, %s9838_s30   ;;  %s8200_s9 = sphi %s8386_s9, %s9841_s9   ;;  %s8196_s5 = sphi %s8384_s5, %s9840_s5   ;;  %s8192_s8 = sphi %s8382_s8, %s9839_s8  }
  0x31   : > { %9770 = sst [smem:[#allocation43_spill]] %s8200_s9  ;;  %s8404_s6 = sadd.s32 1, %s8204_s30  }
  0x32   : > { %9771 = sst [smem:[#allocation44_spill]] %s8401_s3  ;;  %s178_s10 = ssub.s32 %s8204_s30, %s8404_s6 }
  0x33   : > { %9772 = sst [smem:[#allocation45_spill]] %s8404_s6  ;;  %s181_s0 = sadd.s32 1, %s8200_s9 }
  0x34   : > { %p179_p0 = scmp.eq.s32.totalorder %s178_s10, 0  ;;  %p188_p1 = scmp.ne.s32.totalorder %s8200_s9, %s8196_s5 }
  0x35   : > { %p189_p2 = scmp.eq.s32.totalorder %s8204_s30, 0  ;;  %p194_p3 = scmp.ne.s32.totalorder %s8196_s5, %s8192_s8 }
  0x36   : > { %s8414_s11 = scalar_select %p179_p0, %s8200_s9, %s181_s0  }
  0x37   : > { %p8416_p4 = por %p189_p2, %p188_p1  ;;  %p9721_p5 = scmp.eq.s32.totalorder %s8401_s3, 0 }
  0x38   : > { %9773 = sst [smem:[#allocation46_spill]] %s8414_s11  ;;  %p6566_p6 = scmp.ge.s32.totalorder %s8204_s30, 1 }
  0x39   : > { %p778_p7 = scmp.lt.s32.totalorder %s8204_s30, 3  ;;  %p8425_p8 = por %p9721_p5, %p194_p3 }
  0x3a   : > { %s8206_s12 = smov [#allocation26]   ;;  %s8207_s4 = smov [#allocation29]  }
  0x3b   : > { %s9775_s2 = scalar_select %p8425_p8, 1, 0 }
  0x3c   : > { %p8430_p10 = pnand %p6566_p6, %p778_p7  ;;  %s803_s1 = sshll.u32 %s8206_s12, 4  ;;  %s804_s1 = int_to_ptr.vmem [resolvable:$true] %s803_s1 }
  0x3d   : > { %9776 = sst [smem:[#allocation47_spill]] %s9775_s2  ;;  %s824_s8 = sshll.u32 %s8207_s4, 4  ;;  %s8442_s8 = int_to_ptr.vmem [resolvable:$true] %s824_s8 }
  0x3e   : > { %p7363_p11 = pneg %p8430_p10  ;;  %s8208_s0 = smov [#allocation28]  }
  0x3f   : > { %s814_s11 = sshll.u32 %s8208_s0, 4  ;;  %s7651_s6 = scalar_lea.vmem %s804_s1, 16  ;;  %s815_s11 = int_to_ptr.vmem [resolvable:$true] %s814_s11 }
  0x40   : > { %p8438_p12 = pnand %p7363_p11, %p9721_p5  ;;  %p7652_p0 = scmp.ne.s32.totalorder %s804_s1, %s7651_s6 }
  0x41   : > { %s7658_s12 = scalar_lea.vmem %s804_s1, 32  ;;  %p7659_p3 = scmp.lt.s32.totalorder %s804_s1, %s804_s1 }
  0x42   : > { %p7642_p13 = pneg %p8438_p12  ;;  %p7660_p6 = scmp.lt.s32.totalorder %s7658_s12, %s7651_s6 }
  0x44   : > { %p7654_p1 = pnand %p7652_p0, %p7642_p13  ;;  %p7661_p7 = por %p7660_p6, %p7659_p3 }
  0x46   : > { %p7655_p2 = pneg %p7654_p1 }
  0x48   : > { %p7662_p11 = pnand %p7661_p7, %p7655_p2 }
  0x4a   : > { %7665 = shalt.err (!%p7662_p11)
}
  0x4b   : > { %s9779_s24 = sld [smem:[#allocation71_spill]]  ;;  %s7677_s0 = scalar_lea.vmem %s8442_s8, 1024 }
  0x4c   : > { %p7678_p9 = scmp.ne.s32.totalorder %s8442_s8, %s7677_s0  ;;  %p7685_p3 = scmp.lt.s32.totalorder %s8442_s8, %s8442_s8 }
  0x4d   : > { %p7686_p2 = scmp.lt.s32.totalorder %s7677_s0, %s7677_s0 }
  0x4e   : > { %p7680_p0 = pnand %p7678_p9, %p7642_p13 }
  0x4f   : > { %p7687_p6 = por %p7686_p2, %p7685_p3 }
  0x50   : > { %p7681_p1 = pneg %p7680_p0 }
  0x51   : > { %7366 = dma.hbm_to_vmem [thread:$0]  (!%p8438_p12), %s9779_s24, 16, %s804_s1, [#allocation27]  }
  0x52   : > { %p7688_p7 = pnand %p7687_p6, %p7681_p1 }
  0x54   : > { %7691 = shalt.err (!%p7688_p7)
}
  0x55   : > { %s8209_s6 = smov 64   ;;  %s8210_s28 = smov 4  }
  0x56   : > { %s9780_s26 = sld [smem:[#allocation73_spill]]  ;;  %s7703_s4 = scalar_lea.vmem %s815_s11, 16 }
  0x57   : > { %p7704_p9 = scmp.ne.s32.totalorder %s815_s11, %s7703_s4  ;;  %s7710_s0 = scalar_lea.vmem %s815_s11, 32 }
  0x58   : > { %p7711_p1 = scmp.lt.s32.totalorder %s815_s11, %s815_s11  ;;  %p7712_p3 = scmp.lt.s32.totalorder %s7710_s0, %s7703_s4 }
  0x59   : > { %p7706_p11 = pnand %p7704_p9, %p7642_p13 }
  0x5a   : > { %p7713_p2 = por %p7712_p3, %p7711_p1 }
  0x5b   : > { %p7707_p0 = pneg %p7706_p11 }
  0x5c   : > { %7372 = dma.hbm_to_vmem [thread:$0]  (!%p8438_p12), %s9780_s26, 1024, %s8442_s8, [#allocation30], %s8209_s6, %s8209_s6, %s8210_s28  }
  0x5d   : > { %p7714_p6 = pnand %p7713_p2, %p7707_p0 }
  0x5f   : > { %7717 = shalt.err (!%p7714_p6)
}
  0x60   : > { %s9781_s25 = sld [smem:[#allocation72_spill]]  ;;  %s8211_s8 = smov [#allocation31]  }
  0x61   : > { %s838_s6 = sshll.u32 %s8211_s8, 4  ;;  %s839_s6 = int_to_ptr.vmem [resolvable:$true] %s838_s6 }
  0x62   : > { %s7729_s28 = scalar_lea.vmem %s839_s6, 16  ;;  %s7736_s12 = scalar_lea.vmem %s839_s6, 32 }
  0x63   : > { %p7730_p7 = scmp.ne.s32.totalorder %s839_s6, %s7729_s28  ;;  %p7737_p1 = scmp.lt.s32.totalorder %s839_s6, %s839_s6 }
  0x64   : > { %p7738_p0 = scmp.lt.s32.totalorder %s7736_s12, %s7729_s28 }
  0x65   : > { %p7732_p9 = pnand %p7730_p7, %p7642_p13 }
  0x66   : > { %7369 = dma.hbm_to_vmem [thread:$0]  (!%p8438_p12), %s9781_s25, 16, %s815_s11, [#allocation27]  }
  0x67   : > { %p7733_p11 = pneg %p7732_p9  ;;  %p7739_p3 = por %p7738_p0, %p7737_p1 }
  0x69   : > { %p7740_p2 = pnand %p7739_p3, %p7733_p11 }
  0x6b   : > { %7743 = shalt.err (!%p7740_p2)
}
  0x6c   : > { %s9782_s27 = sld [smem:[#allocation74_spill]]  ;;  %p6571_p6 = scmp.ge.s32.totalorder %s8204_s30, 2 }
  0x6d   : > { %s8485_s11 = sand.u32 (!%p6571_p6), 1, %s8200_s9   ;;  %s8488_s1 = sand.u32 (!%p6571_p6), 1, %s8204_s30  }
  0x6e   : > { %845 = sbr.rel (%p6571_p6) target bundleno = 525 (0x20d), region = 48  ;;  %s8491_s4 = sshll.u32 (!%p6571_p6), %s8485_s11, 6 }
  0x6f   : > { %s8494_s10 = sshll.u32 (!%p6571_p6), %s8204_s30, 10  ;;  %s880_s12 = scalar_lea.vmem (!%p6571_p6), [#allocation5], %s8491_s4 }
  0x70   : > { %s887_s20 = sshll.u32 (!%p6571_p6), %s880_s12, 4  ;;  %s8506_s24 = sshll.u32 (!%p6571_p6), %s8204_s30, 4  ;;  %s8503_s20 = int_to_ptr.vmem [resolvable:$true] %s887_s20 }
  0x72   : > { %7375 = dma.hbm_to_vmem [thread:$0]  (!%p8438_p12), %s9782_s27, 16, %s839_s6, [#allocation30]  }
  0x73   : > { %s9783_s6 = sld [smem:[#allocation54_spill]] }
  0x79   : > { %s8500_s28 = scalar_lea.hbm %s9783_s6, %s8494_s10  ;;  %s7748_s0 = scalar_lea.hbm %s9783_s6, 2048 }
  0x7a   : > { %s7744_s26 = scalar_lea.hbm %s8500_s28, 1024  ;;  %p7749_p9 = scmp.lt.s32.totalorder %s8500_s28, %s9783_s6 }
  0x7b   : > { %p7745_p12 = scmp.ne.s32.totalorder %s8500_s28, %s7744_s26  ;;  %p7750_p11 = scmp.lt.s32.totalorder %s7748_s0, %s7744_s26 }
  0x7d   : > { %p7746_p13 = pnand %p7745_p12, %p8416_p4  ;;  %p7751_p1 = por %p7750_p11, %p7749_p9 }
  0x7f   : > { %p7747_p7 = pneg %p7746_p13 }
  0x81   : > { %p7752_p0 = pnand %p7751_p1, %p7747_p7 }
  0x83   : > { %7755 = shalt.err (!%p7752_p0)
}
  0x84   : > { %s7756_s12 = scalar_lea.vmem %s8503_s20, 1024  ;;  %s8212_s25 = smov [#allocation5]  }
  0x85   : > { %p7757_p3 = scmp.ne.s32.totalorder %s8503_s20, %s7756_s12  ;;  %s7760_s27 = sshll.u32 %s8212_s25, 4  ;;  %s7761_s27 = int_to_ptr.vmem [resolvable:$false] %s7760_s27 }
  0x86   : > { %s7762_s9 = scalar_lea.vmem %s7761_s27, 2048  ;;  %p7763_p12 = scmp.lt.s32.totalorder %s8503_s20, %s7761_s27 }
  0x87   : > { %p7758_p2 = pnand %p7757_p3, %p8416_p4  ;;  %p7764_p13 = scmp.lt.s32.totalorder %s7762_s9, %s7756_s12 }
  0x89   : > { %p7759_p6 = pneg %p7758_p2  ;;  %p7765_p5 = por %p7764_p13, %p7763_p12 }
  0x8b   : > { %p7766_p8 = pnand %p7765_p5, %p7759_p6 }
  0x8d   : > { %7769 = shalt.err (!%p7766_p8)
}
  0x8e   : > { %s9729_s18 = smov 64   ;;  %s8214_s26 = smov 4  }
  0x8f   : > { %s9784_s25 = scalar_lea.sflag [#allocation6], %s8488_s1  ;;  %s9785_s12 = sld [smem:[#allocation56_spill]] }
  0x90   : > { %7326 = dma.hbm_to_vmem [thread:$0]  (%p8416_p4), %s8500_s28, 1024, %s8503_s20, %s9784_s25, %s9729_s18, %s9729_s18, %s8214_s26  }
  0x91   : > { %s917_s9 = scalar_lea.vmem [#allocation8], %s8485_s11  ;;  %s9731_s13 = scalar_lea.sflag [#allocation9], %s8488_s1 }
  0x92   : > { %s924_s6 = sshll.u32 %s917_s9, 4  ;;  %s925_s6 = int_to_ptr.vmem [resolvable:$true] %s924_s6 }
  0x95   : > { %s8538_s27 = scalar_lea.hbm %s9785_s12, %s8506_s24  ;;  %s7774_s28 = scalar_lea.hbm %s9785_s12, 32 }
  0x96   : > { %s7770_s3 = scalar_lea.hbm %s8538_s27, 16  ;;  %p7775_p9 = scmp.lt.s32.totalorder %s8538_s27, %s9785_s12 }
  0x97   : > { %p7771_p5 = scmp.ne.s32.totalorder %s8538_s27, %s7770_s3  ;;  %p7776_p11 = scmp.lt.s32.totalorder %s7774_s28, %s7770_s3 }
  0x99   : > { %p7772_p8 = pnand %p7771_p5, %p8416_p4  ;;  %p7777_p1 = por %p7776_p11, %p7775_p9 }
  0x9b   : > { %p7773_p7 = pneg %p7772_p8 }
  0x9d   : > { %p7778_p0 = pnand %p7777_p1, %p7773_p7 }
  0x9f   : > { %7781 = shalt.err (!%p7778_p0)
}
  0xa0   : > { %s7782_s0 = scalar_lea.vmem %s925_s6, 16  ;;  %s8215_s8 = smov [#allocation8]  }
  0xa1   : > { %p7783_p3 = scmp.ne.s32.totalorder %s925_s6, %s7782_s0  ;;  %s7786_s9 = sshll.u32 %s8215_s8, 4  ;;  %s7787_s9 = int_to_ptr.vmem [resolvable:$false] %s7786_s9 }
  0xa2   : > { %s7788_s18 = scalar_lea.vmem %s7787_s9, 32  ;;  %p7789_p12 = scmp.lt.s32.totalorder %s925_s6, %s7787_s9 }
  0xa3   : > { %p7784_p2 = pnand %p7783_p3, %p8416_p4  ;;  %p7790_p13 = scmp.lt.s32.totalorder %s7788_s18, %s7782_s0 }
  0xa5   : > { %p7785_p6 = pneg %p7784_p2  ;;  %p7791_p5 = por %p7790_p13, %p7789_p12 }
  0xa7   : > { %p7792_p8 = pnand %p7791_p5, %p7785_p6 }
  0xa9   : > { %7795 = shalt.err (!%p7792_p8)
}
  0xaa   : > { %7328 = dma.hbm_to_vmem [thread:$0]  (%p8416_p4), %s8538_s27, 16, %s925_s6, %s9731_s13  }
  0xab   : > { %s9786_s2 = sld [smem:[#allocation58_spill]]  ;;  %s952_s18 = scalar_lea.vmem [#allocation11], %s8491_s4 }
  0xac   : > { %s959_s20 = sshll.u32 %s952_s18, 4  ;;  %s9735_s25 = scalar_lea.sflag [#allocation12], %s8488_s1  ;;  %s8567_s20 = int_to_ptr.vmem [resolvable:$true] %s959_s20 }
  0xb1   : > { %s8564_s28 = scalar_lea.hbm %s9786_s2, %s8494_s10  ;;  %s7800_s27 = scalar_lea.hbm %s9786_s2, 2048 }
  0xb2   : > { %s7796_s0 = scalar_lea.hbm %s8564_s28, 1024  ;;  %p7801_p1 = scmp.lt.s32.totalorder %s8564_s28, %s9786_s2 }
  0xb3   : > { %p7797_p7 = scmp.ne.s32.totalorder %s8564_s28, %s7796_s0  ;;  %p7802_p0 = scmp.lt.s32.totalorder %s7800_s27, %s7796_s0 }
  0xb5   : > { %p7798_p9 = pnand %p7797_p7, %p8416_p4  ;;  %p7803_p3 = por %p7802_p0, %p7801_p1 }
  0xb7   : > { %p7799_p11 = pneg %p7798_p9 }
  0xb9   : > { %p7804_p2 = pnand %p7803_p3, %p7799_p11 }
  0xbb   : > { %7807 = shalt.err (!%p7804_p2)
}
  0xbc   : > { %s7808_s3 = scalar_lea.vmem %s8567_s20, 1024  ;;  %s8216_s18 = smov [#allocation11]  }
  0xbd   : > { %p7809_p6 = scmp.ne.s32.totalorder %s8567_s20, %s7808_s3  ;;  %s7812_s8 = sshll.u32 %s8216_s18, 4  ;;  %s7813_s8 = int_to_ptr.vmem [resolvable:$false] %s7812_s8 }
  0xbe   : > { %s7814_s6 = scalar_lea.vmem %s7813_s8, 2048  ;;  %p7815_p5 = scmp.lt.s32.totalorder %s8567_s20, %s7813_s8 }
  0xbf   : > { %p7810_p12 = pnand %p7809_p6, %p8416_p4  ;;  %p7816_p8 = scmp.lt.s32.totalorder %s7814_s6, %s7808_s3 }
  0xc1   : > { %p7811_p13 = pneg %p7810_p12  ;;  %p7817_p7 = por %p7816_p8, %p7815_p5 }
  0xc3   : > { %p7818_p9 = pnand %p7817_p7, %p7811_p13 }
  0xc5   : > { %7821 = shalt.err (!%p7818_p9)
}
  0xc6   : > { %s9787_s0 = smov 64   ;;  %s9788_s14 = sld [smem:[#allocation62_spill]] }
  0xc7   : > { %7330 = dma.hbm_to_vmem [thread:$0]  (%p8416_p4), %s8564_s28, 1024, %s8567_s20, %s9735_s25, %s9787_s0, %s9787_s0, %s8214_s26  }
  0xc8   : > { %s1005_s3 = scalar_lea.vmem [#allocation14], %s8491_s4  ;;  %s9732_s8 = scalar_lea.sflag [#allocation15], %s8488_s1 }
  0xc9   : > { %s1012_s18 = sshll.u32 %s1005_s3, 4  ;;  %s8602_s18 = int_to_ptr.vmem [resolvable:$true] %s1012_s18 }
  0xcc   : > { %s8599_s5 = scalar_lea.hbm %s9788_s14, %s8494_s10  ;;  %s7826_s20 = scalar_lea.hbm %s9788_s14, 2048 }
  0xcd   : > { %s7822_s6 = scalar_lea.hbm %s8599_s5, 1024  ;;  %p7827_p3 = scmp.lt.s32.totalorder %s8599_s5, %s9788_s14 }
  0xce   : > { %p7823_p11 = scmp.ne.s32.totalorder %s8599_s5, %s7822_s6  ;;  %p7828_p2 = scmp.lt.s32.totalorder %s7826_s20, %s7822_s6 }
  0xd0   : > { %p7824_p1 = pnand %p7823_p11, %p8416_p4  ;;  %p7829_p6 = por %p7828_p2, %p7827_p3 }
  0xd2   : > { %p7825_p0 = pneg %p7824_p1 }
  0xd4   : > { %p7830_p12 = pnand %p7829_p6, %p7825_p0 }
  0xd6   : > { %7833 = shalt.err (!%p7830_p12)
}
  0xd7   : > { %s7834_s4 = scalar_lea.vmem %s8602_s18, 1024  ;;  %s8217_s9 = smov [#allocation14]  }
  0xd8   : > { %p7835_p13 = scmp.ne.s32.totalorder %s8602_s18, %s7834_s4  ;;  %s7838_s13 = sshll.u32 %s8217_s9, 4  ;;  %s7839_s13 = int_to_ptr.vmem [resolvable:$false] %s7838_s13 }
  0xd9   : > { %s7840_s3 = scalar_lea.vmem %s7839_s13, 2048  ;;  %p7841_p7 = scmp.lt.s32.totalorder %s8602_s18, %s7839_s13 }
  0xda   : > { %p7836_p5 = pnand %p7835_p13, %p8416_p4  ;;  %p7842_p9 = scmp.lt.s32.totalorder %s7840_s3, %s7834_s4 }
  0xdc   : > { %p7837_p8 = pneg %p7836_p5  ;;  %p7843_p11 = por %p7842_p9, %p7841_p7 }
  0xde   : > { %p7844_p1 = pnand %p7843_p11, %p7837_p8 }
  0xe0   : > { %7847 = shalt.err (!%p7844_p1)
}
  0xe1   : > { %7332 = dma.hbm_to_vmem [thread:$0]  (%p8416_p4), %s8599_s5, 1024, %s8602_s18, %s9732_s8, %s9787_s0, %s9787_s0, %s8214_s26  }
  0xe2   : > { %s9789_s16 = sld [smem:[#allocation64_spill]]  ;;  %s1042_s27 = scalar_lea.vmem [#allocation17], %s8485_s11 }
  0xe3   : > { %s1049_s10 = sshll.u32 %s1042_s27, 4  ;;  %s6589_s4 = sshll.u32 %s8485_s11, 1  ;;  %s1050_s10 = int_to_ptr.vmem [resolvable:$true] %s1049_s10 }
  0xe4   : > { %s9734_s9 = scalar_lea.sflag [#allocation18], %s8488_s1 }
  0xe8   : > { %s8634_s20 = scalar_lea.hbm %s9789_s16, %s8506_s24  ;;  %s7852_s0 = scalar_lea.hbm %s9789_s16, 32 }
  0xe9   : > { %s7848_s13 = scalar_lea.hbm %s8634_s20, 16  ;;  %p7853_p6 = scmp.lt.s32.totalorder %s8634_s20, %s9789_s16 }
  0xea   : > { %p7849_p0 = scmp.ne.s32.totalorder %s8634_s20, %s7848_s13  ;;  %p7854_p12 = scmp.lt.s32.totalorder %s7852_s0, %s7848_s13 }
  0xec   : > { %p7850_p3 = pnand %p7849_p0, %p8416_p4  ;;  %p7855_p13 = por %p7854_p12, %p7853_p6 }
  0xee   : > { %p7851_p2 = pneg %p7850_p3 }
  0xf0   : > { %p7856_p5 = pnand %p7855_p13, %p7851_p2 }
  0xf2   : > { %7859 = shalt.err (!%p7856_p5)
}
  0xf3   : > { %s7860_s6 = scalar_lea.vmem %s1050_s10, 16  ;;  %s8218_s28 = smov [#allocation17]  }
  0xf4   : > { %p7861_p8 = scmp.ne.s32.totalorder %s1050_s10, %s7860_s6  ;;  %s7864_s27 = sshll.u32 %s8218_s28, 4  ;;  %s7865_s27 = int_to_ptr.vmem [resolvable:$false] %s7864_s27 }
  0xf5   : > { %s7866_s8 = scalar_lea.vmem %s7865_s27, 32  ;;  %p7867_p11 = scmp.lt.s32.totalorder %s1050_s10, %s7865_s27 }
  0xf6   : > { %p7862_p7 = pnand %p7861_p8, %p8416_p4  ;;  %p7868_p1 = scmp.lt.s32.totalorder %s7866_s8, %s7860_s6 }
  0xf8   : > { %p7863_p9 = pneg %p7862_p7  ;;  %p7869_p0 = por %p7868_p1, %p7867_p11 }
  0xfa   : > { %p7870_p3 = pnand %p7869_p0, %p7863_p9 }
  0xfc   : > { %7873 = shalt.err (!%p7870_p3)
}
  0xfd   : > { %7334 = dma.hbm_to_vmem [thread:$0]  (%p8416_p4), %s8634_s20, 16, %s1050_s10, %s9734_s9  }
  0xfe   : > { %s6800_s13 = sshll.u32 %s8204_s30, 5  ;;  %s9790_s19 = sld [smem:[#allocation67_spill]] }
  0xff   : > { %s1085_s8 = scalar_lea.vmem [#allocation20], %s6589_s4  ;;  %s9733_s18 = scalar_lea.sflag [#allocation21], %s8488_s1 }
 0x100   : > { %s1093_s5 = sshll.u32 %s1085_s8, 4  ;;  %s1094_s5 = int_to_ptr.vmem [resolvable:$true] %s1093_s5 }
 0x104   : > { %s8661_s0 = scalar_lea.hbm %s9790_s19, %s6800_s13  ;;  %s7878_s10 = scalar_lea.hbm %s9790_s19, 64 }
 0x105   : > { %s7874_s6 = scalar_lea.hbm %s8661_s0, 32  ;;  %p7879_p13 = scmp.lt.s32.totalorder %s8661_s0, %s9790_s19 }
 0x106   : > { %p7875_p2 = scmp.ne.s32.totalorder %s8661_s0, %s7874_s6  ;;  %p7880_p5 = scmp.lt.s32.totalorder %s7878_s10, %s7874_s6 }
 0x108   : > { %p7876_p6 = pnand %p7875_p2, %p8416_p4  ;;  %p7881_p8 = por %p7880_p5, %p7879_p13 }
 0x10a   : > { %p7877_p12 = pneg %p7876_p6 }
 0x10c   : > { %p7882_p7 = pnand %p7881_p8, %p7877_p12 }
 0x10e   : > { %7885 = shalt.err (!%p7882_p7)
}
 0x10f   : > { %s7886_s4 = scalar_lea.vmem %s1094_s5, 32  ;;  %s8219_s13 = smov [#allocation20]  }
 0x110   : > { %p7887_p9 = scmp.ne.s32.totalorder %s1094_s5, %s7886_s4  ;;  %s7890_s26 = sshll.u32 %s8219_s13, 4  ;;  %s7891_s26 = int_to_ptr.vmem [resolvable:$false] %s7890_s26 }
 0x111   : > { %s7892_s8 = scalar_lea.vmem %s7891_s26, 64  ;;  %p7893_p0 = scmp.lt.s32.totalorder %s1094_s5, %s7891_s26 }
 0x112   : > { %p7888_p11 = pnand %p7887_p9, %p8416_p4  ;;  %p7894_p3 = scmp.lt.s32.totalorder %s7892_s8, %s7886_s4 }
 0x114   : > { %p7889_p1 = pneg %p7888_p11  ;;  %p7895_p2 = por %p7894_p3, %p7893_p0 }
 0x116   : > { %p7896_p6 = pnand %p7895_p2, %p7889_p1 }
 0x118   : > { %7899 = shalt.err (!%p7896_p6)
}
 0x119   : > { %7336 = dma.hbm_to_vmem [thread:$0]  (%p8416_p4), %s8661_s0, 32, %s1094_s5, %s9733_s18  }
 0x11a   : > { %s9791_s22 = sld [smem:[#allocation70_spill]]  ;;  %s1128_s10 = scalar_lea.vmem [#allocation23], %s8485_s11 }
 0x11b   : > { %s1135_s27 = sshll.u32 %s1128_s10, 4  ;;  %s7313_s3 = smul.u32 3, %s8485_s11  ;;  %s1136_s27 = int_to_ptr.vmem [resolvable:$true] %s1135_s27 }
 0x11c   : > { %s9738_s4 = scalar_lea.sflag [#allocation24], %s8488_s1 }
 0x120   : > { %s8686_s20 = scalar_lea.hbm %s9791_s22, %s8506_s24  ;;  %s7904_s5 = scalar_lea.hbm %s9791_s22, 32 }
 0x121   : > { %s7900_s13 = scalar_lea.hbm %s8686_s20, 16  ;;  %p7905_p8 = scmp.lt.s32.totalorder %s8686_s20, %s9791_s22 }
 0x122   : > { %p7901_p12 = scmp.ne.s32.totalorder %s8686_s20, %s7900_s13  ;;  %p7906_p7 = scmp.lt.s32.totalorder %s7904_s5, %s7900_s13 }
 0x124   : > { %p7902_p13 = pnand %p7901_p12, %p8416_p4  ;;  %p7907_p9 = por %p7906_p7, %p7905_p8 }
 0x126   : > { %p7903_p5 = pneg %p7902_p13 }
 0x128   : > { %p7908_p11 = pnand %p7907_p9, %p7903_p5 }
 0x12a   : > { %7911 = shalt.err (!%p7908_p11)
}
 0x12b   : > { %s7912_s28 = scalar_lea.vmem %s1136_s27, 16  ;;  %s8220_s10 = smov [#allocation23]  }
 0x12c   : > { %p7913_p1 = scmp.ne.s32.totalorder %s1136_s27, %s7912_s28  ;;  %s7916_s18 = sshll.u32 %s8220_s10, 4  ;;  %s7917_s18 = int_to_ptr.vmem [resolvable:$false] %s7916_s18 }
 0x12d   : > { %s7918_s9 = scalar_lea.vmem %s7917_s18, 32  ;;  %p7919_p2 = scmp.lt.s32.totalorder %s1136_s27, %s7917_s18 }
 0x12e   : > { %p7914_p0 = pnand %p7913_p1, %p8416_p4  ;;  %p7920_p6 = scmp.lt.s32.totalorder %s7918_s9, %s7912_s28 }
 0x130   : > { %p7915_p3 = pneg %p7914_p0  ;;  %p7921_p12 = por %p7920_p6, %p7919_p2 }
 0x132   : > { %p7922_p13 = pnand %p7921_p12, %p7915_p3 }
 0x134   : > { %7925 = shalt.err (!%p7922_p13)
}
 0x135   : > { %7338 = dma.hbm_to_vmem [thread:$0]  (%p8416_p4), %s8686_s20, 16, %s1136_s27, %s9738_s4  }
 0x136   : > { %s7314_s13 = smul.u32 48, %s8204_s30  ;;  %s861_s26 = scalar_lea.vmem [#allocation3], %s7313_s3 }
 0x137   : > { %s869_s0 = sshll.u32 %s861_s26, 4  ;;  %s9792_s6 = sld [smem:[#allocation53_spill]]  ;;  %s870_s0 = int_to_ptr.vmem [resolvable:$true] %s869_s0 }
 0x138   : > { %s858_s9 = scalar_lea.sflag [#allocation4], %s8485_s11 }
 0x13d   : > { %s867_s18 = scalar_lea.hbm %s9792_s6, %s7314_s13  ;;  %s7930_s2 = scalar_lea.hbm %s9792_s6, 96 }
 0x13e   : > { %s7926_s28 = scalar_lea.hbm %s867_s18, 48  ;;  %p7931_p9 = scmp.lt.s32.totalorder %s867_s18, %s9792_s6 }
 0x13f   : > { %p7927_p5 = scmp.ne.s32.totalorder %s867_s18, %s7926_s28  ;;  %p7932_p11 = scmp.lt.s32.totalorder %s7930_s2, %s7926_s28 }
 0x141   : > { %p7928_p8 = pnand %p7927_p5, %p8416_p4  ;;  %p7933_p1 = por %p7932_p11, %p7931_p9 }
 0x143   : > { %p7929_p7 = pneg %p7928_p8 }
 0x145   : > { %p7934_p0 = pnand %p7933_p1, %p7929_p7 }
 0x147   : > { %7937 = shalt.err (!%p7934_p0)
}
 0x148   : > { %s7938_s30 = scalar_lea.vmem %s870_s0, 48  ;;  %s8221_s27 = smov [#allocation3]  }
 0x149   : > { %p7939_p3 = scmp.ne.s32.totalorder %s870_s0, %s7938_s30  ;;  %s7942_s3 = sshll.u32 %s8221_s27, 4  ;;  %s7943_s3 = int_to_ptr.vmem [resolvable:$false] %s7942_s3 }
 0x14a   : > { %s7944_s13 = scalar_lea.vmem %s7943_s3, 96  ;;  %p7945_p12 = scmp.lt.s32.totalorder %s870_s0, %s7943_s3 }
 0x14b   : > { %p7940_p2 = pnand %p7939_p3, %p8416_p4  ;;  %p7946_p13 = scmp.lt.s32.totalorder %s7944_s13, %s7938_s30 }
 0x14d   : > { %p7941_p6 = pneg %p7940_p2  ;;  %p7947_p5 = por %p7946_p13, %p7945_p12 }
 0x14f   : > { %p7948_p8 = pnand %p7947_p5, %p7941_p6 }
 0x151   : > { %7951 = shalt.err (!%p7948_p8)
}
 0x152   : > { %7325 = dma.hbm_to_vmem [thread:$0]  (%p8416_p4), %s867_s18, 48, %s870_s0, %s858_s9  }
 0x153   : > { %s9793_s25 = sld [smem:[#allocation55_spill]]  ;;  %s900_s5 = scalar_lea.vmem [#allocation7], %s8485_s11 }
 0x154   : > { %s907_s8 = sshll.u32 %s900_s5, 4  ;;  %s908_s8 = int_to_ptr.vmem [resolvable:$true] %s907_s8 }
 0x159   : > { %s905_s26 = scalar_lea.hbm %s9793_s25, %s8506_s24  ;;  %s7956_s30 = scalar_lea.hbm %s9793_s25, 32 }
 0x15a   : > { %s7952_s28 = scalar_lea.hbm %s905_s26, 16  ;;  %p7957_p1 = scmp.lt.s32.totalorder %s905_s26, %s9793_s25 }
 0x15b   : > { %p7953_p7 = scmp.ne.s32.totalorder %s905_s26, %s7952_s28  ;;  %p7958_p0 = scmp.lt.s32.totalorder %s7956_s30, %s7952_s28 }
 0x15d   : > { %p7954_p9 = pnand %p7953_p7, %p8416_p4  ;;  %p7959_p3 = por %p7958_p0, %p7957_p1 }
 0x15f   : > { %p7955_p11 = pneg %p7954_p9 }
 0x161   : > { %p7960_p2 = pnand %p7959_p3, %p7955_p11 }
 0x163   : > { %7963 = shalt.err (!%p7960_p2)
}
 0x164   : > { %s7964_s0 = scalar_lea.vmem %s908_s8, 16  ;;  %s8222_s18 = smov [#allocation7]  }
 0x165   : > { %p7965_p6 = scmp.ne.s32.totalorder %s908_s8, %s7964_s0  ;;  %s7968_s9 = sshll.u32 %s8222_s18, 4  ;;  %s7969_s9 = int_to_ptr.vmem [resolvable:$false] %s7968_s9 }
 0x166   : > { %s7970_s13 = scalar_lea.vmem %s7969_s9, 32  ;;  %p7971_p5 = scmp.lt.s32.totalorder %s908_s8, %s7969_s9 }
 0x167   : > { %p7966_p12 = pnand %p7965_p6, %p8416_p4  ;;  %p7972_p8 = scmp.lt.s32.totalorder %s7970_s13, %s7964_s0 }
 0x169   : > { %p7967_p13 = pneg %p7966_p12  ;;  %p7973_p7 = por %p7972_p8, %p7971_p5 }
 0x16b   : > { %p7974_p9 = pnand %p7973_p7, %p7967_p13 }
 0x16d   : > { %7977 = shalt.err (!%p7974_p9)
}
 0x16e   : > { %s9794_s12 = scalar_lea.sflag [#allocation6], %s8488_s1  ;;  %s9795_s28 = sld [smem:[#allocation57_spill]] }
 0x16f   : > { %7327 = dma.hbm_to_vmem [thread:$0]  (%p8416_p4), %s905_s26, 16, %s908_s8, %s9794_s12  }
 0x170   : > { %s934_s20 = scalar_lea.vmem [#allocation10], %s8485_s11 }
 0x171   : > { %s941_s30 = sshll.u32 %s934_s20, 4  ;;  %s942_s30 = int_to_ptr.vmem [resolvable:$true] %s941_s30 }
 0x174   : > { %s939_s10 = scalar_lea.hbm %s9795_s28, %s8506_s24  ;;  %s7982_s18 = scalar_lea.hbm %s9795_s28, 32 }
 0x175   : > { %s7978_s27 = scalar_lea.hbm %s939_s10, 16  ;;  %p7983_p3 = scmp.lt.s32.totalorder %s939_s10, %s9795_s28 }
 0x176   : > { %p7979_p11 = scmp.ne.s32.totalorder %s939_s10, %s7978_s27  ;;  %p7984_p2 = scmp.lt.s32.totalorder %s7982_s18, %s7978_s27 }
 0x178   : > { %p7980_p1 = pnand %p7979_p11, %p8416_p4  ;;  %p7985_p6 = por %p7984_p2, %p7983_p3 }
 0x17a   : > { %p7981_p0 = pneg %p7980_p1 }
 0x17c   : > { %p7986_p12 = pnand %p7985_p6, %p7981_p0 }
 0x17e   : > { %7989 = shalt.err (!%p7986_p12)
}
 0x17f   : > { %s7990_s26 = scalar_lea.vmem %s942_s30, 16  ;;  %s8223_s8 = smov [#allocation10]  }
 0x180   : > { %p7991_p13 = scmp.ne.s32.totalorder %s942_s30, %s7990_s26  ;;  %s7994_s12 = sshll.u32 %s8223_s8, 4  ;;  %s7995_s12 = int_to_ptr.vmem [resolvable:$false] %s7994_s12 }
 0x181   : > { %s7996_s2 = scalar_lea.vmem %s7995_s12, 32  ;;  %p7997_p7 = scmp.lt.s32.totalorder %s942_s30, %s7995_s12 }
 0x182   : > { %p7992_p5 = pnand %p7991_p13, %p8416_p4  ;;  %p7998_p9 = scmp.lt.s32.totalorder %s7996_s2, %s7990_s26 }
 0x184   : > { %p7993_p8 = pneg %p7992_p5  ;;  %p7999_p11 = por %p7998_p9, %p7997_p7 }
 0x186   : > { %p8000_p1 = pnand %p7999_p11, %p7993_p8 }
 0x188   : > { %8003 = shalt.err (!%p8000_p1)
}
 0x189   : > { %s9796_s5 = scalar_lea.sflag [#allocation9], %s8488_s1  ;;  %s9797_s3 = sld [smem:[#allocation59_spill]] }
 0x18a   : > { %7329 = dma.hbm_to_vmem [thread:$0]  (%p8416_p4), %s939_s10, 16, %s942_s30, %s9796_s5  }
 0x18b   : > { %s972_s18 = scalar_lea.vmem [#allocation13], %s8485_s11 }
 0x18c   : > { %s979_s9 = sshll.u32 %s972_s18, 4  ;;  %s980_s9 = int_to_ptr.vmem [resolvable:$true] %s979_s9 }
 0x18f   : > { %s977_s0 = scalar_lea.hbm %s9797_s3, %s8506_s24  ;;  %s8008_s12 = scalar_lea.hbm %s9797_s3, 32 }
 0x190   : > { %s8004_s13 = scalar_lea.hbm %s977_s0, 16  ;;  %p8009_p6 = scmp.lt.s32.totalorder %s977_s0, %s9797_s3 }
 0x191   : > { %p8005_p0 = scmp.ne.s32.totalorder %s977_s0, %s8004_s13  ;;  %p8010_p12 = scmp.lt.s32.totalorder %s8008_s12, %s8004_s13 }
 0x193   : > { %p8006_p3 = pnand %p8005_p0, %p8416_p4  ;;  %p8011_p13 = por %p8010_p12, %p8009_p6 }
 0x195   : > { %p8007_p2 = pneg %p8006_p3 }
 0x197   : > { %p8012_p5 = pnand %p8011_p13, %p8007_p2 }
 0x199   : > { %8015 = shalt.err (!%p8012_p5)
}
 0x19a   : > { %s8016_s10 = scalar_lea.vmem %s980_s9, 16  ;;  %s8224_s30 = smov [#allocation13]  }
 0x19b   : > { %p8017_p8 = scmp.ne.s32.totalorder %s980_s9, %s8016_s10  ;;  %s8020_s5 = sshll.u32 %s8224_s30, 4  ;;  %s8021_s5 = int_to_ptr.vmem [resolvable:$false] %s8020_s5 }
 0x19c   : > { %s8022_s20 = scalar_lea.vmem %s8021_s5, 32  ;;  %p8023_p11 = scmp.lt.s32.totalorder %s980_s9, %s8021_s5 }
 0x19d   : > { %p8018_p7 = pnand %p8017_p8, %p8416_p4  ;;  %p8024_p1 = scmp.lt.s32.totalorder %s8022_s20, %s8016_s10 }
 0x19f   : > { %p8019_p9 = pneg %p8018_p7  ;;  %p8025_p0 = por %p8024_p1, %p8023_p11 }
 0x1a1   : > { %p8026_p3 = pnand %p8025_p0, %p8019_p9 }
 0x1a3   : > { %8029 = shalt.err (!%p8026_p3)
}
 0x1a4   : > { %s9798_s4 = scalar_lea.sflag [#allocation12], %s8488_s1  ;;  %s9799_s15 = sld [smem:[#allocation63_spill]] }
 0x1a5   : > { %7331 = dma.hbm_to_vmem [thread:$0]  (%p8416_p4), %s977_s0, 16, %s980_s9, %s9798_s4  }
 0x1a6   : > { %s1025_s26 = scalar_lea.vmem [#allocation16], %s8485_s11 }
 0x1a7   : > { %s1032_s8 = sshll.u32 %s1025_s26, 4  ;;  %s1033_s8 = int_to_ptr.vmem [resolvable:$true] %s1032_s8 }
 0x1aa   : > { %s1030_s13 = scalar_lea.hbm %s9799_s15, %s8506_s24  ;;  %s8034_s30 = scalar_lea.hbm %s9799_s15, 32 }
 0x1ab   : > { %s8030_s12 = scalar_lea.hbm %s1030_s13, 16  ;;  %p8035_p13 = scmp.lt.s32.totalorder %s1030_s13, %s9799_s15 }
 0x1ac   : > { %p8031_p2 = scmp.ne.s32.totalorder %s1030_s13, %s8030_s12  ;;  %p8036_p5 = scmp.lt.s32.totalorder %s8034_s30, %s8030_s12 }
 0x1ae   : > { %p8032_p6 = pnand %p8031_p2, %p8416_p4  ;;  %p8037_p8 = por %p8036_p5, %p8035_p13 }
 0x1b0   : > { %p8033_p12 = pneg %p8032_p6 }
 0x1b2   : > { %p8038_p7 = pnand %p8037_p8, %p8033_p12 }
 0x1b4   : > { %8041 = shalt.err (!%p8038_p7)
}
 0x1b5   : > { %s8042_s0 = scalar_lea.vmem %s1033_s8, 16  ;;  %s8225_s9 = smov [#allocation16]  }
 0x1b6   : > { %p8043_p9 = scmp.ne.s32.totalorder %s1033_s8, %s8042_s0  ;;  %s8046_s4 = sshll.u32 %s8225_s9, 4  ;;  %s8047_s4 = int_to_ptr.vmem [resolvable:$false] %s8046_s4 }
 0x1b7   : > { %s8048_s27 = scalar_lea.vmem %s8047_s4, 32  ;;  %p8049_p0 = scmp.lt.s32.totalorder %s1033_s8, %s8047_s4 }
 0x1b8   : > { %p8044_p11 = pnand %p8043_p9, %p8416_p4  ;;  %p8050_p3 = scmp.lt.s32.totalorder %s8048_s27, %s8042_s0 }
 0x1ba   : > { %p8045_p1 = pneg %p8044_p11  ;;  %p8051_p2 = por %p8050_p3, %p8049_p0 }
 0x1bc   : > { %p8052_p6 = pnand %p8051_p2, %p8045_p1 }
 0x1be   : > { %8055 = shalt.err (!%p8052_p6)
}
 0x1bf   : > { %s9800_s18 = scalar_lea.sflag [#allocation15], %s8488_s1  ;;  %s9801_s17 = sld [smem:[#allocation65_spill]] }
 0x1c0   : > { %7333 = dma.hbm_to_vmem [thread:$0]  (%p8416_p4), %s1030_s13, 16, %s1033_s8, %s9800_s18  }
 0x1c1   : > { %s1059_s10 = scalar_lea.vmem [#allocation19], %s8485_s11 }
 0x1c2   : > { %s1066_s30 = sshll.u32 %s1059_s10, 4  ;;  %s1067_s30 = int_to_ptr.vmem [resolvable:$true] %s1066_s30 }
 0x1c5   : > { %s1064_s2 = scalar_lea.hbm %s9801_s17, %s8506_s24  ;;  %s8060_s9 = scalar_lea.hbm %s9801_s17, 32 }
 0x1c6   : > { %s8056_s5 = scalar_lea.hbm %s1064_s2, 16  ;;  %p8061_p8 = scmp.lt.s32.totalorder %s1064_s2, %s9801_s17 }
 0x1c7   : > { %p8057_p12 = scmp.ne.s32.totalorder %s1064_s2, %s8056_s5  ;;  %p8062_p7 = scmp.lt.s32.totalorder %s8060_s9, %s8056_s5 }
 0x1c9   : > { %p8058_p13 = pnand %p8057_p12, %p8416_p4  ;;  %p8063_p9 = por %p8062_p7, %p8061_p8 }
 0x1cb   : > { %p8059_p5 = pneg %p8058_p13 }
 0x1cd   : > { %p8064_p11 = pnand %p8063_p9, %p8059_p5 }
 0x1cf   : > { %8067 = shalt.err (!%p8064_p11)
}
 0x1d0   : > { %s8068_s13 = scalar_lea.vmem %s1067_s30, 16  ;;  %s8226_s8 = smov [#allocation19]  }
 0x1d1   : > { %p8069_p1 = scmp.ne.s32.totalorder %s1067_s30, %s8068_s13  ;;  %s8072_s18 = sshll.u32 %s8226_s8, 4  ;;  %s8073_s18 = int_to_ptr.vmem [resolvable:$false] %s8072_s18 }
 0x1d2   : > { %s8074_s26 = scalar_lea.vmem %s8073_s18, 32  ;;  %p8075_p2 = scmp.lt.s32.totalorder %s1067_s30, %s8073_s18 }
 0x1d3   : > { %p8070_p0 = pnand %p8069_p1, %p8416_p4  ;;  %p8076_p6 = scmp.lt.s32.totalorder %s8074_s26, %s8068_s13 }
 0x1d5   : > { %p8071_p3 = pneg %p8070_p0  ;;  %p8077_p12 = por %p8076_p6, %p8075_p2 }
 0x1d7   : > { %p8078_p13 = pnand %p8077_p12, %p8071_p3 }
 0x1d9   : > { %8081 = shalt.err (!%p8078_p13)
}
 0x1da   : > { %s9802_s12 = scalar_lea.sflag [#allocation18], %s8488_s1  ;;  %s9803_s21 = sld [smem:[#allocation69_spill]] }
 0x1db   : > { %7335 = dma.hbm_to_vmem [thread:$0]  (%p8416_p4), %s1064_s2, 16, %s1067_s30, %s9802_s12  }
 0x1dc   : > { %s1111_s0 = scalar_lea.vmem [#allocation22], %s8485_s11 }
 0x1dd   : > { %s1118_s9 = sshll.u32 %s1111_s0, 4  ;;  %s1119_s9 = int_to_ptr.vmem [resolvable:$true] %s1118_s9 }
 0x1e0   : > { %s1116_s20 = scalar_lea.hbm %s9803_s21, %s8506_s24  ;;  %s8086_s8 = scalar_lea.hbm %s9803_s21, 32 }
 0x1e1   : > { %s8082_s4 = scalar_lea.hbm %s1116_s20, 16  ;;  %p8087_p9 = scmp.lt.s32.totalorder %s1116_s20, %s9803_s21 }
 0x1e2   : > { %p8083_p5 = scmp.ne.s32.totalorder %s1116_s20, %s8082_s4  ;;  %p8088_p11 = scmp.lt.s32.totalorder %s8086_s8, %s8082_s4 }
 0x1e4   : > { %p8084_p8 = pnand %p8083_p5, %p8416_p4  ;;  %p8089_p1 = por %p8088_p11, %p8087_p9 }
 0x1e6   : > { %p8085_p7 = pneg %p8084_p8 }
 0x1e8   : > { %p8090_p0 = pnand %p8089_p1, %p8085_p7 }
 0x1ea   : > { %8093 = shalt.err (!%p8090_p0)
}
 0x1eb   : > { %s8094_s2 = scalar_lea.vmem %s1119_s9, 16  ;;  %s8227_s30 = smov [#allocation22]  }
 0x1ec   : > { %p8095_p3 = scmp.ne.s32.totalorder %s1119_s9, %s8094_s2  ;;  %s8098_s12 = sshll.u32 %s8227_s30, 4  ;;  %s8099_s12 = int_to_ptr.vmem [resolvable:$false] %s8098_s12 }
 0x1ed   : > { %s8100_s10 = scalar_lea.vmem %s8099_s12, 32  ;;  %p8101_p12 = scmp.lt.s32.totalorder %s1119_s9, %s8099_s12 }
 0x1ee   : > { %p8096_p2 = pnand %p8095_p3, %p8416_p4  ;;  %p8102_p13 = scmp.lt.s32.totalorder %s8100_s10, %s8094_s2 }
 0x1f0   : > { %p8097_p6 = pneg %p8096_p2  ;;  %p8103_p5 = por %p8102_p13, %p8101_p12 }
 0x1f2   : > { %p8104_p8 = pnand %p8103_p5, %p8097_p6 }
 0x1f4   : > { %8107 = shalt.err (!%p8104_p8)
}
 0x1f5   : > { %s9804_s5 = scalar_lea.sflag [#allocation21], %s8488_s1  ;;  %s1150_s27 = scalar_lea.hbm %s9700_s23, %s8506_s24 }
 0x1f6   : > { %7337 = dma.hbm_to_vmem [thread:$0]  (%p8416_p4), %s1116_s20, 16, %s1119_s9, %s9804_s5  }
 0x1f7   : > { %s1145_s13 = scalar_lea.vmem [#allocation25], %s8485_s11  ;;  %s8108_s18 = scalar_lea.hbm %s1150_s27, 16 }
 0x1f8   : > { %s1152_s8 = sshll.u32 %s1145_s13, 4  ;;  %p8109_p7 = scmp.ne.s32.totalorder %s1150_s27, %s8108_s18  ;;  %s1153_s8 = int_to_ptr.vmem [resolvable:$true] %s1152_s8 }
 0x1f9   : > { %s8112_s30 = scalar_lea.hbm %s9700_s23, 32  ;;  %p8113_p1 = scmp.lt.s32.totalorder %s1150_s27, %s9700_s23 }
 0x1fa   : > { %p8110_p9 = pnand %p8109_p7, %p8416_p4  ;;  %p8114_p0 = scmp.lt.s32.totalorder %s8112_s30, %s8108_s18 }
 0x1fc   : > { %p8111_p11 = pneg %p8110_p9  ;;  %p8115_p3 = por %p8114_p0, %p8113_p1 }
 0x1fe   : > { %p8116_p2 = pnand %p8115_p3, %p8111_p11 }
 0x200   : > { %8119 = shalt.err (!%p8116_p2)
}
 0x201   : > { %s8120_s11 = scalar_lea.vmem %s1153_s8, 16  ;;  %s8228_s24 = smov [#allocation25]  }
 0x202   : > { %p8121_p6 = scmp.ne.s32.totalorder %s1153_s8, %s8120_s11  ;;  %s8124_s20 = sshll.u32 %s8228_s24, 4  ;;  %s8125_s20 = int_to_ptr.vmem [resolvable:$false] %s8124_s20 }
 0x203   : > { %s8126_s9 = scalar_lea.vmem %s8125_s20, 32  ;;  %p8127_p5 = scmp.lt.s32.totalorder %s1153_s8, %s8125_s20 }
 0x204   : > { %p8122_p12 = pnand %p8121_p6, %p8416_p4  ;;  %p8128_p8 = scmp.lt.s32.totalorder %s8126_s9, %s8120_s11 }
 0x206   : > { %p8123_p13 = pneg %p8122_p12  ;;  %p8129_p7 = por %p8128_p8, %p8127_p5 }
 0x208   : > { %p8130_p9 = pnand %p8129_p7, %p8123_p13 }
 0x20a   : > { %8133 = shalt.err (!%p8130_p9)
}
 0x20b   : > { %s9805_s5 = scalar_lea.sflag [#allocation24], %s8488_s1 }
 0x20c   : > { %7339 = dma.hbm_to_vmem [thread:$0]  (%p8416_p4), %s1150_s27, 16, %s1153_s8, %s9805_s5  }
 0x20d PF: > { %1161 = sbr.rel (%p8430_p10) target bundleno = 9686 (0x25d6), region = 132  ;;  %s9806_s0 = sld [smem:[#allocation42_spill]] (!%p8430_p10) }
 0x20e   : > { %s9807_s4 = sld [smem:[#allocation47_spill]] (!%p8430_p10) }
 0x213   : > { %s8862_s13 = sand.u32 1, %s9806_s0  }
 0x214   : > { %s7315_s18 = smul.u32 3, %s8862_s13  ;;  %s1164_s26 = scalar_lea.sflag [#allocation4], %s8862_s13 }
 0x215   : > { %p9808_p11 = scmp.ne.s32.totalorder %s9807_s4, 0 }
 0x216   : > { %s8866_s2 = scalar_lea.vmem [#allocation3], %s7315_s18 }
 0x217   : > { %8151 = dma.done.wait (%p9808_p11), %s1164_s26, 48  }
 0x218   : > { %8153 = vsyncadd (%p9808_p11), %s1164_s26, 4294967248  ;;  %s9809_s29 = sld [smem:[#allocation44_spill]]  ;;  %s6596_s1 = sshll.u32 %s8862_s13, 6 }
 0x219   : > { %s8877_s8 = scalar_lea.vmem [#allocation5], %s6596_s1 }
 0x21e   : > { %s8873_s7 = sand.u32 1, %s9809_s29  }
 0x21f   : > { %s1173_s27 = scalar_lea.sflag [#allocation6], %s8873_s7 }
 0x220   : > { %8155 = dma.done.wait (%p9808_p11), %s1173_s27, 1040  }
 0x221   : > { %8157 = vsyncadd (%p9808_p11), %s1173_s27, 4294966256  ;;  %s1190_s12 = scalar_lea.sflag [#allocation9], %s8873_s7 }
 0x222   : > { %8159 = dma.done.wait (%p9808_p11), %s1190_s12, 32  }
 0x223   : > { %8161 = vsyncadd (%p9808_p11), %s1190_s12, 4294967264  ;;  %s1206_s24 = scalar_lea.sflag [#allocation12], %s8873_s7  ;;  %s8892_s20 = scalar_lea.vmem [#allocation11], %s6596_s1 }
 0x224   : > { %8163 = dma.done.wait (%p9808_p11), %s1206_s24, 1040  }
 0x225   : > { %8165 = vsyncadd (%p9808_p11), %s1206_s24, 4294966256  ;;  %s1223_s5 = scalar_lea.sflag [#allocation15], %s8873_s7  ;;  %s8900_s0 = scalar_lea.vmem [#allocation14], %s6596_s1 }
 0x226   : > { %8167 = dma.done.wait (%p9808_p11), %s1223_s5, 1040  }
 0x227   : > { %8169 = vsyncadd (%p9808_p11), %s1223_s5, 4294966256  ;;  %s1240_s26 = scalar_lea.sflag [#allocation18], %s8873_s7 }
 0x228   : > { %8171 = dma.done.wait (%p9808_p11), %s1240_s26, 32  }
 0x229   : > { %8173 = vsyncadd (%p9808_p11), %s1240_s26, 4294967264  ;;  %s6599_s1 = sshll.u32 %s8862_s13, 1  ;;  %s1256_s24 = scalar_lea.sflag [#allocation21], %s8873_s7 }
 0x22a   : > { %s8916_s5 = scalar_lea.vmem [#allocation20], %s6599_s1 }
 0x22b   : > { %8175 = dma.done.wait (%p9808_p11), %s1256_s24, 48  }
 0x22c   : > { %8177 = vsyncadd (%p9808_p11), %s1256_s24, 4294967248  ;;  %s1273_s26 = scalar_lea.sflag [#allocation24], %s8873_s7 }
 0x22d   : > { %8179 = dma.done.wait (%p9808_p11), %s1273_s26, 32  }
 0x22e   : > { %8181 = vsyncadd (%p9808_p11), %s1273_s26, 4294967264  ;;  %p9810_p4 = scmp.eq.s32.totalorder %s9809_s29, 0 }
 0x230   : > { %8183 = dma.done.wait (%p9810_p4), [#allocation27], 32   ;;  %p9811_p10 = pmov %p9810_p4 }
 0x231   : > { %p9812_p1 = pmov %p9810_p4 }
 0x232   : > { %8185 = vsyncadd (%p9811_p10), [#allocation27], 4294967264 }
 0x233   : > { %8187 = dma.done.wait (%p9812_p1), [#allocation30], 1040   ;;  %p9813_p0 = pmov %p9812_p1 }
 0x234   : > { %p1451_p3 = scmp.lt.s32.totalorder %s9809_s29, 1  ;;  %s9814_s1 = sld [smem:[#allocation60_spill]] }
 0x235   : > { %8189 = vsyncadd (%p9813_p0), [#allocation30], 4294966256  ;;  %s9815_s10 = sld [smem:[#allocation52_spill]]  ;;  %p9819_p2 = scmp.ne.s32.totalorder %s9809_s29, 0 }
 0x236   : > { %s1452_s7 = scalar_select %p1451_p3, %s9809_s29, 1 }
 0x237   : > { %s9816_s14 = sld [smem:[#allocation61_spill]] }
 0x238   : > { %s7316_s4 = smul.u32 192, %s1452_s7  ;;  %s6801_s24 = sshll.u32 %s1452_s7, 7 }
 0x239   : > { %s6607_s12 = sshll.u32 %s1452_s7, 1  ;;  %s9817_s19 = sld [smem:[#allocation66_spill]] }
 0x23a   : > { %s8943_s27 = scalar_lea.vmem %s9814_s1, %s6801_s24  ;;  %s9818_s1 = sld [smem:[#allocation68_spill]] }
 0x23b   : > { %s8948_s30 = scalar_lea.vmem %s9815_s10, %s7316_s4  ;;  %s9820_s9 = sld [smem:[#allocation48_spill]] (!%p9819_p2) }
 0x23c   : > { %1479 = sbr.rel (%p9819_p2) target bundleno = 580 (0x244), region = 212 }
 0x23d   : > { %s8953_s15 = scalar_lea.vmem %s9816_s14, %s6607_s12 }
 0x23f   : > { %s8958_s21 = scalar_lea.vmem %s9817_s19, %s6801_s24 }
 0x240   : > { %s8963_s26 = scalar_lea.vmem %s9818_s1, %s6801_s24 }
 0x241   : > { %s9821_s7 = smov %s9820_s9  ;;  %v1480_v0 = vld [vmem:[%s9820_s9] sm:$0xff] }
 0x242   : > { %v1481_v1 = vld [vmem:[%s9821_s7 + $0x8] sm:$0xff]  ;;  %1482 = vst [vmem:[#allocation2] sm:$0xff] %v1480_v0 }
 0x243   : > { %1483 = vst [vmem:[#allocation2 + $0x8] sm:$0xff] %v1481_v1 }
 0x244 PF: > { %v7432_v2 = vld [vmem:[%s8948_s30 + $0xac] ss:$12 sps:$4 sm:$0xff]   ;;  %v7434_v3 = vld [vmem:[%s8948_s30 + $0xa8] ss:$12 sps:$4 sm:$0xff]   ;;  %v8229_v4 = vmov 0.0   ;;  %v8230_v5 = vmov 0   ;;  %v1544_v31 = vlaneseq }
 0x245   : > { %6965 = vmatprep.subr.bf16.mxu1 %v8229_v4  ;;  %1719 = vmatprep.mubr.bf16.mxu0 %v8230_v5  ;;  %v7435_v6 = vld [vmem:[%s8948_s30 + $0x94] ss:$12 sps:$4 sm:$0xff]   ;;  %vm8231_vm0 = vmmov 0   ;;  %v7437_v7 = vld [vmem:[%s8948_s30 + $0x90] ss:$12 sps:$4 sm:$0xff]   ;;  %vm1771_vm1 = vcmask 261120  }
 0x246   : > { %1687 = vmatprep.subr.bf16.mxu0 %v7432_v2  ;;  %6981 = vmatprep.mubr.msk.bf16.mxu1 %vm8231_vm0, %v8229_v4  ;;  %v7438_v8 = vld [vmem:[%s8948_s30 + $0x7c] ss:$12 sps:$4 sm:$0xff]   ;;  %v7440_v10 = vld [vmem:[%s8948_s30 + $0x78] ss:$12 sps:$4 sm:$0xff]   ;;  %v7449_v13 = vld [vmem:[%s8948_s30 + $0x80] ss:$12 sps:$4 sm:$0xff]  }
 0x247   : > { %1688 = vmatpush1.bf16.msra.mxu0 %v7434_v3  ;;  %v7441_v9 = vld [vmem:[%s8948_s30 + $0xb0] ss:$12 sps:$4 sm:$0xff]   ;;  %v7445_v11 = vld [vmem:[%s8948_s30 + $0x98] ss:$12 sps:$4 sm:$0xff]   ;;  %v7444_v14 = vld [vmem:[%s8948_s30 + $0x60] ss:$12 sps:$4 sm:$0xff]  }
 0x248   : > { %1689 = vmatprep.subr.bf16.mxu0 %v7435_v6  ;;  %6966 = vmatpush3.bf16.msra.mxu1 %v7441_v9  ;;  %v7442_v12 = vld [vmem:[%s8948_s30 + $0x64] ss:$12 sps:$4 sm:$0xff]   ;;  %v7446_v15 = vld [vmem:[%s8948_s30 + $0x4c] ss:$12 sps:$4 sm:$0xff]   ;;  %v7453_v16 = vld [vmem:[%s8948_s30 + $0x68] ss:$12 sps:$4 sm:$0xff]  }
 0x249   : > { %6967 = vmatprep.subr.bf16.mxu1 %v8229_v4  ;;  %v7448_v17 = vld [vmem:[%s8948_s30 + $0x48] ss:$12 sps:$4 sm:$0xff]   ;;  %v7457_v19 = vld [vmem:[%s8948_s30 + $0x50] ss:$12 sps:$4 sm:$0xff]   ;;  %v7461_v22 = vld [vmem:[%s8948_s30 + $0x38] ss:$12 sps:$4 sm:$0xff]  }
 0x24a   : > { %v7450_v18 = vld [vmem:[%s8948_s30 + $0x34] ss:$12 sps:$4 sm:$0xff]   ;;  %v7452_v20 = vld [vmem:[%s8948_s30 + $0x30] ss:$12 sps:$4 sm:$0xff]   ;;  %v7456_v23 = vld [vmem:[%s8948_s30 + $0x18] ss:$12 sps:$4 sm:$0xff]  }
 0x24b   : > { %1690 = vmatpush1.bf16.msra.mxu0 %v7437_v7  ;;  %v7454_v21 = vld [vmem:[%s8948_s30 + $0x1c] ss:$12 sps:$4 sm:$0xff]   ;;  %v7458_v24 = vld [vmem:[%s8948_s30 + $0x4] ss:$12 sps:$4 sm:$0xff]   ;;  %v7462_v25 = vld [vmem:[%s8948_s30 + $0x20] ss:$12 sps:$4 sm:$0xff]  }
 0x24c   : > { %1691 = vmatprep.subr.bf16.mxu0 %v7438_v8  ;;  %6968 = vmatpush3.bf16.msra.mxu1 %v7445_v11  ;;  %v7460_v26 = vld [vmem:[%s8948_s30] ss:$12 sps:$4 sm:$0xff]   ;;  %v7463_v29 = vld [vmem:[%s8948_s30 + $0x8] ss:$12 sps:$4 sm:$0xff]   ;;  %v1545_v32 = vshrl.u32 %v1544_v31, 7  ;;  %s8232_s16 = smov 96  }
 0x24d   : > { %6969 = vmatprep.subr.bf16.mxu1 %v8229_v4  ;;  %v9005_v27 = vld [vmem:[#allocation2] sm:$0xff]  ;;  %v9007_v28 = vld [vmem:[#allocation2 + $0x8] sm:$0xff]  ;;  %v1524_v34 = vld [vmem:[%s8866_s2] sm:$0x7]  ;;  %s8233_s17 = smov 64   ;;  %s9822_s3 = sld [smem:[#allocation50_spill]] }
 0x24e   : > { %v1542_v30 = vpack.c.bf16 %v9007_v28, %v9005_v27  ;;  %v9020_v33 = vsub.s32 1, %v1545_v32  ;;  %v9023_v35 = vsub.s32 0, %v1545_v32  ;;  %v1554_v37 = vsub.s32 2, %v1545_v32  ;;  %s8234_s2 = smov 32   ;;  %s9824_s24 = sld [smem:[#allocation49_spill]] }
 0x24f   : > { %1692 = vmatpush1.bf16.msra.mxu0 %v7440_v10  ;;  %vm1850_vm2 = vcmask 64512   ;;  %s9828_s9 = sld [smem:[#allocation51_spill]] }
 0x250   : > { %1693 = vmatprep.subr.bf16.mxu0 %v7442_v12  ;;  %6970 = vmatpush3.bf16.msra.mxu1 %v7449_v13  ;;  %v9026_v36 = vrot.slane %v1524_v34, %v9020_v33  ;;  %v1547_v39 = vrot.slane %v1524_v34, %v9023_v35  ;;  %v1555_v42 = vrot.slane %v1524_v34, %v1554_v37  ;;  %v9083_v13 = vld [vmem:[%s8877_s8 + $0x8] sm:$0xff]   ;;  %s9836_s22 = sld [smem:[#allocation44_spill]] }
 0x251   : > { %6971 = vmatprep.subr.bf16.mxu1 %v8229_v4 }
 0x253   : > { %1694 = vmatpush1.bf16.msra.mxu0 %v7444_v14  ;;  %v9065_v55 = vld [vmem:[%s9822_s3] sm:$0xff] }
 0x254   : > { %1695 = vmatprep.subr.bf16.mxu0 %v7446_v15  ;;  %6972 = vmatpush3.bf16.msra.mxu1 %v7453_v16  ;;  %v9089_v16 = vld [vmem:[%s8877_s8] sm:$0xff]  }
 0x255   : > { %6973 = vmatprep.subr.bf16.mxu1 %v8229_v4  ;;  %s9829_s6 = smov %s9828_s9 }
 0x256   : > { %p6783_p6 = scmp.ne.s32.totalorder %s9836_s22, 1 }
 0x257   : > { %1696 = vmatpush1.bf16.msra.mxu0 %v7448_v17  ;;  %v9097_v17 = vld [vmem:[%s8877_s8 + $0x18] sm:$0xff]   ;;  %s9837_s29 = sld [smem:[#allocation75_spill]] (!%p6783_p6) }
 0x258   : > { %1697 = vmatprep.subr.bf16.mxu0 %v7450_v18  ;;  %6974 = vmatpush3.bf16.msra.mxu1 %v7457_v19 }
 0x259   : > { %6975 = vmatprep.subr.bf16.mxu1 %v8229_v4 }
 0x25b   : > { %1698 = vmatpush1.bf16.msra.mxu0 %v7452_v20  ;;  %v9104_v20 = vld [vmem:[%s8877_s8 + $0x10] sm:$0xff]  }
 0x25c   : > { %1699 = vmatprep.subr.bf16.mxu0 %v7454_v21  ;;  %6976 = vmatpush3.bf16.msra.mxu1 %v7461_v22 }
 0x25d   : > { %6977 = vmatprep.subr.bf16.mxu1 %v8229_v4 }
 0x25f   : > { %1700 = vmatpush1.bf16.msra.mxu0 %v7456_v23 }
 0x260   : > { %1701 = vmatprep.subr.bf16.mxu0 %v7458_v24  ;;  %6978 = vmatpush3.bf16.msra.mxu1 %v7462_v25 }
 0x261   : > { %6979 = vmatprep.subr.bf16.mxu1 %v8229_v4 }
 0x263   : > { %1702 = vmatpush1.bf16.msra.mxu0 %v7460_v26 }
 0x264   : > { %6995 = vmatprep.subr.mxu0 %v8229_v4  ;;  %6980 = vmatpush3.bf16.msra.mxu1 %v7463_v29 }
 0x265   : > { %6985 = vmatprep.subr.mxu1 %v8229_v4 }
 0x266   : > { %1720 = vmatmul.mubr.bf16.vlgmr.msra.gmra.mxu0 %v1542_v30 }
 0x267   : > { %6997 = vmatprep.mubr.msk.f32.mxu0 %vm8231_vm0, %v8229_v4  ;;  %6982 = vmatmul.mubr.bf16.vlgmr.msra.gmra.mxu1 %v1542_v30 }
 0x268   : > { %6987 = vmatprep.mubr.msk.f32.mxu1 %vm8231_vm0, %v8229_v4 }
 0x326   : > { %v1721_v38 = vpop.f32.mrf.mxu0 }
 0x327   : > { %v1764_v43 = vpop.f32.mrf.mxu1  ;;  %v9038_v47 = vadd.f32 %v1721_v38, %v1547_v39 }
 0x328   : > { %v1723_v40 = vpop.f32.mrf.mxu0  ;;  %v9041_v48 = vadd.f32 %v1764_v43, %v1555_v42 }
 0x329   : > { %v9030_v41 = vadd.f32 %v1723_v40, %v9026_v36  ;;  %v6983_v46 = vpop.f32.mrf.mxu1 }
 0x32a   : > { %v1725_v44 = vpop.f32.mrf.mxu0 }
 0x32b   : > { %v9032_v45 = vadd.f32 %v1725_v44, %v1547_v39  ;;  %1938 = vrot.lane.b32.xlu0 %v9030_v41, %s8232_s16  ;;  %6986 = vmatpush3.xpose.msk.msra.mxu1 %vm1771_vm1, %v9030_v41  ;;  %v1767_v49 = vpop.f32.mrf.mxu1 }
 0x32c   : > { %6990 = vmatprep.subr.mxu1 %v8229_v4  ;;  %v9045_v50 = vadd.f32 %v1767_v49, %v1555_v42  ;;  %v9069_v60 = vpop.f32.mrf.mxu0 }
 0x32d   : > { %v6984_v51 = vpop.f32.mrf.mxu1 }
 0x32e   : > { %6988 = vmatmul.mubr.msk.f32.vlgmr.msra.gmra.mxu1 %vm1771_vm1, %v9038_v47 }
 0x32f   : > { %1936 = vrot.lane.b32.xlu0 %v9038_v47, %s8232_s16  ;;  %6991 = vmatpush3.msra.mxu1 %v9041_v48 }
 0x330   : > { %6992 = vmatprep.mubr.msk.f32.mxu1 %vm8231_vm0, %v8229_v4  ;;  %7000 = vmatprep.subr.mxu1 %v8229_v4 }
 0x333   : > { %2026 = vrot.lane.b32.xlu0 %v9041_v48, %s8232_s16 }
 0x337   : > { %2217 = vrot.lane.b32.xlu0 %v9030_v41, %s8233_s17 }
 0x39d   : > { %v1939_v52 = vpop.permute.xlu0 %1938 }
 0x39e   : > { %6996 = vmatpush3.xpose.msk.msra.mxu0 %vm1771_vm1, %v1939_v52 }
 0x39f   : > { %7005 = vmatprep.subr.bf16.mxu0 %v8229_v4 }
 0x3a1   : > { %v1937_v53 = vpop.permute.xlu0 %1936 }
 0x3a2   : > { %6998 = vmatmul.mubr.msk.f32.vlgmr.msra.gmra.mxu0 %vm1771_vm1, %v1937_v53 }
 0x3a3   : > { %7009 = vmatprep.mubr.msk.bf16.mxu0 %vm8231_vm0, %v8229_v4  ;;  %7006 = vmatpush3.bf16.msra.mxu0 %v9097_v17 }
 0x3a4   : > { %7007 = vmatprep.subr.bf16.mxu0 %v8229_v4 }
 0x3a5   : > { %v2027_v8 = vpop.permute.xlu0 %2026 }
 0x3a7   : > { %7008 = vmatpush3.bf16.msra.mxu0 %v9104_v20 }
 0x3a8   : > { %7021 = vmatprep.subr.mxu0 %v8229_v4 }
 0x3a9   : > { %v2218_v18 = vpop.permute.xlu0 %2217 }
 0x3ee   : > { %v1844_v54 = vpop.f32.mrf.mxu1 }
 0x3ef   : > { %v1848_v56 = vmul.f32 0.17677669, %v1844_v54 }
 0x3f0   : > { %v6989_v57 = vpop.f32.mrf.mxu1 }
 0x3f1   : > { %v1849_v58 = vadd.f32 %v1848_v56, %v9065_v55 }
 0x3f3   : > { %v1851_v59 = vsel %vm1850_vm2, %v1849_v58, -inf }
 0x3f4   : > { %1852 = vmax.xlane.f32.xlu1 %v1851_v59 }
 0x462   : > { %v2010_v61 = vpop.f32.mrf.mxu0 }
 0x463   : > { %v2014_v62 = vmul.f32 0.17677669, %v2010_v61 }
 0x464   : > { %v6999_v63 = vpop.f32.mrf.mxu0 }
 0x465   : > { %v2015_v0 = vadd.f32 %v2014_v62, %v9065_v55 }
 0x467   : > { %v2016_v1 = vsel %vm1850_vm2, %v2015_v0, -inf }
 0x468   : > { %2017 = vmax.xlane.f32.xlu1 %v2016_v1 }
 0x47d   : > { %v1853_v2 = vpop.xlane.xlu1 %1852 }
 0x47e   : > { %v1854_v3 = vsub.f32 %v1849_v58, %v1853_v2 }
 0x480   : > { %v1855_v6 = vmul.f32 1.442695, %v1854_v3 }
 0x482   : > { %7552 = vpow2.f32 %v1855_v6 }
 0x48f   : > { %v7553_v7 = vpop.eup %7552 }
 0x490   : > { %6993 = vmatmul.mubr.msk.f32.vlgmr.msra.gmra.mxu1 %vm1850_vm2, %v7553_v7  ;;  %v1857_v9 = vsel %vm1850_vm2, %v7553_v7, 0.0 }
 0x491   : > { %1858 = vadd.xlane.f32.xlu0 %v1857_v9  ;;  %7001 = vmatpush3.msra.mxu1 %v2027_v8  ;;  %v9143_v8 = vadd.f32 %v9069_v60, %v9026_v36 }
 0x492   : > { %7002 = vmatprep.mubr.msk.f32.mxu1 %vm8231_vm0, %v8229_v4  ;;  %7013 = vmatprep.subr.bf16.mxu1 %v8229_v4 }
 0x4a7   : > { %2304 = vrot.lane.b32.xlu0 %v9041_v48, %s8233_s17 }
 0x4ab   : > { %2439 = vrot.lane.b32.xlu0 %v9038_v47, %s8234_s2 }
 0x4f1   : > { %v2018_v10 = vpop.xlane.xlu1 %2017 }
 0x4f2   : > { %v2019_v11 = vsub.f32 %v2015_v0, %v2018_v10  ;;  %v9149_v10 = vld [vmem:[%s8877_s8 + $0x28] sm:$0xff]  }
 0x4f4   : > { %v2020_v12 = vmul.f32 1.442695, %v2019_v11  ;;  %v9153_v11 = vld [vmem:[%s8877_s8 + $0x20] sm:$0xff]  }
 0x4f6   : > { %7554 = vpow2.f32 %v2020_v12 }
 0x503   : > { %v7555_v14 = vpop.eup %7554 }
 0x504   : > { %7003 = vmatmul.mubr.msk.f32.vlgmr.msra.gmra.mxu1 %vm1850_vm2, %v7555_v14  ;;  %v2022_v15 = vsel %vm1850_vm2, %v7555_v14, 0.0 }
 0x505   : > { %2023 = vadd.xlane.f32.xlu1 %v2022_v15  ;;  %7014 = vmatpush3.bf16.msra.mxu1 %v9083_v13 }
 0x506   : > { %7015 = vmatprep.subr.bf16.mxu1 %v8229_v4  ;;  %7017 = vmatprep.mubr.msk.bf16.mxu1 %vm8231_vm0, %v8229_v4 }
 0x509   : > { %7016 = vmatpush3.bf16.msra.mxu1 %v9089_v16 }
 0x50a   : > { %7026 = vmatprep.subr.mxu1 %v8229_v4 }
 0x516   : > { %2215 = vrot.lane.b32.xlu1 %v9038_v47, %s8233_s17 }
 0x51a   : > { %v1859_v19 = vpop.xlane.xlu0 %1858 }
 0x51b   : > { %7556 = vrcp.f32 %v1859_v19 }
 0x51e   : > { %v2305_v26 = vpop.permute.xlu0 %2304 }
 0x522   : > { %v2440_v63 = vpop.permute.xlu0 %2439 }
 0x528   : > { %v7557_v21 = vpop.eup %7556 }
 0x550   : > { %v1929_v22 = vpop.f32.mrf.mxu1 }
 0x551   : > { %v1934_v23 = vmul.f32 %v7557_v21, %v1929_v22 }
 0x552   : > { %v6994_v24 = vpop.f32.mrf.mxu1 }
 0x553   : > { %v1935_v25 = vpack.c.bf16 %v1934_v23, %v1934_v23 }
 0x555   : > { %7018 = vmatmul.mubr.msk.bf16.vlgmr.msra.gmra.mxu1 %vm1771_vm1, %v1935_v25  ;;  %v9176_v25 = vld [vmem:[%s9822_s3 + $0x8] sm:$0xff] }
 0x556   : > { %7027 = vmatpush3.msra.mxu1 %v2305_v26  ;;  %7028 = vmatprep.mubr.msk.f32.mxu1 %vm8231_vm0, %v8229_v4 }
 0x557   : > { %7039 = vmatprep.subr.mxu1 %v8229_v4 }
 0x58e   : > { %v2024_v29 = vpop.xlane.xlu1 %2023 }
 0x58f   : > { %7558 = vrcp.f32 %v2024_v29 }
 0x592   : > { %v2216_v38 = vpop.permute.xlu1 %2215 }
 0x59c   : > { %v7559_v30 = vpop.eup %7558 }
 0x5c4   : > { %v2098_v31 = vpop.f32.mrf.mxu1 }
 0x5c5   : > { %v2103_v32 = vmul.f32 %v7559_v30, %v2098_v31 }
 0x5c6   : > { %v7004_v34 = vpop.f32.mrf.mxu1 }
 0x5c7   : > { %v2104_v37 = vpack.c.bf16 %v2103_v32, %v2103_v32 }
 0x5c9   : > { %7010 = vmatmul.mubr.msk.bf16.vlgmr.msra.gmra.mxu0 %vm1771_vm1, %v2104_v37 }
 0x5ca   : > { %7022 = vmatpush3.xpose.msk.msra.mxu0 %vm1771_vm1, %v2218_v18  ;;  %7023 = vmatprep.mubr.msk.f32.mxu0 %vm8231_vm0, %v8229_v4 }
 0x5cb   : > { %7031 = vmatprep.subr.bf16.mxu0 %v8229_v4 }
 0x5d1   : > { %7024 = vmatmul.mubr.msk.f32.vlgmr.msra.gmra.mxu0 %vm1771_vm1, %v2216_v38 }
 0x5d2   : > { %7035 = vmatprep.mubr.msk.bf16.mxu0 %vm8231_vm0, %v8229_v4  ;;  %7032 = vmatpush3.bf16.msra.mxu0 %v9149_v10 }
 0x5d3   : > { %7033 = vmatprep.subr.bf16.mxu0 %v8229_v4 }
 0x5d6   : > { %7034 = vmatpush3.bf16.msra.mxu0 %v9153_v11 }
 0x5d7   : > { %7049 = vmatprep.subr.bf16.mxu0 %v8229_v4 }
 0x615   : > { %v9120_v39 = vpop.f32.mrf.mxu1 }
 0x617   : > { %v7019_v40 = vpop.f32.mrf.mxu1 }
 0x619   : > { %v2212_v42 = vpop.f32.mrf.mxu1 }
 0x61b   : > { %v7020_v43 = vpop.f32.mrf.mxu1 }
 0x689   : > { %v9122_v44 = vpop.f32.mrf.mxu0 }
 0x68a   : > { %v2210_v32 = vadd.f32 %v9120_v39, %v9122_v44 }
 0x68b   : > { %v7011_v46 = vpop.f32.mrf.mxu0 }
 0x68c   : > { %v9186_v46 = vld [vmem:[%s8877_s8 + $0x38] sm:$0xff]  }
 0x68d   : > { %v2157_v47 = vpop.f32.mrf.mxu0 }
 0x68e   : > { %v9190_v47 = vld [vmem:[%s8877_s8 + $0x30] sm:$0xff]   ;;  %s9823_s8 = scalar_lea.vmem [#allocation7], %s8862_s13 }
 0x68f   : > { %v7012_v49 = vpop.f32.mrf.mxu0 }
 0x691   : > { %v2289_v51 = vpop.f32.mrf.mxu0 }
 0x692   : > { %v2293_v52 = vmul.f32 0.17677669, %v2289_v51 }
 0x693   : > { %v7025_v53 = vpop.f32.mrf.mxu0 }
 0x694   : > { %v2294_v54 = vadd.f32 %v2293_v52, %v9065_v55 }
 0x696   : > { %v2295_v56 = vsel %vm1850_vm2, %v2294_v54, -inf }
 0x697   : > { %2296 = vmax.xlane.f32.xlu1 %v2295_v56 }
 0x6a8   : > { %2441 = vrot.lane.b32.xlu1 %v9030_v41, %s8234_s2 }
 0x6ac   : > { %2528 = vrot.lane.b32.xlu1 %v9041_v48, %s8234_s2 }
 0x720   : > { %v2297_v57 = vpop.xlane.xlu1 %2296 }
 0x721   : > { %v2298_v58 = vsub.f32 %v2294_v54, %v2297_v57 }
 0x723   : > { %v2299_v59 = vmul.f32 1.442695, %v2298_v58 }
 0x724   : > { %v2442_v61 = vpop.permute.xlu1 %2441 }
 0x725   : > { %7560 = vpow2.f32 %v2299_v59 }
 0x728   : > { %v2529_v41 = vpop.permute.xlu1 %2528 }
 0x732   : > { %v7561_v62 = vpop.eup %7560 }
 0x733   : > { %7029 = vmatmul.mubr.msk.f32.vlgmr.msra.gmra.mxu1 %vm1850_vm2, %v7561_v62  ;;  %v2301_v9 = vsel %vm1850_vm2, %v7561_v62, 0.0 }
 0x734   : > { %7040 = vmatpush3.xpose.msk.msra.mxu1 %vm1771_vm1, %v2442_v61  ;;  %7041 = vmatprep.mubr.msk.f32.mxu1 %vm8231_vm0, %v8229_v4 }
 0x735   : > { %7044 = vmatprep.subr.mxu1 %v8229_v4 }
 0x737   : > { %7042 = vmatmul.mubr.msk.f32.vlgmr.msra.gmra.mxu1 %vm1771_vm1, %v2440_v63 }
 0x738   : > { %7045 = vmatpush3.msra.mxu1 %v2529_v41  ;;  %7046 = vmatprep.mubr.msk.f32.mxu1 %vm8231_vm0, %v8229_v4 }
 0x739   : > { %7057 = vmatprep.subr.mxu1 %v8229_v4 }
 0x7f3   : > { %v2376_v48 = vpop.f32.mrf.mxu1 }
 0x7f5   : > { %v7030_v0 = vpop.f32.mrf.mxu1 }
 0x7f7   : > { %v2513_v1 = vpop.f32.mrf.mxu1 }
 0x7f8   : > { %v2517_v2 = vmul.f32 0.17677669, %v2513_v1 }
 0x7f9   : > { %v7043_v3 = vpop.f32.mrf.mxu1 }
 0x7fa   : > { %v2518_v6 = vadd.f32 %v2517_v2, %v9065_v55 }
 0x7fc   : > { %v2519_v7 = vsel %vm1850_vm2, %v2518_v6, -inf }
 0x7fd   : > { %2520 = vmax.xlane.f32.xlu0 %v2519_v7 }
 0x813   : > { %2828 = vrot.lane.b32.xlu0 %v9143_v8, %s8232_s16 }
 0x832   : > { %2302 = vadd.xlane.f32.xlu0 %v2301_v9 }
 0x886   : > { %v2521_v36 = vpop.xlane.xlu0 %2520 }
 0x887   : > { %v2522_v55 = vsub.f32 %v2518_v6, %v2521_v36 }
 0x889   : > { %v2523_v60 = vmul.f32 1.442695, %v2522_v55 }
 0x88a   : > { %v2829_v14 = vpop.permute.xlu0 %2828 }
 0x88b   : > { %7562 = vpow2.f32 %v2523_v60 }
 0x898   : > { %v7563_v12 = vpop.eup %7562 }
 0x899   : > { %7047 = vmatmul.mubr.msk.f32.vlgmr.msra.gmra.mxu1 %vm1850_vm2, %v7563_v12  ;;  %v2525_v43 = vsel %vm1850_vm2, %v7563_v12, 0.0 }
 0x89a   : > { %7058 = vmatpush3.xpose.msk.msra.mxu1 %vm1771_vm1, %v9143_v8  ;;  %7059 = vmatprep.mubr.msk.f32.mxu1 %vm8231_vm0, %v8229_v4 }
 0x89b   : > { %7062 = vmatprep.subr.mxu1 %v8229_v4 }
 0x89d   : > { %7060 = vmatmul.mubr.msk.f32.vlgmr.msra.gmra.mxu1 %vm1771_vm1, %v9032_v45 }
 0x89e   : > { %7063 = vmatpush3.msra.mxu1 %v9045_v50  ;;  %7064 = vmatprep.mubr.msk.f32.mxu1 %vm8231_vm0, %v8229_v4 }
 0x89f   : > { %7067 = vmatprep.subr.mxu1 %v8229_v4 }
 0x8bb   : > { %v2303_v15 = vpop.xlane.xlu0 %2302 }
 0x8bc   : > { %7564 = vrcp.f32 %v2303_v15 }
 0x8c9   : > { %v7565_v18 = vpop.eup %7564 }
 0x8ca   : > { %v2381_v19 = vmul.f32 %v7565_v18, %v2376_v48 }
 0x8cc   : > { %v2382_v21 = vpack.c.bf16 %v2381_v19, %v2381_v19 }
 0x8ce   : > { %7036 = vmatmul.mubr.msk.bf16.vlgmr.msra.gmra.mxu0 %vm1771_vm1, %v2382_v21 }
 0x8cf   : > { %7053 = vmatprep.mubr.msk.bf16.mxu0 %vm8231_vm0, %v8229_v4  ;;  %7050 = vmatpush3.bf16.msra.mxu0 %v9186_v46 }
 0x8d0   : > { %7051 = vmatprep.subr.bf16.mxu0 %v8229_v4 }
 0x8d3   : > { %7052 = vmatpush3.bf16.msra.mxu0 %v9190_v47 }
 0x8d4   : > { %7072 = vmatprep.subr.mxu0 %v8229_v4 }
 0x959   : > { %v2600_v22 = vpop.f32.mrf.mxu1 }
 0x95b   : > { %v7048_v23 = vpop.f32.mrf.mxu1 }
 0x95d   : > { %v2735_v24 = vpop.f32.mrf.mxu1 }
 0x95e   : > { %v2739_v26 = vmul.f32 0.17677669, %v2735_v24 }
 0x95f   : > { %v7061_v29 = vpop.f32.mrf.mxu1 }
 0x960   : > { %v2740_v30 = vadd.f32 %v2739_v26, %v9176_v25 }
 0x962   : > { %v2741_v31 = vsel %vm1850_vm2, %v2740_v30, -inf }
 0x963   : > { %2742 = vmax.xlane.f32.xlu1 %v2741_v31 }
 0x974   : > { %2826 = vrot.lane.b32.xlu1 %v9032_v45, %s8232_s16 }
 0x98e   : > { %v2432_v34 = vpop.f32.mrf.mxu0 }
 0x98f   : > { %v2438_v37 = vadd.f32 %v2432_v34, %v2210_v32 }
 0x990   : > { %v7037_v38 = vpop.f32.mrf.mxu0 }
 0x992   : > { %v2435_v40 = vpop.f32.mrf.mxu0 }
 0x994   : > { %v7038_v42 = vpop.f32.mrf.mxu0 }
 0x998   : > { %2526 = vadd.xlane.f32.xlu1 %v2525_v43 }
 0x9ec   : > { %v2743_v39 = vpop.xlane.xlu1 %2742 }
 0x9ed   : > { %v2744_v44 = vsub.f32 %v2740_v30, %v2743_v39 }
 0x9ef   : > { %v2745_v49 = vmul.f32 1.442695, %v2744_v44 }
 0x9f0   : > { %v2827_v52 = vpop.permute.xlu1 %2826 }
 0x9f1   : > { %7566 = vpow2.f32 %v2745_v49 }
 0x9fe   : > { %v7567_v51 = vpop.eup %7566 }
 0x9ff   : > { %7065 = vmatmul.mubr.msk.f32.vlgmr.msra.gmra.mxu1 %vm1850_vm2, %v7567_v51  ;;  %v2747_v3 = vsel %vm1850_vm2, %v7567_v51, 0.0 }
 0xa00   : > { %7068 = vmatpush3.xpose.msk.msra.mxu1 %vm1771_vm1, %v2829_v14  ;;  %7069 = vmatprep.mubr.msk.f32.mxu1 %vm8231_vm0, %v8229_v4 }
 0xa01   : > { %7077 = vmatprep.subr.bf16.mxu1 %v8229_v4 }
 0xa03   : > { %7070 = vmatmul.mubr.msk.f32.vlgmr.msra.gmra.mxu1 %vm1771_vm1, %v2827_v52 }
 0xa04   : > { %7078 = vmatpush3.bf16.msra.mxu1 %v9097_v17  ;;  %7081 = vmatprep.mubr.msk.bf16.mxu1 %vm8231_vm0, %v8229_v4 }
 0xa05   : > { %7079 = vmatprep.subr.bf16.mxu1 %v8229_v4 }
 0xa08   : > { %7080 = vmatpush3.bf16.msra.mxu1 %v9104_v20 }
 0xa09   : > { %7093 = vmatprep.subr.mxu1 %v8229_v4 }
 0xa21   : > { %v2527_v53 = vpop.xlane.xlu1 %2526 }
 0xa22   : > { %7568 = vrcp.f32 %v2527_v53 }
 0xa2f   : > { %v7569_v54 = vpop.eup %7568 }
 0xa30   : > { %v2605_v56 = vmul.f32 %v7569_v54, %v2600_v22 }
 0xa32   : > { %v2606_v57 = vpack.c.bf16 %v2605_v56, %v2605_v56 }
 0xa34   : > { %7054 = vmatmul.mubr.msk.bf16.vlgmr.msra.gmra.mxu0 %vm1771_vm1, %v2606_v57 }
 0xa35   : > { %7074 = vmatprep.mubr.msk.f32.mxu0 %vm8231_vm0, %v8229_v4 }
 0xabf   : > { %v2819_v17 = vpop.f32.mrf.mxu1 }
 0xac1   : > { %v7066_v58 = vpop.f32.mrf.mxu1 }
 0xac3   : > { %v2900_v59 = vpop.f32.mrf.mxu1 }
 0xac4   : > { %v2904_v61 = vmul.f32 0.17677669, %v2900_v59 }
 0xac5   : > { %v7071_v62 = vpop.f32.mrf.mxu1 }
 0xac6   : > { %v2905_v63 = vadd.f32 %v2904_v61, %v9176_v25 }
 0xac8   : > { %v2906_v20 = vsel %vm1850_vm2, %v2905_v63, -inf }
 0xac9   : > { %2907 = vmax.xlane.f32.xlu0 %v2906_v20 }
 0xadf   : > { %2916 = vrot.lane.b32.xlu0 %v9045_v50, %s8232_s16 }
 0xae3   : > { %3081 = vrot.lane.b32.xlu0 %v9032_v45, %s8233_s17 }
 0xaf4   : > { %v2656_v41 = vpop.f32.mrf.mxu0 }
 0xaf5   : > { %v9216_v48 = vadd.f32 %v2656_v41, %v2438_v37 }
 0xaf6   : > { %v7055_v0 = vpop.f32.mrf.mxu0 }
 0xaf8   : > { %v2659_v1 = vpop.f32.mrf.mxu0 }
 0xafa   : > { %v7056_v2 = vpop.f32.mrf.mxu0 }
 0xb02   : > { %2748 = vadd.xlane.f32.xlu0 %v2747_v3 }
 0xb18   : > { %3170 = vrot.lane.b32.xlu0 %v9045_v50, %s8233_s17 }
 0xb1c   : > { %3293 = vrot.lane.b32.xlu0 %v9032_v45, %s8234_s2 }
 0xb52   : > { %v2908_v6 = vpop.xlane.xlu0 %2907 }
 0xb53   : > { %v2909_v7 = vsub.f32 %v2905_v63, %v2908_v6  ;;  %v6677_v6 = vld [vmem:[%s9823_s8] ss:$0 sm:$0xff] }
 0xb55   : > { %v2910_v9 = vmul.f32 1.442695, %v2909_v7 }
 0xb56   : > { %v2917_v36 = vpop.permute.xlu0 %2916 }
 0xb57   : > { %7570 = vpow2.f32 %v2910_v9  ;;  %7073 = vmatpush3.msra.mxu0 %v2917_v36 }
 0xb58   : > { %7085 = vmatprep.subr.bf16.mxu0 %v8229_v4 }
 0xb5a   : > { %v3082_v45 = vpop.permute.xlu0 %3081 }
 0xb64   : > { %v7571_v55 = vpop.eup %7570 }
 0xb65   : > { %7075 = vmatmul.mubr.msk.f32.vlgmr.msra.gmra.mxu0 %vm1850_vm2, %v7571_v55  ;;  %v2912_v60 = vsel %vm1850_vm2, %v7571_v55, 0.0 }
 0xb66   : > { %2913 = vadd.xlane.f32.xlu1 %v2912_v60  ;;  %7086 = vmatpush3.bf16.msra.mxu0 %v9083_v13 }
 0xb67   : > { %7087 = vmatprep.subr.bf16.mxu0 %v8229_v4  ;;  %7089 = vmatprep.mubr.msk.bf16.mxu0 %vm8231_vm0, %v8229_v4 }
 0xb6a   : > { %7088 = vmatpush3.bf16.msra.mxu0 %v9089_v16 }
 0xb6b   : > { %7098 = vmatprep.subr.mxu0 %v8229_v4 }
 0xb77   : > { %3083 = vrot.lane.b32.xlu1 %v9143_v8, %s8233_s17 }
 0xb8b   : > { %v2749_v12 = vpop.xlane.xlu0 %2748 }
 0xb8c   : > { %7572 = vrcp.f32 %v2749_v12 }
 0xb8f   : > { %v3171_v19 = vpop.permute.xlu0 %3170 }
 0xb99   : > { %v7573_v14 = vpop.eup %7572 }
 0xb9a   : > { %v2824_v15 = vmul.f32 %v7573_v14, %v2819_v17 }
 0xb9c   : > { %v2825_v18 = vpack.c.bf16 %v2824_v15, %v2824_v15 }
 0xb9e   : > { %7090 = vmatmul.mubr.msk.bf16.vlgmr.msra.gmra.mxu0 %vm1771_vm1, %v2825_v18 }
 0xb9f   : > { %7099 = vmatpush3.msra.mxu0 %v3171_v19  ;;  %7100 = vmatprep.mubr.msk.f32.mxu0 %vm8231_vm0, %v8229_v4 }
 0xba0   : > { %7111 = vmatprep.subr.mxu0 %v8229_v4 }
 0xbef   : > { %v2914_v13 = vpop.xlane.xlu1 %2913 }
 0xbf0   : > { %7574 = vrcp.f32 %v2914_v13 }
 0xbf3   : > { %v3084_v26 = vpop.permute.xlu1 %3083 }
 0xbfd   : > { %v7575_v16 = vpop.eup %7574 }
 0xc25   : > { %v2988_v21 = vpop.f32.mrf.mxu0 }
 0xc26   : > { %v2993_v22 = vmul.f32 %v7575_v16, %v2988_v21 }
 0xc27   : > { %v7076_v23 = vpop.f32.mrf.mxu0 }
 0xc28   : > { %v2994_v24 = vpack.c.bf16 %v2993_v22, %v2993_v22 }
 0xc2a   : > { %7082 = vmatmul.mubr.msk.bf16.vlgmr.msra.gmra.mxu1 %vm1771_vm1, %v2994_v24 }
 0xc2b   : > { %7094 = vmatpush3.xpose.msk.msra.mxu1 %vm1771_vm1, %v3084_v26  ;;  %7095 = vmatprep.mubr.msk.f32.mxu1 %vm8231_vm0, %v8229_v4 }
 0xc2c   : > { %7103 = vmatprep.subr.bf16.mxu1 %v8229_v4 }
 0xc32   : > { %7096 = vmatmul.mubr.msk.f32.vlgmr.msra.gmra.mxu1 %vm1771_vm1, %v3082_v45 }
 0xc33   : > { %7104 = vmatpush3.bf16.msra.mxu1 %v9149_v10  ;;  %7107 = vmatprep.mubr.msk.bf16.mxu1 %vm8231_vm0, %v8229_v4 }
 0xc34   : > { %7105 = vmatprep.subr.bf16.mxu1 %v8229_v4 }
 0xc37   : > { %7106 = vmatpush3.bf16.msra.mxu1 %v9153_v11 }
 0xc38   : > { %7121 = vmatprep.subr.bf16.mxu1 %v8229_v4 }
 0xc5e   : > { %v9250_v29 = vpop.f32.mrf.mxu0 }
 0xc60   : > { %v7091_v30 = vpop.f32.mrf.mxu0 }
 0xc62   : > { %v3078_v31 = vpop.f32.mrf.mxu0 }
 0xc64   : > { %v7092_v32 = vpop.f32.mrf.mxu0 }
 0xcea   : > { %v3032_v34 = vpop.f32.mrf.mxu1 }
 0xcec   : > { %v7083_v37 = vpop.f32.mrf.mxu1 }
 0xced   : > { %v7474_v37 = vld [vmem:[%s8943_s27 + $0x74] ss:$8 sps:$4 sm:$0xff]  }
 0xcee   : > { %v3035_v38 = vpop.f32.mrf.mxu1 }
 0xcef   : > { %v7477_v38 = vld [vmem:[%s8943_s27 + $0x64] ss:$8 sps:$4 sm:$0xff]  }
 0xcf0   : > { %v7084_v40 = vpop.f32.mrf.mxu1 }
 0xcf1   : > { %v7481_v40 = vld [vmem:[%s8892_s20 + $0x38] sm:$0xff]  }
 0xcf2   : > { %v3155_v42 = vpop.f32.mrf.mxu1 }
 0xcf3   : > { %v3159_v10 = vmul.f32 0.17677669, %v3155_v42  ;;  %v7475_v42 = vld [vmem:[%s8943_s27 + $0x60] ss:$8 sps:$4 sm:$0xff]  }
 0xcf4   : > { %v7097_v43 = vpop.f32.mrf.mxu1 }
 0xcf5   : > { %v3160_v39 = vadd.f32 %v3159_v10, %v9176_v25  ;;  %v7480_v10 = vld [vmem:[%s8943_s27 + $0x54] ss:$8 sps:$4 sm:$0xff]   ;;  %v7478_v43 = vld [vmem:[%s8943_s27 + $0x50] ss:$8 sps:$4 sm:$0xff]  }
 0xcf7   : > { %v3161_v44 = vsel %vm1850_vm2, %v3160_v39, -inf }
 0xcf8   : > { %3162 = vmax.xlane.f32.xlu1 %v3161_v44  ;;  %v7482_v44 = vld [vmem:[%s8943_s27 + $0x40] ss:$8 sps:$4 sm:$0xff]  }
 0xd09   : > { %3295 = vrot.lane.b32.xlu1 %v9143_v8, %s8234_s2  ;;  %v3294_v8 = vpop.permute.xlu0 %3293 }
 0xd0d   : > { %3382 = vrot.lane.b32.xlu1 %v9045_v50, %s8234_s2 }
 0xd81   : > { %v3163_v11 = vpop.xlane.xlu1 %3162 }
 0xd82   : > { %v3164_v49 = vsub.f32 %v3160_v39, %v3163_v11  ;;  %v7484_v39 = vld [vmem:[%s8943_s27 + $0x44] ss:$8 sps:$4 sm:$0xff]  }
 0xd84   : > { %v3165_v51 = vmul.f32 1.442695, %v3164_v49 }
 0xd85   : > { %v3296_v52 = vpop.permute.xlu1 %3295 }
 0xd86   : > { %7576 = vpow2.f32 %v3165_v51 }
 0xd89   : > { %v3383_v50 = vpop.permute.xlu1 %3382 }
 0xd93   : > { %v7577_v53 = vpop.eup %7576 }
 0xd94   : > { %7101 = vmatmul.mubr.msk.f32.vlgmr.msra.gmra.mxu0 %vm1850_vm2, %v7577_v53  ;;  %v3167_v54 = vsel %vm1850_vm2, %v7577_v53, 0.0  ;;  %v7488_v53 = vld [vmem:[%s8943_s27 + $0x34] ss:$8 sps:$4 sm:$0xff]  }
 0xd95   : > { %7112 = vmatpush3.xpose.msk.msra.mxu0 %vm1771_vm1, %v3296_v52  ;;  %3168 = vadd.xlane.f32.xlu1 %v3167_v54  ;;  %v7486_v54 = vld [vmem:[%s8943_s27 + $0x30] ss:$8 sps:$4 sm:$0xff]  }
 0xd96   : > { %7113 = vmatprep.mubr.msk.f32.mxu0 %vm8231_vm0, %v8229_v4  ;;  %7116 = vmatprep.subr.mxu0 %v8229_v4 }
 0xd98   : > { %7114 = vmatmul.mubr.msk.f32.vlgmr.msra.gmra.mxu0 %vm1771_vm1, %v3294_v8  ;;  %v7489_v8 = vld [vmem:[%s8892_s20 + $0x28] sm:$0xff]  }
 0xd99   : > { %7117 = vmatpush3.msra.mxu0 %v3383_v50  ;;  %7118 = vmatprep.mubr.msk.f32.mxu0 %vm8231_vm0, %v8229_v4  ;;  %v7490_v50 = vld [vmem:[%s8943_s27 + $0x20] ss:$8 sps:$4 sm:$0xff]  }
 0xd9a   : > { %7129 = vmatprep.subr.bf16.mxu0 %v8229_v4 }
 0xe1e   : > { %v3169_v56 = vpop.xlane.xlu1 %3168 }
 0xe1f   : > { %7578 = vrcp.f32 %v3169_v56  ;;  %v7492_v56 = vld [vmem:[%s8943_s27 + $0x24] ss:$8 sps:$4 sm:$0xff]  }
 0xe2c   : > { %v7579_v57 = vpop.eup %7578 }
 0xe54   : > { %v3242_v17 = vpop.f32.mrf.mxu0 }
 0xe55   : > { %v3247_v58 = vmul.f32 %v7579_v57, %v3242_v17  ;;  %v7493_v57 = vld [vmem:[%s8892_s20 + $0x20] sm:$0xff]  }
 0xe56   : > { %v7102_v59 = vpop.f32.mrf.mxu0  ;;  %v7496_v17 = vld [vmem:[%s8943_s27 + $0x14] ss:$8 sps:$4 sm:$0xff]  }
 0xe57   : > { %v3248_v61 = vpack.c.bf16 %v3247_v58, %v3247_v58  ;;  %v7494_v58 = vld [vmem:[%s8943_s27 + $0x10] ss:$8 sps:$4 sm:$0xff]  }
 0xe58   : > { %v3367_v62 = vpop.f32.mrf.mxu0  ;;  %v7497_v59 = vld [vmem:[%s8892_s20 + $0x18] sm:$0xff]  }
 0xe59   : > { %v3371_v63 = vmul.f32 0.17677669, %v3367_v62  ;;  %7108 = vmatmul.mubr.msk.bf16.vlgmr.msra.gmra.mxu1 %vm1771_vm1, %v3248_v61  ;;  %v7500_v61 = vld [vmem:[%s8943_s27 + $0x4] ss:$8 sps:$4 sm:$0xff]   ;;  %v7498_v62 = vld [vmem:[%s8943_s27] ss:$8 sps:$4 sm:$0xff]  }
 0xe5a   : > { %v7115_v20 = vpop.f32.mrf.mxu0  ;;  %7122 = vmatpush3.bf16.msra.mxu1 %v9186_v46  ;;  %7125 = vmatprep.mubr.msk.bf16.mxu1 %vm8231_vm0, %v8229_v4  ;;  %v3511_v46 = vadd.f32 %v6677_v6, %v9216_v48 }
 0xe5b   : > { %v3372_v41 = vadd.f32 %v3371_v63, %v9176_v25  ;;  %7123 = vmatprep.subr.bf16.mxu1 %v8229_v4  ;;  %v1486_v63 = vld [vmem:[%s9824_s24] sm:$0xff]  ;;  %v1487_v20 = vld [vmem:[%s9824_s24 + $0x8] sm:$0xff] }
 0xe5c   : > { %v3515_v9 = vadd.f32 %v3511_v46, %v9005_v27 }
 0xe5d   : > { %v3373_v0 = vsel %vm1850_vm2, %v3372_v41, -inf }
 0xe5e   : > { %3374 = vmax.xlane.f32.xlu0 %v3373_v0  ;;  %7124 = vmatpush3.bf16.msra.mxu1 %v9190_v47  ;;  %v3076_v47 = vadd.f32 %v9250_v29, %v3032_v34  ;;  %v7472_v34 = vld [vmem:[%s8943_s27 + $0x70] ss:$8 sps:$4 sm:$0xff]   ;;  %v3703_v0 = vpack.c.bf16 %v1487_v20, %v1486_v63  ;;  %s9825_s27 = scalar_lea.vmem [#allocation8], %s8862_s13 }
 0xe5f   : > { %3795 = vmatprep.subr.bf16.mxu1 %v7474_v37 }
 0xee7   : > { %v3375_v1 = vpop.xlane.xlu0 %3374 }
 0xee8   : > { %v3376_v2 = vsub.f32 %v3372_v41, %v3375_v1  ;;  %v7501_v41 = vld [vmem:[%s8892_s20 + $0x10] sm:$0xff]   ;;  %v7502_v1 = vld [vmem:[%s8892_s20 + $0x8] sm:$0xff]  }
 0xeea   : > { %v3377_v3 = vmul.f32 1.442695, %v3376_v2  ;;  %v7503_v2 = vld [vmem:[%s8892_s20] sm:$0xff]  }
 0xeec   : > { %7580 = vpow2.f32 %v3377_v3 }
 0xef9   : > { %v7581_v7 = vpop.eup %7580 }
 0xefa   : > { %7119 = vmatmul.mubr.msk.f32.vlgmr.msra.gmra.mxu0 %vm1850_vm2, %v7581_v7  ;;  %v3379_v25 = vsel %vm1850_vm2, %v7581_v7, 0.0 }
 0xefb   : > { %3380 = vadd.xlane.f32.xlu0 %v3379_v25  ;;  %7145 = vmatprep.mubr.msk.bf16.mxu0 %vm8231_vm0, %v8229_v4 }
 0xefc   : > { %7130 = vmatpush3.bf16.msra.mxu0 %v7481_v40 }
 0xefd   : > { %7131 = vmatprep.subr.bf16.mxu0 %v8229_v4 }
 0xeff   : > { %3517 = vadd.xlane.f32.xlu0 %v3515_v9 }
 0xf19   : > { %v3286_v36 = vpop.f32.mrf.mxu1 }
 0xf1a   : > { %v3292_v55 = vadd.f32 %v3286_v36, %v3076_v47 }
 0xf1b   : > { %v7109_v60 = vpop.f32.mrf.mxu1 }
 0xf1d   : > { %v3289_v45 = vpop.f32.mrf.mxu1 }
 0xf1f   : > { %v7110_v12 = vpop.f32.mrf.mxu1 }
 0xf84   : > { %v3381_v14 = vpop.xlane.xlu0 %3380 }
 0xf85   : > { %7582 = vrcp.f32 %v3381_v14 }
 0xf88   : > { %v3518_v27 = vpop.xlane.xlu0 %3517 }
 0xf89   : > { %v3522_v21 = vmul.f32 0.0078125, %v3518_v27 }
 0xf8b   : > { %v9287_v29 = vsub.f32 %v3515_v9, %v3522_v21 }
 0xf8d   : > { %v3526_v32 = vmul.f32 %v9287_v29, %v9287_v29 }
 0xf92   : > { %v7583_v48 = vpop.eup %7582 }
 0xfba   : > { %v3454_v15 = vpop.f32.mrf.mxu0 }
 0xfbb   : > { %v3459_v18 = vmul.f32 %v7583_v48, %v3454_v15 }
 0xfbc   : > { %v7120_v19 = vpop.f32.mrf.mxu0 }
 0xfbd   : > { %v3460_v13 = vpack.c.bf16 %v3459_v18, %v3459_v18 }
 0xfbf   : > { %7126 = vmatmul.mubr.msk.bf16.vlgmr.msra.gmra.mxu1 %vm1771_vm1, %v3460_v13  ;;  %v3589_v13 = vld [vmem:[%s8953_s15] sm:$0x3]  ;;  %s9827_s15 = scalar_lea.vmem [#allocation13], %s8862_s13 }
 0xfc0   : > { %3827 = vmatprep.mubr.bf16.mxu1 %v8230_v5  ;;  %3796 = vmatpush1.bf16.msra.mxu1 %v7472_v34  ;;  %v3708_v27 = vrot.slane %v3589_v13, %v9023_v35 }
 0xfc1   : > { %3797 = vmatprep.subr.bf16.mxu1 %v7477_v38 }
 0xfc4   : > { %3798 = vmatpush1.bf16.msra.mxu1 %v7475_v42 }
 0xfc5   : > { %3799 = vmatprep.subr.bf16.mxu1 %v7480_v10 }
 0xfc8   : > { %3800 = vmatpush1.bf16.msra.mxu1 %v7478_v43  ;;  %v9381_v43 = vld [vmem:[%s9828_s9] sm:$0xff] }
 0xfc9   : > { %3801 = vmatprep.subr.bf16.mxu1 %v7484_v39 }
 0xfcc   : > { %3802 = vmatpush1.bf16.msra.mxu1 %v7482_v44 }
 0xfcd   : > { %3803 = vmatprep.subr.bf16.mxu1 %v7488_v53 }
 0xfd0   : > { %3804 = vmatpush1.bf16.msra.mxu1 %v7486_v54 }
 0xfd1   : > { %3805 = vmatprep.subr.bf16.mxu1 %v7492_v56 }
 0xfd4   : > { %3806 = vmatpush1.bf16.msra.mxu1 %v7490_v50 }
 0xfd5   : > { %3807 = vmatprep.subr.bf16.mxu1 %v7496_v17 }
 0xfd8   : > { %3808 = vmatpush1.bf16.msra.mxu1 %v7494_v58 }
 0xfd9   : > { %3809 = vmatprep.subr.bf16.mxu1 %v7500_v61 }
 0xfdc   : > { %3810 = vmatpush1.bf16.msra.mxu1 %v7498_v62 }
 0xfdd   : > { %7159 = vmatprep.subr.mxu1 %v8229_v4 }
 0xfdf   : > { %3828 = vmatmul.mubr.bf16.vlgmr.msra.gmra.mxu1 %v3703_v0  ;;  %v9401_v0 = vld [vmem:[%s8900_s0 + $0x18] sm:$0xff]  }
 0xfe0   : > { %7161 = vmatprep.mubr.msk.f32.mxu1 %vm8231_vm0, %v8229_v4 }
0x107f   : > { %v3498_v16 = vpop.f32.mrf.mxu1 }
0x1080   : > { %v3504_v22 = vadd.f32 %v3498_v16, %v3292_v55  ;;  %v6678_v55 = vld [vmem:[%s9825_s27] ss:$0 sm:$0xff] }
0x1081   : > { %v7127_v23 = vpop.f32.mrf.mxu1 }
0x1082   : > { %v3512_v24 = vadd.f32 %v6677_v6, %v3504_v22 }
0x1083   : > { %v3501_v26 = vpop.f32.mrf.mxu1 }
0x1084   : > { %v3516_v30 = vadd.f32 %v3512_v24, %v9007_v28  ;;  %v7485_v28 = vld [vmem:[%s8892_s20 + $0x30] sm:$0xff]   ;;  %s9826_s20 = scalar_lea.vmem [#allocation10], %s8862_s13 }
0x1085   : > { %v7128_v31 = vpop.f32.mrf.mxu1  ;;  %7132 = vmatpush3.bf16.msra.mxu0 %v7485_v28  ;;  %v6679_v14 = vld [vmem:[%s9826_s20] ss:$0 sm:$0xff] }
0x1086   : > { %3519 = vadd.xlane.f32.xlu0 %v3516_v30  ;;  %7133 = vmatprep.subr.bf16.mxu0 %v8229_v4 }
0x1089   : > { %7134 = vmatpush3.bf16.msra.mxu0 %v7489_v8 }
0x108a   : > { %3528 = vadd.xlane.f32.xlu0 %v3526_v32  ;;  %7135 = vmatprep.subr.bf16.mxu0 %v8229_v4 }
0x108d   : > { %7136 = vmatpush3.bf16.msra.mxu0 %v7493_v57 }
0x108e   : > { %7137 = vmatprep.subr.bf16.mxu0 %v8229_v4 }
0x1091   : > { %7138 = vmatpush3.bf16.msra.mxu0 %v7497_v59 }
0x1092   : > { %7139 = vmatprep.subr.bf16.mxu0 %v8229_v4 }
0x1095   : > { %7140 = vmatpush3.bf16.msra.mxu0 %v7501_v41 }
0x1096   : > { %7141 = vmatprep.subr.bf16.mxu0 %v8229_v4 }
0x1099   : > { %7142 = vmatpush3.bf16.msra.mxu0 %v7502_v1 }
0x109a   : > { %7143 = vmatprep.subr.bf16.mxu0 %v8229_v4 }
0x109d   : > { %7144 = vmatpush3.bf16.msra.mxu0 %v7503_v2  ;;  %v9409_v2 = vld [vmem:[%s8900_s0 + $0x10] sm:$0xff]  }
0x109e   : > { %7149 = vmatprep.subr.mxu0 %v8229_v4 }
0x109f   : > { %v3829_v16 = vpop.f32.mrf.mxu1 }
0x10a0   : > { %v9348_v21 = vadd.f32 %v3829_v16, %v3708_v27 }
0x10a1   : > { %v3831_v22 = vpop.f32.mrf.mxu1 }
0x10a2   : > { %4003 = vrot.lane.b32.xlu0 %v9348_v21, %s8232_s16 }
0x10a3   : > { %v3833_v23 = vpop.f32.mrf.mxu1 }
0x10a4   : > { %v9355_v24 = vadd.f32 %v3833_v23, %v3708_v27 }
0x110f   : > { %v3520_v11 = vpop.xlane.xlu0 %3519 }
0x1110   : > { %v3523_v49 = vmul.f32 0.0078125, %v3520_v11 }
0x1112   : > { %v3525_v51 = vsub.f32 %v3516_v30, %v3523_v49  ;;  %v6680_v30 = vld [vmem:[%s9827_s15] ss:$0 sm:$0xff] }
0x1113   : > { %v3529_v3 = vpop.xlane.xlu0 %3528 }
0x1114   : > { %v3527_v52 = vmul.f32 %v3525_v51, %v3525_v51  ;;  %v3532_v6 = vmul.f32 0.0078125, %v3529_v3  ;;  %v9416_v3 = vld [vmem:[%s8900_s0 + $0x8] sm:$0xff]  }
0x1116   : > { %3530 = vadd.xlane.f32.xlu1 %v3527_v52  ;;  %v3534_v7 = vadd.f32 1e-05, %v3532_v6 }
0x1117   : > { %v4004_v26 = vpop.permute.xlu0 %4003 }
0x1118   : > { %7584 = vrsqrt.f32 %v3534_v7  ;;  %7160 = vmatpush3.xpose.msk.msra.mxu1 %vm1771_vm1, %v4004_v26  ;;  %v9422_v7 = vld [vmem:[%s8900_s0] sm:$0xff]  }
0x1119   : > { %7169 = vmatprep.subr.bf16.mxu1 %v8229_v4 }
0x1125   : > { %v7585_v47 = vpop.eup %7584 }
0x1126   : > { %v3538_v36 = vmul.f32 %v7585_v47, %v9287_v29  ;;  %v9360_v29 = vrot.slane %v3589_v13, %v9020_v33 }
0x1128   : > { %v3546_v12 = vmul.f32 %v6678_v55, %v3538_v36  ;;  %v9365_v34 = vadd.f32 %v3831_v22, %v9360_v29 }
0x112a   : > { %v9338_v15 = vadd.f32 %v6679_v14, %v3546_v12 }
0x119f   : > { %v3531_v46 = vpop.xlane.xlu1 %3530 }
0x11a0   : > { %v3533_v25 = vmul.f32 0.0078125, %v3531_v46 }
0x11a2   : > { %v3535_v9 = vadd.f32 1e-05, %v3533_v25 }
0x11a4   : > { %7586 = vrsqrt.f32 %v3535_v9 }
0x11b1   : > { %v7587_v60 = vpop.eup %7586 }
0x11b2   : > { %v3539_v45 = vmul.f32 %v7587_v60, %v3525_v51  ;;  %v9385_v51 = vpop.f32.mrf.mxu1 }
0x11b4   : > { %v3547_v48 = vmul.f32 %v6678_v55, %v3539_v45 }
0x11b6   : > { %v9340_v18 = vadd.f32 %v6679_v14, %v3547_v48 }
0x11b8   : > { %v3607_v19 = vpack.c.bf16 %v9340_v18, %v9338_v15 }
0x11ba   : > { %7146 = vmatmul.mubr.bf16.vlgmr.msra.gmra.mxu0 %v3607_v19 }
0x11bb   : > { %7151 = vmatprep.mubr.msk.f32.mxu0 %vm8231_vm0, %v8229_v4  ;;  %7150 = vmatpush3.xpose.msk.msra.mxu0 %vm1771_vm1, %v9348_v21 }
0x11bc   : > { %7154 = vmatprep.subr.mxu0 %v8229_v4 }
0x127a   : > { %v3696_v31 = vpop.f32.mrf.mxu0 }
0x127b   : > { %v3697_v32 = vadd.f32 %v6680_v30, %v3696_v31 }
0x127c   : > { %v7147_v37 = vpop.f32.mrf.mxu0 }
0x127d   : > { %4001 = vrot.lane.b32.xlu1 %v3697_v32, %s8232_s16  ;;  %7152 = vmatmul.mubr.msk.f32.vlgmr.msra.gmra.mxu0 %vm1771_vm1, %v3697_v32 }
0x127e   : > { %7155 = vmatpush3.msra.mxu0 %v9365_v34  ;;  %v3699_v38 = vpop.f32.mrf.mxu0  ;;  %7156 = vmatprep.mubr.msk.f32.mxu0 %vm8231_vm0, %v8229_v4 }
0x127f   : > { %v9372_v40 = vadd.f32 %v6680_v30, %v3699_v38  ;;  %7164 = vmatprep.subr.mxu0 %v8229_v4 }
0x1280   : > { %v7148_v42 = vpop.f32.mrf.mxu0 }
0x12ef   : > { %v4002_v10 = vpop.permute.xlu1 %4001 }
0x12f0   : > { %7162 = vmatmul.mubr.msk.f32.vlgmr.msra.gmra.mxu1 %vm1771_vm1, %v4002_v10 }
0x12f1   : > { %7173 = vmatprep.mubr.msk.bf16.mxu1 %vm8231_vm0, %v8229_v4  ;;  %7170 = vmatpush3.bf16.msra.mxu1 %v9401_v0 }
0x12f2   : > { %7171 = vmatprep.subr.bf16.mxu1 %v8229_v4 }
0x12f5   : > { %7172 = vmatpush3.bf16.msra.mxu1 %v9409_v2 }
0x12f6   : > { %7185 = vmatprep.subr.mxu1 %v8229_v4 }
0x133d   : > { %v3910_v28 = vpop.f32.mrf.mxu0 }
0x133e   : > { %v3914_v39 = vmul.f32 0.17677669, %v3910_v28 }
0x133f   : > { %v7153_v44 = vpop.f32.mrf.mxu0 }
0x1340   : > { %v3915_v11 = vadd.f32 %v3914_v39, %v9381_v43 }
0x1342   : > { %v3916_v49 = vsel %vm1850_vm2, %v3915_v11, -inf }
0x1343   : > { %3917 = vmax.xlane.f32.xlu1 %v3916_v49 }
0x13b0   : > { %v4075_v52 = vpop.f32.mrf.mxu1 }
0x13b1   : > { %v4079_v53 = vmul.f32 0.17677669, %v4075_v52 }
0x13b2   : > { %v7163_v54 = vpop.f32.mrf.mxu1 }
0x13b3   : > { %v4080_v8 = vadd.f32 %v4079_v53, %v9381_v43 }
0x13b5   : > { %v4081_v50 = vsel %vm1850_vm2, %v4080_v8, -inf }
0x13b6   : > { %4082 = vmax.xlane.f32.xlu0 %v4081_v50 }
0x13cc   : > { %4091 = vrot.lane.b32.xlu0 %v9365_v34, %s8232_s16  ;;  %v3918_v56 = vpop.xlane.xlu1 %3917 }
0x13cd   : > { %v3919_v57 = vsub.f32 %v3915_v11, %v3918_v56 }
0x13cf   : > { %v3920_v17 = vmul.f32 1.442695, %v3919_v57 }
0x13d0   : > { %4280 = vrot.lane.b32.xlu0 %v3697_v32, %s8233_s17 }
0x13d1   : > { %7588 = vpow2.f32 %v3920_v17 }
0x13de   : > { %v7589_v58 = vpop.eup %7588 }
0x13df   : > { %7157 = vmatmul.mubr.msk.f32.vlgmr.msra.gmra.mxu0 %vm1850_vm2, %v7589_v58  ;;  %v3922_v1 = vsel %vm1850_vm2, %v7589_v58, 0.0 }
0x13e0   : > { %7166 = vmatprep.mubr.msk.f32.mxu0 %vm8231_vm0, %v8229_v4 }
0x143f   : > { %v4083_v59 = vpop.xlane.xlu0 %4082 }
0x1440   : > { %v4084_v61 = vsub.f32 %v4080_v8, %v4083_v59 }
0x1442   : > { %v4085_v62 = vmul.f32 1.442695, %v4084_v61 }
0x1443   : > { %v4092_v63 = vpop.permute.xlu0 %4091 }
0x1444   : > { %7590 = vpow2.f32 %v4085_v62  ;;  %7165 = vmatpush3.msra.mxu0 %v4092_v63  ;;  %v9461_v62 = vld [vmem:[%s8900_s0 + $0x28] sm:$0xff]   ;;  %v9465_v63 = vld [vmem:[%s8900_s0 + $0x20] sm:$0xff]  }
0x1445   : > { %7177 = vmatprep.subr.bf16.mxu0 %v8229_v4 }
0x1447   : > { %v4281_v14 = vpop.permute.xlu0 %4280 }
0x1451   : > { %v7591_v20 = vpop.eup %7590 }
0x1452   : > { %7167 = vmatmul.mubr.msk.f32.vlgmr.msra.gmra.mxu0 %vm1850_vm2, %v7591_v20  ;;  %v4087_v41 = vsel %vm1850_vm2, %v7591_v20, 0.0 }
0x1453   : > { %4088 = vadd.xlane.f32.xlu1 %v4087_v41  ;;  %7181 = vmatprep.mubr.msk.bf16.mxu0 %vm8231_vm0, %v8229_v4 }
0x1454   : > { %7178 = vmatpush3.bf16.msra.mxu0 %v9416_v3 }
0x1455   : > { %7179 = vmatprep.subr.bf16.mxu0 %v8229_v4 }
0x1458   : > { %7180 = vmatpush3.bf16.msra.mxu0 %v9422_v7 }
0x1459   : > { %7190 = vmatprep.subr.mxu0 %v8229_v4 }
0x1464   : > { %4282 = vrot.lane.b32.xlu1 %v9348_v21, %s8233_s17 }
0x1488   : > { %3923 = vadd.xlane.f32.xlu1 %v3922_v1 }
0x1499   : > { %4506 = vrot.lane.b32.xlu1 %v9348_v21, %s8234_s2 }
0x149d   : > { %4504 = vrot.lane.b32.xlu1 %v3697_v32, %s8234_s2 }
0x149f   : > { %v3994_v6 = vpop.f32.mrf.mxu0 }
0x14a1   : > { %4593 = vrot.lane.b32.xlu1 %v9365_v34, %s8234_s2  ;;  %v7158_v46 = vpop.f32.mrf.mxu0 }
0x14dc   : > { %v4089_v25 = vpop.xlane.xlu1 %4088 }
0x14dd   : > { %7592 = vrcp.f32 %v4089_v25 }
0x14e0   : > { %v4283_v9 = vpop.permute.xlu1 %4282 }
0x14ea   : > { %v7593_v36 = vpop.eup %7592 }
0x1511   : > { %v3924_v47 = vpop.xlane.xlu1 %3923 }
0x1512   : > { %7594 = vrcp.f32 %v3924_v47  ;;  %v4163_v55 = vpop.f32.mrf.mxu0 }
0x1513   : > { %v4168_v60 = vmul.f32 %v7593_v36, %v4163_v55 }
0x1514   : > { %v7168_v45 = vpop.f32.mrf.mxu0 }
0x1515   : > { %v4169_v12 = vpack.c.bf16 %v4168_v60, %v4168_v60  ;;  %v4507_v52 = vpop.permute.xlu1 %4506  ;;  %v9492_v60 = vld [vmem:[%s9829_s6 + $0x8] sm:$0xff] }
0x1517   : > { %7174 = vmatmul.mubr.msk.bf16.vlgmr.msra.gmra.mxu1 %vm1771_vm1, %v4169_v12 }
0x1518   : > { %7186 = vmatpush3.xpose.msk.msra.mxu1 %vm1771_vm1, %v4283_v9  ;;  %7187 = vmatprep.mubr.msk.f32.mxu1 %vm8231_vm0, %v8229_v4 }
0x1519   : > { %7195 = vmatprep.subr.bf16.mxu1 %v8229_v4  ;;  %v4505_v53 = vpop.permute.xlu1 %4504 }
0x151f   : > { %v7595_v48 = vpop.eup %7594  ;;  %7188 = vmatmul.mubr.msk.f32.vlgmr.msra.gmra.mxu1 %vm1771_vm1, %v4281_v14 }
0x1520   : > { %v3999_v19 = vmul.f32 %v7595_v48, %v3994_v6  ;;  %7199 = vmatprep.mubr.msk.bf16.mxu1 %vm8231_vm0, %v8229_v4  ;;  %7196 = vmatpush3.bf16.msra.mxu1 %v9461_v62  ;;  %v9478_v6 = vadd.f32 %v9385_v51, %v9360_v29 }
0x1521   : > { %7197 = vmatprep.subr.bf16.mxu1 %v8229_v4 }
0x1522   : > { %v4000_v13 = vpack.c.bf16 %v3999_v19, %v3999_v19 }
0x1524   : > { %7182 = vmatmul.mubr.msk.bf16.vlgmr.msra.gmra.mxu0 %vm1771_vm1, %v4000_v13  ;;  %7198 = vmatpush3.bf16.msra.mxu1 %v9465_v63 }
0x1525   : > { %7192 = vmatprep.mubr.msk.f32.mxu0 %vm8231_vm0, %v8229_v4  ;;  %7213 = vmatprep.subr.bf16.mxu1 %v8229_v4 }
0x15d7   : > { %v4219_v27 = vpop.f32.mrf.mxu1 }
0x15d9   : > { %v7175_v16 = vpop.f32.mrf.mxu1 }
0x15db   : > { %v4222_v21 = vpop.f32.mrf.mxu1 }
0x15dd   : > { %v7176_v22 = vpop.f32.mrf.mxu1 }
0x15df   : > { %v4354_v23 = vpop.f32.mrf.mxu1 }
0x15e0   : > { %v4358_v26 = vmul.f32 0.17677669, %v4354_v23  ;;  %v9501_v23 = vld [vmem:[%s8900_s0 + $0x38] sm:$0xff]  }
0x15e1   : > { %v7189_v30 = vpop.f32.mrf.mxu1 }
0x15e2   : > { %v4359_v31 = vadd.f32 %v4358_v26, %v9381_v43  ;;  %v9505_v26 = vld [vmem:[%s8900_s0 + $0x30] sm:$0xff]   ;;  %s9830_s0 = scalar_lea.vmem [#allocation16], %s8862_s13 }
0x15e4   : > { %v4274_v32 = vpop.f32.mrf.mxu0  ;;  %v4360_v37 = vsel %vm1850_vm2, %v4359_v31, -inf }
0x15e5   : > { %v9441_v38 = vadd.f32 %v4274_v32, %v4219_v27  ;;  %4361 = vmax.xlane.f32.xlu0 %v4360_v37 }
0x15e6   : > { %v7183_v42 = vpop.f32.mrf.mxu0 }
0x15e8   : > { %v4277_v10 = vpop.f32.mrf.mxu0 }
0x15ea   : > { %v7184_v28 = vpop.f32.mrf.mxu0 }
0x15fb   : > { %4369 = vrot.lane.b32.xlu0 %v9365_v34, %s8233_s17  ;;  %v4594_v34 = vpop.permute.xlu1 %4593 }
0x166e   : > { %v4362_v39 = vpop.xlane.xlu0 %4361 }
0x166f   : > { %v4363_v44 = vsub.f32 %v4359_v31, %v4362_v39 }
0x1671   : > { %v4364_v11 = vmul.f32 1.442695, %v4363_v44 }
0x1672   : > { %v4370_v49 = vpop.permute.xlu0 %4369 }
0x1673   : > { %7596 = vpow2.f32 %v4364_v11  ;;  %7191 = vmatpush3.msra.mxu0 %v4370_v49 }
0x1674   : > { %7203 = vmatprep.subr.mxu0 %v8229_v4 }
0x1680   : > { %v7597_v54 = vpop.eup %7596 }
0x1681   : > { %7193 = vmatmul.mubr.msk.f32.vlgmr.msra.gmra.mxu0 %vm1850_vm2, %v7597_v54  ;;  %v4366_v61 = vsel %vm1850_vm2, %v7597_v54, 0.0 }
0x1682   : > { %7204 = vmatpush3.xpose.msk.msra.mxu0 %vm1771_vm1, %v4507_v52  ;;  %7205 = vmatprep.mubr.msk.f32.mxu0 %vm8231_vm0, %v8229_v4 }
0x1683   : > { %7208 = vmatprep.subr.mxu0 %v8229_v4 }
0x1685   : > { %7206 = vmatmul.mubr.msk.f32.vlgmr.msra.gmra.mxu0 %vm1771_vm1, %v4505_v53 }
0x1686   : > { %7209 = vmatpush3.msra.mxu0 %v4594_v34  ;;  %7210 = vmatprep.mubr.msk.f32.mxu0 %vm8231_vm0, %v8229_v4 }
0x1687   : > { %7221 = vmatprep.subr.mxu0 %v8229_v4 }
0x1741   : > { %v4441_v8 = vpop.f32.mrf.mxu0 }
0x1743   : > { %v7194_v50 = vpop.f32.mrf.mxu0 }
0x1745   : > { %v4578_v56 = vpop.f32.mrf.mxu0 }
0x1746   : > { %v4582_v57 = vmul.f32 0.17677669, %v4578_v56 }
0x1747   : > { %v7207_v17 = vpop.f32.mrf.mxu0 }
0x1748   : > { %v4583_v58 = vadd.f32 %v4582_v57, %v9381_v43 }
0x174a   : > { %v4584_v59 = vsel %vm1850_vm2, %v4583_v58, -inf }
0x174b   : > { %4585 = vmax.xlane.f32.xlu0 %v4584_v59 }
0x1761   : > { %4893 = vrot.lane.b32.xlu0 %v9355_v24, %s8232_s16 }
0x1780   : > { %4367 = vadd.xlane.f32.xlu0 %v4366_v61 }
0x17d4   : > { %v4586_v43 = vpop.xlane.xlu0 %4585 }
0x17d5   : > { %v4587_v20 = vsub.f32 %v4583_v58, %v4586_v43 }
0x17d7   : > { %v4588_v41 = vmul.f32 1.442695, %v4587_v20 }
0x17d8   : > { %v4894_v46 = vpop.permute.xlu0 %4893 }
0x17d9   : > { %7598 = vpow2.f32 %v4588_v41 }
0x17e6   : > { %v7599_v1 = vpop.eup %7598 }
0x17e7   : > { %7211 = vmatmul.mubr.msk.f32.vlgmr.msra.gmra.mxu0 %vm1850_vm2, %v7599_v1  ;;  %v4590_v22 = vsel %vm1850_vm2, %v7599_v1, 0.0 }
0x17e8   : > { %7222 = vmatpush3.xpose.msk.msra.mxu0 %vm1771_vm1, %v9355_v24  ;;  %7223 = vmatprep.mubr.msk.f32.mxu0 %vm8231_vm0, %v8229_v4 }
0x17e9   : > { %7226 = vmatprep.subr.mxu0 %v8229_v4 }
0x17eb   : > { %7224 = vmatmul.mubr.msk.f32.vlgmr.msra.gmra.mxu0 %vm1771_vm1, %v9372_v40 }
0x17ec   : > { %7227 = vmatpush3.msra.mxu0 %v9478_v6  ;;  %7228 = vmatprep.mubr.msk.f32.mxu0 %vm8231_vm0, %v8229_v4 }
0x17ed   : > { %7231 = vmatprep.subr.mxu0 %v8229_v4 }
0x1809   : > { %v4368_v25 = vpop.xlane.xlu0 %4367 }
0x180a   : > { %7600 = vrcp.f32 %v4368_v25 }
0x1817   : > { %v7601_v9 = vpop.eup %7600 }
0x1818   : > { %v4446_v47 = vmul.f32 %v7601_v9, %v4441_v8 }
0x181a   : > { %v4447_v36 = vpack.c.bf16 %v4446_v47, %v4446_v47 }
0x181c   : > { %7200 = vmatmul.mubr.msk.bf16.vlgmr.msra.gmra.mxu1 %vm1771_vm1, %v4447_v36 }
0x181d   : > { %7217 = vmatprep.mubr.msk.bf16.mxu1 %vm8231_vm0, %v8229_v4  ;;  %7214 = vmatpush3.bf16.msra.mxu1 %v9501_v23 }
0x181e   : > { %7215 = vmatprep.subr.bf16.mxu1 %v8229_v4 }
0x1821   : > { %7216 = vmatpush3.bf16.msra.mxu1 %v9505_v26 }
0x1822   : > { %7236 = vmatprep.subr.mxu1 %v8229_v4 }
0x18a7   : > { %v4665_v29 = vpop.f32.mrf.mxu0 }
0x18a9   : > { %v7212_v51 = vpop.f32.mrf.mxu0 }
0x18ab   : > { %v4800_v55 = vpop.f32.mrf.mxu0 }
0x18ac   : > { %v4804_v45 = vmul.f32 0.17677669, %v4800_v55 }
0x18ad   : > { %v7225_v12 = vpop.f32.mrf.mxu0 }
0x18ae   : > { %v4805_v14 = vadd.f32 %v4804_v45, %v9492_v60 }
0x18b0   : > { %v4806_v48 = vsel %vm1850_vm2, %v4805_v14, -inf }
0x18b1   : > { %4807 = vmax.xlane.f32.xlu1 %v4806_v48 }
0x18c2   : > { %4891 = vrot.lane.b32.xlu1 %v9372_v40, %s8232_s16 }
0x18dc   : > { %v4497_v19 = vpop.f32.mrf.mxu1 }
0x18dd   : > { %v4503_v13 = vadd.f32 %v4497_v19, %v9441_v38 }
0x18de   : > { %v7201_v27 = vpop.f32.mrf.mxu1 }
0x18e0   : > { %v4500_v16 = vpop.f32.mrf.mxu1 }
0x18e2   : > { %v7202_v21 = vpop.f32.mrf.mxu1 }
0x18e6   : > { %4591 = vadd.xlane.f32.xlu1 %v4590_v22 }
0x193a   : > { %v4808_v30 = vpop.xlane.xlu1 %4807 }
0x193b   : > { %v4809_v31 = vsub.f32 %v4805_v14, %v4808_v30 }
0x193d   : > { %v4810_v32 = vmul.f32 1.442695, %v4809_v31 }
0x193e   : > { %v4892_v38 = vpop.permute.xlu1 %4891 }
0x193f   : > { %7602 = vpow2.f32 %v4810_v32 }
0x194c   : > { %v7603_v37 = vpop.eup %7602 }
0x194d   : > { %7229 = vmatmul.mubr.msk.f32.vlgmr.msra.gmra.mxu0 %vm1850_vm2, %v7603_v37  ;;  %v4812_v57 = vsel %vm1850_vm2, %v7603_v37, 0.0  ;;  %v9577_v37 = vld [vmem:[%s9830_s0] ss:$0 sm:$0xff] }
0x194e   : > { %7232 = vmatpush3.xpose.msk.msra.mxu0 %vm1771_vm1, %v4894_v46  ;;  %7233 = vmatprep.mubr.msk.f32.mxu0 %vm8231_vm0, %v8229_v4 }
0x194f   : > { %7241 = vmatprep.subr.bf16.mxu0 %v8229_v4 }
0x1951   : > { %7234 = vmatmul.mubr.msk.f32.vlgmr.msra.gmra.mxu0 %vm1771_vm1, %v4892_v38 }
0x1952   : > { %7242 = vmatpush3.bf16.msra.mxu0 %v9401_v0  ;;  %7245 = vmatprep.mubr.msk.bf16.mxu0 %vm8231_vm0, %v8229_v4 }
0x1953   : > { %7243 = vmatprep.subr.bf16.mxu0 %v8229_v4 }
0x1956   : > { %7244 = vmatpush3.bf16.msra.mxu0 %v9409_v2 }
0x1957   : > { %7257 = vmatprep.subr.mxu0 %v8229_v4 }
0x196f   : > { %v4592_v42 = vpop.xlane.xlu1 %4591 }
0x1970   : > { %7604 = vrcp.f32 %v4592_v42 }
0x197d   : > { %v7605_v10 = vpop.eup %7604 }
0x197e   : > { %v4670_v28 = vmul.f32 %v7605_v10, %v4665_v29 }
0x1980   : > { %v4671_v39 = vpack.c.bf16 %v4670_v28, %v4670_v28 }
0x1982   : > { %7218 = vmatmul.mubr.msk.bf16.vlgmr.msra.gmra.mxu1 %vm1771_vm1, %v4671_v39 }
0x1983   : > { %7238 = vmatprep.mubr.msk.f32.mxu1 %vm8231_vm0, %v8229_v4 }
0x1a0d   : > { %v4884_v0 = vpop.f32.mrf.mxu0 }
0x1a0f   : > { %v7230_v44 = vpop.f32.mrf.mxu0 }
0x1a11   : > { %v4965_v11 = vpop.f32.mrf.mxu0 }
0x1a12   : > { %v4969_v49 = vmul.f32 0.17677669, %v4965_v11 }
0x1a13   : > { %v7235_v52 = vpop.f32.mrf.mxu0 }
0x1a14   : > { %v4970_v53 = vadd.f32 %v4969_v49, %v9492_v60 }
0x1a16   : > { %v4971_v2 = vsel %vm1850_vm2, %v4970_v53, -inf }
0x1a17   : > { %4972 = vmax.xlane.f32.xlu0 %v4971_v2 }
0x1a2d   : > { %4981 = vrot.lane.b32.xlu0 %v9478_v6, %s8232_s16  ;;  %s9832_s16 = scalar_lea.vmem [#allocation19], %s8862_s13 }
0x1a31   : > { %5146 = vrot.lane.b32.xlu0 %v9372_v40, %s8233_s17 }
0x1a42   : > { %v4721_v54 = vpop.f32.mrf.mxu1 }
0x1a43   : > { %v9531_v34 = vadd.f32 %v4721_v54, %v4503_v13 }
0x1a44   : > { %v7219_v8 = vpop.f32.mrf.mxu1 }
0x1a45   : > { %v5576_v10 = vadd.f32 %v9577_v37, %v9531_v34 }
0x1a46   : > { %v4724_v50 = vpop.f32.mrf.mxu1 }
0x1a48   : > { %v7220_v56 = vpop.f32.mrf.mxu1 }
0x1a50   : > { %4813 = vadd.xlane.f32.xlu0 %v4812_v57 }
0x1a66   : > { %5235 = vrot.lane.b32.xlu0 %v9478_v6, %s8233_s17 }
0x1a6a   : > { %5358 = vrot.lane.b32.xlu0 %v9372_v40, %s8234_s2 }
0x1a6e   : > { %5447 = vrot.lane.b32.xlu0 %v9478_v6, %s8234_s2 }
0x1aa0   : > { %v4973_v17 = vpop.xlane.xlu0 %4972 }
0x1aa1   : > { %v4974_v58 = vsub.f32 %v4970_v53, %v4973_v17 }
0x1aa3   : > { %v4975_v59 = vmul.f32 1.442695, %v4974_v58 }
0x1aa4   : > { %v4982_v61 = vpop.permute.xlu0 %4981 }
0x1aa5   : > { %7606 = vpow2.f32 %v4975_v59  ;;  %7237 = vmatpush3.msra.mxu1 %v4982_v61 }
0x1aa6   : > { %7249 = vmatprep.subr.bf16.mxu1 %v8229_v4 }
0x1aa8   : > { %v5147_v40 = vpop.permute.xlu0 %5146 }
0x1ab2   : > { %v7607_v43 = vpop.eup %7606 }
0x1ab3   : > { %7239 = vmatmul.mubr.msk.f32.vlgmr.msra.gmra.mxu1 %vm1850_vm2, %v7607_v43  ;;  %v4977_v20 = vsel %vm1850_vm2, %v7607_v43, 0.0 }
0x1ab4   : > { %4978 = vadd.xlane.f32.xlu1 %v4977_v20  ;;  %7250 = vmatpush3.bf16.msra.mxu1 %v9416_v3 }
0x1ab5   : > { %7251 = vmatprep.subr.bf16.mxu1 %v8229_v4  ;;  %7253 = vmatprep.mubr.msk.bf16.mxu1 %vm8231_vm0, %v8229_v4 }
0x1ab8   : > { %7252 = vmatpush3.bf16.msra.mxu1 %v9422_v7 }
0x1ab9   : > { %7262 = vmatprep.subr.mxu1 %v8229_v4 }
0x1ac5   : > { %5148 = vrot.lane.b32.xlu1 %v9355_v24, %s8233_s17  ;;  %s9835_s17 = scalar_lea.vmem [#allocation25], %s8862_s13 }
0x1ad9   : > { %v4814_v41 = vpop.xlane.xlu0 %4813 }
0x1ada   : > { %7608 = vrcp.f32 %v4814_v41 }
0x1add   : > { %v5236_v25 = vpop.permute.xlu0 %5235 }
0x1ae1   : > { %v5359_v38 = vpop.permute.xlu0 %5358 }
0x1ae7   : > { %v7609_v1 = vpop.eup %7608 }
0x1ae8   : > { %v4889_v6 = vmul.f32 %v7609_v1, %v4884_v0  ;;  %v5448_v0 = vpop.permute.xlu0 %5447 }
0x1aea   : > { %v4890_v46 = vpack.c.bf16 %v4889_v6, %v4889_v6 }
0x1aec   : > { %7254 = vmatmul.mubr.msk.bf16.vlgmr.msra.gmra.mxu1 %vm1771_vm1, %v4890_v46 }
0x1aed   : > { %7263 = vmatpush3.msra.mxu1 %v5236_v25  ;;  %7264 = vmatprep.mubr.msk.f32.mxu1 %vm8231_vm0, %v8229_v4 }
0x1aee   : > { %7275 = vmatprep.subr.mxu1 %v8229_v4 }
0x1b3d   : > { %v4979_v3 = vpop.xlane.xlu1 %4978 }
0x1b3e   : > { %7610 = vrcp.f32 %v4979_v3 }
0x1b41   : > { %v5149_v51 = vpop.permute.xlu1 %5148 }
0x1b4b   : > { %v7611_v7 = vpop.eup %7610 }
0x1b73   : > { %v5053_v9 = vpop.f32.mrf.mxu1 }
0x1b74   : > { %v5058_v47 = vmul.f32 %v7611_v7, %v5053_v9 }
0x1b75   : > { %v7240_v36 = vpop.f32.mrf.mxu1 }
0x1b76   : > { %v5059_v29 = vpack.c.bf16 %v5058_v47, %v5058_v47 }
0x1b78   : > { %7246 = vmatmul.mubr.msk.bf16.vlgmr.msra.gmra.mxu0 %vm1771_vm1, %v5059_v29 }
0x1b79   : > { %7258 = vmatpush3.xpose.msk.msra.mxu0 %vm1771_vm1, %v5149_v51  ;;  %7259 = vmatprep.mubr.msk.f32.mxu0 %vm8231_vm0, %v8229_v4 }
0x1b7a   : > { %7267 = vmatprep.subr.bf16.mxu0 %v8229_v4 }
0x1b80   : > { %7260 = vmatmul.mubr.msk.f32.vlgmr.msra.gmra.mxu0 %vm1771_vm1, %v5147_v40 }
0x1b81   : > { %7268 = vmatpush3.bf16.msra.mxu0 %v9461_v62  ;;  %7271 = vmatprep.mubr.msk.bf16.mxu0 %vm8231_vm0, %v8229_v4 }
0x1b82   : > { %7269 = vmatprep.subr.bf16.mxu0 %v8229_v4 }
0x1b85   : > { %7270 = vmatpush3.bf16.msra.mxu0 %v9465_v63 }
0x1b86   : > { %7285 = vmatprep.subr.bf16.mxu0 %v8229_v4 }
0x1bac   : > { %v9567_v55 = vpop.f32.mrf.mxu1 }
0x1bae   : > { %v7255_v45 = vpop.f32.mrf.mxu1 }
0x1bb0   : > { %v5143_v12 = vpop.f32.mrf.mxu1 }
0x1bb1   : > { %v7512_v12 = vld [vmem:[%s8958_s21 + $0x70] ss:$8 sps:$4 sm:$0xff]  }
0x1bb2   : > { %v7256_v14 = vpop.f32.mrf.mxu1 }
0x1bb3   : > { %v7514_v14 = vld [vmem:[%s8958_s21 + $0x74] ss:$8 sps:$4 sm:$0xff]  }
0x1c38   : > { %v9569_v48 = vpop.f32.mrf.mxu0 }
0x1c3a   : > { %v7247_v19 = vpop.f32.mrf.mxu0 }
0x1c3b   : > { %v7515_v19 = vld [vmem:[%s8958_s21 + $0x60] ss:$8 sps:$4 sm:$0xff]  }
0x1c3c   : > { %v5100_v13 = vpop.f32.mrf.mxu0 }
0x1c3e   : > { %v7248_v62 = vpop.f32.mrf.mxu0 }
0x1c40   : > { %v5220_v27 = vpop.f32.mrf.mxu0 }
0x1c41   : > { %v5224_v16 = vmul.f32 0.17677669, %v5220_v27 }
0x1c42   : > { %v7261_v21 = vpop.f32.mrf.mxu0 }
0x1c43   : > { %v5225_v22 = vadd.f32 %v5224_v16, %v9492_v60  ;;  %v7520_v16 = vld [vmem:[%s8958_s21 + $0x54] ss:$8 sps:$4 sm:$0xff]   ;;  %v7518_v21 = vld [vmem:[%s8958_s21 + $0x50] ss:$8 sps:$4 sm:$0xff]  }
0x1c45   : > { %v5226_v63 = vsel %vm1850_vm2, %v5225_v22, -inf }
0x1c46   : > { %5227 = vmax.xlane.f32.xlu1 %v5226_v63  ;;  %v7523_v63 = vld [vmem:[%s8958_s21 + $0x44] ss:$8 sps:$4 sm:$0xff]  }
0x1c57   : > { %5360 = vrot.lane.b32.xlu1 %v9355_v24, %s8234_s2  ;;  %v5580_v24 = vadd.f32 %v5576_v10, %v9338_v15  ;;  %v7535_v10 = vld [vmem:[%s8958_s21 + $0x4] ss:$8 sps:$4 sm:$0xff]  }
0x1ccf   : > { %v5228_v30 = vpop.xlane.xlu1 %5227 }
0x1cd0   : > { %v5229_v31 = vsub.f32 %v5225_v22, %v5228_v30  ;;  %v7521_v22 = vld [vmem:[%s8958_s21 + $0x40] ss:$8 sps:$4 sm:$0xff]   ;;  %v7526_v30 = vld [vmem:[%s8958_s21 + $0x34] ss:$8 sps:$4 sm:$0xff]  }
0x1cd2   : > { %v5230_v32 = vmul.f32 1.442695, %v5229_v31  ;;  %v7524_v31 = vld [vmem:[%s8958_s21 + $0x30] ss:$8 sps:$4 sm:$0xff]  }
0x1cd3   : > { %v5361_v28 = vpop.permute.xlu1 %5360 }
0x1cd4   : > { %7612 = vpow2.f32 %v5230_v32  ;;  %v7529_v32 = vld [vmem:[%s8958_s21 + $0x24] ss:$8 sps:$4 sm:$0xff]  }
0x1ce1   : > { %v7613_v42 = vpop.eup %7612 }
0x1ce2   : > { %7265 = vmatmul.mubr.msk.f32.vlgmr.msra.gmra.mxu1 %vm1850_vm2, %v7613_v42  ;;  %v5232_v39 = vsel %vm1850_vm2, %v7613_v42, 0.0  ;;  %v7530_v42 = vld [vmem:[%s8958_s21 + $0x10] ss:$8 sps:$4 sm:$0xff]  }
0x1ce3   : > { %7276 = vmatpush3.xpose.msk.msra.mxu1 %vm1771_vm1, %v5361_v28  ;;  %5233 = vadd.xlane.f32.xlu0 %v5232_v39  ;;  %v7533_v28 = vld [vmem:[%s8958_s21] ss:$8 sps:$4 sm:$0xff]   ;;  %v7536_v39 = vld [vmem:[%s8963_s26 + $0x78] sm:$0xff]  }
0x1ce4   : > { %7277 = vmatprep.mubr.msk.f32.mxu1 %vm8231_vm0, %v8229_v4  ;;  %7280 = vmatprep.subr.mxu1 %v8229_v4 }
0x1ce6   : > { %7278 = vmatmul.mubr.msk.f32.vlgmr.msra.gmra.mxu1 %vm1771_vm1, %v5359_v38  ;;  %v7532_v38 = vld [vmem:[%s8958_s21 + $0x14] ss:$8 sps:$4 sm:$0xff]  }
0x1ce7   : > { %7281 = vmatpush3.msra.mxu1 %v5448_v0  ;;  %5582 = vadd.xlane.f32.xlu0 %v5580_v24  ;;  %v7538_v0 = vld [vmem:[%s8963_s26 + $0x70] sm:$0xff]  }
0x1ce8   : > { %7282 = vmatprep.mubr.msk.f32.mxu1 %vm8231_vm0, %v8229_v4  ;;  %5762 = vmatprep.subr.bf16.mxu1 %v7514_v14 }
0x1d6c   : > { %v5234_v44 = vpop.xlane.xlu0 %5233 }
0x1d6d   : > { %7614 = vrcp.f32 %v5234_v44  ;;  %v7539_v44 = vld [vmem:[%s8963_s26 + $0x30] sm:$0xff]  }
0x1d70   : > { %v5583_v11 = vpop.xlane.xlu0 %5582 }
0x1d71   : > { %v5586_v49 = vmul.f32 0.0078125, %v5583_v11  ;;  %v7540_v11 = vld [vmem:[%s8963_s26 + $0x68] sm:$0xff]  }
0x1d73   : > { %v9591_v52 = vsub.f32 %v5580_v24, %v5586_v49  ;;  %v7537_v24 = vld [vmem:[%s8963_s26 + $0x38] sm:$0xff]   ;;  %v7541_v49 = vld [vmem:[%s8963_s26 + $0x28] sm:$0xff]  }
0x1d75   : > { %v5590_v53 = vmul.f32 %v9591_v52, %v9591_v52 }
0x1d77   : > { %5592 = vadd.xlane.f32.xlu0 %v5590_v53  ;;  %v7542_v53 = vld [vmem:[%s8963_s26 + $0x60] sm:$0xff]  }
0x1d7a   : > { %v7615_v2 = vpop.eup %7614 }
0x1da2   : > { %v5307_v15 = vpop.f32.mrf.mxu1 }
0x1da3   : > { %v5312_v54 = vmul.f32 %v7615_v2, %v5307_v15  ;;  %v7543_v2 = vld [vmem:[%s8963_s26 + $0x20] sm:$0xff]   ;;  %v7544_v15 = vld [vmem:[%s8963_s26 + $0x58] sm:$0xff]  }
0x1da4   : > { %v7266_v34 = vpop.f32.mrf.mxu1 }
0x1da5   : > { %v5313_v8 = vpack.c.bf16 %v5312_v54, %v5312_v54  ;;  %v7545_v54 = vld [vmem:[%s8963_s26 + $0x18] sm:$0xff]  }
0x1da6   : > { %v5432_v50 = vpop.f32.mrf.mxu1 }
0x1da7   : > { %v5436_v56 = vmul.f32 0.17677669, %v5432_v50  ;;  %7272 = vmatmul.mubr.msk.bf16.vlgmr.msra.gmra.mxu0 %vm1771_vm1, %v5313_v8 }
0x1da8   : > { %v7279_v57 = vpop.f32.mrf.mxu1  ;;  %7286 = vmatpush3.bf16.msra.mxu0 %v9501_v23  ;;  %7289 = vmatprep.mubr.msk.bf16.mxu0 %vm8231_vm0, %v8229_v4 }
0x1da9   : > { %v5437_v17 = vadd.f32 %v5436_v56, %v9492_v60  ;;  %7287 = vmatprep.subr.bf16.mxu0 %v8229_v4  ;;  %v5141_v4 = vadd.f32 %v9567_v55, %v9569_v48  ;;  %v7517_v48 = vld [vmem:[%s8958_s21 + $0x64] ss:$8 sps:$4 sm:$0xff]  }
0x1dab   : > { %v5438_v58 = vsel %vm1850_vm2, %v5437_v17, -inf }
0x1dac   : > { %5439 = vmax.xlane.f32.xlu1 %v5438_v58  ;;  %7288 = vmatpush3.bf16.msra.mxu0 %v9505_v26 }
0x1dad   : > { %6934 = vmatprep.subr.bf16.mxu0 %v7536_v39 }
0x1e00   : > { %v5593_v34 = vpop.xlane.xlu0 %5592 }
0x1e01   : > { %v5596_v8 = vmul.f32 0.0078125, %v5593_v34 }
0x1e03   : > { %v5598_v50 = vadd.f32 1e-05, %v5596_v8 }
0x1e35   : > { %v5440_v59 = vpop.xlane.xlu1 %5439 }
0x1e36   : > { %v5441_v61 = vsub.f32 %v5437_v17, %v5440_v59 }
0x1e38   : > { %v5442_v43 = vmul.f32 1.442695, %v5441_v61 }
0x1e3a   : > { %7616 = vpow2.f32 %v5442_v43 }
0x1e47   : > { %v7617_v20 = vpop.eup %7616 }
0x1e48   : > { %7283 = vmatmul.mubr.msk.f32.vlgmr.msra.gmra.mxu1 %vm1850_vm2, %v7617_v20  ;;  %v5444_v23 = vsel %vm1850_vm2, %v7617_v20, 0.0 }
0x1e49   : > { %5445 = vadd.xlane.f32.xlu1 %v5444_v23  ;;  %5794 = vmatprep.mubr.bf16.mxu1 %v8230_v5 }
0x1e4a   : > { %5763 = vmatpush1.bf16.msra.mxu1 %v7512_v12 }
0x1e4b   : > { %5764 = vmatprep.subr.bf16.mxu1 %v7517_v48 }
0x1e4e   : > { %5765 = vmatpush1.bf16.msra.mxu1 %v7515_v19 }
0x1e4f   : > { %5766 = vmatprep.subr.bf16.mxu1 %v7520_v16 }
0x1e52   : > { %5767 = vmatpush1.bf16.msra.mxu1 %v7518_v21 }
0x1e53   : > { %5768 = vmatprep.subr.bf16.mxu1 %v7523_v63 }
0x1e56   : > { %5769 = vmatpush1.bf16.msra.mxu1 %v7521_v22 }
0x1e57   : > { %5770 = vmatprep.subr.bf16.mxu1 %v7526_v30 }
0x1e5a   : > { %5771 = vmatpush1.bf16.msra.mxu1 %v7524_v31 }
0x1e5b   : > { %5772 = vmatprep.subr.bf16.mxu1 %v7529_v32 }
0x1e67   : > { %v5351_v60 = vpop.f32.mrf.mxu0 }
0x1e68   : > { %v5357_v40 = vadd.f32 %v5351_v60, %v5141_v4  ;;  %v6747_v4 = vld [vmem:[%s9832_s16] ss:$0 sm:$0xff] }
0x1e69   : > { %v7273_v41 = vpop.f32.mrf.mxu0 }
0x1e6b   : > { %v5354_v1 = vpop.f32.mrf.mxu0 }
0x1e6d   : > { %v7274_v26 = vpop.f32.mrf.mxu0 }
0x1e6e   : > { %v7546_v26 = vld [vmem:[%s8963_s26 + $0x50] sm:$0xff]  }
0x1ed2   : > { %v5446_v6 = vpop.xlane.xlu1 %5445 }
0x1ed3   : > { %7618 = vrcp.f32 %v5446_v6  ;;  %v7547_v6 = vld [vmem:[%s8963_s26 + $0x10] sm:$0xff]  }
0x1ed4   : > { %7620 = vrsqrt.f32 %v5598_v50 }
0x1ee0   : > { %v7619_v46 = vpop.eup %7618 }
0x1ee1   : > { %v7621_v58 = vpop.eup %7620 }
0x1ee2   : > { %v5602_v59 = vmul.f32 %v7621_v58, %v9591_v52  ;;  %v7548_v52 = vld [vmem:[%s8963_s26 + $0x48] sm:$0xff]  }
0x1f08   : > { %v5519_v25 = vpop.f32.mrf.mxu1 }
0x1f09   : > { %v5524_v3 = vmul.f32 %v7619_v46, %v5519_v25  ;;  %v7549_v46 = vld [vmem:[%s8963_s26 + $0x8] sm:$0xff]   ;;  %v7550_v25 = vld [vmem:[%s8963_s26 + $0x40] sm:$0xff]  }
0x1f0a   : > { %v7284_v7 = vpop.f32.mrf.mxu1 }
0x1f0b   : > { %v5525_v9 = vpack.c.bf16 %v5524_v3, %v5524_v3  ;;  %v7551_v3 = vld [vmem:[%s8963_s26] sm:$0xff]   ;;  %s9834_s26 = scalar_lea.vmem [#allocation23], %s8862_s13 }
0x1f0c   : > { %v5636_v7 = vld [vmem:[%s8916_s5] sm:$0x3]  ;;  %s9833_s5 = scalar_lea.vmem [#allocation22], %s8862_s13  ;;  %v6781_v50 = vld [vmem:[%s9834_s26] ss:$0 sm:$0xff] }
0x1f0d   : > { %7290 = vmatmul.mubr.msk.bf16.vlgmr.msra.gmra.mxu0 %vm1771_vm1, %v5525_v9 }
0x1f0e   : > { %6935 = vmatpush3.bf16.msra.mxu0 %v7537_v24 }
0x1f0f   : > { %6936 = vmatprep.subr.bf16.mxu0 %v7538_v0 }
0x1f12   : > { %6937 = vmatpush3.bf16.msra.mxu0 %v7539_v44 }
0x1f13   : > { %6938 = vmatprep.subr.bf16.mxu0 %v7540_v11 }
0x1f16   : > { %6939 = vmatpush3.bf16.msra.mxu0 %v7541_v49 }
0x1f17   : > { %6940 = vmatprep.subr.bf16.mxu0 %v7542_v53 }
0x1f1a   : > { %6941 = vmatpush3.bf16.msra.mxu0 %v7543_v2 }
0x1f1b   : > { %6942 = vmatprep.subr.bf16.mxu0 %v7544_v15 }
0x1f1e   : > { %6943 = vmatpush3.bf16.msra.mxu0 %v7545_v54 }
0x1f1f   : > { %6944 = vmatprep.subr.bf16.mxu0 %v7546_v26 }
0x1f22   : > { %6945 = vmatpush3.bf16.msra.mxu0 %v7547_v6 }
0x1f23   : > { %6946 = vmatprep.subr.bf16.mxu0 %v7548_v52 }
0x1f26   : > { %6947 = vmatpush3.bf16.msra.mxu0 %v7549_v46 }
0x1f27   : > { %6948 = vmatprep.subr.bf16.mxu0 %v7550_v25 }
0x1f2a   : > { %6949 = vmatpush3.bf16.msra.mxu0 %v7551_v3 }
0x1fcd   : > { %v5563_v5 = vpop.f32.mrf.mxu0 }
0x1fce   : > { %v5569_v47 = vadd.f32 %v5563_v5, %v5357_v40  ;;  %v5679_v5 = vrot.slane %v5636_v7, %v9020_v33  ;;  %v6764_v33 = vld [vmem:[%s9833_s5] ss:$0 sm:$0xff] }
0x1fcf   : > { %v7291_v36 = vpop.f32.mrf.mxu0 }
0x1fd0   : > { %v5577_v29 = vadd.f32 %v9577_v37, %v5569_v47  ;;  %v7527_v37 = vld [vmem:[%s8958_s21 + $0x20] ss:$8 sps:$4 sm:$0xff]   ;;  %s9831_s21 = scalar_lea.vmem [#allocation17], %s8862_s13  ;;  %v5675_v47 = vrot.slane %v5636_v7, %v9023_v35 }
0x1fd1   : > { %v5566_v51 = vpop.f32.mrf.mxu0  ;;  %5773 = vmatpush1.bf16.msra.mxu1 %v7527_v37  ;;  %v6746_v61 = vld [vmem:[%s9831_s21] ss:$0 sm:$0xff] }
0x1fd2   : > { %v5581_v55 = vadd.f32 %v5577_v29, %v9340_v18  ;;  %5774 = vmatprep.subr.bf16.mxu1 %v7532_v38  ;;  %v5610_v23 = vmul.f32 %v6746_v61, %v5602_v59 }
0x1fd3   : > { %v7292_v45 = vpop.f32.mrf.mxu0 }
0x1fd4   : > { %5584 = vadd.xlane.f32.xlu1 %v5581_v55  ;;  %v5618_v40 = vadd.f32 %v6747_v4, %v5610_v23 }
0x1fd5   : > { %5775 = vmatpush1.bf16.msra.mxu1 %v7530_v42 }
0x1fd6   : > { %5776 = vmatprep.subr.bf16.mxu1 %v7535_v10 }
0x1fd9   : > { %5777 = vmatpush1.bf16.msra.mxu1 %v7533_v28 }
0x205d   : > { %v5585_v13 = vpop.xlane.xlu1 %5584 }
0x205e   : > { %v5587_v62 = vmul.f32 0.0078125, %v5585_v13 }
0x2060   : > { %v5589_v18 = vsub.f32 %v5581_v55, %v5587_v62 }
0x2062   : > { %v5591_v27 = vmul.f32 %v5589_v18, %v5589_v18 }
0x2064   : > { %5594 = vadd.xlane.f32.xlu1 %v5591_v27 }
0x20ed   : > { %v5595_v56 = vpop.xlane.xlu1 %5594 }
0x20ee   : > { %v5597_v57 = vmul.f32 0.0078125, %v5595_v56 }
0x20f0   : > { %v5599_v17 = vadd.f32 1e-05, %v5597_v57  ;;  %v6782_v57 = vld [vmem:[%s9835_s17] ss:$0 sm:$0xff] }
0x20f2   : > { %7622 = vrsqrt.f32 %v5599_v17 }
0x20ff   : > { %v7623_v43 = vpop.eup %7622 }
0x2100   : > { %v5603_v20 = vmul.f32 %v7623_v43, %v5589_v18 }
0x2102   : > { %v5611_v60 = vmul.f32 %v6746_v61, %v5603_v20 }
0x2104   : > { %v5619_v41 = vadd.f32 %v6747_v4, %v5611_v60 }
0x2106   : > { %v5670_v1 = vpack.c.bf16 %v5619_v41, %v5618_v40 }
0x2108   : > { %5795 = vmatmul.mubr.bf16.vlgmr.msra.gmra.mxu1 %v5670_v1 }
0x21c8   : > { %v5796_v9 = vpop.f32.mrf.mxu1 }
0x21c9   : > { %v5797_v45 = vadd.f32 %v5796_v9, %v5675_v47 }
0x21ca   : > { %v5798_v36 = vpop.f32.mrf.mxu1 }
0x21cb   : > { %v5799_v51 = vadd.f32 %v5798_v36, %v5679_v5  ;;  %v5805_v62 = vmax.f32 %v5797_v45, 0.0 }
0x21cc   : > { %v5800_v29 = vpop.f32.mrf.mxu1 }
0x21cd   : > { %v5801_v55 = vadd.f32 %v5800_v29, %v5675_v47  ;;  %v5806_v19 = vmax.f32 %v5799_v51, 0.0 }
0x21ce   : > { %v5802_v12 = vpop.f32.mrf.mxu1 }
0x21cf   : > { %v5803_v14 = vadd.f32 %v5802_v12, %v5679_v5  ;;  %v5807_v48 = vmax.f32 %v5801_v55, 0.0 }
0x21d1   : > { %v5808_v13 = vmax.f32 %v5803_v14, 0.0  ;;  %v5809_v27 = vpack.c.bf16 %v5807_v48, %v5805_v62 }
0x21d3   : > { %v5810_v18 = vpack.c.bf16 %v5808_v13, %v5806_v19 }
0x21d5   : > { %5945 = vmatprep.mubr.bf16.mxu0 %v5810_v18 }
0x21d6   : > { %5946 = vmatmul.mubr.bf16.vlgmr.msra.gmra.mxu0 %v5809_v27 }
0x2296   : > { %v6950_v16 = vpop.f32.mrf.mxu0 }
0x2298   : > { %v6951_v35 = vpop.f32.mrf.mxu0 }
0x2299   : > { %v6952_v21 = vadd.f32 %v6951_v35, %v6950_v16 }
0x229a   : > { %v6953_v22 = vpop.f32.mrf.mxu0 }
0x229b   : > { %v5948_v63 = vadd.f32 %v6952_v21, %v6764_v33 }
0x229c   : > { %v6954_v30 = vpop.f32.mrf.mxu0 }
0x229d   : > { %v6955_v31 = vadd.f32 %v6954_v30, %v6953_v22  ;;  %v5956_v32 = vadd.f32 %v5948_v63, %v5618_v40 }
0x229f   : > { %v5951_v37 = vadd.f32 %v6955_v31, %v6764_v33  ;;  %5958 = vadd.xlane.f32.xlu0 %v5956_v32 }
0x22a1   : > { %v5957_v38 = vadd.f32 %v5951_v37, %v5619_v41 }
0x22a3   : > { %5960 = vadd.xlane.f32.xlu1 %v5957_v38 }
0x2328   : > { %v5959_v42 = vpop.xlane.xlu0 %5958 }
0x2329   : > { %v5962_v10 = vmul.f32 0.0078125, %v5959_v42 }
0x232b   : > { %v5964_v28 = vsub.f32 %v5956_v32, %v5962_v10 }
0x232c   : > { %v5961_v39 = vpop.xlane.xlu1 %5960 }
0x232d   : > { %v5963_v24 = vmul.f32 0.0078125, %v5961_v39  ;;  %v5966_v0 = vmul.f32 %v5964_v28, %v5964_v28 }
0x232f   : > { %v5965_v44 = vsub.f32 %v5957_v38, %v5963_v24  ;;  %5968 = vadd.xlane.f32.xlu0 %v5966_v0 }
0x2331   : > { %v5967_v11 = vmul.f32 %v5965_v44, %v5965_v44 }
0x2333   : > { %5970 = vadd.xlane.f32.xlu1 %v5967_v11 }
0x23b8   : > { %v5969_v49 = vpop.xlane.xlu0 %5968 }
0x23b9   : > { %v5972_v53 = vmul.f32 0.0078125, %v5969_v49 }
0x23bb   : > { %v5974_v2 = vadd.f32 1e-05, %v5972_v53 }
0x23bc   : > { %v5971_v15 = vpop.xlane.xlu1 %5970 }
0x23bd   : > { %7624 = vrsqrt.f32 %v5974_v2  ;;  %v5973_v54 = vmul.f32 0.0078125, %v5971_v15 }
0x23bf   : > { %v5975_v34 = vadd.f32 1e-05, %v5973_v54 }
0x23c1   : > { %7626 = vrsqrt.f32 %v5975_v34 }
0x23ca   : > { %v7625_v8 = vpop.eup %7624 }
0x23cb   : > { %v5978_v56 = vmul.f32 %v7625_v8, %v5964_v28 }
0x23cd   : > { %v5986_v17 = vmul.f32 %v6781_v50, %v5978_v56 }
0x23ce   : > { %v7627_v58 = vpop.eup %7626 }
0x23cf   : > { %v5994_v59 = vadd.f32 %v6782_v57, %v5986_v17  ;;  %v5979_v61 = vmul.f32 %v7627_v58, %v5965_v44 }
0x23d1   : > { %5996 = vst [vmem:[#allocation2] sm:$0xff] %v5994_v59  ;;  %v5987_v43 = vmul.f32 %v6781_v50, %v5979_v61  ;;  %6001 = sbr.rel (%p6783_p6) target bundleno = 9686 (0x25d6), region = 216 }
0x23d3   : > { %v5995_v20 = vadd.f32 %v6782_v57, %v5987_v43 }
0x23d5   : > { %5997 = vst [vmem:[#allocation2 + $0x8] sm:$0xff] %v5995_v20 }
0x23d6   : > { %6004 = vadd.xlane.f32.xlu0 %v5994_v59  ;;  %v8235_v23 = vmov 0.0   ;;  %v7628_v46 = vld [vmem:[#allocation29 + $0x38] sm:$0xff]   ;;  %v7629_v25 = vld [vmem:[#allocation29 + $0x30] sm:$0xff]   ;;  %v7630_v3 = vld [vmem:[#allocation29 + $0x28] sm:$0xff]   ;;  %vm8236_vm3 = vmmov 0  }
0x23d7   : > { %7293 = vmatprep.subr.bf16.mxu0 %v8235_v23  ;;  %v7631_v7 = vld [vmem:[#allocation29 + $0x20] sm:$0xff]   ;;  %7309 = vmatprep.mubr.msk.bf16.mxu0 %vm8236_vm3, %v8235_v23  ;;  %v7632_v9 = vld [vmem:[#allocation29 + $0x18] sm:$0xff]   ;;  %v7633_v5 = vld [vmem:[#allocation29 + $0x10] sm:$0xff]  }
0x23d8   : > { %7294 = vmatpush3.bf16.msra.mxu0 %v7628_v46  ;;  %v7634_v47 = vld [vmem:[#allocation29 + $0x8] sm:$0xff]   ;;  %v7635_v36 = vld [vmem:[#allocation29] sm:$0xff]   ;;  %v6784_v13 = vld [vmem:[#allocation26] ss:$0 sm:$0xff] }
0x23d9   : > { %7295 = vmatprep.subr.bf16.mxu0 %v8235_v23  ;;  %v6785_v16 = vld [vmem:[#allocation28] ss:$0 sm:$0xff]  ;;  %v6786_v63 = vld [vmem:[#allocation31] ss:$0 sm:$0xff] }
0x23da   : > { %6006 = vadd.xlane.f32.xlu0 %v5995_v20 }
0x23dc   : > { %7296 = vmatpush3.bf16.msra.mxu0 %v7629_v25 }
0x23dd   : > { %7297 = vmatprep.subr.bf16.mxu0 %v8235_v23 }
0x23e0   : > { %7298 = vmatpush3.bf16.msra.mxu0 %v7630_v3 }
0x23e1   : > { %7299 = vmatprep.subr.bf16.mxu0 %v8235_v23 }
0x23e4   : > { %7300 = vmatpush3.bf16.msra.mxu0 %v7631_v7 }
0x23e5   : > { %7301 = vmatprep.subr.bf16.mxu0 %v8235_v23 }
0x23e8   : > { %7302 = vmatpush3.bf16.msra.mxu0 %v7632_v9 }
0x23e9   : > { %7303 = vmatprep.subr.bf16.mxu0 %v8235_v23 }
0x23ec   : > { %7304 = vmatpush3.bf16.msra.mxu0 %v7633_v5 }
0x23ed   : > { %7305 = vmatprep.subr.bf16.mxu0 %v8235_v23 }
0x23f0   : > { %7306 = vmatpush3.bf16.msra.mxu0 %v7634_v47 }
0x23f1   : > { %7307 = vmatprep.subr.bf16.mxu0 %v8235_v23 }
0x23f4   : > { %7308 = vmatpush3.bf16.msra.mxu0 %v7635_v36 }
0x245f   : > { %v6005_v4 = vpop.xlane.xlu0 %6004 }
0x2460   : > { %v6008_v60 = vmul.f32 0.0078125, %v6005_v4 }
0x2462   : > { %v6010_v40 = vsub.f32 %v5994_v59, %v6008_v60 }
0x2463   : > { %v6007_v41 = vpop.xlane.xlu0 %6006 }
0x2464   : > { %v6009_v1 = vmul.f32 0.0078125, %v6007_v41  ;;  %v6012_v26 = vmul.f32 %v6010_v40, %v6010_v40 }
0x2466   : > { %v6011_v6 = vsub.f32 %v5995_v20, %v6009_v1  ;;  %6014 = vadd.xlane.f32.xlu1 %v6012_v26 }
0x2468   : > { %v6013_v52 = vmul.f32 %v6011_v6, %v6011_v6 }
0x246a   : > { %6016 = vadd.xlane.f32.xlu1 %v6013_v52 }
0x24ef   : > { %v6015_v29 = vpop.xlane.xlu1 %6014 }
0x24f0   : > { %v6018_v51 = vmul.f32 0.0078125, %v6015_v29 }
0x24f2   : > { %v6020_v55 = vadd.f32 1e-05, %v6018_v51 }
0x24f3   : > { %v6017_v45 = vpop.xlane.xlu1 %6016 }
0x24f4   : > { %7636 = vrsqrt.f32 %v6020_v55  ;;  %v6019_v12 = vmul.f32 0.0078125, %v6017_v45 }
0x24f6   : > { %v6021_v14 = vadd.f32 1e-05, %v6019_v12 }
0x24f8   : > { %7638 = vrsqrt.f32 %v6021_v14 }
0x2501   : > { %v7637_v48 = vpop.eup %7636 }
0x2502   : > { %v6024_v19 = vmul.f32 %v7637_v48, %v6010_v40 }
0x2504   : > { %v6032_v27 = vmul.f32 %v6784_v13, %v6024_v19 }
0x2505   : > { %v7639_v62 = vpop.eup %7638 }
0x2506   : > { %v6025_v18 = vmul.f32 %v7639_v62, %v6011_v6  ;;  %v6040_v35 = vadd.f32 %v6785_v16, %v6032_v27 }
0x2508   : > { %v6033_v33 = vmul.f32 %v6784_v13, %v6025_v18 }
0x250a   : > { %v6041_v21 = vadd.f32 %v6785_v16, %v6033_v33 }
0x250c   : > { %v6042_v22 = vpack.c.bf16 %v6041_v21, %v6040_v35 }
0x250e   : > { %7310 = vmatmul.mubr.bf16.vlgmr.msra.gmra.mxu0 %v6042_v22 }
0x25ce   : > { %v6148_v30 = vpop.f32.mrf.mxu0 }
0x25cf   : > { %v6149_v31 = vadd.f32 %v6786_v63, %v6148_v30 }
0x25d0   : > { %v7311_v32 = vpop.f32.mrf.mxu0 }
0x25d1   : > { %6155 = vst [vmem:[%s9837_s29] sm:$0xff] %v6149_v31 }
0x25d2   : > { %v6151_v37 = vpop.f32.mrf.mxu0 }
0x25d3   : > { %v6152_v38 = vadd.f32 %v6786_v63, %v6151_v37 }
0x25d4   : > { %v7312_v42 = vpop.f32.mrf.mxu0 }
0x25d5   : > { %6156 = vst [vmem:[%s9837_s29 + $0x8] sm:$0xff] %v6152_v38 }
0x25d6 PF: > { %s9838_s30 = sld [smem:[#allocation45_spill]] }
0x25d7   : > { %s9839_s8 = sld [smem:[#allocation42_spill]] }
0x25d8   : > { %s9840_s5 = sld [smem:[#allocation43_spill]] }
0x25d9   : > { %s9841_s9 = sld [smem:[#allocation46_spill]] }
0x25dc   : > { %p61_p12 = scmp.ge.s32.totalorder %s9838_s30, 4  }
0x25de   :  { %63 = sbr.rel (!%p61_p12) target bundleno = 48 (0x30), region = 375 }
0x25e3   :  { %6168 = vsyncpa [#allocation4], 1 }
0x25e4   :  { %6170 = vsyncpa [#allocation4 + $0x1], 1 }
0x25e5   :  { %6171 = vsyncpa [#allocation6], 1 }
0x25e6   :  { %6173 = vsyncpa [#allocation6 + $0x1], 1 }
0x25e7   :  { %6174 = vsyncpa [#allocation9], 1 }
0x25e8   :  { %6176 = vsyncpa [#allocation9 + $0x1], 1 }
0x25e9   :  { %6177 = vsyncpa [#allocation12], 1 }
0x25ea   :  { %6179 = vsyncpa [#allocation12 + $0x1], 1 }
0x25eb   :  { %6180 = vsyncpa [#allocation15], 1 }
0x25ec   :  { %6182 = vsyncpa [#allocation15 + $0x1], 1 }
0x25ed   :  { %6183 = vsyncpa [#allocation18], 1 }
0x25ee   :  { %6185 = vsyncpa [#allocation18 + $0x1], 1 }
0x25ef   :  { %6186 = vsyncpa [#allocation21], 1 }
0x25f0   :  { %6188 = vsyncpa [#allocation21 + $0x1], 1 }
0x25f1   :  { %6189 = vsyncpa [#allocation24], 1 }
0x25f2   :  { %6191 = vsyncpa [#allocation24 + $0x1], 1 }
0x25f3   :  { %6192 = vsyncpa [#allocation27], 1 }
0x25f4   :  { %6193 = vsyncpa [#allocation30], 1 }

</bundles_post_ra>
